<compile_context>
chip_gen: v7x
topology: tpu7x:2x2x1
jax: 0.10.0
libtpu: 0.0.40
codegen_flags: <defaults>
</compile_context>

<pallas_src>
import functools
import math

import jax
import jax.numpy as jnp
from jax.experimental import pallas as pl
from jax.experimental.pallas import tpu as pltpu

# Scaled-down hyperparameters (module defaults are d_model=512, layers=6, heads=8, d_ff=2048).
D_MODEL = 128
NUM_HEADS = 2
D_FF = 256
NUM_LAYERS = 2
EPS = 1e-5

_ENC_WEIGHT_KEYS = ("wqkv", "bqkv", "wo", "bo",
                    "g1", "be1", "w1", "b1", "w2", "b2", "g2", "be2")
_DEC_WEIGHT_KEYS = ("swqkv", "sbqkv", "swo", "sbo",
                    "cwqkv", "cbqkv", "cwo", "cbo",
                    "g1", "be1", "g2", "be2", "g3", "be3",
                    "w1", "b1", "w2", "b2")


# ----------------------------- in-kernel (traced) helpers -----------------------------

def _layer_norm(x, g, b, eps):
    # x: (S, D) f32.  torch.Tensor.std(): unbiased (n-1); eps added to the std, not the variance.
    # Exact division for the inv-std (residual-stream numerics); approx reciprocal only in softmax.
    d = x.shape[-1]
    mean = jnp.mean(x, axis=-1, keepdims=True)
    diff = x - mean
    var = jnp.sum(diff * diff, axis=-1, keepdims=True) * (1.0 / float(d - 1))
    return g * (diff / (jnp.sqrt(var) + eps)) + b


def _ffn(x, w1, b1, w2, b2):
    # Linear -> exact GELU (erf) -> Linear.  bf16 MXU operands, f32 accumulation.
    h = jnp.dot(x.astype(jnp.bfloat16), w1, preferred_element_type=jnp.float32) + b1
    h = 0.5 * h * (1.0 + jax.lax.erf(h * (1.0 / math.sqrt(2.0))))
    return jnp.dot(h.astype(jnp.bfloat16), w2, preferred_element_type=jnp.float32) + b2


def _mha(x, wqkv_ref, bqkv_ref, wo_ref, bo_ref, bias, num_heads):
    # x: (S, D) f32.  wqkv: (1, D, 3D) bf16 (Q columns pre-scaled by 1/sqrt(d_k)); bqkv: (1, 1, 3D).
    # wo: (1, D, D) bf16; bo: (1, 1, D).  bias: None or (H, S, S) f32 additive mask bias.
    s_len, d_model = x.shape
    dk = d_model // num_heads
    x_bf = x.astype(jnp.bfloat16)

    # One lane-dense fused QKV matmul (N = 3*D), f32 accumulate, bias, single bf16 cast.
    qkv = (jnp.dot(x_bf, wqkv_ref[0], preferred_element_type=jnp.float32)
           + bqkv_ref[0]).astype(jnp.bfloat16)                                   # (S, 3D) bf16

    av = []
    for h in range(num_heads):  # small static unroll; only the (S,S) part is per-head
        q = qkv[:, h * dk:(h + 1) * dk]
        k = qkv[:, d_model + h * dk:d_model + (h + 1) * dk]
        v = qkv[:, 2 * d_model + h * dk:2 * d_model + (h + 1) * dk]
        s = jax.lax.dot_general(q, k, (((1,), (1,)), ((), ())),
                                preferred_element_type=jnp.float32)              # (S, S) f32
        if bias is not None:
            s = s + bias[h]     # additive mask bias (0 or -1e30); finite -> no NaN rows
        m = jnp.max(s, axis=-1, keepdims=True)
        p = jnp.exp(s - m)
        p = p * pl.reciprocal(jnp.sum(p, axis=-1, keepdims=True), approx=True)
        av.append(jnp.dot(p.astype(jnp.bfloat16), v,
                          preferred_element_type=jnp.float32).astype(jnp.bfloat16))  # (S, dk)

    av = jnp.concatenate(av, axis=-1)                                            # (S, D) bf16
    # Single full-depth out-projection (matches torch combine_heads column order).
    return jnp.dot(av, wo_ref[0], preferred_element_type=jnp.float32) + bo_ref[0]


# ----------------------------- fused stack kernels -----------------------------

def _encoder_stack_kernel(*refs, eps, has_mask, num_heads):
    idx = 0
    x_ref = refs[idx]; idx += 1
    bias_ref = None
    if has_mask:
        bias_ref = refs[idx]; idx += 1
    (wqkv, bqkv, wo, bo,
     g1, be1, w1, b1, w2, b2, g2, be2) = refs[idx:idx + 12]
    o_ref = refs[idx + 12]

    layer = pl.program_id(1)

    @pl.when(layer == 0)
    def _():
        o_ref[...] = x_ref[...]          # seed the VMEM-resident layer carry with the stack input

    x = o_ref[0].astype(jnp.float32)                                  # (S, D)
    self_bias = bias_ref[0] if has_mask else None
    a = _mha(x, wqkv, bqkv, wo, bo, self_bias, num_heads)
    x = _layer_norm(x + a, g1[0], be1[0], eps)                        # dropout = identity (eval)
    y = _ffn(x, w1[0], b1[0], w2[0], b2[0])
    x = _layer_norm(x + y, g2[0], be2[0], eps)
    o_ref[0] = x.astype(o_ref.dtype)


def _decoder_stack_kernel(*refs, eps, has_mask, num_heads):
    idx = 0
    x_ref = refs[idx]; idx += 1
    bias_ref = None
    if has_mask:
        bias_ref = refs[idx]; idx += 1
    cross_bias_ref = refs[idx]; idx += 1
    (swqkv, sbqkv, swo, sbo,
     cwqkv, cbqkv, cwo, cbo,
     g1, be1, g2, be2, g3, be3,
     w1, b1, w2, b2) = refs[idx:idx + 18]
    o_ref = refs[idx + 18]

    layer = pl.program_id(1)

    @pl.when(layer == 0)
    def _():
        o_ref[...] = x_ref[...]

    x = o_ref[0].astype(jnp.float32)                                  # (S, D)
    self_bias = bias_ref[0] if has_mask else None
    a = _mha(x, swqkv, sbqkv, swo, sbo, self_bias, num_heads)
    x = _layer_norm(x + a, g1[0], be1[0], eps)
    # Faithful to the reference defect: the encoder output is passed as the *mask* argument of
    # cross-attention (q/k/v still come from x); additive bias precomputed where enc_out == 0.
    c = _mha(x, cwqkv, cbqkv, cwo, cbo, cross_bias_ref[...], num_heads)
    x = _layer_norm(x + c, g2[0], be2[0], eps)
    y = _ffn(x, w1[0], b1[0], w2[0], b2[0])
    x = _layer_norm(x + y, g3[0], be3[0], eps)
    o_ref[0] = x.astype(o_ref.dtype)


# ----------------------------- pallas_call wrappers -----------------------------

def _weight_spec(a):
    # Stacked weight (L, ...): block = one layer's slab, indexed by the layer grid axis.
    return pl.BlockSpec((1,) + a.shape[1:],
                        lambda b, l, _n=a.ndim - 1: (l,) + (0,) * _n)


def encoder_stack(x, p, mask=None):
    B, S, D = x.shape
    L = p["wqkv"].shape[0]
    has_mask = mask is not None

    inputs = [x]
    in_specs = [pl.BlockSpec((1, S, D), lambda b, l: (b, 0, 0))]
    if has_mask:
        # Additive mask bias built ONCE for the whole stack (torch masked_fill broadcast onto
        # (B, H, S, S)); -1e30 instead of -inf keeps fully-masked rows NaN-free.
        bias = jnp.where(jnp.broadcast_to(mask == 0, (B, NUM_HEADS, S, S)),
                         jnp.float32(-1e30), jnp.float32(0.0))
        inputs.append(bias)
        in_specs.append(pl.BlockSpec((1, NUM_HEADS, S, S), lambda b, l: (b, 0, 0, 0)))
    for k in _ENC_WEIGHT_KEYS:
        inputs.append(p[k])
        in_specs.append(_weight_spec(p[k]))

    return pl.pallas_call(
        functools.partial(_encoder_stack_kernel, eps=EPS, has_mask=has_mask,
                          num_heads=NUM_HEADS),
        out_shape=jax.ShapeDtypeStruct((B, S, D), x.dtype),
        grid=(B, L),
        in_specs=in_specs,
        out_specs=pl.BlockSpec((1, S, D), lambda b, l: (b, 0, 0)),
        compiler_params=pltpu.CompilerParams(
            dimension_semantics=("parallel", "arbitrary")),
    )(*inputs)


def decoder_stack(x, enc_out, p, mask=None):
    B, S, D = x.shape
    # Reference cross-attn "mask" broadcast (enc_out as mask) requires these shapes:
    assert B == NUM_HEADS and S == D and enc_out.shape == (B, S, D)
    L = p["swqkv"].shape[0]
    has_mask = mask is not None

    inputs = [x]
    in_specs = [pl.BlockSpec((1, S, D), lambda b, l: (b, 0, 0))]
    if has_mask:
        bias = jnp.where(jnp.broadcast_to(mask == 0, (B, NUM_HEADS, S, S)),
                         jnp.float32(-1e30), jnp.float32(0.0))
        inputs.append(bias)
        in_specs.append(pl.BlockSpec((1, NUM_HEADS, S, S), lambda b, l: (b, 0, 0, 0)))
    # Cross-attn additive bias: torch broadcast makes head h use enc_out[h] regardless of batch b.
    cross_bias = jnp.where(enc_out == 0.0, jnp.float32(-1e30), jnp.float32(0.0))  # (H, S, S)
    inputs.append(cross_bias)
    in_specs.append(pl.BlockSpec(cross_bias.shape, lambda b, l: (0, 0, 0)))
    for k in _DEC_WEIGHT_KEYS:
        inputs.append(p[k])
        in_specs.append(_weight_spec(p[k]))

    return pl.pallas_call(
        functools.partial(_decoder_stack_kernel, eps=EPS, has_mask=has_mask,
                          num_heads=NUM_HEADS),
        out_shape=jax.ShapeDtypeStruct((B, S, D), x.dtype),
        grid=(B, L),
        in_specs=in_specs,
        out_specs=pl.BlockSpec((1, S, D), lambda b, l: (b, 0, 0)),
        compiler_params=pltpu.CompilerParams(
            dimension_semantics=("parallel", "arbitrary")),
    )(*inputs)


def transformer_forward(src, tgt, params, src_mask=None, tgt_mask=None):
    enc_out = encoder_stack(src, params["encoder"], src_mask)
    return decoder_stack(tgt, enc_out, params["decoder"], tgt_mask)


# ----------------------------- deterministic init -----------------------------

def xavier_uniform(key, fan_in, fan_out):
    bound = math.sqrt(6.0 / (fan_in + fan_out))
    return jax.random.uniform(key, (fan_in, fan_out), jnp.float32, -bound, bound)


def init_mha(key, d_model, num_heads):
    dk = d_model // num_heads
    k1, k2 = jax.random.split(key)
    wqkv = xavier_uniform(k1, d_model, 3 * d_model)   # (in, out) = transposed torch weight layout
    out_w = xavier_uniform(k2, d_model, d_model)
    bqkv = jnp.zeros((1, 3 * d_model), jnp.float32)
    # Fold the 1/sqrt(d_k) attention scale into the Q projection (weights + bias) in f32,
    # before the bf16 cast, so the kernel never scales the (S,S) scores.
    scale = 1.0 / math.sqrt(dk)
    wqkv = wqkv.at[:, :d_model].multiply(scale)
    bqkv = bqkv.at[:, :d_model].multiply(scale)
    return {"wqkv": wqkv.astype(jnp.bfloat16), "bqkv": bqkv,
            "wo": out_w.astype(jnp.bfloat16),
            "bo": jnp.zeros((1, d_model), jnp.float32)}


def init_ffn(key, d_model, d_ff):
    k1, k2 = jax.random.split(key)
    return {"w1": xavier_uniform(k1, d_model, d_ff).astype(jnp.bfloat16),
            "b1": jnp.zeros((1, d_ff), jnp.float32),
            "w2": xavier_uniform(k2, d_ff, d_model).astype(jnp.bfloat16),
            "b2": jnp.zeros((1, d_model), jnp.float32)}


def init_ln(d_model):
    return {"gamma": jnp.ones((1, d_model), jnp.float32),
            "beta": jnp.zeros((1, d_model), jnp.float32)}


def init_params(key, d_model, num_layers, d_ff, num_heads):
    enc_layers, dec_layers = [], []
    for _ in range(num_layers):
        key, k1, k2 = jax.random.split(key, 3)
        attn, ffn = init_mha(k1, d_model, num_heads), init_ffn(k2, d_model, d_ff)
        n1, n2 = init_ln(d_model), init_ln(d_model)
        enc_layers.append({
            "wqkv": attn["wqkv"], "bqkv": attn["bqkv"], "wo": attn["wo"], "bo": attn["bo"],
            "g1": n1["gamma"], "be1": n1["beta"],
            "w1": ffn["w1"], "b1": ffn["b1"], "w2": ffn["w2"], "b2": ffn["b2"],
            "g2": n2["gamma"], "be2": n2["beta"]})
    for _ in range(num_layers):
        key, k1, k2, k3 = jax.random.split(key, 4)
        sa, ca = init_mha(k1, d_model, num_heads), init_mha(k2, d_model, num_heads)
        ffn = init_ffn(k3, d_model, d_ff)
        n1, n2, n3 = init_ln(d_model), init_ln(d_model), init_ln(d_model)
        dec_layers.append({
            "swqkv": sa["wqkv"], "sbqkv": sa["bqkv"], "swo": sa["wo"], "sbo": sa["bo"],
            "cwqkv": ca["wqkv"], "cbqkv": ca["bqkv"], "cwo": ca["wo"], "cbo": ca["bo"],
            "g1": n1["gamma"], "be1": n1["beta"],
            "g2": n2["gamma"], "be2": n2["beta"],
            "g3": n3["gamma"], "be3": n3["beta"],
            "w1": ffn["w1"], "b1": ffn["b1"], "w2": ffn["w2"], "b2": ffn["b2"]})

    def stack(layers, keys):
        return {k: jnp.stack([lp[k] for lp in layers], axis=0) for k in keys}

    return {"encoder": stack(enc_layers, _ENC_WEIGHT_KEYS),
            "decoder": stack(dec_layers, _DEC_WEIGHT_KEYS)}


# ----------------------------- main -----------------------------

if __name__ == "__main__":
    key = jax.random.PRNGKey(0)
    kp, ks, kt = jax.random.split(key, 3)

    B = NUM_HEADS    # must equal num_heads (reference cross-attn mask broadcast requirement)
    S = D_MODEL      # seq == d_model required by the same broadcast

    params = init_params(kp, D_MODEL, NUM_LAYERS, D_FF, NUM_HEADS)
    src = jax.random.normal(ks, (B, S, D_MODEL), jnp.float32)
    tgt = jax.random.normal(kt, (B, S, D_MODEL), jnp.float32)

    out = jax.jit(transformer_forward)(src, tgt, params)
    out = jax.block_until_ready(out)
    assert out.shape == (B, S, D_MODEL)
    assert bool(jnp.all(jnp.isfinite(out)))
    print("KERNEL_OK")
</pallas_src>

<mosaic_0001>
module attributes {stable_mosaic.version = 11 : i64} {
  func.func @_encoder_stack_kernel(%arg0: i32, %arg1: i32, %arg2: memref<1x128x128xf32, #tpu.memory_space<vmem>>, %arg3: memref<1x128x384xbf16, #tpu.memory_space<vmem>>, %arg4: memref<1x1x384xf32, #tpu.memory_space<vmem>>, %arg5: memref<1x128x128xbf16, #tpu.memory_space<vmem>>, %arg6: memref<1x1x128xf32, #tpu.memory_space<vmem>>, %arg7: memref<1x1x128xf32, #tpu.memory_space<vmem>>, %arg8: memref<1x1x128xf32, #tpu.memory_space<vmem>>, %arg9: memref<1x128x256xbf16, #tpu.memory_space<vmem>>, %arg10: memref<1x1x256xf32, #tpu.memory_space<vmem>>, %arg11: memref<1x256x128xbf16, #tpu.memory_space<vmem>>, %arg12: memref<1x1x128xf32, #tpu.memory_space<vmem>>, %arg13: memref<1x1x128xf32, #tpu.memory_space<vmem>>, %arg14: memref<1x1x128xf32, #tpu.memory_space<vmem>>, %arg15: memref<1x128x128xf32, #tpu.memory_space<vmem>>) attributes {dimension_semantics = [#tpu.dimension_semantics<parallel>, #tpu.dimension_semantics<arbitrary>], iteration_bounds = array<i64: 2, 2>, scalar_prefetch = 0 : i64, scratch_operands = 0 : i64, tpu.core_type = #tpu.core_type<tc>, window_params = [{transform_indices = @transform_0, window_bounds = array<i64: 1, 128, 128>}, {transform_indices = @transform_1, window_bounds = array<i64: 1, 128, 384>}, {transform_indices = @transform_2, window_bounds = array<i64: 1, 1, 384>}, {transform_indices = @transform_3, window_bounds = array<i64: 1, 128, 128>}, {transform_indices = @transform_4, window_bounds = array<i64: 1, 1, 128>}, {transform_indices = @transform_5, window_bounds = array<i64: 1, 1, 128>}, {transform_indices = @transform_6, window_bounds = array<i64: 1, 1, 128>}, {transform_indices = @transform_7, window_bounds = array<i64: 1, 128, 256>}, {transform_indices = @transform_8, window_bounds = array<i64: 1, 1, 256>}, {transform_indices = @transform_9, window_bounds = array<i64: 1, 256, 128>}, {transform_indices = @transform_10, window_bounds = array<i64: 1, 1, 128>}, {transform_indices = @transform_11, window_bounds = array<i64: 1, 1, 128>}, {transform_indices = @transform_12, window_bounds = array<i64: 1, 1, 128>}, {transform_indices = @transform_13, window_bounds = array<i64: 1, 128, 128>}]} {
    %c0_i32 = arith.constant 0 : i32
    %0 = arith.cmpi eq, %arg1, %c0_i32 : i32
    %1 = arith.extui %0 : i1 to i32
    %c0_i32_0 = arith.constant 0 : i32
    %2 = arith.cmpi ne, %1, %c0_i32_0 : i32
    scf.if %2 {
      %c0_66 = arith.constant 0 : index
      %c0_67 = arith.constant 0 : index
      %c0_68 = arith.constant 0 : index
      %133 = vector.load %arg2[%c0_66, %c0_67, %c0_68] : memref<1x128x128xf32, #tpu.memory_space<vmem>>, vector<1x128x128xf32>
      %c0_69 = arith.constant 0 : index
      %c0_70 = arith.constant 0 : index
      %c0_71 = arith.constant 0 : index
      %134 = vector.load %arg15[%c0_69, %c0_70, %c0_71] : memref<1x128x128xf32, #tpu.memory_space<vmem>>, vector<1x128x128xf32>
      tpu.vector_store %arg15[%c0_69, %c0_70, %c0_71], %133 {strides = array<i32>} : memref<1x128x128xf32, #tpu.memory_space<vmem>>, vector<1x128x128xf32>,
    } else {
    }
    %c0 = arith.constant 0 : index
    %c0_1 = arith.constant 0 : index
    %c0_2 = arith.constant 0 : index
    %3 = vector.load %arg15[%c0, %c0_1, %c0_2] : memref<1x128x128xf32, #tpu.memory_space<vmem>>, vector<1x128x128xf32>
    %4 = vector.shape_cast %3 : vector<1x128x128xf32> to vector<128x128xf32>
    %5 = arith.truncf %4 : vector<128x128xf32> to vector<128x128xbf16>
    %c0_3 = arith.constant 0 : index
    %c0_4 = arith.constant 0 : index
    %c0_5 = arith.constant 0 : index
    %6 = vector.load %arg3[%c0_3, %c0_4, %c0_5] : memref<1x128x384xbf16, #tpu.memory_space<vmem>>, vector<1x128x384xbf16>
    %7 = vector.shape_cast %6 : vector<1x128x384xbf16> to vector<128x384xbf16>
    %cst = arith.constant dense<0.000000e+00> : vector<128x384xf32>
    %8 = tpu.matmul %5, %7, %cst {dimension_numbers = #tpu.dot_dimension_numbers<[1], [0], [0], [1], [0, 0, 1, 1], [], []>} : vector<128x128xbf16>, vector<128x384xbf16>, vector<128x384xf32> -> vector<128x384xf32>
    %c0_6 = arith.constant 0 : index
    %c0_7 = arith.constant 0 : index
    %c0_8 = arith.constant 0 : index
    %9 = vector.load %arg4[%c0_6, %c0_7, %c0_8] : memref<1x1x384xf32, #tpu.memory_space<vmem>>, vector<1x1x384xf32>
    %10 = vector.shape_cast %9 : vector<1x1x384xf32> to vector<1x384xf32>
    %11 = vector.broadcast %10 : vector<1x384xf32> to vector<128x384xf32>
    %12 = arith.addf %8, %11 : vector<128x384xf32>
    %13 = arith.truncf %12 : vector<128x384xf32> to vector<128x384xbf16>
    %14 = vector.extract_strided_slice %13 {offsets = [0, 0], sizes = [128, 64], strides = [1, 1]} : vector<128x384xbf16> to vector<128x64xbf16>
    %15 = vector.extract_strided_slice %13 {offsets = [0, 128], sizes = [128, 64], strides = [1, 1]} : vector<128x384xbf16> to vector<128x64xbf16>
    %16 = vector.extract_strided_slice %13 {offsets = [0, 256], sizes = [128, 64], strides = [1, 1]} : vector<128x384xbf16> to vector<128x64xbf16>
    %cst_9 = arith.constant dense<0.000000e+00> : vector<128x128xf32>
    %17 = tpu.matmul %14, %15, %cst_9 {dimension_numbers = #tpu.dot_dimension_numbers<[1], [1], [0], [0], [0, 0, 1, 0], [], []>} : vector<128x64xbf16>, vector<128x64xbf16>, vector<128x128xf32> -> vector<128x128xf32>
    %cst_10 = arith.constant dense<0xFF800000> : vector<128xf32>
    %18 = vector.multi_reduction <maximumf>, %17, %cst_10 [1] : vector<128x128xf32> to vector<128xf32>
    %19 = vector.shape_cast %18 : vector<128xf32> to vector<128x1xf32>
    %20 = vector.broadcast %19 : vector<128x1xf32> to vector<128x128xf32>
    %21 = arith.subf %17, %20 : vector<128x128xf32>
    %22 = math.exp %21 : vector<128x128xf32>
    %cst_11 = arith.constant dense<0.000000e+00> : vector<128xf32>
    %23 = vector.multi_reduction <add>, %22, %cst_11 [1] : vector<128x128xf32> to vector<128xf32>
    %24 = vector.shape_cast %23 : vector<128xf32> to vector<128x1xf32>
    %25 = tpu.reciprocal %24 {approx = true} : vector<128x1xf32> -> vector<128x1xf32>
    %26 = vector.broadcast %25 : vector<128x1xf32> to vector<128x128xf32>
    %27 = arith.mulf %22, %26 : vector<128x128xf32>
    %28 = arith.truncf %27 : vector<128x128xf32> to vector<128x128xbf16>
    %cst_12 = arith.constant dense<0.000000e+00> : vector<128x64xf32>
    %29 = tpu.matmul %28, %16, %cst_12 {dimension_numbers = #tpu.dot_dimension_numbers<[1], [0], [0], [1], [0, 0, 1, 1], [], []>} : vector<128x128xbf16>, vector<128x64xbf16>, vector<128x64xf32> -> vector<128x64xf32>
    %30 = arith.truncf %29 : vector<128x64xf32> to vector<128x64xbf16>
    %31 = vector.extract_strided_slice %13 {offsets = [0, 64], sizes = [128, 64], strides = [1, 1]} : vector<128x384xbf16> to vector<128x64xbf16>
    %32 = vector.extract_strided_slice %13 {offsets = [0, 192], sizes = [128, 64], strides = [1, 1]} : vector<128x384xbf16> to vector<128x64xbf16>
    %33 = vector.extract_strided_slice %13 {offsets = [0, 320], sizes = [128, 64], strides = [1, 1]} : vector<128x384xbf16> to vector<128x64xbf16>
    %cst_13 = arith.constant dense<0.000000e+00> : vector<128x128xf32>
    %34 = tpu.matmul %31, %32, %cst_13 {dimension_numbers = #tpu.dot_dimension_numbers<[1], [1], [0], [0], [0, 0, 1, 0], [], []>} : vector<128x64xbf16>, vector<128x64xbf16>, vector<128x128xf32> -> vector<128x128xf32>
    %cst_14 = arith.constant dense<0xFF800000> : vector<128xf32>
    %35 = vector.multi_reduction <maximumf>, %34, %cst_14 [1] : vector<128x128xf32> to vector<128xf32>
    %36 = vector.shape_cast %35 : vector<128xf32> to vector<128x1xf32>
    %37 = vector.broadcast %36 : vector<128x1xf32> to vector<128x128xf32>
    %38 = arith.subf %34, %37 : vector<128x128xf32>
    %39 = math.exp %38 : vector<128x128xf32>
    %cst_15 = arith.constant dense<0.000000e+00> : vector<128xf32>
    %40 = vector.multi_reduction <add>, %39, %cst_15 [1] : vector<128x128xf32> to vector<128xf32>
    %41 = vector.shape_cast %40 : vector<128xf32> to vector<128x1xf32>
    %42 = tpu.reciprocal %41 {approx = true} : vector<128x1xf32> -> vector<128x1xf32>
    %43 = vector.broadcast %42 : vector<128x1xf32> to vector<128x128xf32>
    %44 = arith.mulf %39, %43 : vector<128x128xf32>
    %45 = arith.truncf %44 : vector<128x128xf32> to vector<128x128xbf16>
    %cst_16 = arith.constant dense<0.000000e+00> : vector<128x64xf32>
    %46 = tpu.matmul %45, %33, %cst_16 {dimension_numbers = #tpu.dot_dimension_numbers<[1], [0], [0], [1], [0, 0, 1, 1], [], []>} : vector<128x128xbf16>, vector<128x64xbf16>, vector<128x64xf32> -> vector<128x64xf32>
    %47 = arith.truncf %46 : vector<128x64xf32> to vector<128x64xbf16>
    %48 = tpu.concatenate %30, %47 in 1 : vector<128x64xbf16>, vector<128x64xbf16> -> vector<128x128xbf16>
    %c0_17 = arith.constant 0 : index
    %c0_18 = arith.constant 0 : index
    %c0_19 = arith.constant 0 : index
    %49 = vector.load %arg5[%c0_17, %c0_18, %c0_19] : memref<1x128x128xbf16, #tpu.memory_space<vmem>>, vector<1x128x128xbf16>
    %50 = vector.shape_cast %49 : vector<1x128x128xbf16> to vector<128x128xbf16>
    %cst_20 = arith.constant dense<0.000000e+00> : vector<128x128xf32>
    %51 = tpu.matmul %48, %50, %cst_20 {dimension_numbers = #tpu.dot_dimension_numbers<[1], [0], [0], [1], [0, 0, 1, 1], [], []>} : vector<128x128xbf16>, vector<128x128xbf16>, vector<128x128xf32> -> vector<128x128xf32>
    %c0_21 = arith.constant 0 : index
    %c0_22 = arith.constant 0 : index
    %c0_23 = arith.constant 0 : index
    %52 = vector.load %arg6[%c0_21, %c0_22, %c0_23] : memref<1x1x128xf32, #tpu.memory_space<vmem>>, vector<1x1x128xf32>
    %53 = vector.shape_cast %52 : vector<1x1x128xf32> to vector<1x128xf32>
    %54 = vector.broadcast %53 : vector<1x128xf32> to vector<128x128xf32>
    %55 = arith.addf %51, %54 : vector<128x128xf32>
    %56 = arith.addf %4, %55 : vector<128x128xf32>
    %c0_24 = arith.constant 0 : index
    %c0_25 = arith.constant 0 : index
    %c0_26 = arith.constant 0 : index
    %57 = vector.load %arg7[%c0_24, %c0_25, %c0_26] : memref<1x1x128xf32, #tpu.memory_space<vmem>>, vector<1x1x128xf32>
    %58 = vector.shape_cast %57 : vector<1x1x128xf32> to vector<1x128xf32>
    %c0_27 = arith.constant 0 : index
    %c0_28 = arith.constant 0 : index
    %c0_29 = arith.constant 0 : index
    %59 = vector.load %arg8[%c0_27, %c0_28, %c0_29] : memref<1x1x128xf32, #tpu.memory_space<vmem>>, vector<1x1x128xf32>
    %60 = vector.shape_cast %59 : vector<1x1x128xf32> to vector<1x128xf32>
    %cst_30 = arith.constant dense<0.000000e+00> : vector<128xf32>
    %61 = vector.multi_reduction <add>, %56, %cst_30 [1] : vector<128x128xf32> to vector<128xf32>
    %62 = vector.shape_cast %61 : vector<128xf32> to vector<128x1xf32>
    %cst_31 = arith.constant 1.280000e+02 : f32
    %63 = vector.broadcast %cst_31 : f32 to vector<128x1xf32>
    %64 = arith.divf %62, %63 : vector<128x1xf32>
    %65 = vector.broadcast %64 : vector<128x1xf32> to vector<128x128xf32>
    %66 = arith.subf %56, %65 : vector<128x128xf32>
    %67 = arith.mulf %66, %66 : vector<128x128xf32>
    %cst_32 = arith.constant dense<0.000000e+00> : vector<128xf32>
    %68 = vector.multi_reduction <add>, %67, %cst_32 [1] : vector<128x128xf32> to vector<128xf32>
    %69 = vector.shape_cast %68 : vector<128xf32> to vector<128x1xf32>
    %cst_33 = arith.constant 0.00787401571 : f32
    %70 = vector.broadcast %cst_33 : f32 to vector<128x1xf32>
    %71 = arith.mulf %69, %70 : vector<128x1xf32>
    %72 = math.sqrt %71 : vector<128x1xf32>
    %cst_34 = arith.constant 9.99999974E-6 : f32
    %73 = vector.broadcast %cst_34 : f32 to vector<128x1xf32>
    %74 = arith.addf %72, %73 : vector<128x1xf32>
    %75 = vector.broadcast %74 : vector<128x1xf32> to vector<128x128xf32>
    %76 = arith.divf %66, %75 : vector<128x128xf32>
    %77 = vector.broadcast %58 : vector<1x128xf32> to vector<128x128xf32>
    %78 = arith.mulf %77, %76 : vector<128x128xf32>
    %79 = vector.broadcast %60 : vector<1x128xf32> to vector<128x128xf32>
    %80 = arith.addf %78, %79 : vector<128x128xf32>
    %c0_35 = arith.constant 0 : index
    %c0_36 = arith.constant 0 : index
    %c0_37 = arith.constant 0 : index
    %81 = vector.load %arg9[%c0_35, %c0_36, %c0_37] : memref<1x128x256xbf16, #tpu.memory_space<vmem>>, vector<1x128x256xbf16>
    %82 = vector.shape_cast %81 : vector<1x128x256xbf16> to vector<128x256xbf16>
    %c0_38 = arith.constant 0 : index
    %c0_39 = arith.constant 0 : index
    %c0_40 = arith.constant 0 : index
    %83 = vector.load %arg10[%c0_38, %c0_39, %c0_40] : memref<1x1x256xf32, #tpu.memory_space<vmem>>, vector<1x1x256xf32>
    %84 = vector.shape_cast %83 : vector<1x1x256xf32> to vector<1x256xf32>
    %c0_41 = arith.constant 0 : index
    %c0_42 = arith.constant 0 : index
    %c0_43 = arith.constant 0 : index
    %85 = vector.load %arg11[%c0_41, %c0_42, %c0_43] : memref<1x256x128xbf16, #tpu.memory_space<vmem>>, vector<1x256x128xbf16>
    %86 = vector.shape_cast %85 : vector<1x256x128xbf16> to vector<256x128xbf16>
    %c0_44 = arith.constant 0 : index
    %c0_45 = arith.constant 0 : index
    %c0_46 = arith.constant 0 : index
    %87 = vector.load %arg12[%c0_44, %c0_45, %c0_46] : memref<1x1x128xf32, #tpu.memory_space<vmem>>, vector<1x1x128xf32>
    %88 = vector.shape_cast %87 : vector<1x1x128xf32> to vector<1x128xf32>
    %89 = arith.truncf %80 : vector<128x128xf32> to vector<128x128xbf16>
    %cst_47 = arith.constant dense<0.000000e+00> : vector<128x256xf32>
    %90 = tpu.matmul %89, %82, %cst_47 {dimension_numbers = #tpu.dot_dimension_numbers<[1], [0], [0], [1], [0, 0, 1, 1], [], []>} : vector<128x128xbf16>, vector<128x256xbf16>, vector<128x256xf32> -> vector<128x256xf32>
    %91 = vector.broadcast %84 : vector<1x256xf32> to vector<128x256xf32>
    %92 = arith.addf %90, %91 : vector<128x256xf32>
    %cst_48 = arith.constant 5.000000e-01 : f32
    %93 = vector.broadcast %cst_48 : f32 to vector<128x256xf32>
    %94 = arith.mulf %93, %92 : vector<128x256xf32>
    %cst_49 = arith.constant 0.707106769 : f32
    %95 = vector.broadcast %cst_49 : f32 to vector<128x256xf32>
    %96 = arith.mulf %92, %95 : vector<128x256xf32>
    %97 = math.erf %96 : vector<128x256xf32>
    %cst_50 = arith.constant 1.000000e+00 : f32
    %98 = vector.broadcast %cst_50 : f32 to vector<128x256xf32>
    %99 = arith.addf %98, %97 : vector<128x256xf32>
    %100 = arith.mulf %94, %99 : vector<128x256xf32>
    %101 = arith.truncf %100 : vector<128x256xf32> to vector<128x256xbf16>
    %cst_51 = arith.constant dense<0.000000e+00> : vector<128x128xf32>
    %102 = tpu.matmul %101, %86, %cst_51 {dimension_numbers = #tpu.dot_dimension_numbers<[1], [0], [0], [1], [0, 0, 1, 1], [], []>} : vector<128x256xbf16>, vector<256x128xbf16>, vector<128x128xf32> -> vector<128x128xf32>
    %103 = vector.broadcast %88 : vector<1x128xf32> to vector<128x128xf32>
    %104 = arith.addf %102, %103 : vector<128x128xf32>
    %105 = arith.addf %80, %104 : vector<128x128xf32>
    %c0_52 = arith.constant 0 : index
    %c0_53 = arith.constant 0 : index
    %c0_54 = arith.constant 0 : index
    %106 = vector.load %arg13[%c0_52, %c0_53, %c0_54] : memref<1x1x128xf32, #tpu.memory_space<vmem>>, vector<1x1x128xf32>
    %107 = vector.shape_cast %106 : vector<1x1x128xf32> to vector<1x128xf32>
    %c0_55 = arith.constant 0 : index
    %c0_56 = arith.constant 0 : index
    %c0_57 = arith.constant 0 : index
    %108 = vector.load %arg14[%c0_55, %c0_56, %c0_57] : memref<1x1x128xf32, #tpu.memory_space<vmem>>, vector<1x1x128xf32>
    %109 = vector.shape_cast %108 : vector<1x1x128xf32> to vector<1x128xf32>
    %cst_58 = arith.constant dense<0.000000e+00> : vector<128xf32>
    %110 = vector.multi_reduction <add>, %105, %cst_58 [1] : vector<128x128xf32> to vector<128xf32>
    %111 = vector.shape_cast %110 : vector<128xf32> to vector<128x1xf32>
    %cst_59 = arith.constant 1.280000e+02 : f32
    %112 = vector.broadcast %cst_59 : f32 to vector<128x1xf32>
    %113 = arith.divf %111, %112 : vector<128x1xf32>
    %114 = vector.broadcast %113 : vector<128x1xf32> to vector<128x128xf32>
    %115 = arith.subf %105, %114 : vector<128x128xf32>
    %116 = arith.mulf %115, %115 : vector<128x128xf32>
    %cst_60 = arith.constant dense<0.000000e+00> : vector<128xf32>
    %117 = vector.multi_reduction <add>, %116, %cst_60 [1] : vector<128x128xf32> to vector<128xf32>
    %118 = vector.shape_cast %117 : vector<128xf32> to vector<128x1xf32>
    %cst_61 = arith.constant 0.00787401571 : f32
    %119 = vector.broadcast %cst_61 : f32 to vector<128x1xf32>
    %120 = arith.mulf %118, %119 : vector<128x1xf32>
    %121 = math.sqrt %120 : vector<128x1xf32>
    %cst_62 = arith.constant 9.99999974E-6 : f32
    %122 = vector.broadcast %cst_62 : f32 to vector<128x1xf32>
    %123 = arith.addf %121, %122 : vector<128x1xf32>
    %124 = vector.broadcast %123 : vector<128x1xf32> to vector<128x128xf32>
    %125 = arith.divf %115, %124 : vector<128x128xf32>
    %126 = vector.broadcast %107 : vector<1x128xf32> to vector<128x128xf32>
    %127 = arith.mulf %126, %125 : vector<128x128xf32>
    %128 = vector.broadcast %109 : vector<1x128xf32> to vector<128x128xf32>
    %129 = arith.addf %127, %128 : vector<128x128xf32>
    %c0_63 = arith.constant 0 : index
    %c0_64 = arith.constant 0 : index
    %c0_65 = arith.constant 0 : index
    %130 = vector.load %arg15[%c0_63, %c0_64, %c0_65] : memref<1x128x128xf32, #tpu.memory_space<vmem>>, vector<1x128x128xf32>
    %131 = vector.shape_cast %130 : vector<1x128x128xf32> to vector<128x128xf32>
    %132 = vector.shape_cast %129 : vector<128x128xf32> to vector<1x128x128xf32>
    tpu.vector_store %arg15[%c0_63, %c0_64, %c0_65], %132 {strides = array<i32>} : memref<1x128x128xf32, #tpu.memory_space<vmem>>, vector<1x128x128xf32>,
    return
  }
  func.func @transform_0(%arg0: i32, %arg1: i32) -> (i32, i32, i32) {
    %c0_i32 = arith.constant 0 : i32
    %c0_i32_0 = arith.constant 0 : i32
    %c0_i32_1 = arith.constant 0 : i32
    return %arg0, %c0_i32, %c0_i32_0 : i32, i32, i32
  }
  func.func @transform_1(%arg0: i32, %arg1: i32) -> (i32, i32, i32) {
    %c0_i32 = arith.constant 0 : i32
    %c0_i32_0 = arith.constant 0 : i32
    %c0_i32_1 = arith.constant 0 : i32
    return %arg1, %c0_i32, %c0_i32_0 : i32, i32, i32
  }
  func.func @transform_2(%arg0: i32, %arg1: i32) -> (i32, i32, i32) {
    %c0_i32 = arith.constant 0 : i32
    %c0_i32_0 = arith.constant 0 : i32
    %c0_i32_1 = arith.constant 0 : i32
    return %arg1, %c0_i32, %c0_i32_0 : i32, i32, i32
  }
  func.func @transform_3(%arg0: i32, %arg1: i32) -> (i32, i32, i32) {
    %c0_i32 = arith.constant 0 : i32
    %c0_i32_0 = arith.constant 0 : i32
    %c0_i32_1 = arith.constant 0 : i32
    return %arg1, %c0_i32, %c0_i32_0 : i32, i32, i32
  }
  func.func @transform_4(%arg0: i32, %arg1: i32) -> (i32, i32, i32) {
    %c0_i32 = arith.constant 0 : i32
    %c0_i32_0 = arith.constant 0 : i32
    %c0_i32_1 = arith.constant 0 : i32
    return %arg1, %c0_i32, %c0_i32_0 : i32, i32, i32
  }
  func.func @transform_5(%arg0: i32, %arg1: i32) -> (i32, i32, i32) {
    %c0_i32 = arith.constant 0 : i32
    %c0_i32_0 = arith.constant 0 : i32
    %c0_i32_1 = arith.constant 0 : i32
    return %arg1, %c0_i32, %c0_i32_0 : i32, i32, i32
  }
  func.func @transform_6(%arg0: i32, %arg1: i32) -> (i32, i32, i32) {
    %c0_i32 = arith.constant 0 : i32
    %c0_i32_0 = arith.constant 0 : i32
    %c0_i32_1 = arith.constant 0 : i32
    return %arg1, %c0_i32, %c0_i32_0 : i32, i32, i32
  }
  func.func @transform_7(%arg0: i32, %arg1: i32) -> (i32, i32, i32) {
    %c0_i32 = arith.constant 0 : i32
    %c0_i32_0 = arith.constant 0 : i32
    %c0_i32_1 = arith.constant 0 : i32
    return %arg1, %c0_i32, %c0_i32_0 : i32, i32, i32
  }
  func.func @transform_8(%arg0: i32, %arg1: i32) -> (i32, i32, i32) {
    %c0_i32 = arith.constant 0 : i32
    %c0_i32_0 = arith.constant 0 : i32
    %c0_i32_1 = arith.constant 0 : i32
    return %arg1, %c0_i32, %c0_i32_0 : i32, i32, i32
  }
  func.func @transform_9(%arg0: i32, %arg1: i32) -> (i32, i32, i32) {
    %c0_i32 = arith.constant 0 : i32
    %c0_i32_0 = arith.constant 0 : i32
    %c0_i32_1 = arith.constant 0 : i32
    return %arg1, %c0_i32, %c0_i32_0 : i32, i32, i32
  }
  func.func @transform_10(%arg0: i32, %arg1: i32) -> (i32, i32, i32) {
    %c0_i32 = arith.constant 0 : i32
    %c0_i32_0 = arith.constant 0 : i32
    %c0_i32_1 = arith.constant 0 : i32
    return %arg1, %c0_i32, %c0_i32_0 : i32, i32, i32
  }
  func.func @transform_11(%arg0: i32, %arg1: i32) -> (i32, i32, i32) {
    %c0_i32 = arith.constant 0 : i32
    %c0_i32_0 = arith.constant 0 : i32
    %c0_i32_1 = arith.constant 0 : i32
    return %arg1, %c0_i32, %c0_i32_0 : i32, i32, i32
  }
  func.func @transform_12(%arg0: i32, %arg1: i32) -> (i32, i32, i32) {
    %c0_i32 = arith.constant 0 : i32
    %c0_i32_0 = arith.constant 0 : i32
    %c0_i32_1 = arith.constant 0 : i32
    return %arg1, %c0_i32, %c0_i32_0 : i32, i32, i32
  }
  func.func @transform_13(%arg0: i32, %arg1: i32) -> (i32, i32, i32) {
    %c0_i32 = arith.constant 0 : i32
    %c0_i32_0 = arith.constant 0 : i32
    %c0_i32_1 = arith.constant 0 : i32
    return %arg0, %c0_i32, %c0_i32_0 : i32, i32, i32
  }
}

module attributes {stable_mosaic.version = 11 : i64} {
  func.func @_decoder_stack_kernel(%arg0: i32, %arg1: i32, %arg2: memref<1x128x128xf32, #tpu.memory_space<vmem>>, %arg3: memref<2x128x128xf32, #tpu.memory_space<vmem>>, %arg4: memref<1x128x384xbf16, #tpu.memory_space<vmem>>, %arg5: memref<1x1x384xf32, #tpu.memory_space<vmem>>, %arg6: memref<1x128x128xbf16, #tpu.memory_space<vmem>>, %arg7: memref<1x1x128xf32, #tpu.memory_space<vmem>>, %arg8: memref<1x128x384xbf16, #tpu.memory_space<vmem>>, %arg9: memref<1x1x384xf32, #tpu.memory_space<vmem>>, %arg10: memref<1x128x128xbf16, #tpu.memory_space<vmem>>, %arg11: memref<1x1x128xf32, #tpu.memory_space<vmem>>, %arg12: memref<1x1x128xf32, #tpu.memory_space<vmem>>, %arg13: memref<1x1x128xf32, #tpu.memory_space<vmem>>, %arg14: memref<1x1x128xf32, #tpu.memory_space<vmem>>, %arg15: memref<1x1x128xf32, #tpu.memory_space<vmem>>, %arg16: memref<1x1x128xf32, #tpu.memory_space<vmem>>, %arg17: memref<1x1x128xf32, #tpu.memory_space<vmem>>, %arg18: memref<1x128x256xbf16, #tpu.memory_space<vmem>>, %arg19: memref<1x1x256xf32, #tpu.memory_space<vmem>>, %arg20: memref<1x256x128xbf16, #tpu.memory_space<vmem>>, %arg21: memref<1x1x128xf32, #tpu.memory_space<vmem>>, %arg22: memref<1x128x128xf32, #tpu.memory_space<vmem>>) attributes {dimension_semantics = [#tpu.dimension_semantics<parallel>, #tpu.dimension_semantics<arbitrary>], iteration_bounds = array<i64: 2, 2>, scalar_prefetch = 0 : i64, scratch_operands = 0 : i64, tpu.core_type = #tpu.core_type<tc>, window_params = [{transform_indices = @transform_0, window_bounds = array<i64: 1, 128, 128>}, {pipeline_mode = #tpu.pipeline_mode<synchronous>, transform_indices = @transform_1, window_bounds = array<i64: 2, 128, 128>}, {transform_indices = @transform_2, window_bounds = array<i64: 1, 128, 384>}, {transform_indices = @transform_3, window_bounds = array<i64: 1, 1, 384>}, {transform_indices = @transform_4, window_bounds = array<i64: 1, 128, 128>}, {transform_indices = @transform_5, window_bounds = array<i64: 1, 1, 128>}, {transform_indices = @transform_6, window_bounds = array<i64: 1, 128, 384>}, {transform_indices = @transform_7, window_bounds = array<i64: 1, 1, 384>}, {transform_indices = @transform_8, window_bounds = array<i64: 1, 128, 128>}, {transform_indices = @transform_9, window_bounds = array<i64: 1, 1, 128>}, {transform_indices = @transform_10, window_bounds = array<i64: 1, 1, 128>}, {transform_indices = @transform_11, window_bounds = array<i64: 1, 1, 128>}, {transform_indices = @transform_12, window_bounds = array<i64: 1, 1, 128>}, {transform_indices = @transform_13, window_bounds = array<i64: 1, 1, 128>}, {transform_indices = @transform_14, window_bounds = array<i64: 1, 1, 128>}, {transform_indices = @transform_15, window_bounds = array<i64: 1, 1, 128>}, {transform_indices = @transform_16, window_bounds = array<i64: 1, 128, 256>}, {transform_indices = @transform_17, window_bounds = array<i64: 1, 1, 256>}, {transform_indices = @transform_18, window_bounds = array<i64: 1, 256, 128>}, {transform_indices = @transform_19, window_bounds = array<i64: 1, 1, 128>}, {transform_indices = @transform_20, window_bounds = array<i64: 1, 128, 128>}]} {
    %c0_i32 = arith.constant 0 : i32
    %0 = arith.cmpi eq, %arg1, %c0_i32 : i32
    %1 = arith.extui %0 : i1 to i32
    %c0_i32_0 = arith.constant 0 : i32
    %2 = arith.cmpi ne, %1, %c0_i32_0 : i32
    scf.if %2 {
      %c0_102 = arith.constant 0 : index
      %c0_103 = arith.constant 0 : index
      %c0_104 = arith.constant 0 : index
      %216 = vector.load %arg2[%c0_102, %c0_103, %c0_104] : memref<1x128x128xf32, #tpu.memory_space<vmem>>, vector<1x128x128xf32>
      %c0_105 = arith.constant 0 : index
      %c0_106 = arith.constant 0 : index
      %c0_107 = arith.constant 0 : index
      %217 = vector.load %arg22[%c0_105, %c0_106, %c0_107] : memref<1x128x128xf32, #tpu.memory_space<vmem>>, vector<1x128x128xf32>
      tpu.vector_store %arg22[%c0_105, %c0_106, %c0_107], %216 {strides = array<i32>} : memref<1x128x128xf32, #tpu.memory_space<vmem>>, vector<1x128x128xf32>,
    } else {
    }
    %c0 = arith.constant 0 : index
    %c0_1 = arith.constant 0 : index
    %c0_2 = arith.constant 0 : index
    %3 = vector.load %arg22[%c0, %c0_1, %c0_2] : memref<1x128x128xf32, #tpu.memory_space<vmem>>, vector<1x128x128xf32>
    %4 = vector.shape_cast %3 : vector<1x128x128xf32> to vector<128x128xf32>
    %5 = arith.truncf %4 : vector<128x128xf32> to vector<128x128xbf16>
    %c0_3 = arith.constant 0 : index
    %c0_4 = arith.constant 0 : index
    %c0_5 = arith.constant 0 : index
    %6 = vector.load %arg4[%c0_3, %c0_4, %c0_5] : memref<1x128x384xbf16, #tpu.memory_space<vmem>>, vector<1x128x384xbf16>
    %7 = vector.shape_cast %6 : vector<1x128x384xbf16> to vector<128x384xbf16>
    %cst = arith.constant dense<0.000000e+00> : vector<128x384xf32>
    %8 = tpu.matmul %5, %7, %cst {dimension_numbers = #tpu.dot_dimension_numbers<[1], [0], [0], [1], [0, 0, 1, 1], [], []>} : vector<128x128xbf16>, vector<128x384xbf16>, vector<128x384xf32> -> vector<128x384xf32>
    %c0_6 = arith.constant 0 : index
    %c0_7 = arith.constant 0 : index
    %c0_8 = arith.constant 0 : index
    %9 = vector.load %arg5[%c0_6, %c0_7, %c0_8] : memref<1x1x384xf32, #tpu.memory_space<vmem>>, vector<1x1x384xf32>
    %10 = vector.shape_cast %9 : vector<1x1x384xf32> to vector<1x384xf32>
    %11 = vector.broadcast %10 : vector<1x384xf32> to vector<128x384xf32>
    %12 = arith.addf %8, %11 : vector<128x384xf32>
    %13 = arith.truncf %12 : vector<128x384xf32> to vector<128x384xbf16>
    %14 = vector.extract_strided_slice %13 {offsets = [0, 0], sizes = [128, 64], strides = [1, 1]} : vector<128x384xbf16> to vector<128x64xbf16>
    %15 = vector.extract_strided_slice %13 {offsets = [0, 128], sizes = [128, 64], strides = [1, 1]} : vector<128x384xbf16> to vector<128x64xbf16>
    %16 = vector.extract_strided_slice %13 {offsets = [0, 256], sizes = [128, 64], strides = [1, 1]} : vector<128x384xbf16> to vector<128x64xbf16>
    %cst_9 = arith.constant dense<0.000000e+00> : vector<128x128xf32>
    %17 = tpu.matmul %14, %15, %cst_9 {dimension_numbers = #tpu.dot_dimension_numbers<[1], [1], [0], [0], [0, 0, 1, 0], [], []>} : vector<128x64xbf16>, vector<128x64xbf16>, vector<128x128xf32> -> vector<128x128xf32>
    %cst_10 = arith.constant dense<0xFF800000> : vector<128xf32>
    %18 = vector.multi_reduction <maximumf>, %17, %cst_10 [1] : vector<128x128xf32> to vector<128xf32>
    %19 = vector.shape_cast %18 : vector<128xf32> to vector<128x1xf32>
    %20 = vector.broadcast %19 : vector<128x1xf32> to vector<128x128xf32>
    %21 = arith.subf %17, %20 : vector<128x128xf32>
    %22 = math.exp %21 : vector<128x128xf32>
    %cst_11 = arith.constant dense<0.000000e+00> : vector<128xf32>
    %23 = vector.multi_reduction <add>, %22, %cst_11 [1] : vector<128x128xf32> to vector<128xf32>
    %24 = vector.shape_cast %23 : vector<128xf32> to vector<128x1xf32>
    %25 = tpu.reciprocal %24 {approx = true} : vector<128x1xf32> -> vector<128x1xf32>
    %26 = vector.broadcast %25 : vector<128x1xf32> to vector<128x128xf32>
    %27 = arith.mulf %22, %26 : vector<128x128xf32>
    %28 = arith.truncf %27 : vector<128x128xf32> to vector<128x128xbf16>
    %cst_12 = arith.constant dense<0.000000e+00> : vector<128x64xf32>
    %29 = tpu.matmul %28, %16, %cst_12 {dimension_numbers = #tpu.dot_dimension_numbers<[1], [0], [0], [1], [0, 0, 1, 1], [], []>} : vector<128x128xbf16>, vector<128x64xbf16>, vector<128x64xf32> -> vector<128x64xf32>
    %30 = arith.truncf %29 : vector<128x64xf32> to vector<128x64xbf16>
    %31 = vector.extract_strided_slice %13 {offsets = [0, 64], sizes = [128, 64], strides = [1, 1]} : vector<128x384xbf16> to vector<128x64xbf16>
    %32 = vector.extract_strided_slice %13 {offsets = [0, 192], sizes = [128, 64], strides = [1, 1]} : vector<128x384xbf16> to vector<128x64xbf16>
    %33 = vector.extract_strided_slice %13 {offsets = [0, 320], sizes = [128, 64], strides = [1, 1]} : vector<128x384xbf16> to vector<128x64xbf16>
    %cst_13 = arith.constant dense<0.000000e+00> : vector<128x128xf32>
    %34 = tpu.matmul %31, %32, %cst_13 {dimension_numbers = #tpu.dot_dimension_numbers<[1], [1], [0], [0], [0, 0, 1, 0], [], []>} : vector<128x64xbf16>, vector<128x64xbf16>, vector<128x128xf32> -> vector<128x128xf32>
    %cst_14 = arith.constant dense<0xFF800000> : vector<128xf32>
    %35 = vector.multi_reduction <maximumf>, %34, %cst_14 [1] : vector<128x128xf32> to vector<128xf32>
    %36 = vector.shape_cast %35 : vector<128xf32> to vector<128x1xf32>
    %37 = vector.broadcast %36 : vector<128x1xf32> to vector<128x128xf32>
    %38 = arith.subf %34, %37 : vector<128x128xf32>
    %39 = math.exp %38 : vector<128x128xf32>
    %cst_15 = arith.constant dense<0.000000e+00> : vector<128xf32>
    %40 = vector.multi_reduction <add>, %39, %cst_15 [1] : vector<128x128xf32> to vector<128xf32>
    %41 = vector.shape_cast %40 : vector<128xf32> to vector<128x1xf32>
    %42 = tpu.reciprocal %41 {approx = true} : vector<128x1xf32> -> vector<128x1xf32>
    %43 = vector.broadcast %42 : vector<128x1xf32> to vector<128x128xf32>
    %44 = arith.mulf %39, %43 : vector<128x128xf32>
    %45 = arith.truncf %44 : vector<128x128xf32> to vector<128x128xbf16>
    %cst_16 = arith.constant dense<0.000000e+00> : vector<128x64xf32>
    %46 = tpu.matmul %45, %33, %cst_16 {dimension_numbers = #tpu.dot_dimension_numbers<[1], [0], [0], [1], [0, 0, 1, 1], [], []>} : vector<128x128xbf16>, vector<128x64xbf16>, vector<128x64xf32> -> vector<128x64xf32>
    %47 = arith.truncf %46 : vector<128x64xf32> to vector<128x64xbf16>
    %48 = tpu.concatenate %30, %47 in 1 : vector<128x64xbf16>, vector<128x64xbf16> -> vector<128x128xbf16>
    %c0_17 = arith.constant 0 : index
    %c0_18 = arith.constant 0 : index
    %c0_19 = arith.constant 0 : index
    %49 = vector.load %arg6[%c0_17, %c0_18, %c0_19] : memref<1x128x128xbf16, #tpu.memory_space<vmem>>, vector<1x128x128xbf16>
    %50 = vector.shape_cast %49 : vector<1x128x128xbf16> to vector<128x128xbf16>
    %cst_20 = arith.constant dense<0.000000e+00> : vector<128x128xf32>
    %51 = tpu.matmul %48, %50, %cst_20 {dimension_numbers = #tpu.dot_dimension_numbers<[1], [0], [0], [1], [0, 0, 1, 1], [], []>} : vector<128x128xbf16>, vector<128x128xbf16>, vector<128x128xf32> -> vector<128x128xf32>
    %c0_21 = arith.constant 0 : index
    %c0_22 = arith.constant 0 : index
    %c0_23 = arith.constant 0 : index
    %52 = vector.load %arg7[%c0_21, %c0_22, %c0_23] : memref<1x1x128xf32, #tpu.memory_space<vmem>>, vector<1x1x128xf32>
    %53 = vector.shape_cast %52 : vector<1x1x128xf32> to vector<1x128xf32>
    %54 = vector.broadcast %53 : vector<1x128xf32> to vector<128x128xf32>
    %55 = arith.addf %51, %54 : vector<128x128xf32>
    %56 = arith.addf %4, %55 : vector<128x128xf32>
    %c0_24 = arith.constant 0 : index
    %c0_25 = arith.constant 0 : index
    %c0_26 = arith.constant 0 : index
    %57 = vector.load %arg12[%c0_24, %c0_25, %c0_26] : memref<1x1x128xf32, #tpu.memory_space<vmem>>, vector<1x1x128xf32>
    %58 = vector.shape_cast %57 : vector<1x1x128xf32> to vector<1x128xf32>
    %c0_27 = arith.constant 0 : index
    %c0_28 = arith.constant 0 : index
    %c0_29 = arith.constant 0 : index
    %59 = vector.load %arg13[%c0_27, %c0_28, %c0_29] : memref<1x1x128xf32, #tpu.memory_space<vmem>>, vector<1x1x128xf32>
    %60 = vector.shape_cast %59 : vector<1x1x128xf32> to vector<1x128xf32>
    %cst_30 = arith.constant dense<0.000000e+00> : vector<128xf32>
    %61 = vector.multi_reduction <add>, %56, %cst_30 [1] : vector<128x128xf32> to vector<128xf32>
    %62 = vector.shape_cast %61 : vector<128xf32> to vector<128x1xf32>
    %cst_31 = arith.constant 1.280000e+02 : f32
    %63 = vector.broadcast %cst_31 : f32 to vector<128x1xf32>
    %64 = arith.divf %62, %63 : vector<128x1xf32>
    %65 = vector.broadcast %64 : vector<128x1xf32> to vector<128x128xf32>
    %66 = arith.subf %56, %65 : vector<128x128xf32>
    %67 = arith.mulf %66, %66 : vector<128x128xf32>
    %cst_32 = arith.constant dense<0.000000e+00> : vector<128xf32>
    %68 = vector.multi_reduction <add>, %67, %cst_32 [1] : vector<128x128xf32> to vector<128xf32>
    %69 = vector.shape_cast %68 : vector<128xf32> to vector<128x1xf32>
    %cst_33 = arith.constant 0.00787401571 : f32
    %70 = vector.broadcast %cst_33 : f32 to vector<128x1xf32>
    %71 = arith.mulf %69, %70 : vector<128x1xf32>
    %72 = math.sqrt %71 : vector<128x1xf32>
    %cst_34 = arith.constant 9.99999974E-6 : f32
    %73 = vector.broadcast %cst_34 : f32 to vector<128x1xf32>
    %74 = arith.addf %72, %73 : vector<128x1xf32>
    %75 = vector.broadcast %74 : vector<128x1xf32> to vector<128x128xf32>
    %76 = arith.divf %66, %75 : vector<128x128xf32>
    %77 = vector.broadcast %58 : vector<1x128xf32> to vector<128x128xf32>
    %78 = arith.mulf %77, %76 : vector<128x128xf32>
    %79 = vector.broadcast %60 : vector<1x128xf32> to vector<128x128xf32>
    %80 = arith.addf %78, %79 : vector<128x128xf32>
    %c0_35 = arith.constant 0 : index
    %c0_36 = arith.constant 0 : index
    %c0_37 = arith.constant 0 : index
    %81 = vector.load %arg3[%c0_35, %c0_36, %c0_37] : memref<2x128x128xf32, #tpu.memory_space<vmem>>, vector<2x128x128xf32>
    %82 = arith.truncf %80 : vector<128x128xf32> to vector<128x128xbf16>
    %c0_38 = arith.constant 0 : index
    %c0_39 = arith.constant 0 : index
    %c0_40 = arith.constant 0 : index
    %83 = vector.load %arg8[%c0_38, %c0_39, %c0_40] : memref<1x128x384xbf16, #tpu.memory_space<vmem>>, vector<1x128x384xbf16>
    %84 = vector.shape_cast %83 : vector<1x128x384xbf16> to vector<128x384xbf16>
    %cst_41 = arith.constant dense<0.000000e+00> : vector<128x384xf32>
    %85 = tpu.matmul %82, %84, %cst_41 {dimension_numbers = #tpu.dot_dimension_numbers<[1], [0], [0], [1], [0, 0, 1, 1], [], []>} : vector<128x128xbf16>, vector<128x384xbf16>, vector<128x384xf32> -> vector<128x384xf32>
    %c0_42 = arith.constant 0 : index
    %c0_43 = arith.constant 0 : index
    %c0_44 = arith.constant 0 : index
    %86 = vector.load %arg9[%c0_42, %c0_43, %c0_44] : memref<1x1x384xf32, #tpu.memory_space<vmem>>, vector<1x1x384xf32>
    %87 = vector.shape_cast %86 : vector<1x1x384xf32> to vector<1x384xf32>
    %88 = vector.broadcast %87 : vector<1x384xf32> to vector<128x384xf32>
    %89 = arith.addf %85, %88 : vector<128x384xf32>
    %90 = arith.truncf %89 : vector<128x384xf32> to vector<128x384xbf16>
    %91 = vector.extract_strided_slice %90 {offsets = [0, 0], sizes = [128, 64], strides = [1, 1]} : vector<128x384xbf16> to vector<128x64xbf16>
    %92 = vector.extract_strided_slice %90 {offsets = [0, 128], sizes = [128, 64], strides = [1, 1]} : vector<128x384xbf16> to vector<128x64xbf16>
    %93 = vector.extract_strided_slice %90 {offsets = [0, 256], sizes = [128, 64], strides = [1, 1]} : vector<128x384xbf16> to vector<128x64xbf16>
    %cst_45 = arith.constant dense<0.000000e+00> : vector<128x128xf32>
    %94 = tpu.matmul %91, %92, %cst_45 {dimension_numbers = #tpu.dot_dimension_numbers<[1], [1], [0], [0], [0, 0, 1, 0], [], []>} : vector<128x64xbf16>, vector<128x64xbf16>, vector<128x128xf32> -> vector<128x128xf32>
    %95 = vector.extract_strided_slice %81 {offsets = [0, 0, 0], sizes = [1, 128, 128], strides = [1, 1, 1]} : vector<2x128x128xf32> to vector<1x128x128xf32>
    %96 = vector.shape_cast %95 : vector<1x128x128xf32> to vector<128x128xf32>
    %97 = arith.addf %94, %96 : vector<128x128xf32>
    %cst_46 = arith.constant dense<0xFF800000> : vector<128xf32>
    %98 = vector.multi_reduction <maximumf>, %97, %cst_46 [1] : vector<128x128xf32> to vector<128xf32>
    %99 = vector.shape_cast %98 : vector<128xf32> to vector<128x1xf32>
    %100 = vector.broadcast %99 : vector<128x1xf32> to vector<128x128xf32>
    %101 = arith.subf %97, %100 : vector<128x128xf32>
    %102 = math.exp %101 : vector<128x128xf32>
    %cst_47 = arith.constant dense<0.000000e+00> : vector<128xf32>
    %103 = vector.multi_reduction <add>, %102, %cst_47 [1] : vector<128x128xf32> to vector<128xf32>
    %104 = vector.shape_cast %103 : vector<128xf32> to vector<128x1xf32>
    %105 = tpu.reciprocal %104 {approx = true} : vector<128x1xf32> -> vector<128x1xf32>
    %106 = vector.broadcast %105 : vector<128x1xf32> to vector<128x128xf32>
    %107 = arith.mulf %102, %106 : vector<128x128xf32>
    %108 = arith.truncf %107 : vector<128x128xf32> to vector<128x128xbf16>
    %cst_48 = arith.constant dense<0.000000e+00> : vector<128x64xf32>
    %109 = tpu.matmul %108, %93, %cst_48 {dimension_numbers = #tpu.dot_dimension_numbers<[1], [0], [0], [1], [0, 0, 1, 1], [], []>} : vector<128x128xbf16>, vector<128x64xbf16>, vector<128x64xf32> -> vector<128x64xf32>
    %110 = arith.truncf %109 : vector<128x64xf32> to vector<128x64xbf16>
    %111 = vector.extract_strided_slice %90 {offsets = [0, 64], sizes = [128, 64], strides = [1, 1]} : vector<128x384xbf16> to vector<128x64xbf16>
    %112 = vector.extract_strided_slice %90 {offsets = [0, 192], sizes = [128, 64], strides = [1, 1]} : vector<128x384xbf16> to vector<128x64xbf16>
    %113 = vector.extract_strided_slice %90 {offsets = [0, 320], sizes = [128, 64], strides = [1, 1]} : vector<128x384xbf16> to vector<128x64xbf16>
    %cst_49 = arith.constant dense<0.000000e+00> : vector<128x128xf32>
    %114 = tpu.matmul %111, %112, %cst_49 {dimension_numbers = #tpu.dot_dimension_numbers<[1], [1], [0], [0], [0, 0, 1, 0], [], []>} : vector<128x64xbf16>, vector<128x64xbf16>, vector<128x128xf32> -> vector<128x128xf32>
    %115 = vector.extract_strided_slice %81 {offsets = [1, 0, 0], sizes = [1, 128, 128], strides = [1, 1, 1]} : vector<2x128x128xf32> to vector<1x128x128xf32>
    %116 = vector.shape_cast %115 : vector<1x128x128xf32> to vector<128x128xf32>
    %117 = arith.addf %114, %116 : vector<128x128xf32>
    %cst_50 = arith.constant dense<0xFF800000> : vector<128xf32>
    %118 = vector.multi_reduction <maximumf>, %117, %cst_50 [1] : vector<128x128xf32> to vector<128xf32>
    %119 = vector.shape_cast %118 : vector<128xf32> to vector<128x1xf32>
    %120 = vector.broadcast %119 : vector<128x1xf32> to vector<128x128xf32>
    %121 = arith.subf %117, %120 : vector<128x128xf32>
    %122 = math.exp %121 : vector<128x128xf32>
    %cst_51 = arith.constant dense<0.000000e+00> : vector<128xf32>
    %123 = vector.multi_reduction <add>, %122, %cst_51 [1] : vector<128x128xf32> to vector<128xf32>
    %124 = vector.shape_cast %123 : vector<128xf32> to vector<128x1xf32>
    %125 = tpu.reciprocal %124 {approx = true} : vector<128x1xf32> -> vector<128x1xf32>
    %126 = vector.broadcast %125 : vector<128x1xf32> to vector<128x128xf32>
    %127 = arith.mulf %122, %126 : vector<128x128xf32>
    %128 = arith.truncf %127 : vector<128x128xf32> to vector<128x128xbf16>
    %cst_52 = arith.constant dense<0.000000e+00> : vector<128x64xf32>
    %129 = tpu.matmul %128, %113, %cst_52 {dimension_numbers = #tpu.dot_dimension_numbers<[1], [0], [0], [1], [0, 0, 1, 1], [], []>} : vector<128x128xbf16>, vector<128x64xbf16>, vector<128x64xf32> -> vector<128x64xf32>
    %130 = arith.truncf %129 : vector<128x64xf32> to vector<128x64xbf16>
    %131 = tpu.concatenate %110, %130 in 1 : vector<128x64xbf16>, vector<128x64xbf16> -> vector<128x128xbf16>
    %c0_53 = arith.constant 0 : index
    %c0_54 = arith.constant 0 : index
    %c0_55 = arith.constant 0 : index
    %132 = vector.load %arg10[%c0_53, %c0_54, %c0_55] : memref<1x128x128xbf16, #tpu.memory_space<vmem>>, vector<1x128x128xbf16>
    %133 = vector.shape_cast %132 : vector<1x128x128xbf16> to vector<128x128xbf16>
    %cst_56 = arith.constant dense<0.000000e+00> : vector<128x128xf32>
    %134 = tpu.matmul %131, %133, %cst_56 {dimension_numbers = #tpu.dot_dimension_numbers<[1], [0], [0], [1], [0, 0, 1, 1], [], []>} : vector<128x128xbf16>, vector<128x128xbf16>, vector<128x128xf32> -> vector<128x128xf32>
    %c0_57 = arith.constant 0 : index
    %c0_58 = arith.constant 0 : index
    %c0_59 = arith.constant 0 : index
    %135 = vector.load %arg11[%c0_57, %c0_58, %c0_59] : memref<1x1x128xf32, #tpu.memory_space<vmem>>, vector<1x1x128xf32>
    %136 = vector.shape_cast %135 : vector<1x1x128xf32> to vector<1x128xf32>
    %137 = vector.broadcast %136 : vector<1x128xf32> to vector<128x128xf32>
    %138 = arith.addf %134, %137 : vector<128x128xf32>
    %139 = arith.addf %80, %138 : vector<128x128xf32>
    %c0_60 = arith.constant 0 : index
    %c0_61 = arith.constant 0 : index
    %c0_62 = arith.constant 0 : index
    %140 = vector.load %arg14[%c0_60, %c0_61, %c0_62] : memref<1x1x128xf32, #tpu.memory_space<vmem>>, vector<1x1x128xf32>
    %141 = vector.shape_cast %140 : vector<1x1x128xf32> to vector<1x128xf32>
    %c0_63 = arith.constant 0 : index
    %c0_64 = arith.constant 0 : index
    %c0_65 = arith.constant 0 : index
    %142 = vector.load %arg15[%c0_63, %c0_64, %c0_65] : memref<1x1x128xf32, #tpu.memory_space<vmem>>, vector<1x1x128xf32>
    %143 = vector.shape_cast %142 : vector<1x1x128xf32> to vector<1x128xf32>
    %cst_66 = arith.constant dense<0.000000e+00> : vector<128xf32>
    %144 = vector.multi_reduction <add>, %139, %cst_66 [1] : vector<128x128xf32> to vector<128xf32>
    %145 = vector.shape_cast %144 : vector<128xf32> to vector<128x1xf32>
    %cst_67 = arith.constant 1.280000e+02 : f32
    %146 = vector.broadcast %cst_67 : f32 to vector<128x1xf32>
    %147 = arith.divf %145, %146 : vector<128x1xf32>
    %148 = vector.broadcast %147 : vector<128x1xf32> to vector<128x128xf32>
    %149 = arith.subf %139, %148 : vector<128x128xf32>
    %150 = arith.mulf %149, %149 : vector<128x128xf32>
    %cst_68 = arith.constant dense<0.000000e+00> : vector<128xf32>
    %151 = vector.multi_reduction <add>, %150, %cst_68 [1] : vector<128x128xf32> to vector<128xf32>
    %152 = vector.shape_cast %151 : vector<128xf32> to vector<128x1xf32>
    %cst_69 = arith.constant 0.00787401571 : f32
    %153 = vector.broadcast %cst_69 : f32 to vector<128x1xf32>
    %154 = arith.mulf %152, %153 : vector<128x1xf32>
    %155 = math.sqrt %154 : vector<128x1xf32>
    %cst_70 = arith.constant 9.99999974E-6 : f32
    %156 = vector.broadcast %cst_70 : f32 to vector<128x1xf32>
    %157 = arith.addf %155, %156 : vector<128x1xf32>
    %158 = vector.broadcast %157 : vector<128x1xf32> to vector<128x128xf32>
    %159 = arith.divf %149, %158 : vector<128x128xf32>
    %160 = vector.broadcast %141 : vector<1x128xf32> to vector<128x128xf32>
    %161 = arith.mulf %160, %159 : vector<128x128xf32>
    %162 = vector.broadcast %143 : vector<1x128xf32> to vector<128x128xf32>
    %163 = arith.addf %161, %162 : vector<128x128xf32>
    %c0_71 = arith.constant 0 : index
    %c0_72 = arith.constant 0 : index
    %c0_73 = arith.constant 0 : index
    %164 = vector.load %arg18[%c0_71, %c0_72, %c0_73] : memref<1x128x256xbf16, #tpu.memory_space<vmem>>, vector<1x128x256xbf16>
    %165 = vector.shape_cast %164 : vector<1x128x256xbf16> to vector<128x256xbf16>
    %c0_74 = arith.constant 0 : index
    %c0_75 = arith.constant 0 : index
    %c0_76 = arith.constant 0 : index
    %166 = vector.load %arg19[%c0_74, %c0_75, %c0_76] : memref<1x1x256xf32, #tpu.memory_space<vmem>>, vector<1x1x256xf32>
    %167 = vector.shape_cast %166 : vector<1x1x256xf32> to vector<1x256xf32>
    %c0_77 = arith.constant 0 : index
    %c0_78 = arith.constant 0 : index
    %c0_79 = arith.constant 0 : index
    %168 = vector.load %arg20[%c0_77, %c0_78, %c0_79] : memref<1x256x128xbf16, #tpu.memory_space<vmem>>, vector<1x256x128xbf16>
    %169 = vector.shape_cast %168 : vector<1x256x128xbf16> to vector<256x128xbf16>
    %c0_80 = arith.constant 0 : index
    %c0_81 = arith.constant 0 : index
    %c0_82 = arith.constant 0 : index
    %170 = vector.load %arg21[%c0_80, %c0_81, %c0_82] : memref<1x1x128xf32, #tpu.memory_space<vmem>>, vector<1x1x128xf32>
    %171 = vector.shape_cast %170 : vector<1x1x128xf32> to vector<1x128xf32>
    %172 = arith.truncf %163 : vector<128x128xf32> to vector<128x128xbf16>
    %cst_83 = arith.constant dense<0.000000e+00> : vector<128x256xf32>
    %173 = tpu.matmul %172, %165, %cst_83 {dimension_numbers = #tpu.dot_dimension_numbers<[1], [0], [0], [1], [0, 0, 1, 1], [], []>} : vector<128x128xbf16>, vector<128x256xbf16>, vector<128x256xf32> -> vector<128x256xf32>
    %174 = vector.broadcast %167 : vector<1x256xf32> to vector<128x256xf32>
    %175 = arith.addf %173, %174 : vector<128x256xf32>
    %cst_84 = arith.constant 5.000000e-01 : f32
    %176 = vector.broadcast %cst_84 : f32 to vector<128x256xf32>
    %177 = arith.mulf %176, %175 : vector<128x256xf32>
    %cst_85 = arith.constant 0.707106769 : f32
    %178 = vector.broadcast %cst_85 : f32 to vector<128x256xf32>
    %179 = arith.mulf %175, %178 : vector<128x256xf32>
    %180 = math.erf %179 : vector<128x256xf32>
    %cst_86 = arith.constant 1.000000e+00 : f32
    %181 = vector.broadcast %cst_86 : f32 to vector<128x256xf32>
    %182 = arith.addf %181, %180 : vector<128x256xf32>
    %183 = arith.mulf %177, %182 : vector<128x256xf32>
    %184 = arith.truncf %183 : vector<128x256xf32> to vector<128x256xbf16>
    %cst_87 = arith.constant dense<0.000000e+00> : vector<128x128xf32>
    %185 = tpu.matmul %184, %169, %cst_87 {dimension_numbers = #tpu.dot_dimension_numbers<[1], [0], [0], [1], [0, 0, 1, 1], [], []>} : vector<128x256xbf16>, vector<256x128xbf16>, vector<128x128xf32> -> vector<128x128xf32>
    %186 = vector.broadcast %171 : vector<1x128xf32> to vector<128x128xf32>
    %187 = arith.addf %185, %186 : vector<128x128xf32>
    %188 = arith.addf %163, %187 : vector<128x128xf32>
    %c0_88 = arith.constant 0 : index
    %c0_89 = arith.constant 0 : index
    %c0_90 = arith.constant 0 : index
    %189 = vector.load %arg16[%c0_88, %c0_89, %c0_90] : memref<1x1x128xf32, #tpu.memory_space<vmem>>, vector<1x1x128xf32>
    %190 = vector.shape_cast %189 : vector<1x1x128xf32> to vector<1x128xf32>
    %c0_91 = arith.constant 0 : index
    %c0_92 = arith.constant 0 : index
    %c0_93 = arith.constant 0 : index
    %191 = vector.load %arg17[%c0_91, %c0_92, %c0_93] : memref<1x1x128xf32, #tpu.memory_space<vmem>>, vector<1x1x128xf32>
    %192 = vector.shape_cast %191 : vector<1x1x128xf32> to vector<1x128xf32>
    %cst_94 = arith.constant dense<0.000000e+00> : vector<128xf32>
    %193 = vector.multi_reduction <add>, %188, %cst_94 [1] : vector<128x128xf32> to vector<128xf32>
    %194 = vector.shape_cast %193 : vector<128xf32> to vector<128x1xf32>
    %cst_95 = arith.constant 1.280000e+02 : f32
    %195 = vector.broadcast %cst_95 : f32 to vector<128x1xf32>
    %196 = arith.divf %194, %195 : vector<128x1xf32>
    %197 = vector.broadcast %196 : vector<128x1xf32> to vector<128x128xf32>
    %198 = arith.subf %188, %197 : vector<128x128xf32>
    %199 = arith.mulf %198, %198 : vector<128x128xf32>
    %cst_96 = arith.constant dense<0.000000e+00> : vector<128xf32>
    %200 = vector.multi_reduction <add>, %199, %cst_96 [1] : vector<128x128xf32> to vector<128xf32>
    %201 = vector.shape_cast %200 : vector<128xf32> to vector<128x1xf32>
    %cst_97 = arith.constant 0.00787401571 : f32
    %202 = vector.broadcast %cst_97 : f32 to vector<128x1xf32>
    %203 = arith.mulf %201, %202 : vector<128x1xf32>
    %204 = math.sqrt %203 : vector<128x1xf32>
    %cst_98 = arith.constant 9.99999974E-6 : f32
    %205 = vector.broadcast %cst_98 : f32 to vector<128x1xf32>
    %206 = arith.addf %204, %205 : vector<128x1xf32>
    %207 = vector.broadcast %206 : vector<128x1xf32> to vector<128x128xf32>
    %208 = arith.divf %198, %207 : vector<128x128xf32>
    %209 = vector.broadcast %190 : vector<1x128xf32> to vector<128x128xf32>
    %210 = arith.mulf %209, %208 : vector<128x128xf32>
    %211 = vector.broadcast %192 : vector<1x128xf32> to vector<128x128xf32>
    %212 = arith.addf %210, %211 : vector<128x128xf32>
    %c0_99 = arith.constant 0 : index
    %c0_100 = arith.constant 0 : index
    %c0_101 = arith.constant 0 : index
    %213 = vector.load %arg22[%c0_99, %c0_100, %c0_101] : memref<1x128x128xf32, #tpu.memory_space<vmem>>, vector<1x128x128xf32>
    %214 = vector.shape_cast %213 : vector<1x128x128xf32> to vector<128x128xf32>
    %215 = vector.shape_cast %212 : vector<128x128xf32> to vector<1x128x128xf32>
    tpu.vector_store %arg22[%c0_99, %c0_100, %c0_101], %215 {strides = array<i32>} : memref<1x128x128xf32, #tpu.memory_space<vmem>>, vector<1x128x128xf32>,
    return
  }
  func.func @transform_0(%arg0: i32, %arg1: i32) -> (i32, i32, i32) {
    %c0_i32 = arith.constant 0 : i32
    %c0_i32_0 = arith.constant 0 : i32
    %c0_i32_1 = arith.constant 0 : i32
    return %arg0, %c0_i32, %c0_i32_0 : i32, i32, i32
  }
  func.func @transform_1(%arg0: i32, %arg1: i32) -> (i32, i32, i32) {
    %c0_i32 = arith.constant 0 : i32
    %c0_i32_0 = arith.constant 0 : i32
    %c0_i32_1 = arith.constant 0 : i32
    %c0_i32_2 = arith.constant 0 : i32
    return %c0_i32, %c0_i32_0, %c0_i32_1 : i32, i32, i32
  }
  func.func @transform_2(%arg0: i32, %arg1: i32) -> (i32, i32, i32) {
    %c0_i32 = arith.constant 0 : i32
    %c0_i32_0 = arith.constant 0 : i32
    %c0_i32_1 = arith.constant 0 : i32
    return %arg1, %c0_i32, %c0_i32_0 : i32, i32, i32
  }
  func.func @transform_3(%arg0: i32, %arg1: i32) -> (i32, i32, i32) {
    %c0_i32 = arith.constant 0 : i32
    %c0_i32_0 = arith.constant 0 : i32
    %c0_i32_1 = arith.constant 0 : i32
    return %arg1, %c0_i32, %c0_i32_0 : i32, i32, i32
  }
  func.func @transform_4(%arg0: i32, %arg1: i32) -> (i32, i32, i32) {
    %c0_i32 = arith.constant 0 : i32
    %c0_i32_0 = arith.constant 0 : i32
    %c0_i32_1 = arith.constant 0 : i32
    return %arg1, %c0_i32, %c0_i32_0 : i32, i32, i32
  }
  func.func @transform_5(%arg0: i32, %arg1: i32) -> (i32, i32, i32) {
    %c0_i32 = arith.constant 0 : i32
    %c0_i32_0 = arith.constant 0 : i32
    %c0_i32_1 = arith.constant 0 : i32
    return %arg1, %c0_i32, %c0_i32_0 : i32, i32, i32
  }
  func.func @transform_6(%arg0: i32, %arg1: i32) -> (i32, i32, i32) {
    %c0_i32 = arith.constant 0 : i32
    %c0_i32_0 = arith.constant 0 : i32
    %c0_i32_1 = arith.constant 0 : i32
    return %arg1, %c0_i32, %c0_i32_0 : i32, i32, i32
  }
  func.func @transform_7(%arg0: i32, %arg1: i32) -> (i32, i32, i32) {
    %c0_i32 = arith.constant 0 : i32
    %c0_i32_0 = arith.constant 0 : i32
    %c0_i32_1 = arith.constant 0 : i32
    return %arg1, %c0_i32, %c0_i32_0 : i32, i32, i32
  }
  func.func @transform_8(%arg0: i32, %arg1: i32) -> (i32, i32, i32) {
    %c0_i32 = arith.constant 0 : i32
    %c0_i32_0 = arith.constant 0 : i32
    %c0_i32_1 = arith.constant 0 : i32
    return %arg1, %c0_i32, %c0_i32_0 : i32, i32, i32
  }
  func.func @transform_9(%arg0: i32, %arg1: i32) -> (i32, i32, i32) {
    %c0_i32 = arith.constant 0 : i32
    %c0_i32_0 = arith.constant 0 : i32
    %c0_i32_1 = arith.constant 0 : i32
    return %arg1, %c0_i32, %c0_i32_0 : i32, i32, i32
  }
  func.func @transform_10(%arg0: i32, %arg1: i32) -> (i32, i32, i32) {
    %c0_i32 = arith.constant 0 : i32
    %c0_i32_0 = arith.constant 0 : i32
    %c0_i32_1 = arith.constant 0 : i32
    return %arg1, %c0_i32, %c0_i32_0 : i32, i32, i32
  }
  func.func @transform_11(%arg0: i32, %arg1: i32) -> (i32, i32, i32) {
    %c0_i32 = arith.constant 0 : i32
    %c0_i32_0 = arith.constant 0 : i32
    %c0_i32_1 = arith.constant 0 : i32
    return %arg1, %c0_i32, %c0_i32_0 : i32, i32, i32
  }
  func.func @transform_12(%arg0: i32, %arg1: i32) -> (i32, i32, i32) {
    %c0_i32 = arith.constant 0 : i32
    %c0_i32_0 = arith.constant 0 : i32
    %c0_i32_1 = arith.constant 0 : i32
    return %arg1, %c0_i32, %c0_i32_0 : i32, i32, i32
  }
  func.func @transform_13(%arg0: i32, %arg1: i32) -> (i32, i32, i32) {
    %c0_i32 = arith.constant 0 : i32
    %c0_i32_0 = arith.constant 0 : i32
    %c0_i32_1 = arith.constant 0 : i32
    return %arg1, %c0_i32, %c0_i32_0 : i32, i32, i32
  }
  func.func @transform_14(%arg0: i32, %arg1: i32) -> (i32, i32, i32) {
    %c0_i32 = arith.constant 0 : i32
    %c0_i32_0 = arith.constant 0 : i32
    %c0_i32_1 = arith.constant 0 : i32
    return %arg1, %c0_i32, %c0_i32_0 : i32, i32, i32
  }
  func.func @transform_15(%arg0: i32, %arg1: i32) -> (i32, i32, i32) {
    %c0_i32 = arith.constant 0 : i32
    %c0_i32_0 = arith.constant 0 : i32
    %c0_i32_1 = arith.constant 0 : i32
    return %arg1, %c0_i32, %c0_i32_0 : i32, i32, i32
  }
  func.func @transform_16(%arg0: i32, %arg1: i32) -> (i32, i32, i32) {
    %c0_i32 = arith.constant 0 : i32
    %c0_i32_0 = arith.constant 0 : i32
    %c0_i32_1 = arith.constant 0 : i32
    return %arg1, %c0_i32, %c0_i32_0 : i32, i32, i32
  }
  func.func @transform_17(%arg0: i32, %arg1: i32) -> (i32, i32, i32) {
    %c0_i32 = arith.constant 0 : i32
    %c0_i32_0 = arith.constant 0 : i32
    %c0_i32_1 = arith.constant 0 : i32
    return %arg1, %c0_i32, %c0_i32_0 : i32, i32, i32
  }
  func.func @transform_18(%arg0: i32, %arg1: i32) -> (i32, i32, i32) {
    %c0_i32 = arith.constant 0 : i32
    %c0_i32_0 = arith.constant 0 : i32
    %c0_i32_1 = arith.constant 0 : i32
    return %arg1, %c0_i32, %c0_i32_0 : i32, i32, i32
  }
  func.func @transform_19(%arg0: i32, %arg1: i32) -> (i32, i32, i32) {
    %c0_i32 = arith.constant 0 : i32
    %c0_i32_0 = arith.constant 0 : i32
    %c0_i32_1 = arith.constant 0 : i32
    return %arg1, %c0_i32, %c0_i32_0 : i32, i32, i32
  }
  func.func @transform_20(%arg0: i32, %arg1: i32) -> (i32, i32, i32) {
    %c0_i32 = arith.constant 0 : i32
    %c0_i32_0 = arith.constant 0 : i32
    %c0_i32_1 = arith.constant 0 : i32
    return %arg0, %c0_i32, %c0_i32_0 : i32, i32, i32
  }
}

</mosaic_0001>

<bundles_post_ra>
// kernel: transformer_forward.2
= control target key start
LH: loop header
LB: loop body
LE: loop exit
PB: predicated region body
PF: predicated region fallthrough
CT: control target
= control target key end

     0   :  { %s7025_s0 = inlined_call_operand.hbm [shape: f32[2,128,128], index: 0, kind: input, shape index: {}]   ;;  %s7026_s1 = inlined_call_operand.hbm [shape: bf16[2,128,384], index: 1, kind: input, shape index: {}]   ;;  %s7027_s2 = inlined_call_operand.vmem [shape: f32[2,1,384], index: 2, kind: input, shape index: {}]   ;;  %s7028_s3 = inlined_call_operand.hbm [shape: bf16[2,128,128], index: 3, kind: input, shape index: {}]   ;;  %s7029_s4 = inlined_call_operand.vmem [shape: f32[2,1,128], index: 4, kind: input, shape index: {}]   ;;  %s7030_s5 = inlined_call_operand.vmem [shape: f32[2,1,128], index: 5, kind: input, shape index: {}]   ;;  %s7031_s6 = inlined_call_operand.vmem [shape: f32[2,1,128], index: 6, kind: input, shape index: {}]   ;;  %s7032_s7 = inlined_call_operand.hbm [shape: bf16[2,128,256], index: 7, kind: input, shape index: {}]   ;;  %s7033_s8 = inlined_call_operand.vmem [shape: f32[2,1,256], index: 8, kind: input, shape index: {}]   ;;  %s7034_s9 = inlined_call_operand.hbm [shape: bf16[2,256,128], index: 9, kind: input, shape index: {}]   ;;  %s7035_s10 = inlined_call_operand.vmem [shape: f32[2,1,128], index: 10, kind: input, shape index: {}]   ;;  %s7036_s11 = inlined_call_operand.vmem [shape: f32[2,1,128], index: 11, kind: input, shape index: {}]   ;;  %s7037_s12 = inlined_call_operand.vmem [shape: f32[2,1,128], index: 12, kind: input, shape index: {}]   ;;  %s7038_s13 = inlined_call_operand.vmem [shape: f32[2,128,128], index: 13, kind: output, shape index: {}]  }
   0x1   :  { %7063 = sst [smem:[#allocation27_spill]] %s7025_s0 }
   0x2   :  { %7064 = sst [smem:[#allocation28_spill]] %s7026_s1 }
   0x3   :  { %7065 = sst [smem:[#allocation29_spill]] %s7027_s2 }
   0x4   :  { %7066 = sst [smem:[#allocation30_spill]] %s7028_s3 }
   0x5   :  { %7067 = sst [smem:[#allocation31_spill]] %s7029_s4 }
   0x6   :  { %7068 = sst [smem:[#allocation32_spill]] %s7030_s5 }
   0x7   :  { %7069 = sst [smem:[#allocation33_spill]] %s7031_s6 }
   0x8   :  { %7070 = sst [smem:[#allocation34_spill]] %s7032_s7 }
   0x9   :  { %7071 = sst [smem:[#allocation35_spill]] %s7033_s8 }
   0xa   :  { %7072 = sst [smem:[#allocation36_spill]] %s7034_s9 }
   0xb   :  { %7073 = sst [smem:[#allocation37_spill]] %s7035_s10 }
   0xc   :  { %7074 = sst [smem:[#allocation38_spill]] %s7036_s11 }
   0xd   :  { %7075 = sst [smem:[#allocation39_spill]] %s7037_s12 }
   0xe   :  { %7076 = sst [smem:[#allocation40_spill]] %s7038_s13 }
   0xf   :  { %18 = vsyncpa [#allocation3], 0 }
  0x10   :  { %20 = vsyncpa [#allocation3 + $0x1], 0 }
  0x11   :  { %21 = vsyncpa [#allocation5], 0 }
  0x12   :  { %23 = vsyncpa [#allocation5 + $0x1], 0 }
  0x13   :  { %24 = vsyncpa [#allocation8], 0 }
  0x14   :  { %26 = vsyncpa [#allocation8 + $0x1], 0  ;;  %s5301_s25 = smov 0   ;;  %s5303_s26 = smov 0  }
  0x15   :  { %s5305_s27 = smov 0   ;;  %s5307_s28 = smov 0  }
  0x16   :  { %s5309_s29 = smov 0   ;;  %s5311_s30 = smov 0  }
  0x17   :  { %s5313_s14 = smov 0   ;;  %s5315_s15 = smov 0  }
  0x18   :  { %s5317_s16 = smov 0   ;;  %s5319_s17 = smov 0  }
  0x19   :  { %s5321_s18 = smov 0  }
  0x1a LB: > { %7077 = sst [smem:[#allocation13_spill]] %s5180_s26  ;;  %s41_s19 = sadd.s32 1, %s5208_s16  ;;  %s5216_s18 = sphi %s5321_s18, %s32_s18   ;;  %s5212_s17 = sphi %s5319_s17, %s7148_s17   ;;  %s5208_s16 = sphi %s5317_s16, %s7147_s16   ;;  %s5204_s15 = sphi %s5315_s15, %s7146_s15   ;;  %s5200_s14 = sphi %s5313_s14, %s7145_s14   ;;  %s5196_s30 = sphi %s5311_s30, %s7144_s30   ;;  %s5192_s29 = sphi %s5309_s29, %s7143_s29   ;;  %s5188_s28 = sphi %s5307_s28, %s7142_s28   ;;  %s5184_s27 = sphi %s5305_s27, %s7141_s27   ;;  %s5180_s26 = sphi %s5303_s26, %s7140_s26   ;;  %s5176_s25 = sphi %s5301_s25, %s7139_s25  }
  0x1b   : > { %7078 = sst [smem:[#allocation14_spill]] %s5184_s27  ;;  %p7043_p0 = scmp.eq.s32.totalorder %s5216_s18, 0 }
  0x1c   : > { %7079 = sst [smem:[#allocation15_spill]] %s5192_s29  ;;  %p5358_p1 = scmp.ge.s32.totalorder %s41_s19, 2 }
  0x1d   : > { %7080 = sst [smem:[#allocation16_spill]] %s5196_s30  ;;  %s77_s21 = sadd.s32 1, %s5184_s27 }
  0x1e   : > { %7081 = sst [smem:[#allocation17_spill]] %s5200_s14  ;;  %p84_p2 = scmp.ne.s32.totalorder %s5184_s27, %s5180_s26 }
  0x1f   : > { %7082 = sst [smem:[#allocation18_spill]] %s5204_s15  ;;  %s7150_s19 = smov (%p5358_p1, %s41_s19), 0 }
  0x20   : > { %7083 = sst [smem:[#allocation19_spill]] %s5208_s16  ;;  %p86_p4 = por %p84_p2, %p7043_p0 }
  0x21   : > { %7084 = sst [smem:[#allocation20_spill]] %s5212_s17  ;;  %s74_s22 = ssub.s32 %s5208_s16, %s7150_s19 }
  0x22   : > { %7085 = sst [smem:[#allocation21_spill]] %s5216_s18  ;;  %p7041_p5 = scmp.lt.s32.totalorder %s5216_s18, 4 }
  0x23   : > { %s7086_s20 = scalar_select %p5358_p1, 1, 0 }
  0x24   : > { %7087 = sst [smem:[#allocation22_spill]] %s7150_s19  ;;  %p75_p6 = scmp.eq.s32.totalorder %s74_s22, 0 }
  0x25   : > { %s7042_s23 = sand.u32 1, %s5216_s18   ;;  %s5378_s24 = sand.u32 1, %s5184_s27  }
  0x26   : > { %s5381_s13 = scalar_select %p75_p6, %s5184_s27, %s77_s21  }
  0x27   : > { %s4425_s12 = smul.u32 192, %s5378_s24  ;;  %p5386_p7 = pnand %p7041_p5, %p86_p4 }
  0x28   : > { %7088 = sst [smem:[#allocation23_spill]] %s5381_s13  ;;  %s4426_s10 = smul.u32 3072, %s5208_s16 }
  0x29   : > { %s7089_s11 = scalar_select %p5386_p7, 1, 0 }
  0x2a   : > { %s7090_s1 = sld [smem:[#allocation28_spill]]  ;;  %s451_s22 = scalar_lea.vmem [#allocation4], %s4425_s12 }
  0x2b   : > { %s458_s21 = sshll.u32 %s451_s22, 4  ;;  %s5400_s13 = scalar_lea.sflag [#allocation5], %s7042_s23  ;;  %s5396_s21 = int_to_ptr.vmem [resolvable:$true] %s458_s21 }
  0x2c   : > { %p5406_p9 = pneg %p5386_p7 }
  0x30   : > { %s5394_s19 = scalar_lea.hbm %s7090_s1, %s4426_s10  ;;  %s4973_s10 = scalar_lea.hbm %s7090_s1, 6144 }
  0x31   : > { %s4968_s27 = scalar_lea.hbm %s5394_s19, 3072  ;;  %p4974_p12 = scmp.lt.u32.totalorder %s5394_s19, %s7090_s1 }
  0x32   : > { %p4969_p8 = scmp.ne.s32.totalorder %s5394_s19, %s4968_s27  ;;  %p4975_p13 = scmp.lt.u32.totalorder %s4973_s10, %s4968_s27 }
  0x33   : > { %p4977_p4 = scmp.lt.u32.totalorder %s4968_s27, %s5394_s19 }
  0x34   : > { %p4971_p10 = pnand %p5406_p9, %p4969_p8  ;;  %p4976_p2 = por %p4975_p13, %p4974_p12 }
  0x36   : > { %p4972_p11 = pneg %p4971_p10  ;;  %p4978_p6 = por %p4977_p4, %p4976_p2 }
  0x38   : > { %p4979_p5 = pnand %p4978_p6, %p4972_p11 }
  0x3a   : > { %4982 = shalt.err (!%p4979_p5)
}
  0x3b   : > { %s4983_s23 = scalar_lea.vmem %s5396_s21, 3072  ;;  %s5218_s2 = smov [#allocation4]  }
  0x3c   : > { %p4984_p8 = scmp.ne.s32.totalorder %s5396_s21, %s4983_s23  ;;  %s4988_s8 = sshll.u32 %s5218_s2, 4  ;;  %s4989_s8 = int_to_ptr.vmem [resolvable:$false] %s4988_s8 }
  0x3d   : > { %s4990_s12 = scalar_lea.vmem %s4989_s8, 6144  ;;  %p4991_p0 = scmp.lt.s32.totalorder %s5396_s21, %s4989_s8 }
  0x3e   : > { %p4986_p10 = pnand %p4984_p8, %p5406_p9  ;;  %p4992_p1 = scmp.lt.s32.totalorder %s4990_s12, %s4983_s23 }
  0x40   : > { %p4987_p3 = pneg %p4986_p10  ;;  %p4993_p12 = por %p4992_p1, %p4991_p0 }
  0x42   : > { %p4994_p13 = pnand %p4993_p12, %p4987_p3 }
  0x44   : > { %4997 = shalt.err (!%p4994_p13)
}
  0x45   : > { %s5219_s27 = smov 192   ;;  %s5220_s10 = smov 12  }
  0x46   : > { %4445 = dma.hbm_to_vmem [thread:$0]  (!%p5386_p7), %s5394_s19, 3072, %s5396_s21, %s5400_s13, %s5219_s27, %s5219_s27, %s5220_s10  }
  0x47   : > { %p3939_p5 = scmp.ge.s32.totalorder %s5216_s18, 1  ;;  %p579_p11 = scmp.lt.s32.totalorder %s5216_s18, 5 }
  0x48   : > { %s7047_s22 = sshll.u32 %s5378_s24, 7  ;;  %s4038_s2 = sshll.u32 %s5208_s16, 11 }
  0x49   : > { %p5432_p0 = pnand %p3939_p5, %p579_p11  ;;  %s7094_s7 = sld [smem:[#allocation34_spill]] }
  0x4a   : > { %s518_s5 = scalar_lea.vmem [#allocation7], %s7047_s22  ;;  %s7095_s9 = sld [smem:[#allocation36_spill]] }
  0x4b   : > { %s7092_s23 = scalar_select %p5432_p0, 1, 0 }
  0x4c   : > { %s525_s19 = sshll.u32 %s518_s5, 4  ;;  %s7096_s4 = sand.u32 1, %s5216_s18   ;;  %s5445_s19 = int_to_ptr.vmem [resolvable:$true] %s525_s19 }
  0x4d   : > { %7093 = sst [smem:[#allocation24_spill]] %s7092_s23  ;;  %s5454_s15 = scalar_lea.sflag [#allocation8], %s7096_s4 }
  0x4f   : > { %s5441_s1 = scalar_lea.hbm %s7094_s7, %s4038_s2  ;;  %s5003_s22 = scalar_lea.hbm %s7094_s7, 4096 }
  0x50   : > { %s5450_s10 = scalar_lea.hbm %s7095_s9, %s4038_s2  ;;  %s4998_s8 = scalar_lea.hbm %s5441_s1, 2048 }
  0x51   : > { %p4999_p1 = scmp.ne.s32.totalorder %s5441_s1, %s4998_s8  ;;  %p5004_p4 = scmp.lt.u32.totalorder %s5441_s1, %s7094_s7 }
  0x52   : > { %p5005_p6 = scmp.lt.u32.totalorder %s5003_s22, %s4998_s8  ;;  %p5007_p10 = scmp.lt.u32.totalorder %s4998_s8, %s5441_s1 }
  0x53   : > { %p5001_p3 = pnand %p4999_p1, %p5406_p9 }
  0x54   : > { %p5006_p8 = por %p5005_p6, %p5004_p4 }
  0x55   : > { %p5002_p2 = pneg %p5001_p3 }
  0x56   : > { %p5008_p12 = por %p5007_p10, %p5006_p8 }
  0x58   : > { %p5009_p13 = pnand %p5008_p12, %p5002_p2 }
  0x5a   : > { %5012 = shalt.err (!%p5009_p13)
}
  0x5b   : > { %s5013_s4 = scalar_lea.vmem %s5445_s19, 2048  ;;  %s5221_s14 = smov [#allocation7]  }
  0x5c   : > { %p5014_p5 = scmp.ne.s32.totalorder %s5445_s19, %s5013_s4  ;;  %s5018_s2 = sshll.u32 %s5221_s14, 4  ;;  %s5019_s2 = int_to_ptr.vmem [resolvable:$false] %s5018_s2 }
  0x5d   : > { %s5020_s23 = scalar_lea.vmem %s5019_s2, 4096  ;;  %p5021_p3 = scmp.lt.s32.totalorder %s5445_s19, %s5019_s2 }
  0x5e   : > { %p5016_p11 = pnand %p5014_p5, %p5406_p9  ;;  %p5022_p0 = scmp.lt.s32.totalorder %s5020_s23, %s5013_s4 }
  0x60   : > { %p5017_p1 = pneg %p5016_p11  ;;  %p5023_p4 = por %p5022_p0, %p5021_p3 }
  0x62   : > { %p5024_p6 = pnand %p5023_p4, %p5017_p1 }
  0x64   : > { %5027 = shalt.err (!%p5024_p6)
}
  0x65   : > { %s7050_s22 = smov 128   ;;  %s7051_s21 = smov 8  }
  0x66   : > { %4451 = dma.hbm_to_vmem [thread:$0]  (!%p5386_p7), %s5441_s1, 2048, %s5445_s19, %s5454_s15, %s7050_s22, %s7050_s22, %s7051_s21  }
  0x67   : > { %s7097_s27 = sshll.u32 %s5378_s24, 7  ;;  %s7049_s5 = sadd.s32 4294967295, %s5216_s18  }
  0x68   : > { %s546_s8 = scalar_lea.vmem [#allocation9], %s7097_s27  ;;  %s44_s4 = sadd.s32 1, %s5212_s17 }
  0x69   : > { %s553_s12 = sshll.u32 %s546_s8, 4  ;;  %p7098_p0 = scmp.ne.s32.totalorder %s7086_s20, 0  ;;  %s5483_s12 = int_to_ptr.vmem [resolvable:$true] %s553_s12 }
  0x6a   : > { %s51_s14 = sadd.s32 1, %s5196_s30  ;;  %p58_p2 = scmp.ne.s32.totalorder %s5196_s30, %s5192_s29 }
  0x6b   : > { %s7152_s4 = smov (!%p7098_p0, %s44_s4), %s5212_s17  ;;  %p64_p10 = scmp.ne.s32.totalorder %s5192_s29, %s5188_s28 }
  0x6c   : > { %p46_p8 = scmp.ge.s32.totalorder %s7152_s4, 2  ;;  %p7099_p12 = scmp.eq.s32.totalorder %s5216_s18, 0 }
  0x6d   : > { %p65_p5 = scmp.eq.s32.totalorder %s7049_s5, 0  ;;  %p7103_p1 = scmp.ne.s32.totalorder %s5180_s26, %s5176_s25 }
  0x6e   : > { %p5497_p13 = por %p7099_p12, %p58_p2  ;;  %s7154_s4 = smov (%p46_p8, %s7152_s4), 0 }
  0x6f   : > { %7101 = sst [smem:[#allocation25_spill]] %s7154_s4  ;;  %p5505_p11 = por %p65_p5, %p64_p10 }
  0x70   : > { %p5512_p3 = por %p7103_p1, %p65_p5  ;;  %s48_s28 = ssub.s32 %s5212_s17, %s7154_s4 }
  0x71   : > { %s7102_s20 = scalar_select %p5505_p11, 1, 0 }
  0x72   : > { %s7104_s19 = scalar_select %p5512_p3, 1, 0 }
  0x73   : > { %s426_s2 = sand.u32 1, %s5196_s30   ;;  %p49_p4 = scmp.eq.s32.totalorder %s48_s28, 0 }
  0x74   : > { %s3926_s23 = sshll.u32 %s426_s2, 7  ;;  %s4036_s27 = sshll.u32 %s5212_s17, 11 }
  0x75   : > { %s5521_s8 = scalar_select %p49_p4, %s5196_s30, %s51_s14  }
  0x76   : > { %s7106_s0 = sld [smem:[#allocation27_spill]]  ;;  %s430_s25 = scalar_lea.vmem [#allocation2], %s3926_s23 }
  0x77   : > { %7105 = sst [smem:[#allocation26_spill]] %s5521_s8  ;;  %s437_s7 = sshll.u32 %s430_s25, 4  ;;  %s5536_s7 = int_to_ptr.vmem [resolvable:$true] %s437_s7 }
  0x78   : > { %p7107_p6 = scmp.lt.s32.totalorder %s5216_s18, 4  ;;  %s3930_s14 = sshll.u32 %s5378_s24, 6 }
  0x79   : > { %s5539_s22 = scalar_lea.sflag [#allocation3], %s426_s2 }
  0x7a   : > { %p5532_p0 = pnand %p7107_p6, %p5497_p13 }
  0x7c   : > { %s5526_s21 = scalar_lea.hbm %s7106_s0, %s4036_s27  ;;  %p5030_p8 = pneg %p5532_p0 }
  0x7d   : > { %s5028_s5 = scalar_lea.hbm %s5526_s21, 2048  ;;  %s5033_s23 = scalar_lea.hbm %s7106_s0, 4096 }
  0x7e   : > { %p5029_p2 = scmp.ne.s32.totalorder %s5526_s21, %s5028_s5  ;;  %p5034_p13 = scmp.lt.u32.totalorder %s5526_s21, %s7106_s0 }
  0x7f   : > { %p5035_p5 = scmp.lt.u32.totalorder %s5033_s23, %s5028_s5  ;;  %p5037_p4 = scmp.lt.u32.totalorder %s5028_s5, %s5526_s21 }
  0x80   : > { %p5031_p10 = pnand %p5030_p8, %p5029_p2 }
  0x81   : > { %p5036_p1 = por %p5035_p5, %p5034_p13 }
  0x82   : > { %p5032_p12 = pneg %p5031_p10 }
  0x83   : > { %p5038_p6 = por %p5037_p4, %p5036_p1 }
  0x85   : > { %p5039_p3 = pnand %p5038_p6, %p5032_p12 }
  0x87   : > { %5042 = shalt.err (!%p5039_p3)
}
  0x88   : > { %s5043_s2 = scalar_lea.vmem %s5536_s7, 2048  ;;  %s5224_s1 = smov [#allocation2]  }
  0x89   : > { %p5044_p2 = scmp.ne.s32.totalorder %s5536_s7, %s5043_s2  ;;  %s5048_s28 = sshll.u32 %s5224_s1, 4  ;;  %s5049_s28 = int_to_ptr.vmem [resolvable:$false] %s5048_s28 }
  0x8a   : > { %s5050_s27 = scalar_lea.vmem %s5049_s28, 4096  ;;  %p5051_p7 = scmp.lt.s32.totalorder %s5536_s7, %s5049_s28 }
  0x8b   : > { %p5046_p10 = pnand %p5044_p2, %p5030_p8  ;;  %p5052_p13 = scmp.lt.s32.totalorder %s5050_s27, %s5043_s2 }
  0x8d   : > { %p5047_p11 = pneg %p5046_p10  ;;  %p5053_p5 = por %p5052_p13, %p5051_p7 }
  0x8f   : > { %p5054_p1 = pnand %p5053_p5, %p5047_p11 }
  0x91   : > { %5057 = shalt.err (!%p5054_p1)
}
  0x92   : > { %s7109_s5 = smov 8   ;;  %s7110_s23 = smov 128  }
  0x93   : > { %4442 = dma.hbm_to_vmem [thread:$0]  (!%p5532_p0), %s5526_s21, 2048, %s5536_s7, %s5539_s22, %s7110_s23, %s7110_s23, %s7109_s5  }
  0x94   : > { %s4037_s25 = sshll.u32 %s5208_s16, 10  ;;  %s479_s1 = scalar_lea.vmem [#allocation6], %s3930_s14 }
  0x95   : > { %s486_s28 = sshll.u32 %s479_s1, 4  ;;  %s7111_s3 = sld [smem:[#allocation30_spill]]  ;;  %s5578_s28 = int_to_ptr.vmem [resolvable:$true] %s486_s28 }
  0x9b   : > { %s5576_s0 = scalar_lea.hbm %s7111_s3, %s4037_s25  ;;  %s5063_s21 = scalar_lea.hbm %s7111_s3, 2048 }
  0x9c   : > { %s5058_s4 = scalar_lea.hbm %s5576_s0, 1024  ;;  %p5064_p0 = scmp.lt.u32.totalorder %s5576_s0, %s7111_s3 }
  0x9d   : > { %p5059_p7 = scmp.ne.s32.totalorder %s5576_s0, %s5058_s4  ;;  %p5065_p8 = scmp.lt.u32.totalorder %s5063_s21, %s5058_s4 }
  0x9e   : > { %p5067_p4 = scmp.lt.u32.totalorder %s5058_s4, %s5576_s0 }
  0x9f   : > { %p5061_p11 = pnand %p5059_p7, %p5406_p9  ;;  %p5066_p12 = por %p5065_p8, %p5064_p0 }
  0xa1   : > { %p5062_p3 = pneg %p5061_p11  ;;  %p5068_p6 = por %p5067_p4, %p5066_p12 }
  0xa3   : > { %p5069_p2 = pnand %p5068_p6, %p5062_p3 }
  0xa5   : > { %5072 = shalt.err (!%p5069_p2)
}
  0xa6   : > { %s5073_s5 = scalar_lea.vmem %s5578_s28, 1024  ;;  %s5225_s23 = smov [#allocation6]  }
  0xa7   : > { %p5074_p10 = scmp.ne.s32.totalorder %s5578_s28, %s5073_s5  ;;  %s5078_s25 = sshll.u32 %s5225_s23, 4  ;;  %s5079_s25 = int_to_ptr.vmem [resolvable:$false] %s5078_s25 }
  0xa8   : > { %s5080_s1 = scalar_lea.vmem %s5079_s25, 2048  ;;  %p5081_p1 = scmp.lt.s32.totalorder %s5578_s28, %s5079_s25 }
  0xa9   : > { %p5076_p13 = pnand %p5074_p10, %p5406_p9  ;;  %p5082_p7 = scmp.lt.s32.totalorder %s5080_s1, %s5073_s5 }
  0xab   : > { %p5077_p5 = pneg %p5076_p13  ;;  %p5083_p11 = por %p5082_p7, %p5081_p1 }
  0xad   : > { %p5084_p0 = pnand %p5083_p11, %p5077_p5 }
  0xaf   : > { %5087 = shalt.err (!%p5084_p0)
}
  0xb0   : > { %s5226_s2 = smov 64   ;;  %s5227_s27 = smov 4  }
  0xb1   : > { %p7112_p3 = scmp.ne.s32.totalorder %s7089_s11, 0  ;;  %s5088_s4 = scalar_lea.hbm %s5450_s10, 2048 }
  0xb2   : > { %p5089_p8 = scmp.ne.s32.totalorder %s5450_s10, %s5088_s4  ;;  %s5093_s21 = scalar_lea.hbm %s7095_s9, 4096 }
  0xb3   : > { %4448 = dma.hbm_to_vmem [thread:$0]  (!%p7112_p3), %s5576_s0, 1024, %s5578_s28, %s5400_s13, %s5226_s2, %s5226_s2, %s5227_s27  }
  0xb4   : > { %p5091_p12 = pnand %p5089_p8, %p5406_p9  ;;  %p5094_p6 = scmp.lt.u32.totalorder %s5450_s10, %s7095_s9 }
  0xb5   : > { %p5095_p2 = scmp.lt.u32.totalorder %s5093_s21, %s5088_s4  ;;  %p5097_p13 = scmp.lt.u32.totalorder %s5088_s4, %s5450_s10 }
  0xb6   : > { %p5092_p4 = pneg %p5091_p12 }
  0xb7   : > { %p5096_p10 = por %p5095_p2, %p5094_p6 }
  0xb9   : > { %p5098_p5 = por %p5097_p13, %p5096_p10 }
  0xbb   : > { %p5099_p1 = pnand %p5098_p5, %p5092_p4 }
  0xbd   : > { %5102 = shalt.err (!%p5099_p1)
}
  0xbe   : > { %s5103_s0 = scalar_lea.vmem %s5483_s12, 2048  ;;  %s5228_s13 = smov [#allocation9]  }
  0xbf   : > { %p5104_p7 = scmp.ne.s32.totalorder %s5483_s12, %s5103_s0  ;;  %s5108_s28 = sshll.u32 %s5228_s13, 4  ;;  %s5109_s28 = int_to_ptr.vmem [resolvable:$false] %s5108_s28 }
  0xc0   : > { %s5110_s5 = scalar_lea.vmem %s5109_s28, 4096  ;;  %p5111_p8 = scmp.lt.s32.totalorder %s5483_s12, %s5109_s28 }
  0xc1   : > { %p5106_p11 = pnand %p5104_p7, %p5406_p9  ;;  %p5112_p12 = scmp.lt.s32.totalorder %s5110_s5, %s5103_s0 }
  0xc3   : > { %p5107_p0 = pneg %p5106_p11  ;;  %p5113_p6 = por %p5112_p12, %p5111_p8 }
  0xc5   : > { %p5114_p2 = pnand %p5113_p6, %p5107_p0 }
  0xc7   : > { %5117 = shalt.err (!%p5114_p2)
}
  0xc8   : > { %4454 = dma.hbm_to_vmem [thread:$0]  (!%p7112_p3), %s5450_s10, 2048, %s5483_s12, %s5454_s15, %s5226_s2, %s5226_s2, %s5227_s27  }
  0xc9   : > { %s7113_s6 = sld [smem:[#allocation24_spill]] }
  0xcf   : > { %p7114_p9 = scmp.ne.s32.totalorder %s7113_s6, 0 }
  0xd0   : > { %s585_s23 = sand.u32 (!%p7114_p9), 1, %s5192_s29   ;;  %p7115_p4 = scmp.ne.s32.totalorder (!%p7114_p9), %s7102_s20, 0 }
  0xd1   : > { %583 = sbr.rel (%p7114_p9) target bundleno = 3484 (0xd9c), region = 72  ;;  %s3940_s25 = sshll.u32 (!%p7114_p9), %s585_s23, 7 }
  0xd2   : > { %s586_s1 = scalar_lea.sflag (!%p7114_p9), [#allocation3], %s585_s23  ;;  %s5633_s4 = scalar_lea.vmem (!%p7114_p9), [#allocation2], %s3940_s25 }
  0xd8   : > { %5163 = dma.done.wait (%p7115_p4), %s586_s1, 2048  }
  0xd9   : > { %5165 = vsyncadd (%p7115_p4), %s586_s1, 4294965248  ;;  %s7116_s11 = sadd.s32 4294967295, %s5216_s18   ;;  %s5642_s10 = sand.u32 1, %s5180_s26  }
  0xda   : > { %s594_s15 = sand.u32 1, %s7116_s11   ;;  %s4427_s12 = smul.u32 192, %s5642_s10 }
  0xdb   : > { %s595_s2 = scalar_lea.sflag [#allocation5], %s594_s15  ;;  %p7117_p3 = scmp.ne.s32.totalorder %s7104_s19, 0 }
  0xdc   : > { %s5645_s27 = scalar_lea.vmem [#allocation4], %s4427_s12 }
  0xdd   : > { %5167 = dma.done.wait (%p7117_p3), %s595_s2, 4096  }
  0xde   : > { %5169 = vsyncadd (%p7117_p3), %s595_s2, 4294963200  ;;  %s3941_s20 = sshll.u32 %s5642_s10, 6  ;;  %s3942_s7 = sshll.u32 %s5642_s10, 7 }
  0xdf   : > { %s5653_s24 = scalar_lea.vmem [#allocation6], %s3941_s20  ;;  %s613_s21 = scalar_lea.sflag [#allocation8], %s594_s15 }
  0xe0   : > { %s5655_s14 = scalar_lea.vmem [#allocation7], %s3942_s7 }
  0xe1   : > { %5171 = dma.done.wait (%p7117_p3), %s613_s21, 4096  }
  0xe2   : > { %5173 = vsyncadd (%p7117_p3), %s613_s21, 4294963200  ;;  %s7118_s22 = sld [smem:[#allocation17_spill]]  ;;  %s7119_s0 = sld [smem:[#allocation18_spill]] }
  0xe3   : > { %s7123_s9 = sld [smem:[#allocation29_spill]]  ;;  %s7124_s29 = sld [smem:[#allocation35_spill]] }
  0xe4   : > { %s7125_s6 = sld [smem:[#allocation37_spill]]  ;;  %s7126_s15 = sld [smem:[#allocation38_spill]] }
  0xe5   : > { %s7127_s20 = sld [smem:[#allocation39_spill]]  ;;  %s7128_s23 = sld [smem:[#allocation40_spill]] }
  0xe8   : > { %p714_p10 = scmp.lt.s32.totalorder %s7118_s22, 1  ;;  %p740_p13 = scmp.lt.s32.totalorder %s7119_s0, 1 }
  0xe9   : > { %p3947_p5 = scmp.ne.s32.totalorder %s7118_s22, 0 }
  0xea   : > { %s5664_s13 = scalar_select %p714_p10, %s7118_s22, 1 }
  0xeb   : > { %s7156_s0 = smov (!%p740_p13, %s7119_s0), 1  ;;  %749 = sbr.rel (%p3947_p5) target bundleno = 249 (0xf9), region = 96 }
  0xec   : > { %s4428_s28 = smul.u32 3, %s5664_s13  ;;  %s3944_s16 = sshll.u32 %s5664_s13, 1  ;;  %v750_v0 = vld [vmem:[%s5633_s4] sm:$0xff] (!%p3947_p5)  ;;  %v751_v1 = vld [vmem:[%s5633_s4 + $0x8] sm:$0xff] (!%p3947_p5)  ;;  %v752_v2 = vld [vmem:[%s5633_s4 + $0x10] sm:$0xff] (!%p3947_p5) }
  0xed   : > { %s5689_s26 = scalar_lea.vmem %s7124_s29, %s3944_s16  ;;  %s733_s25 = scalar_lea.vmem %s7125_s6, %s5664_s13  ;;  %v753_v3 = vld [vmem:[%s5633_s4 + $0x18] sm:$0xff] (!%p3947_p5)  ;;  %v754_v4 = vld [vmem:[%s5633_s4 + $0x20] sm:$0xff] (!%p3947_p5)  ;;  %v755_v5 = vld [vmem:[%s5633_s4 + $0x28] sm:$0xff] (!%p3947_p5) }
  0xee   : > { %s5683_s17 = scalar_lea.vmem %s7123_s9, %s4428_s28  ;;  %s736_s10 = scalar_lea.vmem %s7126_s15, %s5664_s13  ;;  %v756_v6 = vld [vmem:[%s5633_s4 + $0x30] sm:$0xff] (!%p3947_p5)  ;;  %v757_v7 = vld [vmem:[%s5633_s4 + $0x38] sm:$0xff] (!%p3947_p5)  ;;  %v758_v8 = vld [vmem:[%s5633_s4 + $0x40] sm:$0xff] (!%p3947_p5) }
  0xef   : > { %s739_s3 = scalar_lea.vmem %s7127_s20, %s5664_s13  ;;  %s4040_s9 = sshll.u32 %s7156_s0, 7  ;;  %v759_v9 = vld [vmem:[%s5633_s4 + $0x48] sm:$0xff] (!%p3947_p5)  ;;  %v760_v10 = vld [vmem:[%s5633_s4 + $0x50] sm:$0xff] (!%p3947_p5)  ;;  %v761_v11 = vld [vmem:[%s5633_s4 + $0x58] sm:$0xff] (!%p3947_p5) }
  0xf0   : > { %s5706_s18 = scalar_lea.vmem %s7128_s23, %s4040_s9  ;;  %s5708_s29 = scalar_lea.vmem [#allocation9], %s3942_s7  ;;  %v762_v12 = vld [vmem:[%s5633_s4 + $0x60] sm:$0xff] (!%p3947_p5)  ;;  %v763_v13 = vld [vmem:[%s5633_s4 + $0x68] sm:$0xff] (!%p3947_p5)  ;;  %v764_v14 = vld [vmem:[%s5633_s4 + $0x70] sm:$0xff] (!%p3947_p5) }
  0xf1   : > { %766 = vst [vmem:[%s5706_s18] sm:$0xff] (!%p3947_p5), %v750_v0  ;;  %767 = vst [vmem:[%s5706_s18 + $0x8] sm:$0xff] (!%p3947_p5), %v751_v1  ;;  %v765_v15 = vld [vmem:[%s5633_s4 + $0x78] sm:$0xff] (!%p3947_p5) }
  0xf2   : > { %768 = vst [vmem:[%s5706_s18 + $0x10] sm:$0xff] %v752_v2  ;;  %769 = vst [vmem:[%s5706_s18 + $0x18] sm:$0xff] %v753_v3 }
  0xf3   : > { %770 = vst [vmem:[%s5706_s18 + $0x20] sm:$0xff] %v754_v4  ;;  %771 = vst [vmem:[%s5706_s18 + $0x28] sm:$0xff] %v755_v5 }
  0xf4   : > { %772 = vst [vmem:[%s5706_s18 + $0x30] sm:$0xff] %v756_v6  ;;  %773 = vst [vmem:[%s5706_s18 + $0x38] sm:$0xff] %v757_v7 }
  0xf5   : > { %774 = vst [vmem:[%s5706_s18 + $0x40] sm:$0xff] %v758_v8  ;;  %775 = vst [vmem:[%s5706_s18 + $0x48] sm:$0xff] %v759_v9 }
  0xf6   : > { %776 = vst [vmem:[%s5706_s18 + $0x50] sm:$0xff] %v760_v10  ;;  %777 = vst [vmem:[%s5706_s18 + $0x58] sm:$0xff] %v761_v11 }
  0xf7   : > { %778 = vst [vmem:[%s5706_s18 + $0x60] sm:$0xff] %v762_v12  ;;  %779 = vst [vmem:[%s5706_s18 + $0x68] sm:$0xff] %v763_v13 }
  0xf8   : > { %780 = vst [vmem:[%s5706_s18 + $0x70] sm:$0xff] %v764_v14  ;;  %781 = vst [vmem:[%s5706_s18 + $0x78] sm:$0xff] %v765_v15 }
  0xf9 PF: > { %v4552_v16 = vld [vmem:[%s5645_s27 + $0x4] ss:$12 sps:$4 sm:$0xff]   ;;  %v4554_v17 = vld [vmem:[%s5645_s27] ss:$12 sps:$4 sm:$0xff]   ;;  %v5229_v18 = vmov 0   ;;  %v840_v1 = vlaneseq  ;;  %vm1217_vm0 = vcmask 523264  }
  0xfa   : > { %1015 = vmatprep.mubr.bf16.mxu0 %v5229_v18  ;;  %983 = vmatprep.subr.bf16.mxu0 %v4552_v16  ;;  %v4555_v19 = vld [vmem:[%s5645_s27 + $0x1c] ss:$12 sps:$4 sm:$0xff]   ;;  %v4557_v20 = vld [vmem:[%s5645_s27 + $0x18] ss:$12 sps:$4 sm:$0xff]   ;;  %v4558_v21 = vld [vmem:[%s5645_s27 + $0x34] ss:$12 sps:$4 sm:$0xff]  }
  0xfb   : > { %984 = vmatpush1.bf16.msra.mxu0 %v4554_v17  ;;  %v4560_v22 = vld [vmem:[%s5645_s27 + $0x30] ss:$12 sps:$4 sm:$0xff]   ;;  %v4561_v23 = vld [vmem:[%s5645_s27 + $0x4c] ss:$12 sps:$4 sm:$0xff]   ;;  %v4563_v25 = vld [vmem:[%s5645_s27 + $0x48] ss:$12 sps:$4 sm:$0xff]  }
  0xfc   : > { %985 = vmatprep.subr.bf16.mxu0 %v4555_v19  ;;  %v4564_v27 = vld [vmem:[%s5645_s27 + $0x64] ss:$12 sps:$4 sm:$0xff]   ;;  %v4566_v29 = vld [vmem:[%s5645_s27 + $0x60] ss:$12 sps:$4 sm:$0xff]   ;;  %v4567_v30 = vld [vmem:[%s5645_s27 + $0x7c] ss:$12 sps:$4 sm:$0xff]  }
  0xfd   : > { %v4576_v31 = vld [vmem:[%s5645_s27 + $0x8] ss:$12 sps:$4 sm:$0xff]   ;;  %v4577_v32 = vld [vmem:[%s5645_s27 + $0x20] ss:$12 sps:$4 sm:$0xff]   ;;  %v4569_v33 = vld [vmem:[%s5645_s27 + $0x78] ss:$12 sps:$4 sm:$0xff]  }
  0xfe   : > { %4201 = vmatprep.subr.bf16.mxu1 %v4576_v31  ;;  %v4570_v34 = vld [vmem:[%s5645_s27 + $0x94] ss:$12 sps:$4 sm:$0xff]   ;;  %v4578_v35 = vld [vmem:[%s5645_s27 + $0x38] ss:$12 sps:$4 sm:$0xff]   ;;  %v4572_v36 = vld [vmem:[%s5645_s27 + $0x90] ss:$12 sps:$4 sm:$0xff]  }
  0xff   : > { %986 = vmatpush1.bf16.msra.mxu0 %v4557_v20  ;;  %v782_v24 = vld [vmem:[%s5706_s18] sm:$0xff]  ;;  %v783_v26 = vld [vmem:[%s5706_s18 + $0x8] sm:$0xff]  ;;  %4202 = vmatpush3.bf16.msra.mxu1 %v4576_v31  ;;  %v4579_v38 = vld [vmem:[%s5645_s27 + $0x50] ss:$12 sps:$4 sm:$0xff]   ;;  %v5791_v2 = vshrl.u32 %v840_v1, 7  ;;  %s5230_s30 = smov 64  }
 0x100   : > { %987 = vmatprep.subr.bf16.mxu0 %v4558_v21  ;;  %v798_v28 = vpack.c.bf16 %v783_v26, %v782_v24  ;;  %4203 = vmatprep.subr.bf16.mxu1 %v4577_v32  ;;  %v4573_v37 = vld [vmem:[%s5645_s27 + $0xac] ss:$12 sps:$4 sm:$0xff]   ;;  %v4575_v39 = vld [vmem:[%s5645_s27 + $0xa8] ss:$12 sps:$4 sm:$0xff]   ;;  %v4583_v46 = vld [vmem:[%s5645_s27 + $0xb0] ss:$12 sps:$4 sm:$0xff]  }
 0x101   : > { %v4580_v40 = vld [vmem:[%s5645_s27 + $0x68] ss:$12 sps:$4 sm:$0xff]   ;;  %v4581_v41 = vld [vmem:[%s5645_s27 + $0x80] ss:$12 sps:$4 sm:$0xff]   ;;  %v785_v43 = vld [vmem:[%s5706_s18 + $0x18] sm:$0xff]  ;;  %v842_v3 = vsub.s32 0, %v5791_v2 }
 0x102   : > { %4217 = vmatprep.mubr.bf16.mxu1 %v798_v28  ;;  %v784_v42 = vld [vmem:[%s5706_s18 + $0x10] sm:$0xff]  ;;  %v4582_v44 = vld [vmem:[%s5645_s27 + $0x98] ss:$12 sps:$4 sm:$0xff]   ;;  %v787_v48 = vld [vmem:[%s5706_s18 + $0x28] sm:$0xff]  ;;  %v846_v5 = vsub.s32 1, %v5791_v2  ;;  %v850_v24 = vsub.s32 2, %v5791_v2 }
 0x103   : > { %988 = vmatpush1.bf16.msra.mxu0 %v4560_v22  ;;  %4204 = vmatpush3.bf16.msra.mxu1 %v4577_v32  ;;  %v799_v45 = vpack.c.bf16 %v785_v43, %v784_v42  ;;  %v786_v47 = vld [vmem:[%s5706_s18 + $0x20] sm:$0xff]  ;;  %v788_v50 = vld [vmem:[%s5706_s18 + $0x30] sm:$0xff]  ;;  %v789_v51 = vld [vmem:[%s5706_s18 + $0x38] sm:$0xff]  ;;  %s7129_s8 = sld [smem:[#allocation31_spill]]  ;;  %s7133_s23 = sld [smem:[#allocation33_spill]] }
 0x104   : > { %989 = vmatprep.subr.bf16.mxu0 %v4561_v23  ;;  %4205 = vmatprep.subr.bf16.mxu1 %v4578_v35  ;;  %v800_v49 = vpack.c.bf16 %v787_v48, %v786_v47  ;;  %v801_v52 = vpack.c.bf16 %v789_v51, %v788_v50  ;;  %v790_v53 = vld [vmem:[%s5706_s18 + $0x40] sm:$0xff]  ;;  %v791_v54 = vld [vmem:[%s5706_s18 + $0x48] sm:$0xff]  ;;  %v792_v56 = vld [vmem:[%s5706_s18 + $0x50] sm:$0xff] }
 0x105   : > { %v802_v55 = vpack.c.bf16 %v791_v54, %v790_v53  ;;  %v793_v57 = vld [vmem:[%s5706_s18 + $0x58] sm:$0xff]  ;;  %v794_v58 = vld [vmem:[%s5706_s18 + $0x60] sm:$0xff]  ;;  %v795_v59 = vld [vmem:[%s5706_s18 + $0x68] sm:$0xff] }
 0x106   : > { %v803_v60 = vpack.c.bf16 %v793_v57, %v792_v56  ;;  %v804_v61 = vpack.c.bf16 %v795_v59, %v794_v58  ;;  %v796_v62 = vld [vmem:[%s5706_s18 + $0x70] sm:$0xff]  ;;  %v797_v63 = vld [vmem:[%s5706_s18 + $0x78] sm:$0xff]  ;;  %v838_v4 = vld [vmem:[%s5683_s17] sm:$0x7] }
 0x107   : > { %990 = vmatpush1.bf16.msra.mxu0 %v4563_v25  ;;  %4206 = vmatpush3.bf16.msra.mxu1 %v4578_v35  ;;  %v805_v0 = vpack.c.bf16 %v797_v63, %v796_v62  ;;  %v5798_v6 = vrot.slane %v838_v4, %v842_v3  ;;  %v5802_v8 = vrot.slane %v838_v4, %v846_v5 }
 0x108   : > { %991 = vmatprep.subr.bf16.mxu0 %v4564_v27  ;;  %4207 = vmatprep.subr.bf16.mxu1 %v4579_v38  ;;  %v5822_v31 = vrot.slane %v838_v4, %v850_v24 }
 0x109   : > { %s7130_s4 = scalar_lea.vmem %s7129_s8, %s5664_s13  ;;  %s7134_s15 = scalar_lea.vmem %s7133_s23, %s5664_s13 }
 0x10b   : > { %992 = vmatpush1.bf16.msra.mxu0 %v4566_v29  ;;  %4208 = vmatpush3.bf16.msra.mxu1 %v4579_v38 }
 0x10c   : > { %993 = vmatprep.subr.bf16.mxu0 %v4567_v30  ;;  %4209 = vmatprep.subr.bf16.mxu1 %v4580_v40 }
 0x10f   : > { %994 = vmatpush1.bf16.msra.mxu0 %v4569_v33  ;;  %4210 = vmatpush3.bf16.msra.mxu1 %v4580_v40 }
 0x110   : > { %995 = vmatprep.subr.bf16.mxu0 %v4570_v34  ;;  %4211 = vmatprep.subr.bf16.mxu1 %v4581_v41 }
 0x113   : > { %996 = vmatpush1.bf16.msra.mxu0 %v4572_v36  ;;  %4212 = vmatpush3.bf16.msra.mxu1 %v4581_v41 }
 0x114   : > { %997 = vmatprep.subr.bf16.mxu0 %v4573_v37  ;;  %4213 = vmatprep.subr.bf16.mxu1 %v4582_v44 }
 0x117   : > { %998 = vmatpush1.bf16.msra.mxu0 %v4575_v39  ;;  %4214 = vmatpush3.bf16.msra.mxu1 %v4582_v44 }
 0x118   : > { %4215 = vmatprep.subr.bf16.mxu1 %v4583_v46 }
 0x11a   : > { %1016 = vmatmul.mubr.bf16.vlgmr.msra.gmra.mrb[0].mxu0 %v798_v28 }
 0x11b   : > { %1025 = vmatprep.mubr.bf16.mxu0 %v5229_v18  ;;  %4216 = vmatpush3.bf16.msra.mxu1 %v4583_v46 }
 0x11e   : > { %4218 = vmatmul.mubr.bf16.vlgmr.msra.gmra.mrb[0].mxu1 %v799_v45 }
 0x11f   : > { %4221 = vmatprep.mubr.bf16.mxu1 %v800_v49 }
 0x122   : > { %1026 = vmatmul.mubr.bf16.gmra.mrb[4].mxu0 %v799_v45 }
 0x123   : > { %1035 = vmatprep.mubr.bf16.mxu0 %v5229_v18 }
 0x126   : > { %4222 = vmatmul.mubr.bf16.gmra.mrb[4].mxu1 %v801_v52 }
 0x127   : > { %4225 = vmatprep.mubr.bf16.mxu1 %v802_v55 }
 0x12a   : > { %1036 = vmatmul.mubr.bf16.gmra.mrb[8].mxu0 %v800_v49 }
 0x12b   : > { %1045 = vmatprep.mubr.bf16.mxu0 %v5229_v18 }
 0x12e   : > { %4226 = vmatmul.mubr.bf16.gmra.mrb[8].mxu1 %v803_v60 }
 0x12f   : > { %4229 = vmatprep.mubr.bf16.mxu1 %v804_v61 }
 0x132   : > { %1046 = vmatmul.mubr.bf16.gmra.mrb[12].mxu0 %v801_v52 }
 0x133   : > { %1055 = vmatprep.mubr.bf16.mxu0 %v5229_v18 }
 0x136   : > { %4230 = vmatmul.mubr.bf16.gmra.mrb[12].mxu1 %v805_v0 }
 0x13a   : > { %1056 = vmatmul.mubr.bf16.gmra.mrb[16].mxu0 %v802_v55 }
 0x13b   : > { %1065 = vmatprep.mubr.bf16.mxu0 %v5229_v18 }
 0x142   : > { %1066 = vmatmul.mubr.bf16.gmra.mrb[20].mxu0 %v803_v60 }
 0x143   : > { %1075 = vmatprep.mubr.bf16.mxu0 %v5229_v18 }
 0x14a   : > { %1076 = vmatmul.mubr.bf16.gmra.mrb[24].mxu0 %v804_v61 }
 0x14b   : > { %1085 = vmatprep.mubr.bf16.mxu0 %v5229_v18 }
 0x152   : > { %1086 = vmatmul.mubr.bf16.gmra.mrb[28].mxu0 %v805_v0 }
 0x1ed   : > { %v1017_v7 = vpop.f32.mrb[0].mxu0 }
 0x1ee   : > { %v1019_v9 = vpop.f32.mrb[1].mxu0  ;;  %v1018_v11 = vadd.f32 %v1017_v7, %v5798_v6 }
 0x1ef   : > { %v1021_v10 = vpop.f32.mrb[2].mxu0  ;;  %v1020_v14 = vadd.f32 %v1019_v9, %v5802_v8 }
 0x1f0   : > { %v1022_v12 = vadd.f32 %v1021_v10, %v5798_v6  ;;  %v1023_v13 = vpop.f32.mrb[3].mxu0 }
 0x1f1   : > { %v1024_v15 = vadd.f32 %v1023_v13, %v5802_v8  ;;  %v4219_v34 = vpop.f32.mrb[0].mxu1 }
 0x1f2   : > { %v5808_v16 = vpack.c.bf16 %v1022_v12, %v1018_v11  ;;  %v1139_v37 = vadd.f32 %v4219_v34, %v5822_v31  ;;  %v1130_v38 = vpop.f32.mrb[1].mxu1 }
 0x1f3   : > { %v1194_v17 = vpack.c.bf16 %v1024_v15, %v1020_v14  ;;  %v1131_v40 = vadd.f32 %v1130_v38, %v5822_v31  ;;  %v4220_v41 = vpop.f32.mrb[2].mxu1 }
 0x1f4   : > { %4249 = vmatprep.mubr.msk.bf16.mxu0 %vm1217_vm0, %v5808_v16  ;;  %v1142_v44 = vadd.f32 %v4220_v41, %v5822_v31  ;;  %v1133_v45 = vpop.f32.mrb[3].mxu1 }
 0x1f5   : > { %v1027_v19 = vpop.f32.mrb[4].mxu0  ;;  %1652 = vrot.lane.b32.xlu0 %v1194_v17, %s5230_s30  ;;  %4409 = vmatprep.subr.msk.bf16.mxu0 %vm1217_vm0, %v1194_v17  ;;  %v1243_v20 = vsel %vm1217_vm0, %v1194_v17, 0  ;;  %v1134_v48 = vadd.f32 %v1133_v45, %v5822_v31 }
 0x1f6   : > { %v1028_v21 = vadd.f32 %v1027_v19, %v5798_v6  ;;  %v1029_v22 = vpop.f32.mrb[5].mxu0  ;;  %4234 = vmatpush3.bf16.xpose.msra.mxu0 %v1243_v20  ;;  %v5837_v50 = vpack.c.bf16 %v1142_v44, %v1139_v37 }
 0x1f7   : > { %v1031_v23 = vpop.f32.mrb[6].mxu0  ;;  %v1030_v27 = vadd.f32 %v1029_v22, %v5802_v8  ;;  %v5841_v52 = vpack.c.bf16 %v1134_v48, %v1131_v40 }
 0x1f8   : > { %v1032_v25 = vadd.f32 %v1031_v23, %v5798_v6  ;;  %v1033_v26 = vpop.f32.mrb[7].mxu0 }
 0x1f9   : > { %v1034_v28 = vadd.f32 %v1033_v26, %v5802_v8  ;;  %v4223_v55 = vpop.f32.mrb[4].mxu1  ;;  %4265 = vmatprep.subr.bf16.mxu1 %v5841_v52 }
 0x1fa   : > { %v5820_v29 = vpack.c.bf16 %v1032_v25, %v1028_v21  ;;  %v1155_v58 = vadd.f32 %v4223_v55, %v5822_v31  ;;  %v1146_v59 = vpop.f32.mrb[5].mxu1  ;;  %4266 = vmatpush3.bf16.msra.mxu1 %v5841_v52 }
 0x1fb   : > { %v1197_v30 = vpack.c.bf16 %v1034_v28, %v1030_v27  ;;  %v1147_v61 = vadd.f32 %v1146_v59, %v5822_v31  ;;  %v4224_v62 = vpop.f32.mrb[6].mxu1  ;;  %4267 = vmatprep.subr.bf16.mxu1 %v5837_v50 }
 0x1fc   : > { %v1158_v1 = vadd.f32 %v4224_v62, %v5822_v31  ;;  %v1149_v4 = vpop.f32.mrb[7].mxu1 }
 0x1fd   : > { %v1037_v32 = vpop.f32.mrb[8].mxu0  ;;  %1654 = vrot.lane.b32.xlu1 %v1197_v30, %s5230_s30  ;;  %4410 = vmatprep.subr.msk.bf16.mxu0 %vm1217_vm0, %v1197_v30  ;;  %v1246_v33 = vsel %vm1217_vm0, %v1197_v30, 0  ;;  %v1150_v10 = vadd.f32 %v1149_v4, %v5822_v31 }
 0x1fe   : > { %v1038_v35 = vadd.f32 %v1037_v32, %v5798_v6  ;;  %v1039_v36 = vpop.f32.mrb[9].mxu0  ;;  %4236 = vmatpush3.bf16.xpose.msra.mxu0 %v1246_v33  ;;  %v5860_v12 = vpack.c.bf16 %v1158_v1, %v1155_v58  ;;  %4268 = vmatpush3.bf16.msra.mxu1 %v5837_v50 }
 0x1ff   : > { %v1041_v39 = vpop.f32.mrb[10].mxu0  ;;  %v1040_v46 = vadd.f32 %v1039_v36, %v5802_v8  ;;  %v5865_v14 = vpack.c.bf16 %v1150_v10, %v1147_v61 }
 0x200   : > { %v1042_v42 = vadd.f32 %v1041_v39, %v5798_v6  ;;  %v1043_v43 = vpop.f32.mrb[11].mxu0 }
 0x201   : > { %v1044_v47 = vadd.f32 %v1043_v43, %v5802_v8  ;;  %v4227_v19 = vpop.f32.mrb[8].mxu1  ;;  %4269 = vmatprep.subr.bf16.mxu1 %v5865_v14 }
 0x202   : > { %v5835_v49 = vpack.c.bf16 %v1042_v42, %v1038_v35  ;;  %v1171_v22 = vadd.f32 %v4227_v19, %v5822_v31  ;;  %v1162_v23 = vpop.f32.mrb[9].mxu1  ;;  %4270 = vmatpush3.bf16.msra.mxu1 %v5865_v14 }
 0x203   : > { %v5839_v51 = vpack.c.bf16 %v1044_v47, %v1040_v46  ;;  %v1163_v25 = vadd.f32 %v1162_v23, %v5822_v31  ;;  %v4228_v26 = vpop.f32.mrb[10].mxu1  ;;  %4271 = vmatprep.subr.bf16.mxu1 %v5860_v12 }
 0x204   : > { %v1174_v30 = vadd.f32 %v4228_v26, %v5822_v31  ;;  %v1165_v32 = vpop.f32.mrb[11].mxu1 }
 0x205   : > { %v1047_v53 = vpop.f32.mrb[12].mxu0  ;;  %4411 = vmatprep.subr.msk.bf16.mxu0 %vm1217_vm0, %v5839_v51  ;;  %v1249_v54 = vsel %vm1217_vm0, %v5839_v51, 0  ;;  %v1166_v35 = vadd.f32 %v1165_v32, %v5822_v31 }
 0x206   : > { %v1048_v56 = vadd.f32 %v1047_v53, %v5798_v6  ;;  %v1049_v57 = vpop.f32.mrb[13].mxu0  ;;  %4238 = vmatpush3.bf16.xpose.msra.mxu0 %v1249_v54  ;;  %v5884_v37 = vpack.c.bf16 %v1174_v30, %v1171_v22  ;;  %4272 = vmatpush3.bf16.msra.mxu1 %v5860_v12 }
 0x207   : > { %v1051_v60 = vpop.f32.mrb[14].mxu0  ;;  %v1050_v7 = vadd.f32 %v1049_v57, %v5802_v8  ;;  %v5889_v39 = vpack.c.bf16 %v1166_v35, %v1163_v25 }
 0x208   : > { %v1052_v63 = vadd.f32 %v1051_v60, %v5798_v6  ;;  %v1053_v0 = vpop.f32.mrb[15].mxu0 }
 0x209   : > { %v1054_v9 = vadd.f32 %v1053_v0, %v5802_v8  ;;  %v4231_v42 = vpop.f32.mrb[12].mxu1  ;;  %4273 = vmatprep.subr.bf16.mxu1 %v5889_v39 }
 0x20a   : > { %v5858_v11 = vpack.c.bf16 %v1052_v63, %v1048_v56  ;;  %v1187_v45 = vadd.f32 %v4231_v42, %v5822_v31  ;;  %v1178_v46 = vpop.f32.mrb[13].mxu1  ;;  %4274 = vmatpush3.bf16.msra.mxu1 %v5889_v39 }
 0x20b   : > { %v5863_v13 = vpack.c.bf16 %v1054_v9, %v1050_v7  ;;  %v1179_v48 = vadd.f32 %v1178_v46, %v5822_v31  ;;  %v4232_v53 = vpop.f32.mrb[14].mxu1  ;;  %4275 = vmatprep.subr.bf16.mxu1 %v5884_v37 }
 0x20c   : > { %v1190_v56 = vadd.f32 %v4232_v53, %v5822_v31  ;;  %v1181_v57 = vpop.f32.mrb[15].mxu1 }
 0x20d   : > { %v1057_v15 = vpop.f32.mrb[16].mxu0  ;;  %4412 = vmatprep.subr.msk.bf16.mxu0 %vm1217_vm0, %v5863_v13  ;;  %v1252_v17 = vsel %vm1217_vm0, %v5863_v13, 0  ;;  %v1182_v60 = vadd.f32 %v1181_v57, %v5822_v31 }
 0x20e   : > { %v1058_v20 = vadd.f32 %v1057_v15, %v5798_v6  ;;  %v1059_v21 = vpop.f32.mrb[17].mxu0  ;;  %4240 = vmatpush3.bf16.xpose.msra.mxu0 %v1252_v17  ;;  %v5908_v62 = vpack.c.bf16 %v1190_v56, %v1187_v45  ;;  %4276 = vmatpush3.bf16.msra.mxu1 %v5884_v37 }
 0x20f   : > { %v1061_v24 = vpop.f32.mrb[18].mxu0  ;;  %v1060_v33 = vadd.f32 %v1059_v21, %v5802_v8  ;;  %v5913_v0 = vpack.c.bf16 %v1182_v60, %v1179_v48 }
 0x210   : > { %v1062_v27 = vadd.f32 %v1061_v24, %v5798_v6  ;;  %v1063_v28 = vpop.f32.mrb[19].mxu0 }
 0x211   : > { %v1064_v34 = vadd.f32 %v1063_v28, %v5802_v8  ;;  %4277 = vmatprep.subr.bf16.mxu1 %v5913_v0 }
 0x212   : > { %v5882_v36 = vpack.c.bf16 %v1062_v27, %v1058_v20  ;;  %4278 = vmatpush3.bf16.msra.mxu1 %v5913_v0 }
 0x213   : > { %v5887_v38 = vpack.c.bf16 %v1064_v34, %v1060_v33  ;;  %4279 = vmatprep.subr.bf16.mxu1 %v5908_v62 }
 0x215   : > { %v1067_v40 = vpop.f32.mrb[20].mxu0  ;;  %4413 = vmatprep.subr.msk.bf16.mxu0 %vm1217_vm0, %v5887_v38  ;;  %v1255_v41 = vsel %vm1217_vm0, %v5887_v38, 0 }
 0x216   : > { %v1068_v43 = vadd.f32 %v1067_v40, %v5798_v6  ;;  %v1069_v44 = vpop.f32.mrb[21].mxu0  ;;  %4242 = vmatpush3.bf16.xpose.msra.mxu0 %v1255_v41  ;;  %4280 = vmatpush3.bf16.msra.mxu1 %v5908_v62 }
 0x217   : > { %v1071_v47 = vpop.f32.mrb[22].mxu0  ;;  %v1070_v58 = vadd.f32 %v1069_v44, %v5802_v8 }
 0x218   : > { %v1072_v54 = vadd.f32 %v1071_v47, %v5798_v6  ;;  %v1073_v55 = vpop.f32.mrb[23].mxu0 }
 0x219   : > { %v1074_v59 = vadd.f32 %v1073_v55, %v5802_v8 }
 0x21a   : > { %v5906_v61 = vpack.c.bf16 %v1072_v54, %v1068_v43 }
 0x21b   : > { %v5911_v63 = vpack.c.bf16 %v1074_v59, %v1070_v58 }
 0x21d   : > { %v1077_v1 = vpop.f32.mrb[24].mxu0  ;;  %4414 = vmatprep.subr.msk.bf16.mxu0 %vm1217_vm0, %v5911_v63  ;;  %v1258_v4 = vsel %vm1217_vm0, %v5911_v63, 0 }
 0x21e   : > { %v1078_v31 = vadd.f32 %v1077_v1, %v5798_v6  ;;  %v1079_v7 = vpop.f32.mrb[25].mxu0  ;;  %4244 = vmatpush3.bf16.xpose.msra.mxu0 %v1258_v4 }
 0x21f   : > { %v1081_v9 = vpop.f32.mrb[26].mxu0  ;;  %v1080_v17 = vadd.f32 %v1079_v7, %v5802_v8 }
 0x220   : > { %v1082_v10 = vadd.f32 %v1081_v9, %v5798_v6  ;;  %v1083_v15 = vpop.f32.mrb[27].mxu0 }
 0x221   : > { %v1084_v19 = vadd.f32 %v1083_v15, %v5802_v8 }
 0x222   : > { %v5926_v20 = vpack.c.bf16 %v1082_v10, %v1078_v31 }
 0x223   : > { %v5929_v21 = vpack.c.bf16 %v1084_v19, %v1080_v17 }
 0x225   : > { %v1087_v22 = vpop.f32.mrb[28].mxu0  ;;  %4415 = vmatprep.subr.msk.bf16.mxu0 %vm1217_vm0, %v5929_v21  ;;  %v1261_v23 = vsel %vm1217_vm0, %v5929_v21, 0 }
 0x226   : > { %v1088_v24 = vadd.f32 %v1087_v22, %v5798_v6  ;;  %v1089_v25 = vpop.f32.mrb[29].mxu0  ;;  %4246 = vmatpush3.bf16.xpose.msra.mxu0 %v1261_v23 }
 0x227   : > { %v1091_v26 = vpop.f32.mrb[30].mxu0  ;;  %v1090_v30 = vadd.f32 %v1089_v25, %v5802_v8 }
 0x228   : > { %v1092_v27 = vadd.f32 %v1091_v26, %v5798_v6  ;;  %v1093_v28 = vpop.f32.mrb[31].mxu0 }
 0x229   : > { %v1094_v32 = vadd.f32 %v1093_v28, %v5802_v8 }
 0x22a   : > { %v5939_v33 = vpack.c.bf16 %v1092_v27, %v1088_v24 }
 0x22b   : > { %v5941_v34 = vpack.c.bf16 %v1094_v32, %v1090_v30 }
 0x22d   : > { %4416 = vmatprep.subr.msk.bf16.mxu0 %vm1217_vm0, %v5941_v34  ;;  %v1264_v35 = vsel %vm1217_vm0, %v5941_v34, 0 }
 0x22e   : > { %4248 = vmatpush3.bf16.xpose.msra.mxu0 %v1264_v35 }
 0x235   : > { %4250 = vmatmul.mubr.msk.bf16.vlgmr.msra.gmra.mrb[32].mxu0 %vm1217_vm0, %v5820_v29 }
 0x236   : > { %4253 = vmatprep.mubr.msk.bf16.mxu0 %vm1217_vm0, %v5835_v49 }
 0x23d   : > { %4254 = vmatmul.mubr.msk.bf16.gmra.mrb[36].mxu0 %vm1217_vm0, %v5858_v11 }
 0x23e   : > { %4257 = vmatprep.mubr.msk.bf16.mxu0 %vm1217_vm0, %v5882_v36 }
 0x245   : > { %4258 = vmatmul.mubr.msk.bf16.gmra.mrb[40].mxu0 %vm1217_vm0, %v5906_v61 }
 0x246   : > { %4261 = vmatprep.mubr.msk.bf16.mxu0 %vm1217_vm0, %v5926_v20 }
 0x24d   : > { %4262 = vmatmul.mubr.msk.bf16.gmra.mrb[44].mxu0 %vm1217_vm0, %v5939_v33 }
 0x267   : > { %v5961_v6 = vpop.permute.xlu0 %1652 }
 0x268   : > { %4417 = vmatprep.subr.msk.bf16.mxu1 %vm1217_vm0, %v5961_v6 }
 0x26f   : > { %v5999_v59 = vpop.permute.xlu1 %1654 }
 0x308   : > { %v4251_v8 = vpop.f32.mrb[32].mxu0 }
 0x309   : > { %1367 = vmax.xlane.f32.xlu1 %v4251_v8  ;;  %v1300_v40 = vpop.f32.mrb[33].mxu0 }
 0x30a   : > { %1363 = vmax.xlane.f32.xlu0 %v1300_v40  ;;  %v4252_v41 = vpop.f32.mrb[34].mxu0 }
 0x30b   : > { %v1303_v42 = vpop.f32.mrb[35].mxu0 }
 0x30d   : > { %1369 = vmax.xlane.f32.xlu1 %v4252_v41 }
 0x30e   : > { %1365 = vmax.xlane.f32.xlu0 %v1303_v42 }
 0x310   : > { %v4255_v43 = vpop.f32.mrb[36].mxu0 }
 0x311   : > { %v5965_v44 = vpop.f32.mrb[37].mxu0 }
 0x312   : > { %1375 = vmax.xlane.f32.xlu0 %v4255_v43  ;;  %v5967_v45 = vpop.f32.mrb[38].mxu0 }
 0x313   : > { %1377 = vmax.xlane.f32.xlu1 %v5967_v45  ;;  %v5970_v46 = vpop.f32.mrb[39].mxu0 }
 0x316   : > { %1371 = vmax.xlane.f32.xlu0 %v5965_v44 }
 0x317   : > { %1373 = vmax.xlane.f32.xlu1 %v5970_v46 }
 0x318   : > { %v5974_v47 = vpop.f32.mrb[40].mxu0 }
 0x319   : > { %v5976_v48 = vpop.f32.mrb[41].mxu0 }
 0x31a   : > { %1383 = vmax.xlane.f32.xlu0 %v5974_v47  ;;  %v5979_v53 = vpop.f32.mrb[42].mxu0 }
 0x31b   : > { %1385 = vmax.xlane.f32.xlu1 %v5979_v53  ;;  %v5982_v54 = vpop.f32.mrb[43].mxu0 }
 0x31e   : > { %1379 = vmax.xlane.f32.xlu0 %v5976_v48 }
 0x31f   : > { %1381 = vmax.xlane.f32.xlu1 %v5982_v54 }
 0x320   : > { %v4263_v55 = vpop.f32.mrb[44].mxu0 }
 0x321   : > { %v5986_v56 = vpop.f32.mrb[45].mxu0 }
 0x322   : > { %1391 = vmax.xlane.f32.xlu0 %v4263_v55  ;;  %v5988_v57 = vpop.f32.mrb[46].mxu0 }
 0x323   : > { %v5990_v58 = vpop.f32.mrb[47].mxu0 }
 0x326   : > { %1387 = vmax.xlane.f32.xlu0 %v5986_v56 }
 0x330   : > { %1658 = vrot.lane.b32.xlu1 %v5863_v13, %s5230_s30 }
 0x33c   : > { %1656 = vrot.lane.b32.xlu0 %v5839_v51, %s5230_s30 }
 0x354   : > { %1393 = vmax.xlane.f32.xlu1 %v5988_v57 }
 0x358   : > { %1389 = vmax.xlane.f32.xlu1 %v5990_v58 }
 0x396   : > { %v1368_v60 = vpop.xlane.xlu1 %1367 }
 0x397   : > { %v1397_v1 = vsub.f32 %v4251_v8, %v1368_v60  ;;  %v1364_v4 = vpop.xlane.xlu0 %1363 }
 0x398   : > { %v1395_v31 = vsub.f32 %v1300_v40, %v1364_v4 }
 0x399   : > { %v1415_v7 = vmul.f32 1.442695, %v1397_v1 }
 0x39a   : > { %v1411_v9 = vmul.f32 1.442695, %v1395_v31  ;;  %v1370_v10 = vpop.xlane.xlu1 %1369 }
 0x39b   : > { %4632 = vpow2.f32 %v1415_v7  ;;  %v1398_v15 = vsub.f32 %v4252_v41, %v1370_v10  ;;  %v1366_v17 = vpop.xlane.xlu0 %1365 }
 0x39c   : > { %v1396_v13 = vsub.f32 %v1303_v42, %v1366_v17  ;;  %4634 = vpow2.f32 %v1411_v9 }
 0x39d   : > { %v1417_v19 = vmul.f32 1.442695, %v1398_v15 }
 0x39e   : > { %v1413_v51 = vmul.f32 1.442695, %v1396_v13 }
 0x39f   : > { %4636 = vpow2.f32 %v1417_v19  ;;  %v1376_v26 = vpop.xlane.xlu0 %1375 }
 0x3a0   : > { %4638 = vpow2.f32 %v1413_v51  ;;  %v1378_v30 = vpop.xlane.xlu1 %1377  ;;  %v1401_v8 = vsub.f32 %v4255_v43, %v1376_v26 }
 0x3a1   : > { %v1402_v4 = vsub.f32 %v5967_v45, %v1378_v30 }
 0x3a2   : > { %v1423_v42 = vmul.f32 1.442695, %v1401_v8 }
 0x3a3   : > { %v1372_v27 = vpop.xlane.xlu0 %1371 }
 0x3a4   : > { %v1374_v35 = vpop.xlane.xlu1 %1373  ;;  %v1399_v40 = vsub.f32 %v5965_v44, %v1372_v27  ;;  %4640 = vpow2.f32 %v1423_v42 }
 0x3a5   : > { %v6001_v22 = vpop.eup %4632  ;;  %v1400_v60 = vsub.f32 %v5970_v46, %v1374_v35 }
 0x3a6   : > { %1447 = vadd.xlane.f32.xlu0 %v6001_v22  ;;  %v6004_v23 = vpop.eup %4634  ;;  %v1419_v31 = vmul.f32 1.442695, %v1399_v40 }
 0x3a7   : > { %v1384_v28 = vpop.xlane.xlu0 %1383 }
 0x3a8   : > { %v1386_v1 = vpop.xlane.xlu1 %1385  ;;  %4642 = vpow2.f32 %v1419_v31  ;;  %v1405_v10 = vsub.f32 %v5974_v47, %v1384_v28 }
 0x3a9   : > { %v6006_v24 = vpop.eup %4636  ;;  %v1406_v47 = vsub.f32 %v5979_v53, %v1386_v1 }
 0x3aa   : > { %1443 = vadd.xlane.f32.xlu0 %v6004_v23  ;;  %1449 = vadd.xlane.f32.xlu1 %v6006_v24  ;;  %v6010_v25 = vpop.eup %4638  ;;  %v1431_v17 = vmul.f32 1.442695, %v1405_v10 }
 0x3ab   : > { %v1380_v32 = vpop.xlane.xlu0 %1379  ;;  %v1433_v27 = vmul.f32 1.442695, %v1406_v47 }
 0x3ac   : > { %v1382_v15 = vpop.xlane.xlu1 %1381  ;;  %v1403_v46 = vsub.f32 %v5976_v48, %v1380_v32 }
 0x3ad   : > { %v1404_v28 = vsub.f32 %v5982_v54, %v1382_v15 }
 0x3ae   : > { %1445 = vadd.xlane.f32.xlu1 %v6010_v25  ;;  %v6025_v19 = vpop.eup %4640 }
 0x3af   : > { %v1392_v41 = vpop.xlane.xlu0 %1391 }
 0x3b0   : > { %v1409_v7 = vsub.f32 %v4263_v55, %v1392_v41  ;;  %v6023_v13 = vpop.permute.xlu1 %1658  ;;  %v1427_v55 = vmul.f32 1.442695, %v1403_v46 }
 0x3b2   : > { %v1439_v43 = vmul.f32 1.442695, %v1409_v7  ;;  %v6029_v51 = vpop.eup %4642 }
 0x3b3   : > { %v1388_v9 = vpop.xlane.xlu0 %1387 }
 0x3b4   : > { %v1407_v44 = vsub.f32 %v5986_v56, %v1388_v9 }
 0x3b6   : > { %v1435_v45 = vmul.f32 1.442695, %v1407_v44 }
 0x3bf   : > { %1662 = vrot.lane.b32.xlu1 %v5911_v63, %s5230_s30  ;;  %v1421_v63 = vmul.f32 1.442695, %v1400_v60 }
 0x3c0   : > { %1660 = vrot.lane.b32.xlu0 %v5887_v38, %s5230_s30  ;;  %v1425_v38 = vmul.f32 1.442695, %v1402_v4 }
 0x3c1   : > { %4644 = vpow2.f32 %v1421_v63  ;;  %v1693_v63 = vsel %vm1217_vm0, %v5961_v6, 0 }
 0x3c2   : > { %4646 = vpow2.f32 %v1425_v38 }
 0x3c3   : > { %4648 = vpow2.f32 %v1439_v43 }
 0x3c4   : > { %4650 = vpow2.f32 %v1431_v17 }
 0x3c5   : > { %4652 = vpow2.f32 %v1435_v45 }
 0x3c6   : > { %4654 = vpow2.f32 %v1427_v55 }
 0x3cb   : > { %v6031_v26 = vpop.eup %4644 }
 0x3cc   : > { %v6037_v32 = vpop.eup %4646 }
 0x3cd   : > { %v6039_v35 = vpop.eup %4648 }
 0x3ce   : > { %v6044_v40 = vpop.eup %4650 }
 0x3cf   : > { %v6046_v41 = vpop.eup %4652 }
 0x3d0   : > { %v6050_v42 = vpop.eup %4654 }
 0x3df   : > { %1455 = vadd.xlane.f32.xlu0 %v6025_v19 }
 0x3e1   : > { %v1394_v56 = vpop.xlane.xlu1 %1393 }
 0x3e2   : > { %v1410_v48 = vsub.f32 %v5988_v57, %v1394_v56  ;;  %v1429_v57 = vmul.f32 1.442695, %v1404_v28 }
 0x3e3   : > { %1453 = vadd.xlane.f32.xlu0 %v6031_v26  ;;  %1451 = vadd.xlane.f32.xlu1 %v6029_v51 }
 0x3e4   : > { %v1441_v30 = vmul.f32 1.442695, %v1410_v48 }
 0x3e5   : > { %v1390_v53 = vpop.xlane.xlu1 %1389 }
 0x3e6   : > { %4656 = vpow2.f32 %v1441_v30  ;;  %v1408_v8 = vsub.f32 %v5990_v58, %v1390_v53 }
 0x3e7   : > { %1471 = vadd.xlane.f32.xlu0 %v6039_v35  ;;  %1457 = vadd.xlane.f32.xlu1 %v6037_v32  ;;  %4658 = vpow2.f32 %v1433_v27 }
 0x3e8   : > { %4660 = vpow2.f32 %v1429_v57  ;;  %v1437_v54 = vmul.f32 1.442695, %v1408_v8 }
 0x3ea   : > { %4662 = vpow2.f32 %v1437_v54 }
 0x3eb   : > { %1467 = vadd.xlane.f32.xlu0 %v6046_v41  ;;  %1463 = vadd.xlane.f32.xlu1 %v6044_v40 }
 0x3ef   : > { %1459 = vadd.xlane.f32.xlu1 %v6050_v42 }
 0x3f0   : > { %v6053_v60 = vpop.eup %4656 }
 0x3f1   : > { %1473 = vadd.xlane.f32.xlu0 %v6053_v60  ;;  %v6056_v58 = vpop.eup %4658 }
 0x3f2   : > { %v6059_v1 = vpop.eup %4660 }
 0x3f3   : > { %1465 = vadd.xlane.f32.xlu1 %v6056_v58 }
 0x3f4   : > { %v6062_v4 = vpop.eup %4662 }
 0x3f7   : > { %1461 = vadd.xlane.f32.xlu1 %v6059_v1 }
 0x3fb   : > { %1469 = vadd.xlane.f32.xlu1 %v6062_v4 }
 0x407   : > { %1664 = vrot.lane.b32.xlu0 %v5929_v21, %s5230_s30 }
 0x40b   : > { %1628 = vrot.lane.b32.xlu0 %v5808_v16, %s5230_s30  ;;  %v1657_v16 = vpop.permute.xlu0 %1656 }
 0x40c   : > { %1666 = vrot.lane.b32.xlu1 %v5941_v34, %s5230_s30 }
 0x40f   : > { %1632 = vrot.lane.b32.xlu0 %v5835_v49, %s5230_s30 }
 0x410   : > { %1630 = vrot.lane.b32.xlu1 %v5820_v29, %s5230_s30 }
 0x413   : > { %1636 = vrot.lane.b32.xlu0 %v5882_v36, %s5230_s30 }
 0x414   : > { %1634 = vrot.lane.b32.xlu1 %v5858_v11, %s5230_s30 }
 0x417   : > { %1640 = vrot.lane.b32.xlu0 %v5926_v20, %s5230_s30 }
 0x418   : > { %1638 = vrot.lane.b32.xlu1 %v5906_v61, %s5230_s30 }
 0x41b   : > { %1973 = vrot.lane.b32.xlu0 %v5841_v52, %s5230_s30 }
 0x41c   : > { %1642 = vrot.lane.b32.xlu1 %v5939_v33, %s5230_s30 }
 0x41f   : > { %1977 = vrot.lane.b32.xlu0 %v5865_v14, %s5230_s30 }
 0x420   : > { %1975 = vrot.lane.b32.xlu1 %v5837_v50, %s5230_s30 }
 0x423   : > { %1979 = vrot.lane.b32.xlu0 %v5860_v12, %s5230_s30 }
 0x433   : > { %v1448_v29 = vpop.xlane.xlu0 %1447 }
 0x437   : > { %v1444_v49 = vpop.xlane.xlu0 %1443  ;;  %v1450_v11 = vpop.xlane.xlu1 %1449 }
 0x438   : > { %4664 = vrcp.f32 %v1450_v11 }
 0x439   : > { %4666 = vrcp.f32 %v1444_v49 }
 0x43a   : > { %4668 = vrcp.f32 %v1448_v29 }
 0x43b   : > { %v1446_v52 = vpop.xlane.xlu1 %1445  ;;  %v1661_v6 = vpop.permute.xlu0 %1660 }
 0x43c   : > { %4670 = vrcp.f32 %v1446_v52 }
 0x442   : > { %v4665_v36 = vpop.eup %4664 }
 0x443   : > { %v4667_v61 = vpop.eup %4666  ;;  %v1494_v14 = vmul.f32 %v4665_v36, %v6006_v24  ;;  %v1696_v24 = vsel %vm1217_vm0, %v5999_v59, 0 }
 0x444   : > { %v4669_v20 = vpop.eup %4668  ;;  %v1491_v50 = vmul.f32 %v4667_v61, %v6004_v23  ;;  %v1699_v23 = vsel %vm1217_vm0, %v1657_v16, 0 }
 0x445   : > { %v1493_v12 = vmul.f32 %v4669_v20, %v6001_v22  ;;  %v1702_v22 = vsel %vm1217_vm0, %v6023_v13, 0 }
 0x446   : > { %v4671_v21 = vpop.eup %4670 }
 0x447   : > { %v1492_v33 = vmul.f32 %v4671_v21, %v6010_v25  ;;  %v1508_v31 = vpack.c.bf16 %v1494_v14, %v1493_v12  ;;  %v1663_v25 = vpop.permute.xlu1 %1662 }
 0x448   : > { %v1708_v15 = vsel %vm1217_vm0, %v1663_v25, 0 }
 0x449   : > { %v1507_v34 = vpack.c.bf16 %v1492_v33, %v1491_v50 }
 0x44b   : > { %4281 = vmatprep.mubr.bf16.mxu1 %v1507_v34 }
 0x44c   : > { %4282 = vmatmul.mubr.bf16.vlgmr.msra.gmra.mrb[16].mxu1 %v1508_v31 }
 0x44d   : > { %4298 = vmatpush3.bf16.xpose.msra.mxu1 %v1693_v63 }
 0x44e   : > { %4418 = vmatprep.subr.msk.bf16.mxu1 %vm1217_vm0, %v5999_v59  ;;  %v1705_v59 = vsel %vm1217_vm0, %v1661_v6, 0 }
 0x455   : > { %4300 = vmatpush3.bf16.xpose.msra.mxu1 %v1696_v24 }
 0x456   : > { %4419 = vmatprep.subr.msk.bf16.mxu1 %vm1217_vm0, %v1657_v16 }
 0x45d   : > { %4302 = vmatpush3.bf16.xpose.msra.mxu1 %v1699_v23 }
 0x45e   : > { %4420 = vmatprep.subr.msk.bf16.mxu1 %vm1217_vm0, %v6023_v13 }
 0x465   : > { %4304 = vmatpush3.bf16.xpose.msra.mxu1 %v1702_v22 }
 0x466   : > { %4421 = vmatprep.subr.msk.bf16.mxu1 %vm1217_vm0, %v1661_v6 }
 0x46c   : > { %v1456_v7 = vpop.xlane.xlu0 %1455 }
 0x46d   : > { %4306 = vmatpush3.bf16.xpose.msra.mxu1 %v1705_v59 }
 0x46e   : > { %4422 = vmatprep.subr.msk.bf16.mxu1 %vm1217_vm0, %v1663_v25 }
 0x470   : > { %v1454_v9 = vpop.xlane.xlu0 %1453  ;;  %v1452_v38 = vpop.xlane.xlu1 %1451 }
 0x471   : > { %4672 = vrcp.f32 %v1454_v9 }
 0x472   : > { %4674 = vrcp.f32 %v1452_v38 }
 0x473   : > { %4676 = vrcp.f32 %v1456_v7 }
 0x474   : > { %v1472_v10 = vpop.xlane.xlu0 %1471  ;;  %v1458_v43 = vpop.xlane.xlu1 %1457 }
 0x475   : > { %4308 = vmatpush3.bf16.xpose.msra.mxu1 %v1708_v15  ;;  %4678 = vrcp.f32 %v1458_v43 }
 0x478   : > { %v1464_v44 = vpop.xlane.xlu1 %1463  ;;  %v1468_v17 = vpop.xlane.xlu0 %1467 }
 0x47b   : > { %v4673_v46 = vpop.eup %4672 }
 0x47c   : > { %v4675_v45 = vpop.eup %4674  ;;  %v1460_v13 = vpop.xlane.xlu1 %1459  ;;  %v1496_v47 = vmul.f32 %v4673_v46, %v6031_v26 }
 0x47d   : > { %v1495_v55 = vmul.f32 %v4675_v45, %v6029_v51  ;;  %v4677_v56 = vpop.eup %4676 }
 0x47e   : > { %v1474_v48 = vpop.xlane.xlu0 %1473  ;;  %v1497_v53 = vmul.f32 %v4677_v56, %v6025_v19 }
 0x47f   : > { %v1509_v27 = vpack.c.bf16 %v1496_v47, %v1495_v55  ;;  %v4679_v28 = vpop.eup %4678 }
 0x480   : > { %v1466_v30 = vpop.xlane.xlu1 %1465  ;;  %v1498_v57 = vmul.f32 %v4679_v28, %v6037_v32 }
 0x481   : > { %4285 = vmatprep.mubr.bf16.mxu1 %v1509_v27  ;;  %4680 = vrcp.f32 %v1466_v30 }
 0x482   : > { %v1665_v8 = vpop.permute.xlu0 %1664  ;;  %4682 = vrcp.f32 %v1460_v13  ;;  %v1510_v54 = vpack.c.bf16 %v1498_v57, %v1497_v53 }
 0x483   : > { %4423 = vmatprep.subr.msk.bf16.mxu1 %vm1217_vm0, %v1665_v8  ;;  %v1711_v26 = vsel %vm1217_vm0, %v1665_v8, 0  ;;  %4684 = vrcp.f32 %v1464_v44 }
 0x484   : > { %4310 = vmatpush3.bf16.xpose.msra.mxu1 %v1711_v26  ;;  %v1462_v51 = vpop.xlane.xlu1 %1461 }
 0x485   : > { %4286 = vmatmul.mubr.bf16.gmra.mrb[20].mxu1 %v1510_v54  ;;  %4686 = vrcp.f32 %v1462_v51 }
 0x486   : > { %v1629_v16 = vpop.permute.xlu0 %1628  ;;  %4688 = vrcp.f32 %v1468_v17 }
 0x488   : > { %v1470_v29 = vpop.xlane.xlu1 %1469 }
 0x489   : > { %4690 = vrcp.f32 %v1470_v29 }
 0x48a   : > { %4692 = vrcp.f32 %v1474_v48  ;;  %v1633_v19 = vpop.permute.xlu0 %1632 }
 0x48b   : > { %v4681_v32 = vpop.eup %4680  ;;  %4694 = vrcp.f32 %v1472_v10 }
 0x48c   : > { %v1667_v49 = vpop.permute.xlu1 %1666  ;;  %v4683_v11 = vpop.eup %4682  ;;  %v1502_v21 = vmul.f32 %v4681_v32, %v6056_v58 }
 0x48d   : > { %4424 = vmatprep.subr.msk.bf16.mxu1 %vm1217_vm0, %v1667_v49  ;;  %v1714_v52 = vsel %vm1217_vm0, %v1667_v49, 0  ;;  %v4685_v36 = vpop.eup %4684  ;;  %v1499_v50 = vmul.f32 %v4683_v11, %v6050_v42 }
 0x48e   : > { %v1637_v61 = vpop.permute.xlu0 %1636  ;;  %4312 = vmatpush3.bf16.xpose.msra.mxu1 %v1714_v52  ;;  %v1501_v34 = vmul.f32 %v4685_v36, %v6044_v40 }
 0x48f   : > { %v4687_v20 = vpop.eup %4686 }
 0x490   : > { %v1631_v14 = vpop.permute.xlu1 %1630  ;;  %v1500_v33 = vmul.f32 %v4687_v20, %v6059_v1  ;;  %v4689_v12 = vpop.eup %4688  ;;  %v1512_v23 = vpack.c.bf16 %v1502_v21, %v1501_v34 }
 0x491   : > { %v1503_v25 = vmul.f32 %v4689_v12, %v6046_v41 }
 0x492   : > { %v1641_v31 = vpop.permute.xlu0 %1640  ;;  %v1511_v63 = vpack.c.bf16 %v1500_v33, %v1499_v50 }
 0x493   : > { %v4691_v24 = vpop.eup %4690 }
 0x494   : > { %v4693_v22 = vpop.eup %4692  ;;  %4289 = vmatprep.mubr.bf16.mxu1 %v1511_v63  ;;  %v1635_v6 = vpop.permute.xlu1 %1634  ;;  %v1504_v7 = vmul.f32 %v4691_v24, %v6062_v4 }
 0x495   : > { %4290 = vmatmul.mubr.bf16.gmra.mrb[24].mxu1 %v1512_v23  ;;  %v4695_v58 = vpop.eup %4694  ;;  %v1506_v1 = vmul.f32 %v4693_v22, %v6053_v60 }
 0x496   : > { %v1513_v59 = vpack.c.bf16 %v1504_v7, %v1503_v25  ;;  %v1974_v42 = vpop.permute.xlu0 %1973  ;;  %v1505_v9 = vmul.f32 %v4695_v58, %v6039_v35 }
 0x497   : > { %4329 = vmatprep.subr.bf16.mxu0 %v1974_v42 }
 0x498   : > { %4293 = vmatprep.mubr.bf16.mxu1 %v1513_v59  ;;  %v1639_v40 = vpop.permute.xlu1 %1638  ;;  %4330 = vmatpush3.bf16.msra.mxu0 %v1974_v42  ;;  %v1514_v38 = vpack.c.bf16 %v1506_v1, %v1505_v9 }
 0x49a   : > { %v1978_v41 = vpop.permute.xlu0 %1977 }
 0x49c   : > { %v1643_v10 = vpop.permute.xlu1 %1642 }
 0x49d   : > { %4294 = vmatmul.mubr.bf16.gmra.mrb[28].mxu1 %v1514_v38 }
 0x49e   : > { %4313 = vmatprep.mubr.msk.bf16.mxu1 %vm1217_vm0, %v1629_v16  ;;  %v1980_v4 = vpop.permute.xlu0 %1979 }
 0x4a0   : > { %v1976_v15 = vpop.permute.xlu1 %1975 }
 0x4a1   : > { %4331 = vmatprep.subr.bf16.mxu0 %v1976_v15 }
 0x4a2   : > { %4332 = vmatpush3.bf16.msra.mxu0 %v1976_v15 }
 0x4a3   : > { %4333 = vmatprep.subr.bf16.mxu0 %v1978_v41 }
 0x4a5   : > { %4314 = vmatmul.mubr.msk.bf16.vlgmr.msra.gmra.mrb[32].mxu1 %vm1217_vm0, %v1631_v14 }
 0x4a6   : > { %4317 = vmatprep.mubr.msk.bf16.mxu1 %vm1217_vm0, %v1633_v19  ;;  %4334 = vmatpush3.bf16.msra.mxu0 %v1978_v41 }
 0x4a7   : > { %4335 = vmatprep.subr.bf16.mxu0 %v1980_v4 }
 0x4aa   : > { %4336 = vmatpush3.bf16.msra.mxu0 %v1980_v4 }
 0x4ad   : > { %4318 = vmatmul.mubr.msk.bf16.gmra.mrb[36].mxu1 %vm1217_vm0, %v1635_v6 }
 0x4ae   : > { %4321 = vmatprep.mubr.msk.bf16.mxu1 %vm1217_vm0, %v1637_v61 }
 0x4b5   : > { %4322 = vmatmul.mubr.msk.bf16.gmra.mrb[40].mxu1 %vm1217_vm0, %v1639_v40 }
 0x4b6   : > { %4325 = vmatprep.mubr.msk.bf16.mxu1 %vm1217_vm0, %v1641_v31 }
 0x4bd   : > { %4326 = vmatmul.mubr.msk.bf16.gmra.mrb[44].mxu1 %vm1217_vm0, %v1643_v10 }
 0x4be   : > { %2858 = vmatprep.mubr.bf16.mxu1 %v5229_v18 }
 0x51f   : > { %v6138_v35 = vpop.f32.mrb[16].mxu1 }
 0x520   : > { %v6140_v60 = vpop.f32.mrb[17].mxu1 }
 0x521   : > { %v6142_v43 = vpop.f32.mrb[18].mxu1 }
 0x522   : > { %v1613_v44 = vpack.c.bf16 %v6142_v43, %v6138_v35  ;;  %v6146_v17 = vpop.f32.mrb[19].mxu1 }
 0x523   : > { %v1612_v46 = vpack.c.bf16 %v6146_v17, %v6140_v60 }
 0x558   : > { %v6150_v45 = vpop.f32.mrb[20].mxu1 }
 0x559   : > { %v6152_v13 = vpop.f32.mrb[21].mxu1 }
 0x55a   : > { %v6154_v47 = vpop.f32.mrb[22].mxu1 }
 0x55b   : > { %v1615_v55 = vpack.c.bf16 %v6154_v47, %v6150_v45  ;;  %v6158_v56 = vpop.f32.mrb[23].mxu1 }
 0x55c   : > { %v1614_v48 = vpack.c.bf16 %v6158_v56, %v6152_v13 }
 0x568   : > { %v6162_v27 = vpop.f32.mrb[24].mxu1 }
 0x569   : > { %v6164_v28 = vpop.f32.mrb[25].mxu1 }
 0x56a   : > { %v6166_v30 = vpop.f32.mrb[26].mxu1 }
 0x56b   : > { %v1617_v53 = vpack.c.bf16 %v6166_v30, %v6162_v27  ;;  %v6170_v57 = vpop.f32.mrb[27].mxu1 }
 0x56c   : > { %v1616_v8 = vpack.c.bf16 %v6170_v57, %v6164_v28 }
 0x570   : > { %v6174_v54 = vpop.f32.mrb[28].mxu1 }
 0x571   : > { %v6176_v26 = vpop.f32.mrb[29].mxu1 }
 0x572   : > { %v6178_v51 = vpop.f32.mrb[30].mxu1 }
 0x573   : > { %v1619_v16 = vpack.c.bf16 %v6178_v51, %v6174_v54  ;;  %v6182_v29 = vpop.f32.mrb[31].mxu1 }
 0x574   : > { %v1618_v19 = vpack.c.bf16 %v6182_v29, %v6176_v26  ;;  %v4953_v26 = vld [vmem:[%s5706_s18 + $0x8] sm:$0xff]  ;;  %v4954_v29 = vld [vmem:[%s5706_s18 + $0x10] sm:$0xff] }
 0x578   : > { %v4315_v32 = vpop.f32.mrb[32].mxu1 }
 0x579   : > { %1817 = vmax.xlane.f32.xlu0 %v4315_v32  ;;  %v1750_v49 = vpop.f32.mrb[33].mxu1 }
 0x57a   : > { %v4316_v11 = vpop.f32.mrb[34].mxu1 }
 0x57b   : > { %v1753_v52 = vpop.f32.mrb[35].mxu1 }
 0x57c   : > { %1815 = vmax.xlane.f32.xlu1 %v1753_v52 }
 0x57d   : > { %1813 = vmax.xlane.f32.xlu0 %v1750_v49 }
 0x580   : > { %v4319_v36 = vpop.f32.mrb[36].mxu1 }
 0x581   : > { %1819 = vmax.xlane.f32.xlu0 %v4316_v11  ;;  %v1766_v61 = vpop.f32.mrb[37].mxu1 }
 0x582   : > { %v4320_v20 = vpop.f32.mrb[38].mxu1 }
 0x583   : > { %1827 = vmax.xlane.f32.xlu1 %v4320_v20  ;;  %v1769_v21 = vpop.f32.mrb[39].mxu1 }
 0x585   : > { %1825 = vmax.xlane.f32.xlu0 %v4319_v36 }
 0x587   : > { %1823 = vmax.xlane.f32.xlu1 %v1769_v21 }
 0x588   : > { %v6186_v14 = vpop.f32.mrb[40].mxu1 }
 0x589   : > { %1821 = vmax.xlane.f32.xlu0 %v1766_v61  ;;  %v6188_v50 = vpop.f32.mrb[41].mxu1 }
 0x58a   : > { %v6190_v33 = vpop.f32.mrb[42].mxu1 }
 0x58b   : > { %1835 = vmax.xlane.f32.xlu1 %v6190_v33  ;;  %v6193_v12 = vpop.f32.mrb[43].mxu1 }
 0x58d   : > { %1833 = vmax.xlane.f32.xlu0 %v6186_v14 }
 0x58f   : > { %1831 = vmax.xlane.f32.xlu1 %v6193_v12 }
 0x590   : > { %v6197_v34 = vpop.f32.mrb[44].mxu1 }
 0x591   : > { %1829 = vmax.xlane.f32.xlu0 %v6188_v50  ;;  %v6200_v31 = vpop.f32.mrb[45].mxu1 }
 0x592   : > { %v6202_v63 = vpop.f32.mrb[46].mxu1 }
 0x593   : > { %v6204_v24 = vpop.f32.mrb[47].mxu1 }
 0x595   : > { %1841 = vmax.xlane.f32.xlu0 %v6197_v34 }
 0x599   : > { %1837 = vmax.xlane.f32.xlu0 %v6200_v31 }
 0x5a0   : > { %1983 = vrot.lane.b32.xlu1 %v5884_v37, %s5230_s30 }
 0x5af   : > { %1981 = vrot.lane.b32.xlu0 %v5889_v39, %s5230_s30 }
 0x5c4   : > { %1843 = vmax.xlane.f32.xlu1 %v6202_v63 }
 0x5c8   : > { %1839 = vmax.xlane.f32.xlu1 %v6204_v24 }
 0x606   : > { %v1818_v23 = vpop.xlane.xlu0 %1817 }
 0x607   : > { %v1847_v22 = vsub.f32 %v4315_v32, %v1818_v23 }
 0x609   : > { %v1865_v6 = vmul.f32 1.442695, %v1847_v22  ;;  %v1816_v7 = vpop.xlane.xlu1 %1815 }
 0x60a   : > { %v1814_v25 = vpop.xlane.xlu0 %1813  ;;  %v1846_v42 = vsub.f32 %v1753_v52, %v1816_v7 }
 0x60b   : > { %4696 = vpow2.f32 %v1865_v6  ;;  %v1845_v58 = vsub.f32 %v1750_v49, %v1814_v25 }
 0x60c   : > { %v1863_v38 = vmul.f32 1.442695, %v1846_v42 }
 0x60d   : > { %v1861_v59 = vmul.f32 1.442695, %v1845_v58 }
 0x60e   : > { %v1820_v1 = vpop.xlane.xlu0 %1819 }
 0x60f   : > { %4698 = vpow2.f32 %v1861_v59  ;;  %v1848_v40 = vsub.f32 %v4316_v11, %v1820_v1 }
 0x610   : > { %v1828_v37 = vpop.xlane.xlu1 %1827 }
 0x611   : > { %v1867_v9 = vmul.f32 1.442695, %v1848_v40  ;;  %v1852_v39 = vsub.f32 %v4320_v20, %v1828_v37 }
 0x612   : > { %v1826_v10 = vpop.xlane.xlu0 %1825 }
 0x613   : > { %4700 = vpow2.f32 %v1867_v9  ;;  %v1851_v41 = vsub.f32 %v4319_v36, %v1826_v10  ;;  %v1875_v23 = vmul.f32 1.442695, %v1852_v39 }
 0x614   : > { %v1824_v15 = vpop.xlane.xlu1 %1823  ;;  %4702 = vpow2.f32 %v1863_v38 }
 0x615   : > { %v6214_v4 = vpop.eup %4696  ;;  %v1873_v32 = vmul.f32 1.442695, %v1851_v41  ;;  %v1850_v49 = vsub.f32 %v1769_v21, %v1824_v15 }
 0x616   : > { %v1822_v22 = vpop.xlane.xlu0 %1821  ;;  %1897 = vadd.xlane.f32.xlu1 %v6214_v4 }
 0x617   : > { %4704 = vpow2.f32 %v1873_v32  ;;  %v1849_v52 = vsub.f32 %v1766_v61, %v1822_v22  ;;  %v1871_v36 = vmul.f32 1.442695, %v1850_v49 }
 0x618   : > { %4706 = vpow2.f32 %v1875_v23  ;;  %v1836_v59 = vpop.xlane.xlu1 %1835 }
 0x619   : > { %v6217_v11 = vpop.eup %4698  ;;  %v1869_v6 = vmul.f32 1.442695, %v1849_v52  ;;  %v1856_v41 = vsub.f32 %v6190_v33, %v1836_v59 }
 0x61a   : > { %v1834_v20 = vpop.xlane.xlu0 %1833  ;;  %1893 = vadd.xlane.f32.xlu1 %v6217_v11 }
 0x61b   : > { %4708 = vpow2.f32 %v1869_v6  ;;  %v1883_v23 = vmul.f32 1.442695, %v1856_v41  ;;  %v1855_v22 = vsub.f32 %v6186_v14, %v1834_v20 }
 0x61c   : > { %4710 = vpow2.f32 %v1871_v36  ;;  %v1832_v40 = vpop.xlane.xlu1 %1831 }
 0x61d   : > { %v6220_v25 = vpop.eup %4700  ;;  %v1854_v15 = vsub.f32 %v6193_v12, %v1832_v40  ;;  %v1881_v6 = vmul.f32 1.442695, %v1855_v22 }
 0x61e   : > { %v1830_v7 = vpop.xlane.xlu0 %1829  ;;  %1899 = vadd.xlane.f32.xlu1 %v6220_v25  ;;  %v6223_v58 = vpop.eup %4702 }
 0x61f   : > { %v1853_v10 = vsub.f32 %v6188_v50, %v1830_v7  ;;  %v1879_v49 = vmul.f32 1.442695, %v1854_v15 }
 0x620   : > { %v1984_v39 = vpop.permute.xlu1 %1983 }
 0x621   : > { %v6225_v21 = vpop.eup %4704  ;;  %v1877_v32 = vmul.f32 1.442695, %v1853_v10 }
 0x622   : > { %v1842_v61 = vpop.xlane.xlu0 %1841  ;;  %1905 = vadd.xlane.f32.xlu0 %v6225_v21  ;;  %1895 = vadd.xlane.f32.xlu1 %v6223_v58  ;;  %v6229_v42 = vpop.eup %4706 }
 0x623   : > { %4712 = vpow2.f32 %v1877_v32  ;;  %v1859_v33 = vsub.f32 %v6197_v34, %v1842_v61 }
 0x624   : > { %4714 = vpow2.f32 %v1883_v23 }
 0x625   : > { %v6231_v1 = vpop.eup %4708  ;;  %4716 = vpow2.f32 %v1879_v49  ;;  %v1889_v20 = vmul.f32 1.442695, %v1859_v33 }
 0x626   : > { %v1838_v37 = vpop.xlane.xlu0 %1837  ;;  %1901 = vadd.xlane.f32.xlu1 %v6231_v1  ;;  %1907 = vadd.xlane.f32.xlu0 %v6229_v42  ;;  %v6235_v9 = vpop.eup %4710  ;;  %4718 = vpow2.f32 %v1881_v6 }
 0x62a   : > { %v1982_v38 = vpop.permute.xlu0 %1981  ;;  %1903 = vadd.xlane.f32.xlu0 %v6235_v9 }
 0x62b   : > { %4337 = vmatprep.subr.bf16.mxu0 %v1982_v38 }
 0x62c   : > { %4338 = vmatpush3.bf16.msra.mxu0 %v1982_v38 }
 0x62d   : > { %4339 = vmatprep.subr.bf16.mxu0 %v1984_v39  ;;  %v6250_v59 = vpop.eup %4712 }
 0x62e   : > { %v6253_v40 = vpop.eup %4714 }
 0x630   : > { %4340 = vmatpush3.bf16.msra.mxu0 %v1984_v39 }
 0x637   : > { %1987 = vrot.lane.b32.xlu1 %v5908_v62, %s5230_s30  ;;  %v1857_v62 = vsub.f32 %v6200_v31, %v1838_v37  ;;  %v6255_v31 = vpop.eup %4716 }
 0x638   : > { %v6259_v34 = vpop.eup %4718 }
 0x639   : > { %v1885_v12 = vmul.f32 1.442695, %v1857_v62 }
 0x640   : > { %1985 = vrot.lane.b32.xlu0 %v5913_v0, %s5230_s30 }
 0x651   : > { %v1844_v52 = vpop.xlane.xlu1 %1843 }
 0x652   : > { %v1860_v0 = vsub.f32 %v6202_v63, %v1844_v52 }
 0x654   : > { %v1891_v14 = vmul.f32 1.442695, %v1860_v0 }
 0x655   : > { %v1840_v36 = vpop.xlane.xlu1 %1839 }
 0x656   : > { %v1858_v50 = vsub.f32 %v6204_v24, %v1840_v36 }
 0x658   : > { %v1887_v7 = vmul.f32 1.442695, %v1858_v50 }
 0x65a   : > { %4720 = vpow2.f32 %v1887_v7 }
 0x65b   : > { %1909 = vadd.xlane.f32.xlu1 %v6250_v59  ;;  %4722 = vpow2.f32 %v1885_v12 }
 0x65c   : > { %4724 = vpow2.f32 %v1891_v14 }
 0x65d   : > { %4726 = vpow2.f32 %v1889_v20 }
 0x65f   : > { %1915 = vadd.xlane.f32.xlu1 %v6253_v40  ;;  %1911 = vadd.xlane.f32.xlu0 %v6255_v31 }
 0x663   : > { %1913 = vadd.xlane.f32.xlu0 %v6259_v34 }
 0x664   : > { %v6262_v63 = vpop.eup %4720 }
 0x665   : > { %1919 = vadd.xlane.f32.xlu1 %v6262_v63  ;;  %v6265_v24 = vpop.eup %4722 }
 0x666   : > { %v6268_v61 = vpop.eup %4724 }
 0x667   : > { %1917 = vadd.xlane.f32.xlu0 %v6265_v24  ;;  %v6271_v37 = vpop.eup %4726 }
 0x669   : > { %1923 = vadd.xlane.f32.xlu1 %v6268_v61 }
 0x66b   : > { %1921 = vadd.xlane.f32.xlu0 %v6271_v37 }
 0x6a3   : > { %v1898_v38 = vpop.xlane.xlu1 %1897 }
 0x6a7   : > { %v1894_v39 = vpop.xlane.xlu1 %1893 }
 0x6a8   : > { %4728 = vrcp.f32 %v1894_v39 }
 0x6ab   : > { %v1900_v10 = vpop.xlane.xlu1 %1899 }
 0x6ac   : > { %4730 = vrcp.f32 %v1900_v10 }
 0x6af   : > { %v1906_v41 = vpop.xlane.xlu0 %1905  ;;  %v1896_v15 = vpop.xlane.xlu1 %1895 }
 0x6b0   : > { %4732 = vrcp.f32 %v1896_v15 }
 0x6b1   : > { %4734 = vrcp.f32 %v1898_v38 }
 0x6b2   : > { %v4729_v49 = vpop.eup %4728 }
 0x6b3   : > { %v1908_v32 = vpop.xlane.xlu0 %1907  ;;  %v1902_v23 = vpop.xlane.xlu1 %1901  ;;  %v1941_v36 = vmul.f32 %v4729_v49, %v6217_v11 }
 0x6b4   : > { %4736 = vrcp.f32 %v1902_v23 }
 0x6b6   : > { %v4731_v52 = vpop.eup %4730 }
 0x6b7   : > { %v1904_v22 = vpop.xlane.xlu0 %1903  ;;  %v1988_v33 = vpop.permute.xlu1 %1987  ;;  %v1944_v12 = vmul.f32 %v4731_v52, %v6220_v25 }
 0x6b8   : > { %4738 = vrcp.f32 %v1904_v22 }
 0x6b9   : > { %4740 = vrcp.f32 %v1908_v32 }
 0x6ba   : > { %v4733_v6 = vpop.eup %4732  ;;  %4742 = vrcp.f32 %v1906_v41 }
 0x6bb   : > { %v1986_v62 = vpop.permute.xlu0 %1985  ;;  %v1942_v0 = vmul.f32 %v4733_v6, %v6223_v58  ;;  %v4735_v50 = vpop.eup %4734 }
 0x6bc   : > { %4341 = vmatprep.subr.bf16.mxu0 %v1986_v62  ;;  %v1943_v20 = vmul.f32 %v4735_v50, %v6214_v4 }
 0x6bd   : > { %4342 = vmatpush3.bf16.msra.mxu0 %v1986_v62  ;;  %v1957_v7 = vpack.c.bf16 %v1942_v0, %v1941_v36 }
 0x6be   : > { %4343 = vmatprep.subr.bf16.mxu0 %v1988_v33  ;;  %v4737_v14 = vpop.eup %4736  ;;  %v1958_v39 = vpack.c.bf16 %v1944_v12, %v1943_v20 }
 0x6bf   : > { %4345 = vmatprep.mubr.bf16.mxu0 %v1957_v7  ;;  %v1945_v41 = vmul.f32 %v4737_v14, %v6231_v1 }
 0x6c1   : > { %4344 = vmatpush3.bf16.msra.mxu0 %v1988_v33 }
 0x6c2   : > { %v4739_v38 = vpop.eup %4738 }
 0x6c3   : > { %v4741_v10 = vpop.eup %4740  ;;  %v1946_v11 = vmul.f32 %v4739_v38, %v6235_v9 }
 0x6c4   : > { %4346 = vmatmul.mubr.bf16.vlgmr.msra.gmra.mrb[48].mxu0 %v1958_v39  ;;  %v4743_v58 = vpop.eup %4742  ;;  %v1948_v32 = vmul.f32 %v4741_v10, %v6229_v42 }
 0x6c5   : > { %v1959_v15 = vpack.c.bf16 %v1946_v11, %v1945_v41  ;;  %v1947_v25 = vmul.f32 %v4743_v58, %v6225_v21 }
 0x6c7   : > { %4349 = vmatprep.mubr.bf16.mxu0 %v1959_v15  ;;  %v1960_v23 = vpack.c.bf16 %v1948_v32, %v1947_v25  ;;  %v4584_v15 = vld [vmem:[%s5653_s24] sm:$0xff]   ;;  %v4585_v32 = vld [vmem:[%s5653_s24 + $0x8] sm:$0xff]  }
 0x6c8   : > { %4361 = vmatprep.subr.bf16.mxu0 %v4584_v15  ;;  %v4588_v25 = vld [vmem:[%s5653_s24 + $0x20] sm:$0xff]  }
 0x6c9   : > { %4362 = vmatpush3.bf16.msra.mxu0 %v4584_v15 }
 0x6ca   : > { %4363 = vmatprep.subr.bf16.mxu0 %v4585_v32 }
 0x6cc   : > { %4350 = vmatmul.mubr.bf16.gmra.mrb[52].mxu0 %v1960_v23  ;;  %v4591_v23 = vld [vmem:[%s5653_s24 + $0x38] sm:$0xff]  }
 0x6cd   : > { %4364 = vmatpush3.bf16.msra.mxu0 %v4585_v32 }
 0x6e8   : > { %v1910_v4 = vpop.xlane.xlu1 %1909 }
 0x6e9   : > { %4744 = vrcp.f32 %v1910_v4 }
 0x6ec   : > { %v1912_v22 = vpop.xlane.xlu0 %1911  ;;  %v1916_v49 = vpop.xlane.xlu1 %1915 }
 0x6ed   : > { %4746 = vrcp.f32 %v1912_v22 }
 0x6ee   : > { %4748 = vrcp.f32 %v1916_v49 }
 0x6f0   : > { %v1914_v52 = vpop.xlane.xlu0 %1913 }
 0x6f1   : > { %4750 = vrcp.f32 %v1914_v52 }
 0x6f2   : > { %v1920_v1 = vpop.xlane.xlu1 %1919 }
 0x6f3   : > { %4752 = vrcp.f32 %v1920_v1  ;;  %v4745_v6 = vpop.eup %4744 }
 0x6f4   : > { %v1918_v9 = vpop.xlane.xlu0 %1917  ;;  %v1949_v21 = vmul.f32 %v4745_v6, %v6250_v59 }
 0x6f5   : > { %4754 = vrcp.f32 %v1918_v9 }
 0x6f6   : > { %v1924_v62 = vpop.xlane.xlu1 %1923 }
 0x6f7   : > { %v4747_v42 = vpop.eup %4746  ;;  %4756 = vrcp.f32 %v1924_v62 }
 0x6f8   : > { %v1922_v36 = vpop.xlane.xlu0 %1921  ;;  %v1950_v0 = vmul.f32 %v4747_v42, %v6255_v31  ;;  %v4749_v50 = vpop.eup %4748 }
 0x6f9   : > { %4758 = vrcp.f32 %v1922_v36  ;;  %v1952_v14 = vmul.f32 %v4749_v50, %v6253_v40 }
 0x6fa   : > { %v1961_v33 = vpack.c.bf16 %v1950_v0, %v1949_v21 }
 0x6fb   : > { %v4751_v12 = vpop.eup %4750 }
 0x6fc   : > { %4353 = vmatprep.mubr.bf16.mxu0 %v1961_v33  ;;  %v1951_v7 = vmul.f32 %v4751_v12, %v6259_v34 }
 0x6fd   : > { %v4753_v20 = vpop.eup %4752 }
 0x6fe   : > { %v1962_v38 = vpack.c.bf16 %v1952_v14, %v1951_v7  ;;  %v1954_v31 = vmul.f32 %v4753_v20, %v6262_v63  ;;  %v4586_v63 = vld [vmem:[%s5653_s24 + $0x10] sm:$0xff]  }
 0x6ff   : > { %v4755_v39 = vpop.eup %4754  ;;  %4365 = vmatprep.subr.bf16.mxu0 %v4586_v63 }
 0x700   : > { %4354 = vmatmul.mubr.bf16.gmra.mrb[56].mxu0 %v1962_v38  ;;  %v1953_v59 = vmul.f32 %v4755_v39, %v6265_v24  ;;  %v4587_v24 = vld [vmem:[%s5653_s24 + $0x18] sm:$0xff]  }
 0x701   : > { %v4757_v10 = vpop.eup %4756  ;;  %4366 = vmatpush3.bf16.msra.mxu0 %v4586_v63 }
 0x702   : > { %v1963_v41 = vpack.c.bf16 %v1954_v31, %v1953_v59  ;;  %v1956_v40 = vmul.f32 %v4757_v10, %v6268_v61  ;;  %4367 = vmatprep.subr.bf16.mxu0 %v4587_v24  ;;  %v4589_v61 = vld [vmem:[%s5653_s24 + $0x28] sm:$0xff]  }
 0x703   : > { %v4759_v11 = vpop.eup %4758 }
 0x704   : > { %4357 = vmatprep.mubr.bf16.mxu0 %v1963_v41  ;;  %v1955_v34 = vmul.f32 %v4759_v11, %v6271_v37  ;;  %v4590_v37 = vld [vmem:[%s5653_s24 + $0x30] sm:$0xff]   ;;  %s7131_s24 = sld [smem:[#allocation32_spill]] }
 0x705   : > { %4368 = vmatpush3.bf16.msra.mxu0 %v4587_v24 }
 0x706   : > { %v1964_v58 = vpack.c.bf16 %v1956_v40, %v1955_v34  ;;  %4369 = vmatprep.subr.bf16.mxu0 %v4588_v25 }
 0x708   : > { %4358 = vmatmul.mubr.bf16.gmra.mrb[60].mxu0 %v1964_v58 }
 0x709   : > { %4370 = vmatpush3.bf16.msra.mxu0 %v4588_v25  ;;  %v4955_v25 = vld [vmem:[%s5706_s18 + $0x18] sm:$0xff] }
 0x70a   : > { %4371 = vmatprep.subr.bf16.mxu0 %v4589_v61 }
 0x70d   : > { %4372 = vmatpush3.bf16.msra.mxu0 %v4589_v61 }
 0x70e   : > { %4373 = vmatprep.subr.bf16.mxu0 %v4590_v37 }
 0x711   : > { %4374 = vmatpush3.bf16.msra.mxu0 %v4590_v37 }
 0x712   : > { %4375 = vmatprep.subr.bf16.mxu0 %v4591_v23 }
 0x715   : > { %4376 = vmatpush3.bf16.msra.mxu0 %v4591_v23 }
 0x797   : > { %v4347_v4 = vpop.f32.mrb[48].mxu0 }
 0x798   : > { %v2031_v22 = vpop.f32.mrb[49].mxu0 }
 0x799   : > { %v4348_v49 = vpop.f32.mrb[50].mxu0 }
 0x79a   : > { %v2095_v52 = vpack.c.bf16 %v4348_v49, %v4347_v4  ;;  %v2034_v1 = vpop.f32.mrb[51].mxu0  ;;  %v4956_v49 = vld [vmem:[%s5706_s18 + $0x20] sm:$0xff] }
 0x79b   : > { %v2094_v9 = vpack.c.bf16 %v2034_v1, %v2031_v22 }
 0x79c   : > { %2112 = vrot.lane.b32.xlu1 %v2095_v52, %s5230_s30 }
 0x79d   : > { %2110 = vrot.lane.b32.xlu0 %v2094_v9, %s5230_s30 }
 0x79f   : > { %v4351_v6 = vpop.f32.mrb[52].mxu0 }
 0x7a0   : > { %v2047_v62 = vpop.f32.mrb[53].mxu0 }
 0x7a1   : > { %v4352_v42 = vpop.f32.mrb[54].mxu0 }
 0x7a2   : > { %v2097_v36 = vpack.c.bf16 %v4352_v42, %v4351_v6  ;;  %v2050_v21 = vpop.f32.mrb[55].mxu0 }
 0x7a3   : > { %v2096_v0 = vpack.c.bf16 %v2050_v21, %v2047_v62  ;;  %v4957_v62 = vld [vmem:[%s5706_s18 + $0x28] sm:$0xff] }
 0x7a5   : > { %2114 = vrot.lane.b32.xlu1 %v2096_v0, %s5230_s30  ;;  %v4959_v0 = vld [vmem:[%s5706_s18 + $0x38] sm:$0xff] }
 0x7a9   : > { %2116 = vrot.lane.b32.xlu1 %v2097_v36, %s5230_s30  ;;  %v4958_v36 = vld [vmem:[%s5706_s18 + $0x30] sm:$0xff] }
 0x7d3   : > { %v4355_v50 = vpop.f32.mrb[56].mxu0 }
 0x7d4   : > { %v2063_v33 = vpop.f32.mrb[57].mxu0 }
 0x7d5   : > { %v4356_v12 = vpop.f32.mrb[58].mxu0 }
 0x7d6   : > { %v2099_v7 = vpack.c.bf16 %v4356_v12, %v4355_v50  ;;  %v2066_v14 = vpop.f32.mrb[59].mxu0 }
 0x7d7   : > { %v2098_v20 = vpack.c.bf16 %v2066_v14, %v2063_v33 }
 0x7d8   : > { %2120 = vrot.lane.b32.xlu1 %v2099_v7, %s5230_s30 }
 0x7d9   : > { %2118 = vrot.lane.b32.xlu0 %v2098_v20, %s5230_s30 }
 0x7db   : > { %v4359_v38 = vpop.f32.mrb[60].mxu0 }
 0x7dc   : > { %v2079_v39 = vpop.f32.mrb[61].mxu0 }
 0x7dd   : > { %v4360_v59 = vpop.f32.mrb[62].mxu0 }
 0x7de   : > { %v2101_v31 = vpack.c.bf16 %v4360_v59, %v4359_v38  ;;  %v2082_v10 = vpop.f32.mrb[63].mxu0 }
 0x7df   : > { %v2100_v41 = vpack.c.bf16 %v2082_v10, %v2079_v39  ;;  %v4960_v39 = vld [vmem:[%s5706_s18 + $0x40] sm:$0xff] }
 0x7e0   : > { %2124 = vrot.lane.b32.xlu1 %v2101_v31, %s5230_s30 }
 0x7e1   : > { %2122 = vrot.lane.b32.xlu0 %v2100_v41, %s5230_s30  ;;  %v4961_v41 = vld [vmem:[%s5706_s18 + $0x48] sm:$0xff] }
 0x80e   : > { %v2113_v11 = vpop.permute.xlu1 %2112 }
 0x80f   : > { %v2111_v34 = vpop.permute.xlu0 %2110  ;;  %v2132_v58 = vsel %vm1217_vm0, %v1613_v44, %v2113_v11 }
 0x810   : > { %v2128_v40 = vsel %vm1217_vm0, %v1612_v46, %v2111_v34  ;;  %v4962_v34 = vld [vmem:[%s5706_s18 + $0x50] sm:$0xff] }
 0x811   : > { %4377 = vmatprep.mubr.bf16.mxu0 %v2128_v40 }
 0x812   : > { %4378 = vmatmul.mubr.bf16.vlgmr.msra.gmra.mrb[64].mxu0 %v2132_v58 }
 0x817   : > { %v2115_v15 = vpop.permute.xlu1 %2114 }
 0x818   : > { %v2136_v32 = vsel %vm1217_vm0, %v1614_v48, %v2115_v15 }
 0x819   : > { %4381 = vmatprep.mubr.bf16.mxu0 %v2136_v32  ;;  %v4963_v32 = vld [vmem:[%s5706_s18 + $0x58] sm:$0xff] }
 0x81b   : > { %v2117_v63 = vpop.permute.xlu1 %2116 }
 0x81c   : > { %v2140_v60 = vsel %vm1217_vm0, %v1615_v55, %v2117_v63  ;;  %v6343_v55 = vld [vmem:[%s7130_s4] ss:$0 sm:$0xff] }
 0x81d   : > { %4382 = vmatmul.mubr.bf16.gmra.mrb[68].mxu0 %v2140_v60 }
 0x84a   : > { %v2121_v35 = vpop.permute.xlu1 %2120 }
 0x84b   : > { %v2119_v43 = vpop.permute.xlu0 %2118  ;;  %v2148_v17 = vsel %vm1217_vm0, %v1617_v53, %v2121_v35 }
 0x84c   : > { %v2144_v44 = vsel %vm1217_vm0, %v1616_v8, %v2119_v43  ;;  %v4952_v8 = vld [vmem:[%s5706_s18] sm:$0xff] }
 0x84d   : > { %4385 = vmatprep.mubr.bf16.mxu0 %v2144_v44 }
 0x84e   : > { %4386 = vmatmul.mubr.bf16.gmra.mrb[72].mxu0 %v2148_v17  ;;  %v4964_v17 = vld [vmem:[%s5706_s18 + $0x60] sm:$0xff] }
 0x852   : > { %v2125_v46 = vpop.permute.xlu1 %2124 }
 0x853   : > { %v2123_v45 = vpop.permute.xlu0 %2122  ;;  %v2156_v47 = vsel %vm1217_vm0, %v1619_v16, %v2125_v46 }
 0x854   : > { %v2152_v13 = vsel %vm1217_vm0, %v1618_v19, %v2123_v45 }
 0x855   : > { %4389 = vmatprep.mubr.bf16.mxu0 %v2152_v13 }
 0x856   : > { %4390 = vmatmul.mubr.bf16.gmra.mrb[76].mxu0 %v2156_v47  ;;  %v4965_v47 = vld [vmem:[%s5706_s18 + $0x68] sm:$0xff] }
 0x8e5   : > { %v4379_v56 = vpop.f32.mrb[64].mxu0 }
 0x8e6   : > { %v2263_v48 = vpop.f32.mrb[65].mxu0  ;;  %v2272_v53 = vadd.f32 %v4379_v56, %v6343_v55 }
 0x8e7   : > { %v2264_v27 = vadd.f32 %v6343_v55, %v2263_v48  ;;  %v4380_v28 = vpop.f32.mrb[66].mxu0  ;;  %v4966_v48 = vld [vmem:[%s5706_s18 + $0x70] sm:$0xff] }
 0x8e8   : > { %v2266_v30 = vpop.f32.mrb[67].mxu0  ;;  %v2275_v16 = vadd.f32 %v4380_v28, %v6343_v55  ;;  %v6358_v19 = vadd.f32 %v4954_v29, %v2272_v53  ;;  %v4967_v28 = vld [vmem:[%s5706_s18 + $0x78] sm:$0xff] }
 0x8e9   : > { %v2267_v57 = vadd.f32 %v6343_v55, %v2266_v30  ;;  %v6349_v54 = vadd.f32 %v4952_v8, %v2264_v27 }
 0x8ea   : > { %v6362_v61 = vadd.f32 %v4955_v25, %v2275_v16 }
 0x8eb   : > { %v6352_v51 = vadd.f32 %v4953_v26, %v2267_v57  ;;  %2344 = vadd.xlane.f32.xlu0 %v6349_v54 }
 0x8ed   : > { %2346 = vadd.xlane.f32.xlu1 %v6352_v51 }
 0x8ef   : > { %2348 = vadd.xlane.f32.xlu0 %v6358_v19 }
 0x8f0   : > { %v4383_v24 = vpop.f32.mrb[68].mxu0 }
 0x8f1   : > { %v2279_v37 = vpop.f32.mrb[69].mxu0  ;;  %v2288_v9 = vadd.f32 %v4383_v24, %v6343_v55 }
 0x8f2   : > { %v2280_v23 = vadd.f32 %v6343_v55, %v2279_v37  ;;  %v4384_v4 = vpop.f32.mrb[70].mxu0 }
 0x8f3   : > { %2350 = vadd.xlane.f32.xlu0 %v6362_v61  ;;  %v2282_v22 = vpop.f32.mrb[71].mxu0  ;;  %v2291_v6 = vadd.f32 %v4384_v4, %v6343_v55  ;;  %v6378_v21 = vadd.f32 %v4958_v36, %v2288_v9 }
 0x8f4   : > { %v6367_v52 = vadd.f32 %v4956_v49, %v2280_v23  ;;  %v2283_v1 = vadd.f32 %v6343_v55, %v2282_v22 }
 0x8f5   : > { %v6381_v50 = vadd.f32 %v4959_v0, %v2291_v6 }
 0x8f6   : > { %v6373_v42 = vadd.f32 %v4957_v62, %v2283_v1 }
 0x8f7   : > { %2352 = vadd.xlane.f32.xlu0 %v6367_v52 }
 0x8f8   : > { %2354 = vadd.xlane.f32.xlu1 %v6373_v42 }
 0x8fb   : > { %2356 = vadd.xlane.f32.xlu0 %v6378_v21 }
 0x8fc   : > { %2358 = vadd.xlane.f32.xlu1 %v6381_v50 }
 0x921   : > { %v4387_v33 = vpop.f32.mrb[72].mxu0 }
 0x922   : > { %v2295_v12 = vpop.f32.mrb[73].mxu0  ;;  %v2304_v38 = vadd.f32 %v4387_v33, %v6343_v55 }
 0x923   : > { %v2296_v7 = vadd.f32 %v6343_v55, %v2295_v12  ;;  %v4388_v14 = vpop.f32.mrb[74].mxu0 }
 0x924   : > { %v2298_v20 = vpop.f32.mrb[75].mxu0  ;;  %v2307_v10 = vadd.f32 %v4388_v14, %v6343_v55  ;;  %v6397_v40 = vadd.f32 %v4962_v34, %v2304_v38  ;;  %v4603_v34 = vld [vmem:[%s5655_s14 + $0x34] ss:$8 sps:$4 sm:$0xff]  }
 0x925   : > { %v6388_v59 = vadd.f32 %v4960_v39, %v2296_v7  ;;  %v2299_v31 = vadd.f32 %v6343_v55, %v2298_v20  ;;  %v4594_v39 = vld [vmem:[%s5655_s14 + $0x4] ss:$8 sps:$4 sm:$0xff]  }
 0x926   : > { %v6401_v63 = vadd.f32 %v4963_v32, %v2307_v10  ;;  %2826 = vmatprep.subr.bf16.mxu1 %v4594_v39  ;;  %v4600_v10 = vld [vmem:[%s5655_s14 + $0x24] ss:$8 sps:$4 sm:$0xff]   ;;  %v4604_v32 = vld [vmem:[%s5655_s14 + $0x40] ss:$8 sps:$4 sm:$0xff]  }
 0x927   : > { %v6393_v11 = vadd.f32 %v4961_v41, %v2299_v31  ;;  %2360 = vadd.xlane.f32.xlu0 %v6388_v59  ;;  %v4597_v31 = vld [vmem:[%s5655_s14 + $0x14] ss:$8 sps:$4 sm:$0xff]   ;;  %v4598_v41 = vld [vmem:[%s5655_s14 + $0x20] ss:$8 sps:$4 sm:$0xff]  }
 0x929   : > { %2362 = vadd.xlane.f32.xlu1 %v6393_v11  ;;  %v4391_v58 = vpop.f32.mrb[76].mxu0 }
 0x92a   : > { %v2311_v15 = vpop.f32.mrb[77].mxu0  ;;  %v2320_v44 = vadd.f32 %v4391_v58, %v6343_v55  ;;  %v4601_v58 = vld [vmem:[%s5655_s14 + $0x30] ss:$8 sps:$4 sm:$0xff]  }
 0x92b   : > { %v2312_v60 = vadd.f32 %v6343_v55, %v2311_v15  ;;  %2364 = vadd.xlane.f32.xlu0 %v6397_v40  ;;  %v4392_v35 = vpop.f32.mrb[78].mxu0  ;;  %v4606_v15 = vld [vmem:[%s5655_s14 + $0x44] ss:$8 sps:$4 sm:$0xff]  }
 0x92c   : > { %v2314_v43 = vpop.f32.mrb[79].mxu0  ;;  %v2323_v13 = vadd.f32 %v4392_v35, %v6343_v55  ;;  %v6417_v27 = vadd.f32 %v4966_v48, %v2320_v44  ;;  %v4607_v35 = vld [vmem:[%s5655_s14 + $0x50] ss:$8 sps:$4 sm:$0xff]   ;;  %v4610_v44 = vld [vmem:[%s5655_s14 + $0x60] ss:$8 sps:$4 sm:$0xff]  }
 0x92d   : > { %v6407_v46 = vadd.f32 %v4964_v17, %v2312_v60  ;;  %v2315_v45 = vadd.f32 %v6343_v55, %v2314_v43  ;;  %2366 = vadd.xlane.f32.xlu1 %v6401_v63  ;;  %v4609_v60 = vld [vmem:[%s5655_s14 + $0x54] ss:$8 sps:$4 sm:$0xff]   ;;  %v4612_v43 = vld [vmem:[%s5655_s14 + $0x64] ss:$8 sps:$4 sm:$0xff]   ;;  %v4613_v17 = vld [vmem:[%s5655_s14 + $0x70] ss:$8 sps:$4 sm:$0xff]  }
 0x92e   : > { %v6421_v30 = vadd.f32 %v4967_v28, %v2323_v13 }
 0x92f   : > { %v6413_v56 = vadd.f32 %v4965_v47, %v2315_v45  ;;  %2368 = vadd.xlane.f32.xlu0 %v6407_v46  ;;  %v4615_v45 = vld [vmem:[%s5655_s14 + $0x74] ss:$8 sps:$4 sm:$0xff]  }
 0x931   : > { %2370 = vadd.xlane.f32.xlu1 %v6413_v56 }
 0x933   : > { %2372 = vadd.xlane.f32.xlu0 %v6417_v27 }
 0x935   : > { %2374 = vadd.xlane.f32.xlu1 %v6421_v30 }
 0x978   : > { %v2345_v53 = vpop.xlane.xlu0 %2344 }
 0x979   : > { %v2377_v57 = vmul.f32 0.0078125, %v2345_v53 }
 0x97a   : > { %v2347_v55 = vpop.xlane.xlu1 %2346 }
 0x97b   : > { %v6426_v8 = vsub.f32 %v6349_v54, %v2377_v57  ;;  %v2378_v26 = vmul.f32 0.0078125, %v2347_v55 }
 0x97c   : > { %v2349_v16 = vpop.xlane.xlu0 %2348 }
 0x97d   : > { %v6429_v29 = vsub.f32 %v6352_v51, %v2378_v26  ;;  %v2379_v24 = vmul.f32 0.0078125, %v2349_v16  ;;  %v2409_v25 = vmul.f32 %v6426_v8, %v6426_v8 }
 0x97f   : > { %v6434_v37 = vsub.f32 %v6358_v19, %v2379_v24  ;;  %2425 = vadd.xlane.f32.xlu0 %v2409_v25  ;;  %v2410_v23 = vmul.f32 %v6429_v29, %v6429_v29 }
 0x980   : > { %v2351_v4 = vpop.xlane.xlu0 %2350 }
 0x981   : > { %v2380_v22 = vmul.f32 0.0078125, %v2351_v4  ;;  %2427 = vadd.xlane.f32.xlu1 %v2410_v23  ;;  %v2411_v54 = vmul.f32 %v6434_v37, %v6434_v37 }
 0x983   : > { %v6441_v51 = vsub.f32 %v6362_v61, %v2380_v22  ;;  %2429 = vadd.xlane.f32.xlu0 %v2411_v54 }
 0x984   : > { %v2353_v49 = vpop.xlane.xlu0 %2352 }
 0x985   : > { %v2381_v1 = vmul.f32 0.0078125, %v2353_v49  ;;  %v2355_v9 = vpop.xlane.xlu1 %2354  ;;  %v2412_v19 = vmul.f32 %v6441_v51, %v6441_v51 }
 0x986   : > { %v2382_v6 = vmul.f32 0.0078125, %v2355_v9 }
 0x987   : > { %v6446_v62 = vsub.f32 %v6367_v52, %v2381_v1  ;;  %2431 = vadd.xlane.f32.xlu1 %v2412_v19 }
 0x988   : > { %v6449_v36 = vsub.f32 %v6373_v42, %v2382_v6  ;;  %v2357_v0 = vpop.xlane.xlu0 %2356 }
 0x989   : > { %v2383_v61 = vmul.f32 0.0078125, %v2357_v0  ;;  %v2359_v33 = vpop.xlane.xlu1 %2358  ;;  %v2413_v12 = vmul.f32 %v6446_v62, %v6446_v62 }
 0x98a   : > { %v2384_v7 = vmul.f32 0.0078125, %v2359_v33  ;;  %v2414_v14 = vmul.f32 %v6449_v36, %v6449_v36 }
 0x98b   : > { %v6456_v52 = vsub.f32 %v6378_v21, %v2383_v61  ;;  %2433 = vadd.xlane.f32.xlu0 %v2413_v12  ;;  %v4592_v21 = vld [vmem:[%s5655_s14] ss:$8 sps:$4 sm:$0xff]  }
 0x98c   : > { %v6459_v42 = vsub.f32 %v6381_v50, %v2384_v7  ;;  %2435 = vadd.xlane.f32.xlu1 %v2414_v14  ;;  %2827 = vmatpush1.bf16.msra.mxu1 %v4592_v21  ;;  %v4595_v50 = vld [vmem:[%s5655_s14 + $0x10] ss:$8 sps:$4 sm:$0xff]   ;;  %s7132_s14 = scalar_lea.vmem %s7131_s24, %s5664_s13 }
 0x98d   : > { %v2415_v20 = vmul.f32 %v6456_v52, %v6456_v52  ;;  %2828 = vmatprep.subr.bf16.mxu1 %v4597_v31 }
 0x98e   : > { %v2416_v38 = vmul.f32 %v6459_v42, %v6459_v42 }
 0x98f   : > { %2437 = vadd.xlane.f32.xlu0 %v2415_v20  ;;  %v6523_v20 = vld [vmem:[%s5708_s29] sm:$0xff]  }
 0x990   : > { %2439 = vadd.xlane.f32.xlu1 %v2416_v38  ;;  %2829 = vmatpush1.bf16.msra.mxu1 %v4595_v50  ;;  %v6526_v38 = vld [vmem:[%s5708_s29 + $0x48] sm:$0xff]  }
 0x991   : > { %2830 = vmatprep.subr.bf16.mxu1 %v4600_v10 }
 0x994   : > { %2831 = vmatpush1.bf16.msra.mxu1 %v4598_v41 }
 0x995   : > { %2832 = vmatprep.subr.bf16.mxu1 %v4603_v34 }
 0x998   : > { %2833 = vmatpush1.bf16.msra.mxu1 %v4601_v58 }
 0x999   : > { %2834 = vmatprep.subr.bf16.mxu1 %v4606_v15 }
 0x99c   : > { %2835 = vmatpush1.bf16.msra.mxu1 %v4604_v32 }
 0x99d   : > { %2836 = vmatprep.subr.bf16.mxu1 %v4609_v60 }
 0x9a0   : > { %2837 = vmatpush1.bf16.msra.mxu1 %v4607_v35 }
 0x9a1   : > { %2838 = vmatprep.subr.bf16.mxu1 %v4612_v43 }
 0x9a4   : > { %2839 = vmatpush1.bf16.msra.mxu1 %v4610_v44 }
 0x9a5   : > { %2840 = vmatprep.subr.bf16.mxu1 %v4615_v45 }
 0x9a8   : > { %2841 = vmatpush1.bf16.msra.mxu1 %v4613_v17 }
 0x9b4   : > { %v2361_v13 = vpop.xlane.xlu0 %2360 }
 0x9b5   : > { %v2385_v47 = vmul.f32 0.0078125, %v2361_v13 }
 0x9b6   : > { %v2363_v48 = vpop.xlane.xlu1 %2362 }
 0x9b7   : > { %v6482_v28 = vsub.f32 %v6388_v59, %v2385_v47  ;;  %v2386_v53 = vmul.f32 0.0078125, %v2363_v48 }
 0x9b8   : > { %v2365_v57 = vpop.xlane.xlu0 %2364 }
 0x9b9   : > { %v6485_v55 = vsub.f32 %v6393_v11, %v2386_v53  ;;  %v2387_v26 = vmul.f32 0.0078125, %v2365_v57  ;;  %v2417_v16 = vmul.f32 %v6482_v28, %v6482_v28 }
 0x9ba   : > { %v2367_v24 = vpop.xlane.xlu1 %2366 }
 0x9bb   : > { %v6490_v25 = vsub.f32 %v6397_v40, %v2387_v26  ;;  %v2388_v23 = vmul.f32 0.0078125, %v2367_v24  ;;  %2441 = vadd.xlane.f32.xlu0 %v2417_v16  ;;  %v2418_v4 = vmul.f32 %v6485_v55, %v6485_v55 }
 0x9bc   : > { %v2369_v59 = vpop.xlane.xlu0 %2368 }
 0x9bd   : > { %v6495_v22 = vsub.f32 %v6401_v63, %v2388_v23  ;;  %v2389_v54 = vmul.f32 0.0078125, %v2369_v59  ;;  %2443 = vadd.xlane.f32.xlu1 %v2418_v4  ;;  %v2419_v11 = vmul.f32 %v6490_v25, %v6490_v25 }
 0x9be   : > { %v2371_v49 = vpop.xlane.xlu1 %2370 }
 0x9bf   : > { %v6500_v1 = vsub.f32 %v6407_v46, %v2389_v54  ;;  %v2390_v40 = vmul.f32 0.0078125, %v2371_v49  ;;  %2445 = vadd.xlane.f32.xlu0 %v2419_v11  ;;  %v2420_v9 = vmul.f32 %v6495_v22, %v6495_v22 }
 0x9c0   : > { %v2373_v19 = vpop.xlane.xlu0 %2372 }
 0x9c1   : > { %v6505_v6 = vsub.f32 %v6413_v56, %v2390_v40  ;;  %v2391_v63 = vmul.f32 0.0078125, %v2373_v19  ;;  %2447 = vadd.xlane.f32.xlu1 %v2420_v9  ;;  %v2421_v0 = vmul.f32 %v6500_v1, %v6500_v1 }
 0x9c2   : > { %v2375_v61 = vpop.xlane.xlu1 %2374 }
 0x9c3   : > { %v6510_v46 = vsub.f32 %v6417_v27, %v2391_v63  ;;  %v2392_v33 = vmul.f32 0.0078125, %v2375_v61  ;;  %2449 = vadd.xlane.f32.xlu0 %v2421_v0  ;;  %v2422_v12 = vmul.f32 %v6505_v6, %v6505_v6  ;;  %v4616_v27 = vld [vmem:[%s5708_s29 + $0x40] sm:$0xff]  }
 0x9c4   : > { %4137 = vmatprep.subr.bf16.mxu0 %v4616_v27  ;;  %4393 = vmatprep.subr.bf16.mxu1 %v4616_v27 }
 0x9c5   : > { %v6515_v56 = vsub.f32 %v6421_v30, %v2392_v33  ;;  %2451 = vadd.xlane.f32.xlu1 %v2422_v12  ;;  %v2423_v7 = vmul.f32 %v6510_v46, %v6510_v46  ;;  %4138 = vmatpush3.bf16.msra.mxu0 %v6523_v20  ;;  %v6530_v30 = vld [vmem:[%s5708_s29 + $0x8] sm:$0xff]  }
 0x9c6   : > { %4139 = vmatprep.subr.bf16.mxu0 %v6526_v38 }
 0x9c7   : > { %2453 = vadd.xlane.f32.xlu0 %v2423_v7  ;;  %v2424_v14 = vmul.f32 %v6515_v56, %v6515_v56 }
 0x9c9   : > { %2455 = vadd.xlane.f32.xlu1 %v2424_v14  ;;  %4140 = vmatpush3.bf16.msra.mxu0 %v6530_v30 }
 0xa0c   : > { %v2426_v39 = vpop.xlane.xlu0 %2425 }
 0xa0d   : > { %v2457_v21 = vmul.f32 0.007874016, %v2426_v39 }
 0xa0e   : > { %v2428_v31 = vpop.xlane.xlu1 %2427 }
 0xa0f   : > { %4760 = vrsqrt.f32 %v2457_v21  ;;  %v2458_v50 = vmul.f32 0.007874016, %v2428_v31  ;;  %vm2475_vm1 = vcmp.eq.f32.partialorder %v2457_v21, inf  ;;  %v2478_v17 = vand.u32 2147483648, %v2457_v21 }
 0xa10   : > { %v2430_v10 = vpop.xlane.xlu0 %2429  ;;  %vm2477_vm2 = vcmp.eq.f32.partialorder %v2457_v21, 0.0 }
 0xa11   : > { %v2459_v41 = vmul.f32 0.007874016, %v2430_v10  ;;  %4762 = vrsqrt.f32 %v2458_v50  ;;  %vm2482_vm3 = vcmp.eq.f32.partialorder %v2458_v50, inf  ;;  %vm2484_vm4 = vcmp.eq.f32.partialorder %v2458_v50, 0.0 }
 0xa12   : > { %v2485_v23 = vand.u32 2147483648, %v2458_v50 }
 0xa13   : > { %4764 = vrsqrt.f32 %v2459_v41  ;;  %vm2489_vm5 = vcmp.eq.f32.partialorder %v2459_v41, inf  ;;  %v2492_v11 = vand.u32 2147483648, %v2459_v41  ;;  %vm2491_vm6 = vcmp.eq.f32.partialorder %v2459_v41, 0.0 }
 0xa14   : > { %v2432_v34 = vpop.xlane.xlu1 %2431 }
 0xa15   : > { %v2460_v58 = vmul.f32 0.007874016, %v2432_v34 }
 0xa17   : > { %4766 = vrsqrt.f32 %v2460_v58  ;;  %vm2496_vm7 = vcmp.eq.f32.partialorder %v2460_v58, inf  ;;  %v2499_v33 = vand.u32 2147483648, %v2460_v58  ;;  %vm2498_vm8 = vcmp.eq.f32.partialorder %v2460_v58, 0.0 }
 0xa18   : > { %v2434_v15 = vpop.xlane.xlu0 %2433 }
 0xa19   : > { %v4761_v32 = vpop.eup %4760  ;;  %v2461_v60 = vmul.f32 0.007874016, %v2434_v15  ;;  %v2436_v35 = vpop.xlane.xlu1 %2435 }
 0xa1a   : > { %v2474_v43 = vmul.f32 %v4761_v32, %v2457_v21  ;;  %v2462_v44 = vmul.f32 0.007874016, %v2436_v35 }
 0xa1b   : > { %4768 = vrsqrt.f32 %v2461_v60  ;;  %v4763_v45 = vpop.eup %4762  ;;  %vm2503_vm9 = vcmp.eq.f32.partialorder %v2461_v60, inf  ;;  %vm2505_vm10 = vcmp.eq.f32.partialorder %v2461_v60, 0.0  ;;  %v2506_v31 = vand.u32 2147483648, %v2461_v60 }
 0xa1c   : > { %v2476_v13 = vsel %vm2475_vm1, %v2457_v21, %v2474_v43  ;;  %4770 = vrsqrt.f32 %v2462_v44  ;;  %v2438_v47 = vpop.xlane.xlu0 %2437  ;;  %v2481_v57 = vmul.f32 %v4763_v45, %v2458_v50  ;;  %vm2510_vm11 = vcmp.eq.f32.partialorder %v2462_v44, inf }
 0xa1d   : > { %v4765_v48 = vpop.eup %4764  ;;  %v2479_v53 = vsel %vm2477_vm2, %v2478_v17, %v2476_v13  ;;  %v2463_v26 = vmul.f32 0.007874016, %v2438_v47  ;;  %v2440_v16 = vpop.xlane.xlu1 %2439  ;;  %vm2512_vm12 = vcmp.eq.f32.partialorder %v2462_v44, 0.0 }
 0xa1e   : > { %v2585_v24 = vadd.f32 1e-05, %v2479_v53  ;;  %v2488_v4 = vmul.f32 %v4765_v48, %v2459_v41  ;;  %v6534_v59 = vmul.f32 0.007874016, %v2440_v16  ;;  %v2483_v54 = vsel %vm2482_vm3, %v2458_v50, %v2481_v57 }
 0xa1f   : > { %4772 = vrsqrt.f32 %v2463_v26  ;;  %v2486_v49 = vsel %vm2484_vm4, %v2485_v23, %v2483_v54  ;;  %vm2517_vm13 = vcmp.eq.f32.partialorder %v2463_v26, inf  ;;  %vm2519_vm14 = vcmp.eq.f32.partialorder %v2463_v26, 0.0 }
 0xa20   : > { %4774 = vrcp.f32 %v2585_v24  ;;  %v2490_v40 = vsel %vm2489_vm5, %v2459_v41, %v2488_v4  ;;  %v2586_v19 = vadd.f32 1e-05, %v2486_v49  ;;  %v2513_v41 = vand.u32 2147483648, %v2462_v44  ;;  %v6557_v49 = vld [vmem:[%s7134_s15] ss:$0 sm:$0xff] }
 0xa21   : > { %v4767_v9 = vpop.eup %4766  ;;  %v2493_v63 = vsel %vm2491_vm6, %v2492_v11, %v2490_v40  ;;  %4776 = vrsqrt.f32 %v6534_v59  ;;  %v2520_v47 = vand.u32 2147483648, %v2463_v26  ;;  %vm2524_vm15 = vcmp.eq.f32.partialorder %v6534_v59, inf }
 0xa22   : > { %v2587_v0 = vadd.f32 1e-05, %v2493_v63  ;;  %v2495_v61 = vmul.f32 %v4767_v9, %v2460_v58  ;;  %4778 = vrcp.f32 %v2586_v19  ;;  %vm2526_vm0 = vcmp.eq.f32.partialorder %v6534_v59, 0.0 }
 0xa23   : > { %v2527_v24 = vand.u32 2147483648, %v6534_v59 }
 0xa24   : > { %v2497_v12 = vsel %vm2496_vm7, %v2460_v58, %v2495_v61  ;;  %4780 = vrcp.f32 %v2587_v0 }
 0xa25   : > { %v4769_v7 = vpop.eup %4768  ;;  %v2500_v14 = vsel %vm2498_vm8, %v2499_v33, %v2497_v12 }
 0xa26   : > { %v4771_v27 = vpop.eup %4770  ;;  %v2588_v39 = vadd.f32 1e-05, %v2500_v14  ;;  %v2502_v21 = vmul.f32 %v4769_v7, %v2461_v60 }
 0xa27   : > { %v2509_v50 = vmul.f32 %v4771_v27, %v2462_v44 }
 0xa28   : > { %v2504_v10 = vsel %vm2503_vm9, %v2461_v60, %v2502_v21  ;;  %4782 = vrcp.f32 %v2588_v39  ;;  %v6542_v60 = vld [vmem:[%s7132_s14] ss:$0 sm:$0xff] }
 0xa29   : > { %v4773_v34 = vpop.eup %4772  ;;  %v2507_v15 = vsel %vm2505_vm10, %v2506_v31, %v2504_v10  ;;  %v2511_v32 = vsel %vm2510_vm11, %v2462_v44, %v2509_v50 }
 0xa2a   : > { %v4775_v58 = vpop.eup %4774  ;;  %v2589_v35 = vadd.f32 1e-05, %v2507_v15  ;;  %v2514_v43 = vsel %vm2512_vm12, %v2513_v41, %v2511_v32  ;;  %v2516_v17 = vmul.f32 %v4773_v34, %v2463_v26 }
 0xa2b   : > { %v4777_v45 = vpop.eup %4776  ;;  %v2590_v13 = vadd.f32 1e-05, %v2514_v43  ;;  %v2602_v48 = vmul.f32 %v4775_v58, %v6426_v8 }
 0xa2c   : > { %v2518_v53 = vsel %vm2517_vm13, %v2463_v26, %v2516_v17  ;;  %v2523_v44 = vmul.f32 %v4777_v45, %v6534_v59  ;;  %4784 = vrcp.f32 %v2589_v35  ;;  %v4779_v57 = vpop.eup %4778 }
 0xa2d   : > { %v2521_v16 = vsel %vm2519_vm14, %v2520_v47, %v2518_v53  ;;  %4786 = vrcp.f32 %v2590_v13  ;;  %v2604_v54 = vmul.f32 %v4779_v57, %v6429_v29  ;;  %v2639_v8 = vmul.f32 %v6542_v60, %v2602_v48 }
 0xa2e   : > { %v2591_v23 = vadd.f32 1e-05, %v2521_v16  ;;  %v2525_v4 = vsel %vm2524_vm15, %v6534_v59, %v2523_v44  ;;  %v4781_v26 = vpop.eup %4780 }
 0xa2f   : > { %v2528_v11 = vsel %vm2526_vm0, %v2527_v24, %v2525_v4  ;;  %v2640_v9 = vmul.f32 %v6542_v60, %v2604_v54  ;;  %v6561_v63 = vadd.f32 %v6557_v49, %v2639_v8  ;;  %v2606_v29 = vmul.f32 %v4781_v26, %v6434_v37 }
 0xa30   : > { %v2592_v40 = vadd.f32 1e-05, %v2528_v11  ;;  %4788 = vrcp.f32 %v2591_v23 }
 0xa31   : > { %v6564_v59 = vadd.f32 %v6557_v49, %v2640_v9  ;;  %v2641_v7 = vmul.f32 %v6542_v60, %v2606_v29 }
 0xa32   : > { %v4783_v19 = vpop.eup %4782  ;;  %4790 = vrcp.f32 %v2592_v40 }
 0xa33   : > { %v2608_v0 = vmul.f32 %v4783_v19, %v6441_v51  ;;  %v2727_v61 = vpack.c.bf16 %v6564_v59, %v6561_v63  ;;  %v6581_v39 = vadd.f32 %v6557_v49, %v2641_v7 }
 0xa35   : > { %v2642_v33 = vmul.f32 %v6542_v60, %v2608_v0  ;;  %2859 = vmatmul.mubr.bf16.vlgmr.msra.gmra.mrb[48].mxu1 %v2727_v61 }
 0xa36   : > { %v4785_v12 = vpop.eup %4784  ;;  %2868 = vmatprep.mubr.bf16.mxu1 %v5229_v18  ;;  %4401 = vmatpush3.bf16.msra.mxu1 %v6523_v20 }
 0xa37   : > { %v4787_v14 = vpop.eup %4786  ;;  %v6575_v37 = vadd.f32 %v6557_v49, %v2642_v33  ;;  %v2610_v51 = vmul.f32 %v4785_v12, %v6446_v62  ;;  %4394 = vmatprep.subr.bf16.mxu1 %v6526_v38 }
 0xa38   : > { %v2612_v27 = vmul.f32 %v4787_v14, %v6449_v36 }
 0xa39   : > { %v2728_v31 = vpack.c.bf16 %v6575_v37, %v6581_v39  ;;  %v2643_v20 = vmul.f32 %v6542_v60, %v2610_v51 }
 0xa3a   : > { %4402 = vmatpush3.bf16.msra.mxu1 %v6530_v30  ;;  %v4789_v21 = vpop.eup %4788  ;;  %v2644_v50 = vmul.f32 %v6542_v60, %v2612_v27 }
 0xa3b   : > { %v6590_v62 = vadd.f32 %v6557_v49, %v2643_v20  ;;  %v2614_v38 = vmul.f32 %v4789_v21, %v6456_v52 }
 0xa3c   : > { %v4791_v10 = vpop.eup %4790  ;;  %v6593_v36 = vadd.f32 %v6557_v49, %v2644_v50 }
 0xa3d   : > { %2869 = vmatmul.mubr.bf16.gmra.mrb[52].mxu1 %v2728_v31  ;;  %v2616_v30 = vmul.f32 %v4791_v10, %v6459_v42  ;;  %v2645_v34 = vmul.f32 %v6542_v60, %v2614_v38 }
 0xa3e   : > { %2878 = vmatprep.mubr.bf16.mxu1 %v5229_v18  ;;  %v2729_v41 = vpack.c.bf16 %v6593_v36, %v6590_v62 }
 0xa3f   : > { %v2646_v15 = vmul.f32 %v6542_v60, %v2616_v30  ;;  %v6603_v58 = vadd.f32 %v6557_v49, %v2645_v34 }
 0xa41   : > { %v6606_v35 = vadd.f32 %v6557_v49, %v2646_v15 }
 0xa43   : > { %v2730_v45 = vpack.c.bf16 %v6606_v35, %v6603_v58 }
 0xa45   : > { %2879 = vmatmul.mubr.bf16.gmra.mrb[56].mxu1 %v2729_v41 }
 0xa46   : > { %2888 = vmatprep.mubr.bf16.mxu1 %v5229_v18 }
 0xa48   : > { %v2442_v32 = vpop.xlane.xlu0 %2441 }
 0xa49   : > { %v2465_v52 = vmul.f32 0.007874016, %v2442_v32 }
 0xa4a   : > { %v2444_v43 = vpop.xlane.xlu1 %2443 }
 0xa4b   : > { %4792 = vrsqrt.f32 %v2465_v52  ;;  %v2466_v42 = vmul.f32 0.007874016, %v2444_v43  ;;  %vm2531_vm1 = vcmp.eq.f32.partialorder %v2465_v52, inf  ;;  %v2534_v26 = vand.u32 2147483648, %v2465_v52 }
 0xa4c   : > { %v2446_v17 = vpop.xlane.xlu0 %2445  ;;  %vm2533_vm2 = vcmp.eq.f32.partialorder %v2465_v52, 0.0 }
 0xa4d   : > { %v2467_v13 = vmul.f32 0.007874016, %v2446_v17  ;;  %4794 = vrsqrt.f32 %v2466_v42  ;;  %2889 = vmatmul.mubr.bf16.gmra.mrb[60].mxu1 %v2730_v45  ;;  %vm2538_vm3 = vcmp.eq.f32.partialorder %v2466_v42, inf  ;;  %v2541_v33 = vand.u32 2147483648, %v2466_v42 }
 0xa4e   : > { %v2448_v47 = vpop.xlane.xlu1 %2447  ;;  %2898 = vmatprep.mubr.bf16.mxu1 %v5229_v18  ;;  %vm2540_vm4 = vcmp.eq.f32.partialorder %v2466_v42, 0.0 }
 0xa4f   : > { %4796 = vrsqrt.f32 %v2467_v13  ;;  %v2468_v48 = vmul.f32 0.007874016, %v2448_v47  ;;  %vm2545_vm5 = vcmp.eq.f32.partialorder %v2467_v13, inf  ;;  %v2548_v14 = vand.u32 2147483648, %v2467_v13 }
 0xa50   : > { %v2450_v53 = vpop.xlane.xlu0 %2449  ;;  %vm2547_vm6 = vcmp.eq.f32.partialorder %v2467_v13, 0.0 }
 0xa51   : > { %v2469_v44 = vmul.f32 0.007874016, %v2450_v53  ;;  %4798 = vrsqrt.f32 %v2468_v48  ;;  %vm2552_vm7 = vcmp.eq.f32.partialorder %v2468_v48, inf  ;;  %v2555_v30 = vand.u32 2147483648, %v2468_v48 }
 0xa52   : > { %v2452_v57 = vpop.xlane.xlu1 %2451  ;;  %vm2554_vm8 = vcmp.eq.f32.partialorder %v2468_v48, 0.0 }
 0xa53   : > { %4800 = vrsqrt.f32 %v2469_v44  ;;  %v2470_v16 = vmul.f32 0.007874016, %v2452_v57  ;;  %vm2559_vm9 = vcmp.eq.f32.partialorder %v2469_v44, inf  ;;  %v2562_v43 = vand.u32 2147483648, %v2469_v44 }
 0xa54   : > { %v2454_v24 = vpop.xlane.xlu0 %2453  ;;  %vm2561_vm10 = vcmp.eq.f32.partialorder %v2469_v44, 0.0 }
 0xa55   : > { %v4793_v23 = vpop.eup %4792  ;;  %v6611_v4 = vmul.f32 0.007874016, %v2454_v24  ;;  %4802 = vrsqrt.f32 %v2470_v16  ;;  %vm2566_vm11 = vcmp.eq.f32.partialorder %v2470_v16, inf  ;;  %v2569_v47 = vand.u32 2147483648, %v2470_v16 }
 0xa56   : > { %v2530_v54 = vmul.f32 %v4793_v23, %v2465_v52  ;;  %v2456_v8 = vpop.xlane.xlu1 %2455  ;;  %vm2568_vm12 = vcmp.eq.f32.partialorder %v2470_v16, 0.0 }
 0xa57   : > { %4804 = vrsqrt.f32 %v6611_v4  ;;  %v4795_v11 = vpop.eup %4794  ;;  %v6614_v9 = vmul.f32 0.007874016, %v2456_v8  ;;  %vm2573_vm13 = vcmp.eq.f32.partialorder %v6611_v4, inf  ;;  %vm2575_vm0 = vcmp.eq.f32.partialorder %v6611_v4, 0.0 }
 0xa58   : > { %v2532_v40 = vsel %vm2531_vm1, %v2465_v52, %v2530_v54  ;;  %v2537_v0 = vmul.f32 %v4795_v11, %v2466_v42 }
 0xa59   : > { %v4797_v19 = vpop.eup %4796  ;;  %v2535_v29 = vsel %vm2533_vm2, %v2534_v26, %v2532_v40  ;;  %4806 = vrsqrt.f32 %v6614_v9  ;;  %vm2580_vm14 = vcmp.eq.f32.partialorder %v6614_v9, inf  ;;  %vm2582_vm15 = vcmp.eq.f32.partialorder %v6614_v9, 0.0 }
 0xa5a   : > { %v2593_v61 = vadd.f32 1e-05, %v2535_v29  ;;  %v2544_v12 = vmul.f32 %v4797_v19, %v2467_v13  ;;  %v2539_v7 = vsel %vm2538_vm3, %v2466_v42, %v2537_v0  ;;  %v2576_v19 = vand.u32 2147483648, %v6611_v4 }
 0xa5b   : > { %v4799_v51 = vpop.eup %4798  ;;  %v2542_v27 = vsel %vm2540_vm4, %v2541_v33, %v2539_v7 }
 0xa5c   : > { %v2546_v21 = vsel %vm2545_vm5, %v2467_v13, %v2544_v12  ;;  %4808 = vrcp.f32 %v2593_v61  ;;  %v2594_v20 = vadd.f32 1e-05, %v2542_v27  ;;  %v2551_v10 = vmul.f32 %v4799_v51, %v2468_v48 }
 0xa5d   : > { %v4801_v31 = vpop.eup %4800  ;;  %v2549_v50 = vsel %vm2547_vm6, %v2548_v14, %v2546_v21 }
 0xa5e   : > { %v2595_v38 = vadd.f32 1e-05, %v2549_v50  ;;  %v2558_v41 = vmul.f32 %v4801_v31, %v2469_v44  ;;  %v2553_v34 = vsel %vm2552_vm7, %v2468_v48, %v2551_v10  ;;  %4810 = vrcp.f32 %v2594_v20 }
 0xa5f   : > { %v4803_v15 = vpop.eup %4802  ;;  %v2556_v32 = vsel %vm2554_vm8, %v2555_v30, %v2553_v34 }
 0xa60   : > { %v2560_v52 = vsel %vm2559_vm9, %v2469_v44, %v2558_v41  ;;  %v2596_v17 = vadd.f32 1e-05, %v2556_v32  ;;  %v2565_v45 = vmul.f32 %v4803_v15, %v2470_v16  ;;  %4812 = vrcp.f32 %v2595_v38 }
 0xa61   : > { %v4805_v42 = vpop.eup %4804  ;;  %v2563_v13 = vsel %vm2561_vm10, %v2562_v43, %v2560_v52  ;;  %v2583_v44 = vand.u32 2147483648, %v6614_v9 }
 0xa62   : > { %v2567_v53 = vsel %vm2566_vm11, %v2470_v16, %v2565_v45  ;;  %v2572_v57 = vmul.f32 %v4805_v42, %v6611_v4  ;;  %4814 = vrcp.f32 %v2596_v17  ;;  %v2597_v23 = vadd.f32 1e-05, %v2563_v13 }
 0xa63   : > { %v4807_v48 = vpop.eup %4806  ;;  %v2570_v24 = vsel %vm2568_vm12, %v2569_v47, %v2567_v53 }
 0xa64   : > { %v2598_v54 = vadd.f32 1e-05, %v2570_v24  ;;  %v2579_v8 = vmul.f32 %v4807_v48, %v6614_v9  ;;  %v2574_v16 = vsel %vm2573_vm13, %v6611_v4, %v2572_v57  ;;  %v4620_v57 = vld [vmem:[%s5708_s29 + $0x50] sm:$0xff]   ;;  %v4625_v24 = vld [vmem:[%s5708_s29 + $0x20] sm:$0xff]  }
 0xa65   : > { %v2577_v61 = vsel %vm2575_vm0, %v2576_v19, %v2574_v16  ;;  %v4621_v48 = vld [vmem:[%s5708_s29 + $0x10] sm:$0xff]   ;;  %4141 = vmatprep.subr.bf16.mxu0 %v4620_v57  ;;  %4395 = vmatprep.subr.bf16.mxu1 %v4620_v57  ;;  %v4631_v16 = vld [vmem:[%s5708_s29 + $0x38] sm:$0xff]  }
 0xa66   : > { %v4809_v26 = vpop.eup %4808  ;;  %v2581_v11 = vsel %vm2580_vm14, %v6614_v9, %v2579_v8  ;;  %4816 = vrcp.f32 %v2598_v54  ;;  %v2599_v27 = vadd.f32 1e-05, %v2577_v61  ;;  %4142 = vmatpush3.bf16.msra.mxu0 %v4621_v48  ;;  %4403 = vmatpush3.bf16.msra.mxu1 %v4621_v48  ;;  %v4627_v54 = vld [vmem:[%s5708_s29 + $0x28] sm:$0xff]   ;;  %v4628_v8 = vld [vmem:[%s5708_s29 + $0x70] sm:$0xff]  }
 0xa67   : > { %v2618_v40 = vmul.f32 %v4809_v26, %v6482_v28  ;;  %v2584_v29 = vsel %vm2582_vm15, %v2583_v44, %v2581_v11  ;;  %4818 = vrcp.f32 %v2597_v23  ;;  %v4626_v23 = vld [vmem:[%s5708_s29 + $0x68] sm:$0xff]   ;;  %v4629_v26 = vld [vmem:[%s5708_s29 + $0x30] sm:$0xff]   ;;  %v4630_v44 = vld [vmem:[%s5708_s29 + $0x78] sm:$0xff]  }
 0xa68   : > { %v4811_v0 = vpop.eup %4810  ;;  %v2600_v14 = vadd.f32 1e-05, %v2584_v29  ;;  %v2693_v11 = vld [vmem:[%s5689_s26] sm:$0x3] }
 0xa69   : > { %v2620_v33 = vmul.f32 %v4811_v0, %v6485_v55  ;;  %v2647_v12 = vmul.f32 %v6542_v60, %v2618_v40  ;;  %v6693_v40 = vrot.slane %v2693_v11, %v842_v3  ;;  %v6697_v19 = vrot.slane %v2693_v11, %v846_v5 }
 0xa6a   : > { %v4813_v7 = vpop.eup %4812  ;;  %4820 = vrcp.f32 %v2600_v14 }
 0xa6b   : > { %v2648_v51 = vmul.f32 %v6542_v60, %v2620_v33  ;;  %v6632_v28 = vadd.f32 %v6557_v49, %v2647_v12  ;;  %v2622_v4 = vmul.f32 %v4813_v7, %v6490_v25  ;;  %4822 = vrcp.f32 %v2599_v27 }
 0xa6c   : > { %v4815_v9 = vpop.eup %4814 }
 0xa6d   : > { %v6635_v21 = vadd.f32 %v6557_v49, %v2648_v51  ;;  %v2624_v31 = vmul.f32 %v4815_v9, %v6495_v22  ;;  %v2649_v10 = vmul.f32 %v6542_v60, %v2622_v4 }
 0xa6f   : > { %v2731_v55 = vpack.c.bf16 %v6635_v21, %v6632_v28  ;;  %v2650_v20 = vmul.f32 %v6542_v60, %v2624_v31  ;;  %v6649_v22 = vadd.f32 %v6557_v49, %v2649_v10 }
 0xa70   : > { %v4817_v50 = vpop.eup %4816 }
 0xa71   : > { %2899 = vmatmul.mubr.bf16.gmra.mrb[64].mxu1 %v2731_v55  ;;  %v4819_v38 = vpop.eup %4818  ;;  %v6645_v30 = vadd.f32 %v6557_v49, %v2650_v20  ;;  %v2628_v25 = vmul.f32 %v4817_v50, %v6505_v6 }
 0xa72   : > { %2908 = vmatprep.mubr.bf16.mxu1 %v5229_v18  ;;  %v2626_v41 = vmul.f32 %v4819_v38, %v6500_v1 }
 0xa73   : > { %v2732_v34 = vpack.c.bf16 %v6645_v30, %v6649_v22  ;;  %v2652_v15 = vmul.f32 %v6542_v60, %v2628_v25 }
 0xa74   : > { %v4821_v32 = vpop.eup %4820  ;;  %v2651_v52 = vmul.f32 %v6542_v60, %v2626_v41 }
 0xa75   : > { %v4823_v43 = vpop.eup %4822  ;;  %v6658_v6 = vadd.f32 %v6557_v49, %v2652_v15  ;;  %v2632_v42 = vmul.f32 %v4821_v32, %v6515_v56 }
 0xa76   : > { %v6662_v1 = vadd.f32 %v6557_v49, %v2651_v52  ;;  %v2630_v17 = vmul.f32 %v4823_v43, %v6510_v46 }
 0xa77   : > { %v2654_v13 = vmul.f32 %v6542_v60, %v2632_v42 }
 0xa78   : > { %v2733_v45 = vpack.c.bf16 %v6658_v6, %v6662_v1  ;;  %v2653_v47 = vmul.f32 %v6542_v60, %v2630_v17  ;;  %v4623_v60 = vld [vmem:[%s5708_s29 + $0x18] sm:$0xff]  }
 0xa79   : > { %2909 = vmatmul.mubr.bf16.gmra.mrb[68].mxu1 %v2732_v34  ;;  %v6671_v53 = vadd.f32 %v6557_v49, %v2654_v13 }
 0xa7a   : > { %2918 = vmatprep.mubr.bf16.mxu1 %v5229_v18  ;;  %v6674_v56 = vadd.f32 %v6557_v49, %v2653_v47  ;;  %v4624_v49 = vld [vmem:[%s5708_s29 + $0x60] sm:$0xff]  }
 0xa7c   : > { %v2734_v46 = vpack.c.bf16 %v6671_v53, %v6674_v56 }
 0xa81   : > { %2919 = vmatmul.mubr.bf16.gmra.mrb[72].mxu1 %v2733_v45 }
 0xa82   : > { %2928 = vmatprep.mubr.bf16.mxu1 %v5229_v18  ;;  %v4622_v18 = vld [vmem:[%s5708_s29 + $0x58] sm:$0xff]  }
 0xa83   : > { %4143 = vmatprep.subr.bf16.mxu0 %v4622_v18  ;;  %4396 = vmatprep.subr.bf16.mxu1 %v4622_v18 }
 0xa84   : > { %4144 = vmatpush3.bf16.msra.mxu0 %v4623_v60  ;;  %4404 = vmatpush3.bf16.msra.mxu1 %v4623_v60 }
 0xa85   : > { %4145 = vmatprep.subr.bf16.mxu0 %v4624_v49  ;;  %4397 = vmatprep.subr.bf16.mxu1 %v4624_v49 }
 0xa88   : > { %4146 = vmatpush3.bf16.msra.mxu0 %v4625_v24  ;;  %4405 = vmatpush3.bf16.msra.mxu1 %v4625_v24 }
 0xa89   : > { %2929 = vmatmul.mubr.bf16.gmra.mrb[76].mxu1 %v2734_v46  ;;  %4147 = vmatprep.subr.bf16.mxu0 %v4626_v23 }
 0xa8a   : > { %4398 = vmatprep.subr.bf16.mxu1 %v4626_v23 }
 0xa8c   : > { %4148 = vmatpush3.bf16.msra.mxu0 %v4627_v54  ;;  %4406 = vmatpush3.bf16.msra.mxu1 %v4627_v54 }
 0xa8d   : > { %4149 = vmatprep.subr.bf16.mxu0 %v4628_v8  ;;  %4399 = vmatprep.subr.bf16.mxu1 %v4628_v8 }
 0xa90   : > { %4150 = vmatpush3.bf16.msra.mxu0 %v4629_v26  ;;  %4407 = vmatpush3.bf16.msra.mxu1 %v4629_v26 }
 0xa91   : > { %4151 = vmatprep.subr.bf16.mxu0 %v4630_v44  ;;  %4400 = vmatprep.subr.bf16.mxu1 %v4630_v44 }
 0xa94   : > { %4152 = vmatpush3.bf16.msra.mxu0 %v4631_v16  ;;  %4408 = vmatpush3.bf16.msra.mxu1 %v4631_v16 }
 0xb08   : > { %v2860_v29 = vpop.f32.mrb[48].mxu1 }
 0xb09   : > { %v2861_v0 = vadd.f32 %v2860_v29, %v6693_v40  ;;  %v2862_v61 = vpop.f32.mrb[49].mxu1 }
 0xb0a   : > { %v2863_v33 = vadd.f32 %v2862_v61, %v6697_v19  ;;  %v2864_v12 = vpop.f32.mrb[50].mxu1 }
 0xb0b   : > { %v2971_v7 = vmul.f32 0.70710677, %v2861_v0  ;;  %v2865_v14 = vadd.f32 %v2864_v12, %v6693_v40  ;;  %v2866_v51 = vpop.f32.mrb[51].mxu1  ;;  %v2939_v57 = vmul.f32 0.5, %v2861_v0 }
 0xb0c   : > { %v2972_v9 = vmul.f32 0.70710677, %v2863_v33  ;;  %v2867_v27 = vadd.f32 %v2866_v51, %v6697_v19  ;;  %v2940_v24 = vmul.f32 0.5, %v2863_v33 }
 0xb0d   : > { %4824 = verf.f32 %v2971_v7  ;;  %v2973_v3 = vmul.f32 0.70710677, %v2865_v14  ;;  %v2941_v48 = vmul.f32 0.5, %v2865_v14 }
 0xb0e   : > { %4826 = verf.f32 %v2972_v9  ;;  %v2974_v2 = vmul.f32 0.70710677, %v2867_v27  ;;  %v2942_v23 = vmul.f32 0.5, %v2867_v27 }
 0xb0f   : > { %4828 = verf.f32 %v2973_v3 }
 0xb10   : > { %4830 = verf.f32 %v2974_v2  ;;  %v2870_v5 = vpop.f32.mrb[52].mxu1 }
 0xb11   : > { %v2871_v4 = vadd.f32 %v2870_v5, %v6693_v40  ;;  %v2872_v31 = vpop.f32.mrb[53].mxu1 }
 0xb12   : > { %v2873_v55 = vadd.f32 %v2872_v31, %v6697_v19  ;;  %v2874_v20 = vpop.f32.mrb[54].mxu1 }
 0xb13   : > { %v2975_v50 = vmul.f32 0.70710677, %v2871_v4  ;;  %v2875_v10 = vadd.f32 %v2874_v20, %v6693_v40  ;;  %v2876_v38 = vpop.f32.mrb[55].mxu1 }
 0xb14   : > { %v2976_v25 = vmul.f32 0.70710677, %v2873_v55  ;;  %v2877_v41 = vadd.f32 %v2876_v38, %v6697_v19 }
 0xb15   : > { %4832 = verf.f32 %v2975_v50  ;;  %v2977_v34 = vmul.f32 0.70710677, %v2875_v10 }
 0xb16   : > { %4834 = verf.f32 %v2976_v25  ;;  %v2978_v15 = vmul.f32 0.70710677, %v2877_v41  ;;  %v2943_v25 = vmul.f32 0.5, %v2871_v4 }
 0xb17   : > { %v4825_v32 = vpop.eup %4824  ;;  %4836 = verf.f32 %v2977_v34  ;;  %v2945_v34 = vmul.f32 0.5, %v2875_v10 }
 0xb18   : > { %v4827_v52 = vpop.eup %4826  ;;  %v3035_v43 = vadd.f32 1.0, %v4825_v32  ;;  %4838 = verf.f32 %v2978_v15  ;;  %v2880_v42 = vpop.f32.mrb[56].mxu1 }
 0xb19   : > { %v4829_v17 = vpop.eup %4828  ;;  %v3036_v45 = vadd.f32 1.0, %v4827_v52  ;;  %v6708_v13 = vadd.f32 %v2880_v42, %v6693_v40  ;;  %v2882_v47 = vpop.f32.mrb[57].mxu1  ;;  %v2946_v42 = vmul.f32 0.5, %v2877_v41 }
 0xb1a   : > { %v4831_v46 = vpop.eup %4830  ;;  %v3037_v18 = vadd.f32 1.0, %v4829_v17  ;;  %v6711_v60 = vadd.f32 %v2882_v47, %v6697_v19  ;;  %v2884_v49 = vpop.f32.mrb[58].mxu1  ;;  %v3067_v44 = vmul.f32 %v3035_v43, %v2939_v57  ;;  %v2944_v43 = vmul.f32 0.5, %v2873_v55 }
 0xb1b   : > { %v3038_v54 = vadd.f32 1.0, %v4831_v46  ;;  %v2979_v8 = vmul.f32 0.70710677, %v6708_v13  ;;  %v2886_v26 = vpop.f32.mrb[59].mxu1  ;;  %v2885_v29 = vadd.f32 %v2884_v49, %v6693_v40  ;;  %v3068_v61 = vmul.f32 %v3036_v45, %v2940_v24 }
 0xb1c   : > { %v3069_v16 = vmul.f32 %v3037_v18, %v2941_v48  ;;  %v2980_v11 = vmul.f32 0.70710677, %v6711_v60  ;;  %v2887_v12 = vadd.f32 %v2886_v26, %v6697_v19 }
 0xb1d   : > { %v3070_v0 = vmul.f32 %v3038_v54, %v2942_v23  ;;  %4840 = verf.f32 %v2979_v8  ;;  %v2981_v14 = vmul.f32 0.70710677, %v2885_v29 }
 0xb1e   : > { %v3099_v7 = vpack.c.bf16 %v3069_v16, %v3067_v44  ;;  %4842 = verf.f32 %v2980_v11  ;;  %v2982_v51 = vmul.f32 0.70710677, %v2887_v12 }
 0xb1f   : > { %v4833_v33 = vpop.eup %4832  ;;  %v3100_v9 = vpack.c.bf16 %v3070_v0, %v3068_v61  ;;  %4844 = verf.f32 %v2981_v14  ;;  %v2947_v61 = vmul.f32 0.5, %v6708_v13  ;;  %v2949_v0 = vmul.f32 0.5, %v2885_v29 }
 0xb20   : > { %v4835_v27 = vpop.eup %4834  ;;  %v3039_v3 = vadd.f32 1.0, %v4833_v33  ;;  %v2890_v2 = vpop.f32.mrb[60].mxu1  ;;  %4846 = verf.f32 %v2982_v51  ;;  %v2948_v14 = vmul.f32 0.5, %v6711_v60  ;;  %v2950_v33 = vmul.f32 0.5, %v2887_v12 }
 0xb21   : > { %v4837_v5 = vpop.eup %4836  ;;  %v3040_v31 = vadd.f32 1.0, %v4835_v27  ;;  %v2891_v20 = vadd.f32 %v2890_v2, %v6693_v40  ;;  %v2892_v50 = vpop.f32.mrb[61].mxu1  ;;  %3249 = vmatprep.mubr.bf16.mxu0 %v3100_v9 }
 0xb22   : > { %v4839_v38 = vpop.eup %4838  ;;  %v3041_v15 = vadd.f32 1.0, %v4837_v5  ;;  %v2893_v32 = vadd.f32 %v2892_v50, %v6697_v19  ;;  %v2894_v52 = vpop.f32.mrb[62].mxu1  ;;  %3250 = vmatmul.mubr.bf16.vlgmr.msra.gmra.mrb[80].mxu0 %v3099_v7  ;;  %v3071_v46 = vmul.f32 %v3039_v3, %v2943_v25 }
 0xb23   : > { %v3042_v17 = vadd.f32 1.0, %v4839_v38  ;;  %v2983_v45 = vmul.f32 0.70710677, %v2891_v20  ;;  %v2896_v47 = vpop.f32.mrb[63].mxu1  ;;  %v2895_v18 = vadd.f32 %v2894_v52, %v6693_v40  ;;  %v3072_v49 = vmul.f32 %v3040_v31, %v2944_v43 }
 0xb24   : > { %v3073_v57 = vmul.f32 %v3041_v15, %v2945_v34  ;;  %v2984_v48 = vmul.f32 0.70710677, %v2893_v32  ;;  %v2897_v4 = vadd.f32 %v2896_v47, %v6697_v19  ;;  %v2951_v13 = vmul.f32 0.5, %v2891_v20 }
 0xb25   : > { %v3074_v24 = vmul.f32 %v3042_v17, %v2946_v42  ;;  %4848 = verf.f32 %v2983_v45  ;;  %v2985_v10 = vmul.f32 0.70710677, %v2895_v18  ;;  %v2953_v29 = vmul.f32 0.5, %v2895_v18 }
 0xb26   : > { %4850 = verf.f32 %v2984_v48  ;;  %v3101_v23 = vpack.c.bf16 %v3073_v57, %v3071_v46  ;;  %v2986_v8 = vmul.f32 0.70710677, %v2897_v4  ;;  %v2952_v60 = vmul.f32 0.5, %v2893_v32 }
 0xb27   : > { %v4841_v54 = vpop.eup %4840  ;;  %v3102_v55 = vpack.c.bf16 %v3074_v24, %v3072_v49  ;;  %4852 = verf.f32 %v2985_v10  ;;  %v2954_v12 = vmul.f32 0.5, %v2897_v4 }
 0xb28   : > { %v4843_v41 = vpop.eup %4842  ;;  %v3043_v26 = vadd.f32 1.0, %v4841_v54  ;;  %4854 = verf.f32 %v2986_v8 }
 0xb29   : > { %3257 = vmatprep.mubr.bf16.mxu0 %v3102_v55  ;;  %v4845_v44 = vpop.eup %4844  ;;  %v3044_v16 = vadd.f32 1.0, %v4843_v41 }
 0xb2a   : > { %3258 = vmatmul.mubr.bf16.gmra.mrb[84].mxu0 %v3101_v23  ;;  %v4847_v11 = vpop.eup %4846  ;;  %v3045_v7 = vadd.f32 1.0, %v4845_v44  ;;  %v3075_v9 = vmul.f32 %v3043_v26, %v2947_v61 }
 0xb2b   : > { %v3046_v51 = vadd.f32 1.0, %v4847_v11  ;;  %v3076_v3 = vmul.f32 %v3044_v16, %v2948_v14 }
 0xb2c   : > { %v3077_v27 = vmul.f32 %v3045_v7, %v2949_v0 }
 0xb2d   : > { %v3078_v2 = vmul.f32 %v3046_v51, %v2950_v33 }
 0xb2e   : > { %v3103_v31 = vpack.c.bf16 %v3077_v27, %v3075_v9 }
 0xb2f   : > { %v4849_v5 = vpop.eup %4848  ;;  %v3104_v38 = vpack.c.bf16 %v3078_v2, %v3076_v3 }
 0xb30   : > { %v4851_v50 = vpop.eup %4850  ;;  %v3047_v25 = vadd.f32 1.0, %v4849_v5 }
 0xb31   : > { %v4853_v34 = vpop.eup %4852  ;;  %v3048_v15 = vadd.f32 1.0, %v4851_v50  ;;  %3265 = vmatprep.mubr.bf16.mxu0 %v3104_v38 }
 0xb32   : > { %v4855_v52 = vpop.eup %4854  ;;  %v3049_v43 = vadd.f32 1.0, %v4853_v34  ;;  %3266 = vmatmul.mubr.bf16.gmra.mrb[88].mxu0 %v3103_v31  ;;  %v3079_v17 = vmul.f32 %v3047_v25, %v2951_v13 }
 0xb33   : > { %v3050_v42 = vadd.f32 1.0, %v4855_v52  ;;  %v3080_v47 = vmul.f32 %v3048_v15, %v2952_v60 }
 0xb34   : > { %v3081_v45 = vmul.f32 %v3049_v43, %v2953_v29 }
 0xb35   : > { %v3082_v46 = vmul.f32 %v3050_v42, %v2954_v12 }
 0xb36   : > { %v3105_v57 = vpack.c.bf16 %v3081_v45, %v3079_v17 }
 0xb37   : > { %v3106_v48 = vpack.c.bf16 %v3082_v46, %v3080_v47 }
 0xb39   : > { %3273 = vmatprep.mubr.bf16.mxu0 %v3106_v48 }
 0xb3a   : > { %3274 = vmatmul.mubr.bf16.gmra.mrb[92].mxu0 %v3105_v57 }
 0xb44   : > { %v2900_v49 = vpop.f32.mrb[64].mxu1 }
 0xb45   : > { %v2901_v24 = vadd.f32 %v2900_v49, %v6693_v40  ;;  %v2902_v10 = vpop.f32.mrb[65].mxu1 }
 0xb46   : > { %v2903_v20 = vadd.f32 %v2902_v10, %v6697_v19  ;;  %v2904_v18 = vpop.f32.mrb[66].mxu1 }
 0xb47   : > { %v2987_v23 = vmul.f32 0.70710677, %v2901_v24  ;;  %v2905_v32 = vadd.f32 %v2904_v18, %v6693_v40  ;;  %v2906_v4 = vpop.f32.mrb[67].mxu1  ;;  %v2955_v52 = vmul.f32 0.5, %v2901_v24 }
 0xb48   : > { %v2988_v54 = vmul.f32 0.70710677, %v2903_v20  ;;  %v2907_v8 = vadd.f32 %v2906_v4, %v6697_v19  ;;  %v2956_v12 = vmul.f32 0.5, %v2903_v20 }
 0xb49   : > { %4856 = verf.f32 %v2987_v23  ;;  %v2989_v55 = vmul.f32 0.70710677, %v2905_v32  ;;  %v2957_v13 = vmul.f32 0.5, %v2905_v32 }
 0xb4a   : > { %4858 = verf.f32 %v2988_v54  ;;  %v2990_v41 = vmul.f32 0.70710677, %v2907_v8  ;;  %v2958_v42 = vmul.f32 0.5, %v2907_v8 }
 0xb4b   : > { %4860 = verf.f32 %v2989_v55 }
 0xb4c   : > { %4862 = verf.f32 %v2990_v41  ;;  %v2910_v26 = vpop.f32.mrb[68].mxu1 }
 0xb4d   : > { %v2911_v44 = vadd.f32 %v2910_v26, %v6693_v40  ;;  %v2912_v16 = vpop.f32.mrb[69].mxu1 }
 0xb4e   : > { %v2913_v11 = vadd.f32 %v2912_v16, %v6697_v19  ;;  %v2914_v61 = vpop.f32.mrb[70].mxu1 }
 0xb4f   : > { %v2991_v0 = vmul.f32 0.70710677, %v2911_v44  ;;  %v2915_v7 = vadd.f32 %v2914_v61, %v6693_v40  ;;  %v2916_v14 = vpop.f32.mrb[71].mxu1 }
 0xb50   : > { %v2992_v33 = vmul.f32 0.70710677, %v2913_v11  ;;  %v2917_v51 = vadd.f32 %v2916_v14, %v6697_v19 }
 0xb51   : > { %4864 = verf.f32 %v2991_v0  ;;  %v2993_v9 = vmul.f32 0.70710677, %v2915_v7 }
 0xb52   : > { %4866 = verf.f32 %v2992_v33  ;;  %v2994_v27 = vmul.f32 0.70710677, %v2917_v51  ;;  %v2959_v33 = vmul.f32 0.5, %v2911_v44 }
 0xb53   : > { %v4857_v3 = vpop.eup %4856  ;;  %4868 = verf.f32 %v2993_v9  ;;  %v2961_v9 = vmul.f32 0.5, %v2915_v7 }
 0xb54   : > { %v4859_v2 = vpop.eup %4858  ;;  %v3051_v5 = vadd.f32 1.0, %v4857_v3  ;;  %4870 = verf.f32 %v2994_v27  ;;  %v2920_v31 = vpop.f32.mrb[72].mxu1 }
 0xb55   : > { %v4861_v50 = vpop.eup %4860  ;;  %v3052_v38 = vadd.f32 1.0, %v4859_v2  ;;  %v6732_v25 = vadd.f32 %v2920_v31, %v6693_v40  ;;  %v2922_v34 = vpop.f32.mrb[73].mxu1  ;;  %v2962_v31 = vmul.f32 0.5, %v2917_v51 }
 0xb56   : > { %v4863_v15 = vpop.eup %4862  ;;  %v3053_v29 = vadd.f32 1.0, %v4861_v50  ;;  %v6735_v43 = vadd.f32 %v2922_v34, %v6697_v19  ;;  %v2924_v60 = vpop.f32.mrb[74].mxu1  ;;  %v3083_v46 = vmul.f32 %v3051_v5, %v2955_v52  ;;  %v2960_v5 = vmul.f32 0.5, %v2913_v11 }
 0xb57   : > { %v3054_v17 = vadd.f32 1.0, %v4863_v15  ;;  %v2995_v45 = vmul.f32 0.70710677, %v6732_v25  ;;  %v2926_v47 = vpop.f32.mrb[75].mxu1  ;;  %v2925_v49 = vadd.f32 %v2924_v60, %v6693_v40  ;;  %v3084_v10 = vmul.f32 %v3052_v38, %v2956_v12 }
 0xb58   : > { %v3085_v57 = vmul.f32 %v3053_v29, %v2957_v13  ;;  %v2996_v48 = vmul.f32 0.70710677, %v6735_v43  ;;  %v2927_v18 = vadd.f32 %v2926_v47, %v6697_v19 }
 0xb59   : > { %v3086_v24 = vmul.f32 %v3054_v17, %v2958_v42  ;;  %4872 = verf.f32 %v2995_v45  ;;  %v2997_v23 = vmul.f32 0.70710677, %v2925_v49 }
 0xb5a   : > { %4874 = verf.f32 %v2996_v48  ;;  %v3107_v32 = vpack.c.bf16 %v3085_v57, %v3083_v46  ;;  %v2998_v4 = vmul.f32 0.70710677, %v2927_v18  ;;  %v2963_v48 = vmul.f32 0.5, %v6732_v25 }
 0xb5b   : > { %v4865_v20 = vpop.eup %4864  ;;  %v3108_v54 = vpack.c.bf16 %v3086_v24, %v3084_v10  ;;  %4876 = verf.f32 %v2997_v23  ;;  %v2965_v10 = vmul.f32 0.5, %v2925_v49  ;;  %v2966_v23 = vmul.f32 0.5, %v2927_v18 }
 0xb5c   : > { %v4867_v8 = vpop.eup %4866  ;;  %v3055_v55 = vadd.f32 1.0, %v4865_v20  ;;  %v2930_v41 = vpop.f32.mrb[76].mxu1  ;;  %4878 = verf.f32 %v2998_v4 }
 0xb5d   : > { %v4869_v26 = vpop.eup %4868  ;;  %v3056_v16 = vadd.f32 1.0, %v4867_v8  ;;  %v2931_v61 = vadd.f32 %v2930_v41, %v6693_v40  ;;  %v2932_v0 = vpop.f32.mrb[77].mxu1  ;;  %3281 = vmatprep.mubr.bf16.mxu0 %v3108_v54 }
 0xb5e   : > { %v4871_v14 = vpop.eup %4870  ;;  %v3057_v27 = vadd.f32 1.0, %v4869_v26  ;;  %v2933_v3 = vadd.f32 %v2932_v0, %v6697_v19  ;;  %v2934_v2 = vpop.f32.mrb[78].mxu1  ;;  %3282 = vmatmul.mubr.bf16.gmra.mrb[96].mxu0 %v3107_v32  ;;  %v3087_v15 = vmul.f32 %v3055_v55, %v2959_v33 }
 0xb5f   : > { %v3058_v50 = vadd.f32 1.0, %v4871_v14  ;;  %v2999_v38 = vmul.f32 0.70710677, %v2931_v61  ;;  %v2936_v34 = vpop.f32.mrb[79].mxu1  ;;  %v2935_v29 = vadd.f32 %v2934_v2, %v6693_v40  ;;  %v3088_v60 = vmul.f32 %v3056_v16, %v2960_v5 }
 0xb60   : > { %v3089_v52 = vmul.f32 %v3057_v27, %v2961_v9  ;;  %v3000_v13 = vmul.f32 0.70710677, %v2933_v3  ;;  %v2937_v44 = vadd.f32 %v2936_v34, %v6697_v19  ;;  %v2964_v19 = vmul.f32 0.5, %v6735_v43 }
 0xb61   : > { %v3090_v12 = vmul.f32 %v3058_v50, %v2962_v31  ;;  %4880 = verf.f32 %v2999_v38  ;;  %v3001_v7 = vmul.f32 0.70710677, %v2935_v29  ;;  %v2967_v25 = vmul.f32 0.5, %v2931_v61  ;;  %v6752_v61 = vld [vmem:[%s733_s25] ss:$0 sm:$0xff] }
 0xb62   : > { %4882 = verf.f32 %v3000_v13  ;;  %v3109_v42 = vpack.c.bf16 %v3089_v52, %v3087_v15  ;;  %v3002_v45 = vmul.f32 0.70710677, %v2937_v44  ;;  %v2969_v49 = vmul.f32 0.5, %v2935_v29 }
 0xb63   : > { %v4873_v17 = vpop.eup %4872  ;;  %v3110_v11 = vpack.c.bf16 %v3090_v12, %v3088_v60  ;;  %4884 = verf.f32 %v3001_v7  ;;  %v2968_v43 = vmul.f32 0.5, %v2933_v3  ;;  %v2970_v18 = vmul.f32 0.5, %v2937_v44 }
 0xb64   : > { %v4875_v51 = vpop.eup %4874  ;;  %v3059_v47 = vadd.f32 1.0, %v4873_v17  ;;  %4886 = verf.f32 %v3002_v45 }
 0xb65   : > { %3289 = vmatprep.mubr.bf16.mxu0 %v3110_v11  ;;  %v4877_v46 = vpop.eup %4876  ;;  %v3060_v57 = vadd.f32 1.0, %v4875_v51 }
 0xb66   : > { %3290 = vmatmul.mubr.bf16.gmra.mrb[100].mxu0 %v3109_v42  ;;  %v4879_v40 = vpop.eup %4878  ;;  %v3061_v24 = vadd.f32 1.0, %v4877_v46  ;;  %v3091_v20 = vmul.f32 %v3059_v47, %v2963_v48 }
 0xb67   : > { %v3062_v32 = vadd.f32 1.0, %v4879_v40  ;;  %v3092_v54 = vmul.f32 %v3060_v57, %v2964_v19 }
 0xb68   : > { %v3093_v4 = vmul.f32 %v3061_v24, %v2965_v10 }
 0xb69   : > { %v3094_v8 = vmul.f32 %v3062_v32, %v2966_v23 }
 0xb6a   : > { %v3111_v41 = vpack.c.bf16 %v3093_v4, %v3091_v20 }
 0xb6b   : > { %v4881_v55 = vpop.eup %4880  ;;  %v3112_v16 = vpack.c.bf16 %v3094_v8, %v3092_v54 }
 0xb6c   : > { %v4883_v26 = vpop.eup %4882  ;;  %v3063_v0 = vadd.f32 1.0, %v4881_v55 }
 0xb6d   : > { %v4885_v14 = vpop.eup %4884  ;;  %v3064_v33 = vadd.f32 1.0, %v4883_v26  ;;  %3297 = vmatprep.mubr.bf16.mxu1 %v3112_v16 }
 0xb6e   : > { %v4887_v9 = vpop.eup %4886  ;;  %v3065_v27 = vadd.f32 1.0, %v4885_v14  ;;  %3298 = vmatmul.mubr.bf16.vlgmr.msra.gmra.mrb[80].mxu1 %v3111_v41  ;;  %v3095_v5 = vmul.f32 %v3063_v0, %v2967_v25 }
 0xb6f   : > { %v3066_v2 = vadd.f32 1.0, %v4887_v9  ;;  %v3096_v50 = vmul.f32 %v3064_v33, %v2968_v43 }
 0xb70   : > { %v3097_v31 = vmul.f32 %v3065_v27, %v2969_v49 }
 0xb71   : > { %v3098_v38 = vmul.f32 %v3066_v2, %v2970_v18 }
 0xb72   : > { %v3113_v34 = vpack.c.bf16 %v3097_v31, %v3095_v5 }
 0xb73   : > { %v3114_v15 = vpack.c.bf16 %v3098_v38, %v3096_v50 }
 0xb75   : > { %3305 = vmatprep.mubr.bf16.mxu1 %v3114_v15 }
 0xb76   : > { %3306 = vmatmul.mubr.bf16.gmra.mrb[84].mxu1 %v3113_v34 }
 0xbf5   : > { %v4153_v52 = vpop.f32.mrb[80].mxu0 }
 0xbf6   : > { %v4154_v13 = vpop.f32.mrb[81].mxu0 }
 0xbf7   : > { %v4155_v29 = vadd.f32 %v4154_v13, %v4153_v52  ;;  %v4156_v3 = vpop.f32.mrb[82].mxu0 }
 0xbf8   : > { %v4157_v60 = vpop.f32.mrb[83].mxu0 }
 0xbf9   : > { %v3252_v12 = vadd.f32 %v4155_v29, %v6752_v61  ;;  %v4158_v44 = vadd.f32 %v4157_v60, %v4156_v3 }
 0xbfb   : > { %v3255_v7 = vadd.f32 %v4158_v44, %v6752_v61  ;;  %v6757_v42 = vadd.f32 %v3252_v12, %v6561_v63 }
 0xbfd   : > { %3332 = vadd.xlane.f32.xlu0 %v6757_v42  ;;  %v4159_v17 = vpop.f32.mrb[84].mxu0  ;;  %v6761_v45 = vadd.f32 %v3255_v7, %v6564_v59 }
 0xbfe   : > { %v4160_v11 = vpop.f32.mrb[85].mxu0 }
 0xbff   : > { %v4161_v51 = vadd.f32 %v4160_v11, %v4159_v17  ;;  %3334 = vadd.xlane.f32.xlu1 %v6761_v45  ;;  %v4162_v47 = vpop.f32.mrb[86].mxu0 }
 0xc00   : > { %v4163_v46 = vpop.f32.mrb[87].mxu0 }
 0xc01   : > { %v3260_v57 = vadd.f32 %v4161_v51, %v6752_v61  ;;  %v4164_v40 = vadd.f32 %v4163_v46, %v4162_v47 }
 0xc03   : > { %v3263_v48 = vadd.f32 %v4164_v40, %v6752_v61  ;;  %v6767_v63 = vadd.f32 %v3260_v57, %v6581_v39 }
 0xc05   : > { %3336 = vadd.xlane.f32.xlu0 %v6767_v63  ;;  %v6771_v10 = vadd.f32 %v3263_v48, %v6575_v37  ;;  %v4165_v59 = vpop.f32.mrb[88].mxu0 }
 0xc06   : > { %v4166_v24 = vpop.f32.mrb[89].mxu0 }
 0xc07   : > { %3338 = vadd.xlane.f32.xlu1 %v6771_v10  ;;  %v4167_v19 = vadd.f32 %v4166_v24, %v4165_v59  ;;  %v4168_v23 = vpop.f32.mrb[90].mxu0 }
 0xc08   : > { %v4169_v32 = vpop.f32.mrb[91].mxu0 }
 0xc09   : > { %v3268_v20 = vadd.f32 %v4167_v19, %v6752_v61  ;;  %v4170_v4 = vadd.f32 %v4169_v32, %v4168_v23 }
 0xc0b   : > { %v3271_v54 = vadd.f32 %v4170_v4, %v6752_v61  ;;  %v6777_v39 = vadd.f32 %v3268_v20, %v6590_v62 }
 0xc0d   : > { %3340 = vadd.xlane.f32.xlu0 %v6777_v39  ;;  %v4171_v8 = vpop.f32.mrb[92].mxu0  ;;  %v6781_v37 = vadd.f32 %v3271_v54, %v6593_v36 }
 0xc0e   : > { %v4172_v55 = vpop.f32.mrb[93].mxu0 }
 0xc0f   : > { %v4173_v41 = vadd.f32 %v4172_v55, %v4171_v8  ;;  %3342 = vadd.xlane.f32.xlu1 %v6781_v37  ;;  %v4174_v26 = vpop.f32.mrb[94].mxu0 }
 0xc10   : > { %v4175_v16 = vpop.f32.mrb[95].mxu0 }
 0xc11   : > { %v3276_v0 = vadd.f32 %v4173_v41, %v6752_v61  ;;  %v4176_v14 = vadd.f32 %v4175_v16, %v4174_v26 }
 0xc13   : > { %v3279_v33 = vadd.f32 %v4176_v14, %v6752_v61  ;;  %v6787_v62 = vadd.f32 %v3276_v0, %v6603_v58 }
 0xc15   : > { %3344 = vadd.xlane.f32.xlu0 %v6787_v62  ;;  %v6791_v9 = vadd.f32 %v3279_v33, %v6606_v35 }
 0xc17   : > { %3346 = vadd.xlane.f32.xlu1 %v6791_v9 }
 0xc31   : > { %v4177_v36 = vpop.f32.mrb[96].mxu0 }
 0xc32   : > { %v4178_v25 = vpop.f32.mrb[97].mxu0 }
 0xc33   : > { %v4179_v49 = vadd.f32 %v4178_v25, %v4177_v36  ;;  %v4180_v27 = vpop.f32.mrb[98].mxu0 }
 0xc34   : > { %v4181_v43 = vpop.f32.mrb[99].mxu0 }
 0xc35   : > { %v3284_v18 = vadd.f32 %v4179_v49, %v6752_v61  ;;  %v4182_v2 = vadd.f32 %v4181_v43, %v4180_v27 }
 0xc37   : > { %v3287_v5 = vadd.f32 %v4182_v2, %v6752_v61  ;;  %v6797_v58 = vadd.f32 %v3284_v18, %v6632_v28 }
 0xc39   : > { %3348 = vadd.xlane.f32.xlu0 %v6797_v58  ;;  %v4183_v31 = vpop.f32.mrb[100].mxu0  ;;  %v6801_v35 = vadd.f32 %v3287_v5, %v6635_v21 }
 0xc3a   : > { %v4184_v50 = vpop.f32.mrb[101].mxu0 }
 0xc3b   : > { %v4185_v38 = vadd.f32 %v4184_v50, %v4183_v31  ;;  %3350 = vadd.xlane.f32.xlu1 %v6801_v35  ;;  %v4186_v34 = vpop.f32.mrb[102].mxu0 }
 0xc3c   : > { %v4187_v15 = vpop.f32.mrb[103].mxu0 }
 0xc3d   : > { %v3292_v52 = vadd.f32 %v4185_v38, %v6752_v61  ;;  %v4188_v13 = vadd.f32 %v4187_v15, %v4186_v34 }
 0xc3f   : > { %v3295_v29 = vadd.f32 %v4188_v13, %v6752_v61  ;;  %v6807_v28 = vadd.f32 %v3292_v52, %v6649_v22 }
 0xc41   : > { %3352 = vadd.xlane.f32.xlu0 %v6807_v28  ;;  %v6811_v3 = vadd.f32 %v3295_v29, %v6645_v30  ;;  %v4189_v21 = vpop.f32.mrb[80].mxu1 }
 0xc42   : > { %v4190_v60 = vpop.f32.mrb[81].mxu1 }
 0xc43   : > { %3354 = vadd.xlane.f32.xlu1 %v6811_v3  ;;  %v4191_v12 = vadd.f32 %v4190_v60, %v4189_v21  ;;  %v4192_v44 = vpop.f32.mrb[82].mxu1 }
 0xc44   : > { %v4193_v7 = vpop.f32.mrb[83].mxu1 }
 0xc45   : > { %v3300_v17 = vadd.f32 %v4191_v12, %v6752_v61  ;;  %v4194_v11 = vadd.f32 %v4193_v7, %v4192_v44 }
 0xc47   : > { %v3303_v51 = vadd.f32 %v4194_v11, %v6752_v61  ;;  %v6817_v22 = vadd.f32 %v3300_v17, %v6662_v1 }
 0xc49   : > { %3356 = vadd.xlane.f32.xlu0 %v6817_v22  ;;  %v4195_v47 = vpop.f32.mrb[84].mxu1  ;;  %v6821_v30 = vadd.f32 %v3303_v51, %v6658_v6 }
 0xc4a   : > { %v4196_v46 = vpop.f32.mrb[85].mxu1 }
 0xc4b   : > { %v4197_v57 = vadd.f32 %v4196_v46, %v4195_v47  ;;  %3358 = vadd.xlane.f32.xlu1 %v6821_v30  ;;  %v4198_v40 = vpop.f32.mrb[86].mxu1 }
 0xc4c   : > { %v4199_v48 = vpop.f32.mrb[87].mxu1 }
 0xc4d   : > { %v3308_v59 = vadd.f32 %v4197_v57, %v6752_v61  ;;  %v4200_v24 = vadd.f32 %v4199_v48, %v4198_v40 }
 0xc4f   : > { %v3311_v19 = vadd.f32 %v4200_v24, %v6752_v61  ;;  %v6827_v1 = vadd.f32 %v3308_v59, %v6674_v56 }
 0xc51   : > { %3360 = vadd.xlane.f32.xlu0 %v6827_v1  ;;  %v6831_v23 = vadd.f32 %v3311_v19, %v6671_v53 }
 0xc53   : > { %3362 = vadd.xlane.f32.xlu1 %v6831_v23 }
 0xc8a   : > { %v3333_v6 = vpop.xlane.xlu0 %3332 }
 0xc8b   : > { %v3364_v32 = vmul.f32 0.0078125, %v3333_v6 }
 0xc8c   : > { %v3335_v20 = vpop.xlane.xlu1 %3334 }
 0xc8d   : > { %v6835_v4 = vsub.f32 %v6757_v42, %v3364_v32  ;;  %v3365_v54 = vmul.f32 0.0078125, %v3335_v20 }
 0xc8f   : > { %v6838_v8 = vsub.f32 %v6761_v45, %v3365_v54  ;;  %v3396_v56 = vmul.f32 %v6835_v4, %v6835_v4 }
 0xc91   : > { %3412 = vadd.xlane.f32.xlu0 %v3396_v56  ;;  %v3397_v53 = vmul.f32 %v6838_v8, %v6838_v8 }
 0xc92   : > { %v3337_v61 = vpop.xlane.xlu0 %3336 }
 0xc93   : > { %v3366_v55 = vmul.f32 0.0078125, %v3337_v61  ;;  %3414 = vadd.xlane.f32.xlu1 %v3397_v53 }
 0xc94   : > { %v3339_v41 = vpop.xlane.xlu1 %3338 }
 0xc95   : > { %v6845_v26 = vsub.f32 %v6767_v63, %v3366_v55  ;;  %v3367_v42 = vmul.f32 0.0078125, %v3339_v41 }
 0xc97   : > { %v6848_v16 = vsub.f32 %v6771_v10, %v3367_v42  ;;  %v3398_v45 = vmul.f32 %v6845_v26, %v6845_v26 }
 0xc99   : > { %3416 = vadd.xlane.f32.xlu0 %v3398_v45  ;;  %v3399_v0 = vmul.f32 %v6848_v16, %v6848_v16 }
 0xc9a   : > { %v3341_v14 = vpop.xlane.xlu0 %3340 }
 0xc9b   : > { %3418 = vadd.xlane.f32.xlu1 %v3399_v0  ;;  %v3368_v33 = vmul.f32 0.0078125, %v3341_v14 }
 0xc9c   : > { %v3343_v36 = vpop.xlane.xlu1 %3342 }
 0xc9d   : > { %v6855_v25 = vsub.f32 %v6777_v39, %v3368_v33  ;;  %v3369_v63 = vmul.f32 0.0078125, %v3343_v36 }
 0xc9f   : > { %v6858_v49 = vsub.f32 %v6781_v37, %v3369_v63  ;;  %v3400_v10 = vmul.f32 %v6855_v25, %v6855_v25 }
 0xca1   : > { %3420 = vadd.xlane.f32.xlu0 %v3400_v10  ;;  %v3401_v27 = vmul.f32 %v6858_v49, %v6858_v49 }
 0xca2   : > { %v3345_v43 = vpop.xlane.xlu0 %3344 }
 0xca3   : > { %v3370_v18 = vmul.f32 0.0078125, %v3345_v43  ;;  %3422 = vadd.xlane.f32.xlu1 %v3401_v27 }
 0xca4   : > { %v3347_v2 = vpop.xlane.xlu1 %3346 }
 0xca5   : > { %v6865_v5 = vsub.f32 %v6787_v62, %v3370_v18  ;;  %v3371_v39 = vmul.f32 0.0078125, %v3347_v2 }
 0xca7   : > { %v6868_v31 = vsub.f32 %v6791_v9, %v3371_v39  ;;  %v3402_v37 = vmul.f32 %v6865_v5, %v6865_v5 }
 0xca9   : > { %3424 = vadd.xlane.f32.xlu0 %v3402_v37  ;;  %v3403_v50 = vmul.f32 %v6868_v31, %v6868_v31 }
 0xcab   : > { %3426 = vadd.xlane.f32.xlu1 %v3403_v50 }
 0xcc6   : > { %v3349_v38 = vpop.xlane.xlu0 %3348 }
 0xcc7   : > { %v3372_v34 = vmul.f32 0.0078125, %v3349_v38 }
 0xcc8   : > { %v3351_v15 = vpop.xlane.xlu1 %3350 }
 0xcc9   : > { %v6875_v52 = vsub.f32 %v6797_v58, %v3372_v34  ;;  %v3373_v62 = vmul.f32 0.0078125, %v3351_v15 }
 0xccb   : > { %v6878_v13 = vsub.f32 %v6801_v35, %v3373_v62  ;;  %v3404_v9 = vmul.f32 %v6875_v52, %v6875_v52 }
 0xccd   : > { %3428 = vadd.xlane.f32.xlu0 %v3404_v9  ;;  %v3405_v29 = vmul.f32 %v6878_v13, %v6878_v13 }
 0xcce   : > { %v3353_v21 = vpop.xlane.xlu0 %3352 }
 0xccf   : > { %v3374_v60 = vmul.f32 0.0078125, %v3353_v21  ;;  %3430 = vadd.xlane.f32.xlu1 %v3405_v29 }
 0xcd0   : > { %v3355_v12 = vpop.xlane.xlu1 %3354 }
 0xcd1   : > { %v6885_v44 = vsub.f32 %v6807_v28, %v3374_v60  ;;  %v3375_v58 = vmul.f32 0.0078125, %v3355_v12 }
 0xcd3   : > { %v6888_v7 = vsub.f32 %v6811_v3, %v3375_v58  ;;  %v3406_v35 = vmul.f32 %v6885_v44, %v6885_v44 }
 0xcd5   : > { %3432 = vadd.xlane.f32.xlu0 %v3406_v35  ;;  %v3407_v17 = vmul.f32 %v6888_v7, %v6888_v7 }
 0xcd6   : > { %v3357_v11 = vpop.xlane.xlu0 %3356 }
 0xcd7   : > { %3434 = vadd.xlane.f32.xlu1 %v3407_v17  ;;  %v3376_v51 = vmul.f32 0.0078125, %v3357_v11 }
 0xcd8   : > { %v3359_v47 = vpop.xlane.xlu1 %3358 }
 0xcd9   : > { %v6895_v46 = vsub.f32 %v6817_v22, %v3376_v51  ;;  %v3377_v28 = vmul.f32 0.0078125, %v3359_v47 }
 0xcdb   : > { %v6898_v57 = vsub.f32 %v6821_v30, %v3377_v28  ;;  %v3408_v3 = vmul.f32 %v6895_v46, %v6895_v46 }
 0xcdd   : > { %3436 = vadd.xlane.f32.xlu0 %v3408_v3  ;;  %v3409_v40 = vmul.f32 %v6898_v57, %v6898_v57 }
 0xcde   : > { %v3361_v48 = vpop.xlane.xlu0 %3360 }
 0xcdf   : > { %v3378_v59 = vmul.f32 0.0078125, %v3361_v48  ;;  %3438 = vadd.xlane.f32.xlu1 %v3409_v40  ;;  %v6919_v40 = vld [vmem:[%s736_s10] ss:$0 sm:$0xff] }
 0xce0   : > { %v3363_v24 = vpop.xlane.xlu1 %3362 }
 0xce1   : > { %v6905_v19 = vsub.f32 %v6827_v1, %v3378_v59  ;;  %v3379_v22 = vmul.f32 0.0078125, %v3363_v24  ;;  %v6927_v24 = vld [vmem:[%s739_s3] ss:$0 sm:$0xff] }
 0xce3   : > { %v6908_v6 = vsub.f32 %v6831_v23, %v3379_v22  ;;  %v3410_v30 = vmul.f32 %v6905_v19, %v6905_v19 }
 0xce5   : > { %3440 = vadd.xlane.f32.xlu0 %v3410_v30  ;;  %v3411_v32 = vmul.f32 %v6908_v6, %v6908_v6 }
 0xce7   : > { %3442 = vadd.xlane.f32.xlu1 %v3411_v32 }
 0xd1e   : > { %v3413_v20 = vpop.xlane.xlu0 %3412 }
 0xd1f   : > { %v3444_v54 = vmul.f32 0.007874016, %v3413_v20 }
 0xd20   : > { %v3415_v56 = vpop.xlane.xlu1 %3414 }
 0xd21   : > { %4888 = vrsqrt.f32 %v3444_v54  ;;  %v3445_v53 = vmul.f32 0.007874016, %v3415_v56  ;;  %vm3462_vm1 = vcmp.eq.f32.partialorder %v3444_v54, inf  ;;  %v3465_v45 = vand.u32 2147483648, %v3444_v54 }
 0xd22   : > { %vm3464_vm2 = vcmp.eq.f32.partialorder %v3444_v54, 0.0 }
 0xd23   : > { %4890 = vrsqrt.f32 %v3445_v53  ;;  %vm3469_vm3 = vcmp.eq.f32.partialorder %v3445_v53, inf  ;;  %v3472_v27 = vand.u32 2147483648, %v3445_v53  ;;  %vm3471_vm4 = vcmp.eq.f32.partialorder %v3445_v53, 0.0 }
 0xd26   : > { %v3417_v1 = vpop.xlane.xlu0 %3416 }
 0xd27   : > { %v3446_v61 = vmul.f32 0.007874016, %v3417_v1 }
 0xd28   : > { %v3419_v55 = vpop.xlane.xlu1 %3418 }
 0xd29   : > { %4892 = vrsqrt.f32 %v3446_v61  ;;  %v3447_v23 = vmul.f32 0.007874016, %v3419_v55  ;;  %vm3476_vm5 = vcmp.eq.f32.partialorder %v3446_v61, inf  ;;  %v3479_v15 = vand.u32 2147483648, %v3446_v61 }
 0xd2a   : > { %vm3478_vm6 = vcmp.eq.f32.partialorder %v3446_v61, 0.0 }
 0xd2b   : > { %v4889_v41 = vpop.eup %4888  ;;  %4894 = vrsqrt.f32 %v3447_v23  ;;  %vm3483_vm7 = vcmp.eq.f32.partialorder %v3447_v23, inf  ;;  %v3486_v58 = vand.u32 2147483648, %v3447_v23  ;;  %vm3485_vm8 = vcmp.eq.f32.partialorder %v3447_v23, 0.0 }
 0xd2c   : > { %v3461_v42 = vmul.f32 %v4889_v41, %v3444_v54 }
 0xd2d   : > { %v4891_v0 = vpop.eup %4890 }
 0xd2e   : > { %v3463_v14 = vsel %vm3462_vm1, %v3444_v54, %v3461_v42  ;;  %v3468_v36 = vmul.f32 %v4891_v0, %v3445_v53  ;;  %v3421_v63 = vpop.xlane.xlu0 %3420 }
 0xd2f   : > { %v3466_v33 = vsel %vm3464_vm2, %v3465_v45, %v3463_v14  ;;  %v3448_v43 = vmul.f32 0.007874016, %v3421_v63 }
 0xd30   : > { %v3572_v10 = vadd.f32 1e-05, %v3466_v33  ;;  %v3470_v18 = vsel %vm3469_vm3, %v3445_v53, %v3468_v36  ;;  %v3423_v2 = vpop.xlane.xlu1 %3422 }
 0xd31   : > { %v3473_v39 = vsel %vm3471_vm4, %v3472_v27, %v3470_v18  ;;  %v3449_v38 = vmul.f32 0.007874016, %v3423_v2  ;;  %vm3490_vm9 = vcmp.eq.f32.partialorder %v3448_v43, inf  ;;  %v3493_v20 = vand.u32 2147483648, %v3448_v43 }
 0xd32   : > { %4896 = vrcp.f32 %v3572_v10  ;;  %v3573_v50 = vadd.f32 1e-05, %v3473_v39  ;;  %vm3492_vm10 = vcmp.eq.f32.partialorder %v3448_v43, 0.0 }
 0xd33   : > { %v4893_v37 = vpop.eup %4892  ;;  %4898 = vrsqrt.f32 %v3448_v43  ;;  %vm3497_vm11 = vcmp.eq.f32.partialorder %v3449_v38, inf  ;;  %v3500_v41 = vand.u32 2147483648, %v3449_v38  ;;  %vm3499_vm12 = vcmp.eq.f32.partialorder %v3449_v38, 0.0 }
 0xd34   : > { %v3475_v34 = vmul.f32 %v4893_v37, %v3446_v61  ;;  %4900 = vrcp.f32 %v3573_v50 }
 0xd35   : > { %v4895_v62 = vpop.eup %4894  ;;  %4902 = vrsqrt.f32 %v3449_v38 }
 0xd36   : > { %v3477_v9 = vsel %vm3476_vm5, %v3446_v61, %v3475_v34  ;;  %v3482_v21 = vmul.f32 %v4895_v62, %v3447_v23  ;;  %v3425_v60 = vpop.xlane.xlu0 %3424 }
 0xd37   : > { %v3480_v29 = vsel %vm3478_vm6, %v3479_v15, %v3477_v9  ;;  %v3450_v35 = vmul.f32 0.007874016, %v3425_v60 }
 0xd38   : > { %v3574_v12 = vadd.f32 1e-05, %v3480_v29  ;;  %v3484_v17 = vsel %vm3483_vm7, %v3447_v23, %v3482_v21  ;;  %v3427_v11 = vpop.xlane.xlu1 %3426 }
 0xd39   : > { %v3487_v51 = vsel %vm3485_vm8, %v3486_v58, %v3484_v17  ;;  %v3451_v28 = vmul.f32 0.007874016, %v3427_v11  ;;  %vm3504_vm13 = vcmp.eq.f32.partialorder %v3450_v35, inf  ;;  %vm3506_vm14 = vcmp.eq.f32.partialorder %v3450_v35, 0.0 }
 0xd3a   : > { %4904 = vrcp.f32 %v3574_v12  ;;  %v3575_v47 = vadd.f32 1e-05, %v3487_v51 }
 0xd3b   : > { %4906 = vrsqrt.f32 %v3450_v35  ;;  %vm3511_vm15 = vcmp.eq.f32.partialorder %v3451_v28, inf  ;;  %v3514_v15 = vand.u32 2147483648, %v3451_v28  ;;  %vm3513_vm0 = vcmp.eq.f32.partialorder %v3451_v28, 0.0 }
 0xd3c   : > { %v4897_v3 = vpop.eup %4896  ;;  %4908 = vrcp.f32 %v3575_v47 }
 0xd3d   : > { %v4899_v48 = vpop.eup %4898  ;;  %v3589_v59 = vmul.f32 %v4897_v3, %v6835_v4  ;;  %4910 = vrsqrt.f32 %v3451_v28 }
 0xd3e   : > { %v3489_v22 = vmul.f32 %v4899_v48, %v3448_v43  ;;  %v4901_v30 = vpop.eup %4900 }
 0xd3f   : > { %v3626_v32 = vmul.f32 %v6919_v40, %v3589_v59  ;;  %v4903_v54 = vpop.eup %4902  ;;  %v3591_v56 = vmul.f32 %v4901_v30, %v6838_v8 }
 0xd40   : > { %v3491_v53 = vsel %vm3490_vm9, %v3448_v43, %v3489_v22  ;;  %v3496_v61 = vmul.f32 %v4903_v54, %v3449_v38  ;;  %v3507_v43 = vand.u32 2147483648, %v3450_v35 }
 0xd41   : > { %v3648_v4 = vadd.f32 %v6927_v24, %v3626_v32  ;;  %v3494_v1 = vsel %vm3492_vm10, %v3493_v20, %v3491_v53  ;;  %v3627_v55 = vmul.f32 %v6919_v40, %v3591_v56 }
 0xd42   : > { %v3576_v23 = vadd.f32 1e-05, %v3494_v1  ;;  %v3498_v42 = vsel %vm3497_vm11, %v3449_v38, %v3496_v61 }
 0xd43   : > { %3664 = vst [vmem:[%s5706_s18] sm:$0xff] %v3648_v4  ;;  %v3649_v0 = vadd.f32 %v6927_v24, %v3627_v55  ;;  %v3501_v8 = vsel %vm3499_vm12, %v3500_v41, %v3498_v42 }
 0xd44   : > { %v4905_v45 = vpop.eup %4904  ;;  %4912 = vrcp.f32 %v3576_v23  ;;  %v3577_v36 = vadd.f32 1e-05, %v3501_v8 }
 0xd45   : > { %v4907_v14 = vpop.eup %4906  ;;  %v3593_v33 = vmul.f32 %v4905_v45, %v6845_v26  ;;  %3665 = vst [vmem:[%s5706_s18 + $0x8] sm:$0xff] %v3649_v0 }
 0xd46   : > { %v3503_v63 = vmul.f32 %v4907_v14, %v3450_v35  ;;  %v4909_v10 = vpop.eup %4908  ;;  %4914 = vrcp.f32 %v3577_v36 }
 0xd47   : > { %v3628_v27 = vmul.f32 %v6919_v40, %v3593_v33  ;;  %v4911_v18 = vpop.eup %4910  ;;  %v3595_v2 = vmul.f32 %v4909_v10, %v6848_v16 }
 0xd48   : > { %v3505_v39 = vsel %vm3504_vm13, %v3450_v35, %v3503_v63  ;;  %v3510_v26 = vmul.f32 %v4911_v18, %v3451_v28 }
 0xd49   : > { %v3650_v37 = vadd.f32 %v6927_v24, %v3628_v27  ;;  %v3508_v50 = vsel %vm3506_vm14, %v3507_v43, %v3505_v39  ;;  %v3629_v38 = vmul.f32 %v6919_v40, %v3595_v2 }
 0xd4a   : > { %v3578_v34 = vadd.f32 1e-05, %v3508_v50  ;;  %v3512_v62 = vsel %vm3511_vm15, %v3451_v28, %v3510_v26 }
 0xd4b   : > { %3666 = vst [vmem:[%s5706_s18 + $0x10] sm:$0xff] %v3650_v37  ;;  %v3651_v9 = vadd.f32 %v6927_v24, %v3629_v38  ;;  %v3515_v16 = vsel %vm3513_vm0, %v3514_v15, %v3512_v62 }
 0xd4c   : > { %4916 = vrcp.f32 %v3578_v34  ;;  %v3579_v29 = vadd.f32 1e-05, %v3515_v16 }
 0xd4d   : > { %3667 = vst [vmem:[%s5706_s18 + $0x18] sm:$0xff] %v3651_v9 }
 0xd4e   : > { %v4913_v21 = vpop.eup %4912  ;;  %4918 = vrcp.f32 %v3579_v29 }
 0xd4f   : > { %v3597_v60 = vmul.f32 %v4913_v21, %v6855_v25 }
 0xd50   : > { %v4915_v12 = vpop.eup %4914 }
 0xd51   : > { %v3630_v58 = vmul.f32 %v6919_v40, %v3597_v60  ;;  %v3599_v35 = vmul.f32 %v4915_v12, %v6858_v49 }
 0xd53   : > { %v3652_v17 = vadd.f32 %v6927_v24, %v3630_v58  ;;  %v3631_v11 = vmul.f32 %v6919_v40, %v3599_v35 }
 0xd55   : > { %3668 = vst [vmem:[%s5706_s18 + $0x20] sm:$0xff] %v3652_v17  ;;  %v3653_v47 = vadd.f32 %v6927_v24, %v3631_v11 }
 0xd56   : > { %v4917_v51 = vpop.eup %4916 }
 0xd57   : > { %v3601_v28 = vmul.f32 %v4917_v51, %v6865_v5  ;;  %3669 = vst [vmem:[%s5706_s18 + $0x28] sm:$0xff] %v3653_v47 }
 0xd58   : > { %v4919_v25 = vpop.eup %4918 }
 0xd59   : > { %v3632_v3 = vmul.f32 %v6919_v40, %v3601_v28  ;;  %v3603_v48 = vmul.f32 %v4919_v25, %v6868_v31 }
 0xd5a   : > { %v3429_v59 = vpop.xlane.xlu0 %3428 }
 0xd5b   : > { %v3654_v49 = vadd.f32 %v6927_v24, %v3632_v3  ;;  %v3452_v22 = vmul.f32 0.007874016, %v3429_v59  ;;  %v3633_v30 = vmul.f32 %v6919_v40, %v3603_v48 }
 0xd5c   : > { %v3431_v32 = vpop.xlane.xlu1 %3430 }
 0xd5d   : > { %3670 = vst [vmem:[%s5706_s18 + $0x30] sm:$0xff] %v3654_v49  ;;  %4920 = vrsqrt.f32 %v3452_v22  ;;  %v3655_v20 = vadd.f32 %v6927_v24, %v3633_v30  ;;  %v3453_v54 = vmul.f32 0.007874016, %v3431_v32  ;;  %vm3518_vm1 = vcmp.eq.f32.partialorder %v3452_v22, inf }
 0xd5e   : > { %v3521_v61 = vand.u32 2147483648, %v3452_v22  ;;  %vm3520_vm2 = vcmp.eq.f32.partialorder %v3452_v22, 0.0 }
 0xd5f   : > { %3671 = vst [vmem:[%s5706_s18 + $0x38] sm:$0xff] %v3655_v20  ;;  %4922 = vrsqrt.f32 %v3453_v54  ;;  %vm3525_vm3 = vcmp.eq.f32.partialorder %v3453_v54, inf  ;;  %v3528_v8 = vand.u32 2147483648, %v3453_v54  ;;  %vm3527_vm4 = vcmp.eq.f32.partialorder %v3453_v54, 0.0 }
 0xd62   : > { %v3433_v5 = vpop.xlane.xlu0 %3432 }
 0xd63   : > { %v3454_v56 = vmul.f32 0.007874016, %v3433_v5 }
 0xd64   : > { %v3435_v53 = vpop.xlane.xlu1 %3434 }
 0xd65   : > { %4924 = vrsqrt.f32 %v3454_v56  ;;  %v3455_v4 = vmul.f32 0.007874016, %v3435_v53  ;;  %vm3532_vm5 = vcmp.eq.f32.partialorder %v3454_v56, inf  ;;  %v3535_v2 = vand.u32 2147483648, %v3454_v56 }
 0xd66   : > { %vm3534_vm6 = vcmp.eq.f32.partialorder %v3454_v56, 0.0 }
 0xd67   : > { %v4921_v31 = vpop.eup %4920  ;;  %4926 = vrsqrt.f32 %v3455_v4  ;;  %vm3539_vm7 = vcmp.eq.f32.partialorder %v3455_v4, inf  ;;  %v3542_v15 = vand.u32 2147483648, %v3455_v4  ;;  %vm3541_vm8 = vcmp.eq.f32.partialorder %v3455_v4, 0.0 }
 0xd68   : > { %v3517_v1 = vmul.f32 %v4921_v31, %v3452_v22 }
 0xd69   : > { %v4923_v55 = vpop.eup %4922 }
 0xd6a   : > { %v3519_v23 = vsel %vm3518_vm1, %v3452_v22, %v3517_v1  ;;  %v3524_v42 = vmul.f32 %v4923_v55, %v3453_v54  ;;  %v3437_v45 = vpop.xlane.xlu0 %3436 }
 0xd6b   : > { %v3522_v41 = vsel %vm3520_vm2, %v3521_v61, %v3519_v23  ;;  %v3456_v14 = vmul.f32 0.007874016, %v3437_v45 }
 0xd6c   : > { %v3580_v0 = vadd.f32 1e-05, %v3522_v41  ;;  %v3526_v33 = vsel %vm3525_vm3, %v3453_v54, %v3524_v42  ;;  %v3439_v36 = vpop.xlane.xlu1 %3438 }
 0xd6d   : > { %v3529_v63 = vsel %vm3527_vm4, %v3528_v8, %v3526_v33  ;;  %v3457_v43 = vmul.f32 0.007874016, %v3439_v36  ;;  %vm3546_vm9 = vcmp.eq.f32.partialorder %v3456_v14, inf  ;;  %v3549_v47 = vand.u32 2147483648, %v3456_v14 }
 0xd6e   : > { %4928 = vrcp.f32 %v3580_v0  ;;  %v3581_v27 = vadd.f32 1e-05, %v3529_v63  ;;  %vm3548_vm10 = vcmp.eq.f32.partialorder %v3456_v14, 0.0 }
 0xd6f   : > { %v4925_v10 = vpop.eup %4924  ;;  %4930 = vrsqrt.f32 %v3456_v14  ;;  %vm3553_vm11 = vcmp.eq.f32.partialorder %v3457_v43, inf  ;;  %v3556_v30 = vand.u32 2147483648, %v3457_v43  ;;  %vm3555_vm12 = vcmp.eq.f32.partialorder %v3457_v43, 0.0 }
 0xd70   : > { %v3531_v18 = vmul.f32 %v4925_v10, %v3454_v56  ;;  %4932 = vrcp.f32 %v3581_v27 }
 0xd71   : > { %v4927_v39 = vpop.eup %4926  ;;  %4934 = vrsqrt.f32 %v3457_v43 }
 0xd72   : > { %v3533_v37 = vsel %vm3532_vm5, %v3454_v56, %v3531_v18  ;;  %v3538_v26 = vmul.f32 %v4927_v39, %v3455_v4  ;;  %v3441_v38 = vpop.xlane.xlu0 %3440 }
 0xd73   : > { %v3536_v50 = vsel %vm3534_vm6, %v3535_v2, %v3533_v37  ;;  %v3458_v62 = vmul.f32 0.007874016, %v3441_v38 }
 0xd74   : > { %v3582_v34 = vadd.f32 1e-05, %v3536_v50  ;;  %v3540_v9 = vsel %vm3539_vm7, %v3455_v4, %v3538_v26  ;;  %v3443_v16 = vpop.xlane.xlu1 %3442 }
 0xd75   : > { %v3543_v29 = vsel %vm3541_vm8, %v3542_v15, %v3540_v9  ;;  %v3459_v60 = vmul.f32 0.007874016, %v3443_v16  ;;  %vm3560_vm13 = vcmp.eq.f32.partialorder %v3458_v62, inf  ;;  %v3563_v61 = vand.u32 2147483648, %v3458_v62 }
 0xd76   : > { %4936 = vrcp.f32 %v3582_v34  ;;  %v3583_v21 = vadd.f32 1e-05, %v3543_v29  ;;  %vm3562_vm14 = vcmp.eq.f32.partialorder %v3458_v62, 0.0 }
 0xd77   : > { %4938 = vrsqrt.f32 %v3458_v62  ;;  %vm3567_vm15 = vcmp.eq.f32.partialorder %v3459_v60, inf  ;;  %vm3569_vm0 = vcmp.eq.f32.partialorder %v3459_v60, 0.0 }
 0xd78   : > { %v4929_v12 = vpop.eup %4928  ;;  %4940 = vrcp.f32 %v3583_v21 }
 0xd79   : > { %v4931_v58 = vpop.eup %4930  ;;  %v3605_v35 = vmul.f32 %v4929_v12, %v6875_v52  ;;  %4942 = vrsqrt.f32 %v3459_v60 }
 0xd7a   : > { %v3545_v17 = vmul.f32 %v4931_v58, %v3456_v14  ;;  %v4933_v11 = vpop.eup %4932 }
 0xd7b   : > { %v3634_v51 = vmul.f32 %v6919_v40, %v3605_v35  ;;  %v4935_v28 = vpop.eup %4934  ;;  %v3607_v25 = vmul.f32 %v4933_v11, %v6878_v13 }
 0xd7c   : > { %v3547_v3 = vsel %vm3546_vm9, %v3456_v14, %v3545_v17  ;;  %v3552_v49 = vmul.f32 %v4935_v28, %v3457_v43  ;;  %v3570_v14 = vand.u32 2147483648, %v3459_v60 }
 0xd7d   : > { %v3656_v48 = vadd.f32 %v6927_v24, %v3634_v51  ;;  %v3550_v59 = vsel %vm3548_vm10, %v3549_v47, %v3547_v3  ;;  %v3635_v52 = vmul.f32 %v6919_v40, %v3607_v25 }
 0xd7e   : > { %v3584_v22 = vadd.f32 1e-05, %v3550_v59  ;;  %v3554_v32 = vsel %vm3553_vm11, %v3457_v43, %v3552_v49 }
 0xd7f   : > { %3672 = vst [vmem:[%s5706_s18 + $0x40] sm:$0xff] %v3656_v48  ;;  %v3657_v54 = vadd.f32 %v6927_v24, %v3635_v52  ;;  %v3557_v13 = vsel %vm3555_vm12, %v3556_v30, %v3554_v32 }
 0xd80   : > { %v4937_v20 = vpop.eup %4936  ;;  %4944 = vrcp.f32 %v3584_v22  ;;  %v3585_v53 = vadd.f32 1e-05, %v3557_v13 }
 0xd81   : > { %v4939_v5 = vpop.eup %4938  ;;  %v3609_v56 = vmul.f32 %v4937_v20, %v6885_v44  ;;  %3673 = vst [vmem:[%s5706_s18 + $0x48] sm:$0xff] %v3657_v54 }
 0xd82   : > { %v3559_v4 = vmul.f32 %v4939_v5, %v3458_v62  ;;  %v4941_v31 = vpop.eup %4940  ;;  %4946 = vrcp.f32 %v3585_v53 }
 0xd83   : > { %v3636_v1 = vmul.f32 %v6919_v40, %v3609_v56  ;;  %v4943_v55 = vpop.eup %4942  ;;  %v3611_v23 = vmul.f32 %v4941_v31, %v6888_v7 }
 0xd84   : > { %v3561_v41 = vsel %vm3560_vm13, %v3458_v62, %v3559_v4  ;;  %v3566_v44 = vmul.f32 %v4943_v55, %v3459_v60 }
 0xd85   : > { %v3658_v42 = vadd.f32 %v6927_v24, %v3636_v1  ;;  %v3564_v45 = vsel %vm3562_vm14, %v3563_v61, %v3561_v41  ;;  %v3637_v0 = vmul.f32 %v6919_v40, %v3611_v23 }
 0xd86   : > { %v3586_v8 = vadd.f32 1e-05, %v3564_v45  ;;  %v3568_v33 = vsel %vm3567_vm15, %v3459_v60, %v3566_v44 }
 0xd87   : > { %3674 = vst [vmem:[%s5706_s18 + $0x50] sm:$0xff] %v3658_v42  ;;  %v3659_v36 = vadd.f32 %v6927_v24, %v3637_v0  ;;  %v3571_v7 = vsel %vm3569_vm0, %v3570_v14, %v3568_v33 }
 0xd88   : > { %4948 = vrcp.f32 %v3586_v8  ;;  %v3587_v63 = vadd.f32 1e-05, %v3571_v7 }
 0xd89   : > { %3675 = vst [vmem:[%s5706_s18 + $0x58] sm:$0xff] %v3659_v36 }
 0xd8a   : > { %v4945_v10 = vpop.eup %4944  ;;  %4950 = vrcp.f32 %v3587_v63 }
 0xd8b   : > { %v3613_v27 = vmul.f32 %v4945_v10, %v6895_v46 }
 0xd8c   : > { %v4947_v43 = vpop.eup %4946 }
 0xd8d   : > { %v3638_v18 = vmul.f32 %v6919_v40, %v3613_v27  ;;  %v3615_v2 = vmul.f32 %v4947_v43, %v6898_v57 }
 0xd8f   : > { %v3660_v39 = vadd.f32 %v6927_v24, %v3638_v18  ;;  %v3639_v37 = vmul.f32 %v6919_v40, %v3615_v2 }
 0xd91   : > { %3676 = vst [vmem:[%s5706_s18 + $0x60] sm:$0xff] %v3660_v39  ;;  %v3661_v26 = vadd.f32 %v6927_v24, %v3639_v37 }
 0xd92   : > { %v4949_v50 = vpop.eup %4948 }
 0xd93   : > { %v3617_v38 = vmul.f32 %v4949_v50, %v6905_v19  ;;  %3677 = vst [vmem:[%s5706_s18 + $0x68] sm:$0xff] %v3661_v26 }
 0xd94   : > { %v4951_v46 = vpop.eup %4950 }
 0xd95   : > { %v3640_v34 = vmul.f32 %v6919_v40, %v3617_v38  ;;  %v3619_v15 = vmul.f32 %v4951_v46, %v6908_v6 }
 0xd97   : > { %v3662_v62 = vadd.f32 %v6927_v24, %v3640_v34  ;;  %v3641_v57 = vmul.f32 %v6919_v40, %v3619_v15 }
 0xd99   : > { %3678 = vst [vmem:[%s5706_s18 + $0x70] sm:$0xff] %v3662_v62  ;;  %v3663_v9 = vadd.f32 %v6927_v24, %v3641_v57 }
 0xd9b   : > { %3679 = vst [vmem:[%s5706_s18 + $0x78] sm:$0xff] %v3663_v9 }
 0xd9c PF: > { %s7138_s13 = sld [smem:[#allocation21_spill]]  ;;  %s7139_s25 = sld [smem:[#allocation13_spill]] }
 0xd9d   : > { %s7140_s26 = sld [smem:[#allocation14_spill]]  ;;  %s7141_s27 = sld [smem:[#allocation23_spill]] }
 0xd9e   : > { %s7142_s28 = sld [smem:[#allocation15_spill]]  ;;  %s7143_s29 = sld [smem:[#allocation16_spill]] }
 0xd9f   : > { %s7144_s30 = sld [smem:[#allocation26_spill]]  ;;  %s7145_s14 = sld [smem:[#allocation19_spill]] }
 0xda0   : > { %s7146_s15 = sld [smem:[#allocation20_spill]]  ;;  %s7147_s16 = sld [smem:[#allocation22_spill]] }
 0xda1   : > { %s7148_s17 = sld [smem:[#allocation25_spill]] }
 0xda2   : > { %s32_s18 = sadd.s32 1, %s7138_s13  }
 0xda3   : > { %p29_p1 = scmp.ge.s32.totalorder %s32_s18, 6  }
 0xda5   :  { %31 = sbr.rel (!%p29_p1) target bundleno = 26 (0x1a), region = 188 }
 0xdac   :  { %3701 = vsyncpa [#allocation3], 1 }
 0xdad   :  { %3703 = vsyncpa [#allocation3 + $0x1], 1 }
 0xdae   :  { %3704 = vsyncpa [#allocation5], 1 }
 0xdaf   :  { %3706 = vsyncpa [#allocation5 + $0x1], 1 }
 0xdb0   :  { %3707 = vsyncpa [#allocation8], 1 }
 0xdb1   :  { %3709 = vsyncpa [#allocation8 + $0x1], 1 }

// kernel: transformer_forward.3
= control target key start
LH: loop header
LB: loop body
LE: loop exit
PB: predicated region body
PF: predicated region fallthrough
CT: control target
= control target key end

     0   :  { %s10353_s0 = inlined_call_operand.vmem [shape: f32[2,128,128], index: 0, kind: input, shape index: {}]   ;;  %s10354_s1 = inlined_call_operand.vmem [shape: f32[2,128,128], index: 1, kind: input, shape index: {}]   ;;  %s10355_s2 = inlined_call_operand.vmem [shape: bf16[2,128,384], index: 2, kind: input, shape index: {}]   ;;  %s10356_s3 = inlined_call_operand.vmem [shape: f32[2,1,384], index: 3, kind: input, shape index: {}]   ;;  %s10357_s4 = inlined_call_operand.vmem [shape: bf16[2,128,128], index: 4, kind: input, shape index: {}]   ;;  %s10358_s5 = inlined_call_operand.vmem [shape: f32[2,1,128], index: 5, kind: input, shape index: {}]   ;;  %s10359_s6 = inlined_call_operand.vmem [shape: bf16[2,128,384], index: 6, kind: input, shape index: {}]   ;;  %s10360_s7 = inlined_call_operand.vmem [shape: f32[2,1,384], index: 7, kind: input, shape index: {}]   ;;  %s10361_s8 = inlined_call_operand.vmem [shape: bf16[2,128,128], index: 8, kind: input, shape index: {}]   ;;  %s10362_s9 = inlined_call_operand.vmem [shape: f32[2,1,128], index: 9, kind: input, shape index: {}]   ;;  %s10363_s10 = inlined_call_operand.vmem [shape: f32[2,1,128], index: 10, kind: input, shape index: {}]   ;;  %s10364_s11 = inlined_call_operand.vmem [shape: f32[2,1,128], index: 11, kind: input, shape index: {}]   ;;  %s10365_s12 = inlined_call_operand.vmem [shape: f32[2,1,128], index: 12, kind: input, shape index: {}]   ;;  %s10366_s13 = inlined_call_operand.vmem [shape: f32[2,1,128], index: 13, kind: input, shape index: {}]   ;;  %s10367_s14 = inlined_call_operand.vmem [shape: f32[2,1,128], index: 14, kind: input, shape index: {}]   ;;  %s10368_s15 = inlined_call_operand.vmem [shape: f32[2,1,128], index: 15, kind: input, shape index: {}]   ;;  %s10369_s16 = inlined_call_operand.vmem [shape: bf16[2,128,256], index: 16, kind: input, shape index: {}]   ;;  %s10370_s17 = inlined_call_operand.vmem [shape: f32[2,1,256], index: 17, kind: input, shape index: {}]   ;;  %s10371_s18 = inlined_call_operand.vmem [shape: bf16[2,256,128], index: 18, kind: input, shape index: {}]   ;;  %s10372_s19 = inlined_call_operand.vmem [shape: f32[2,1,128], index: 19, kind: input, shape index: {}]   ;;  %s10373_s20 = inlined_call_operand.hbm [shape: f32[2,128,128], index: 20, kind: output, shape index: {}]  }
   0x1   :  { %10404 = sst [smem:[#allocation30_spill]] %s10353_s0 }
   0x2   :  { %10405 = sst [smem:[#allocation31_spill]] %s10354_s1 }
   0x3   :  { %10406 = sst [smem:[#allocation32_spill]] %s10355_s2 }
   0x4   :  { %10407 = sst [smem:[#allocation33_spill]] %s10356_s3 }
   0x5   :  { %10408 = sst [smem:[#allocation34_spill]] %s10357_s4 }
   0x6   :  { %10409 = sst [smem:[#allocation35_spill]] %s10359_s6 }
   0x7   :  { %10410 = sst [smem:[#allocation36_spill]] %s10360_s7 }
   0x8   :  { %10411 = sst [smem:[#allocation37_spill]] %s10361_s8 }
   0x9   :  { %10412 = sst [smem:[#allocation38_spill]] %s10362_s9 }
   0xa   :  { %10413 = sst [smem:[#allocation39_spill]] %s10367_s14 }
   0xb   :  { %10414 = sst [smem:[#allocation40_spill]] %s10368_s15 }
   0xc   :  { %10415 = sst [smem:[#allocation41_spill]] %s10369_s16 }
   0xd   :  { %10416 = sst [smem:[#allocation42_spill]] %s10370_s17 }
   0xe   :  { %10417 = sst [smem:[#allocation43_spill]] %s10371_s18 }
   0xf   :  { %10418 = sst [smem:[#allocation44_spill]] %s10372_s19 }
  0x10   :  { %10419 = sst [smem:[#allocation45_spill]] %s10373_s20 }
  0x11   :  { %25 = vsyncpa [#allocation3], 0 }
  0x12   :  { %27 = vsyncpa [#allocation3 + $0x1], 0  ;;  %s7828_s1 = smov 0   ;;  %s7830_s22 = smov 0  }
  0x13   :  { %s7832_s23 = smov 0   ;;  %s7834_s24 = smov 0  }
  0x14   :  { %s7836_s2 = smov 0   ;;  %s7838_s25 = smov 0  }
  0x15   :  { %s7840_s3 = smov 0   ;;  %s7842_s26 = smov 0  }
  0x16 LB: > { %10420 = sst [smem:[#allocation5_spill]] %s7688_s1  ;;  %s6057_s27 = sadd.s32 4294967295, %s7716_s26   ;;  %s7716_s26 = sphi %s7842_s26, %s33_s26   ;;  %s7712_s3 = sphi %s7840_s3, %s10508_s3   ;;  %s7708_s25 = sphi %s7838_s25, %s10507_s25   ;;  %s7704_s2 = sphi %s7836_s2, %s10506_s2   ;;  %s7700_s24 = sphi %s7834_s24, %s10505_s24   ;;  %s7696_s23 = sphi %s7832_s23, %s10504_s23   ;;  %s7692_s22 = sphi %s7830_s22, %s10503_s22   ;;  %s7688_s1 = sphi %s7828_s1, %s10502_s1  }
  0x17   : > { %10421 = sst [smem:[#allocation6_spill]] %s7692_s22  ;;  %s6058_s28 = sadd.s32 4294967294, %s7716_s26  }
  0x18   : > { %10422 = sst [smem:[#allocation7_spill]] %s7696_s23  ;;  %s42_s4 = sadd.s32 1, %s7708_s25 }
  0x19   : > { %10423 = sst [smem:[#allocation8_spill]] %s7700_s24  ;;  %p43_p0 = scmp.ge.s32.totalorder %s42_s4, 2 }
  0x1a   : > { %10424 = sst [smem:[#allocation9_spill]] %s7704_s2  ;;  %s45_s29 = sadd.s32 1, %s7712_s3 }
  0x1b   : > { %10425 = sst [smem:[#allocation10_spill]] %s7708_s25  ;;  %p577_p1 = scmp.ne.s32.totalorder %s7696_s23, %s7692_s22 }
  0x1c   : > { %10426 = sst [smem:[#allocation11_spill]] %s7712_s3  ;;  %p578_p2 = scmp.eq.s32.totalorder %s6057_s27, 3 }
  0x1d   : > { %10427 = sst [smem:[#allocation12_spill]] %s7716_s26  ;;  %s10510_s4 = smov (%p43_p0, %s42_s4), 0 }
  0x1e   : > { %10428 = sst [smem:[#allocation13_spill]] %s10510_s4  ;;  %s10512_s29 = smov (!%p43_p0, %s45_s29), %s7712_s3 }
  0x1f   : > { %p7877_p3 = por %p578_p2, %p577_p1  ;;  %p583_p4 = scmp.ne.s32.totalorder %s7692_s22, %s7688_s1 }
  0x20   : > { %p47_p5 = scmp.ge.s32.totalorder %s10512_s29, 2  ;;  %p584_p6 = scmp.eq.s32.totalorder %s6058_s28, 3 }
  0x21   : > { %s10429_s30 = scalar_select %p7877_p3, 1, 0 }
  0x22   : > { %p6061_p7 = scmp.ge.s32.totalorder %s7716_s26, 1  ;;  %p736_p8 = scmp.lt.s32.totalorder %s7716_s26, 5 }
  0x23   : > { %10430 = sst [smem:[#allocation14_spill]] %s10429_s30  ;;  %s10514_s29 = smov (%p47_p5, %s10512_s29), 0 }
  0x24   : > { %10431 = sst [smem:[#allocation15_spill]] %s10514_s29  ;;  %p7887_p9 = por %p584_p6, %p583_p4 }
  0x25   : > { %p737_p10 = pnand %p6061_p7, %p736_p8  ;;  %s564_s21 = ssub.s32 %s7712_s3, %s10514_s29 }
  0x26   : > { %s10432_s0 = scalar_select %p7887_p9, 1, 0 }
  0x27   : > { %s567_s27 = sadd.s32 1, %s7696_s23  ;;  %p565_p11 = scmp.eq.s32.totalorder %s564_s21, 0 }
  0x28   : > { %10433 = sst [smem:[#allocation16_spill]] %s10432_s0  ;;  %740 = sbr.rel (%p737_p10) target bundleno = 5698 (0x1642), region = 100 }
  0x29   : > { %s7895_s4 = scalar_select %p565_p11, %s7696_s23, %s567_s27  }
  0x2b   : > { %10434 = sst [smem:[#allocation17_spill]] %s7895_s4 }
  0x2f   : > { %s10380_s28 = sand.u32 1, %s7692_s22   ;;  %p863_p12 = scmp.lt.s32.totalorder %s7704_s2, 1 }
  0x30   : > { %s7901_s25 = sshll.u32 %s10380_s28, 7  ;;  %p868_p13 = scmp.lt.s32.totalorder %s7700_s24, 1 }
  0x31   : > { %s864_s0 = scalar_select %p863_p12, %s7704_s2, 1 }
  0x32   : > { %s7906_s1 = scalar_select %p868_p13, %s7700_s24, 1 }
  0x33   : > { %s6219_s21 = sshll.u32 %s864_s0, 7  ;;  %s10435_s3 = sld [smem:[#allocation30_spill]] }
  0x34   : > { %s6897_s28 = smul.u32 192, %s7906_s1  ;;  %s6220_s26 = sshll.u32 %s7906_s1, 6 }
  0x35   : > { %s6898_s23 = smul.u32 3, %s7906_s1  ;;  %s10437_s22 = sld [smem:[#allocation32_spill]] }
  0x36   : > { %s10438_s19 = sld [smem:[#allocation34_spill]]  ;;  %s10440_s6 = sld [smem:[#allocation35_spill]] }
  0x37   : > { %s10441_s7 = sld [smem:[#allocation36_spill]]  ;;  %s10443_s8 = sld [smem:[#allocation37_spill]] }
  0x38   : > { %s6222_s15 = sshll.u32 %s7906_s1, 7  ;;  %s8000_s14 = scalar_lea.vmem [#allocation2], %s7901_s25 }
  0x39   : > { %s7911_s4 = scalar_lea.vmem %s10435_s3, %s6219_s21  ;;  %s10439_s21 = sld [smem:[#allocation33_spill]] }
  0x3a   : > { %10436 = sst [smem:[#allocation18_spill]] %s7911_s4  ;;  %s10451_s4 = sld [smem:[#allocation44_spill]] }
  0x3b   : > { %s7919_s2 = scalar_lea.vmem %s10437_s22, %s6897_s28  ;;  %s10448_s22 = sld [smem:[#allocation41_spill]] }
  0x3c   : > { %s7924_s18 = scalar_lea.vmem %s10438_s19, %s6220_s26  ;;  %s7938_s20 = scalar_lea.vmem %s10440_s6, %s6897_s28 }
  0x3d   : > { %s7943_s19 = scalar_lea.vmem %s10441_s7, %s6898_s23  ;;  %s7948_s29 = scalar_lea.vmem %s10443_s8, %s6220_s26 }
  0x3e   : > { %10442 = sst [smem:[#allocation19_spill]] %s7943_s19  ;;  %s10449_s6 = sld [smem:[#allocation42_spill]] }
  0x3f   : > { %s7929_s27 = scalar_lea.vmem %s10439_s21, %s6898_s23  ;;  %10444 = sst [smem:[#allocation20_spill]] %s7948_s29 }
  0x40   : > { %s6073_s29 = sshll.u32 %s7906_s1, 1  ;;  %s10450_s8 = sld [smem:[#allocation43_spill]] }
  0x41   : > { %s7983_s19 = scalar_lea.vmem %s10448_s22, %s6222_s15  ;;  %s936_s21 = scalar_lea.vmem %s10451_s4, %s7906_s1 }
  0x42   : > { %s10452_s17 = sld [smem:[#allocation8_spill]] }
  0x44   : > { %s7988_s7 = scalar_lea.vmem %s10449_s6, %s6073_s29 }
  0x46   : > { %s7993_s0 = scalar_lea.vmem %s10450_s8, %s6222_s15 }
  0x48   : > { %p6076_p0 = scmp.ne.s32.totalorder %s10452_s17, 0 }
  0x49   : > { %s10453_s22 = sld [smem:[#allocation18_spill]] (!%p6076_p0) }
  0x4a   : > { %941 = sbr.rel (%p6076_p0) target bundleno = 88 (0x58), region = 104 }
  0x4f   : > { %v942_v0 = vld [vmem:[%s10453_s22] sm:$0xff] (!%p6076_p0)  ;;  %v943_v1 = vld [vmem:[%s10453_s22 + $0x8] sm:$0xff] (!%p6076_p0)  ;;  %v944_v2 = vld [vmem:[%s10453_s22 + $0x10] sm:$0xff] (!%p6076_p0) }
  0x50   : > { %958 = vst [vmem:[%s8000_s14] sm:$0xff] (!%p6076_p0), %v942_v0  ;;  %959 = vst [vmem:[%s8000_s14 + $0x8] sm:$0xff] (!%p6076_p0), %v943_v1  ;;  %v945_v3 = vld [vmem:[%s10453_s22 + $0x18] sm:$0xff] (!%p6076_p0)  ;;  %v946_v4 = vld [vmem:[%s10453_s22 + $0x20] sm:$0xff] (!%p6076_p0) }
  0x51   : > { %960 = vst [vmem:[%s8000_s14 + $0x10] sm:$0xff] %v944_v2  ;;  %v947_v5 = vld [vmem:[%s10453_s22 + $0x28] sm:$0xff]  ;;  %961 = vst [vmem:[%s8000_s14 + $0x18] sm:$0xff] %v945_v3  ;;  %v948_v6 = vld [vmem:[%s10453_s22 + $0x30] sm:$0xff] }
  0x52   : > { %962 = vst [vmem:[%s8000_s14 + $0x20] sm:$0xff] %v946_v4  ;;  %963 = vst [vmem:[%s8000_s14 + $0x28] sm:$0xff] %v947_v5  ;;  %v949_v7 = vld [vmem:[%s10453_s22 + $0x38] sm:$0xff]  ;;  %v950_v8 = vld [vmem:[%s10453_s22 + $0x40] sm:$0xff] }
  0x53   : > { %964 = vst [vmem:[%s8000_s14 + $0x30] sm:$0xff] %v948_v6  ;;  %965 = vst [vmem:[%s8000_s14 + $0x38] sm:$0xff] %v949_v7  ;;  %v951_v9 = vld [vmem:[%s10453_s22 + $0x48] sm:$0xff]  ;;  %v952_v10 = vld [vmem:[%s10453_s22 + $0x50] sm:$0xff] }
  0x54   : > { %966 = vst [vmem:[%s8000_s14 + $0x40] sm:$0xff] %v950_v8  ;;  %v953_v11 = vld [vmem:[%s10453_s22 + $0x58] sm:$0xff]  ;;  %967 = vst [vmem:[%s8000_s14 + $0x48] sm:$0xff] %v951_v9  ;;  %v954_v12 = vld [vmem:[%s10453_s22 + $0x60] sm:$0xff] }
  0x55   : > { %968 = vst [vmem:[%s8000_s14 + $0x50] sm:$0xff] %v952_v10  ;;  %969 = vst [vmem:[%s8000_s14 + $0x58] sm:$0xff] %v953_v11  ;;  %v955_v13 = vld [vmem:[%s10453_s22 + $0x68] sm:$0xff]  ;;  %v956_v14 = vld [vmem:[%s10453_s22 + $0x70] sm:$0xff] }
  0x56   : > { %970 = vst [vmem:[%s8000_s14 + $0x60] sm:$0xff] %v954_v12  ;;  %971 = vst [vmem:[%s8000_s14 + $0x68] sm:$0xff] %v955_v13  ;;  %v957_v15 = vld [vmem:[%s10453_s22 + $0x78] sm:$0xff] }
  0x57   : > { %972 = vst [vmem:[%s8000_s14 + $0x70] sm:$0xff] %v956_v14  ;;  %973 = vst [vmem:[%s8000_s14 + $0x78] sm:$0xff] %v957_v15 }
  0x58 PF: > { %v6974_v16 = vld [vmem:[%s7919_s2 + $0x4] ss:$12 sps:$4 sm:$0xff]   ;;  %v6976_v17 = vld [vmem:[%s7919_s2] ss:$12 sps:$4 sm:$0xff]   ;;  %v10393_v18 = vmov 0   ;;  %v1032_v1 = vlaneseq  ;;  %vm1409_vm0 = vcmask 523264   ;;  %s10456_s25 = scalar_lea.vmem %s10358_s5, %s7906_s1  ;;  %s10457_s29 = scalar_lea.vmem %s10363_s10, %s7906_s1 }
  0x59   : > { %1207 = vmatprep.mubr.bf16.mxu0 %v10393_v18  ;;  %1175 = vmatprep.subr.bf16.mxu0 %v6974_v16  ;;  %v6977_v19 = vld [vmem:[%s7919_s2 + $0x1c] ss:$12 sps:$4 sm:$0xff]   ;;  %v6979_v20 = vld [vmem:[%s7919_s2 + $0x18] ss:$12 sps:$4 sm:$0xff]   ;;  %v6980_v21 = vld [vmem:[%s7919_s2 + $0x34] ss:$12 sps:$4 sm:$0xff]   ;;  %s10458_s17 = scalar_lea.vmem %s10364_s11, %s7906_s1  ;;  %s10486_s30 = scalar_lea.vmem %s10366_s13, %s7906_s1 }
  0x5a   : > { %1176 = vmatpush1.bf16.msra.mxu0 %v6976_v17  ;;  %v6982_v22 = vld [vmem:[%s7919_s2 + $0x30] ss:$12 sps:$4 sm:$0xff]   ;;  %v6983_v23 = vld [vmem:[%s7919_s2 + $0x4c] ss:$12 sps:$4 sm:$0xff]   ;;  %v6985_v25 = vld [vmem:[%s7919_s2 + $0x48] ss:$12 sps:$4 sm:$0xff]  }
  0x5b   : > { %1177 = vmatprep.subr.bf16.mxu0 %v6977_v19  ;;  %v6986_v27 = vld [vmem:[%s7919_s2 + $0x64] ss:$12 sps:$4 sm:$0xff]   ;;  %v6988_v29 = vld [vmem:[%s7919_s2 + $0x60] ss:$12 sps:$4 sm:$0xff]   ;;  %v6989_v30 = vld [vmem:[%s7919_s2 + $0x7c] ss:$12 sps:$4 sm:$0xff]  }
  0x5c   : > { %v6998_v31 = vld [vmem:[%s7919_s2 + $0x8] ss:$12 sps:$4 sm:$0xff]   ;;  %v6999_v32 = vld [vmem:[%s7919_s2 + $0x20] ss:$12 sps:$4 sm:$0xff]   ;;  %v6991_v33 = vld [vmem:[%s7919_s2 + $0x78] ss:$12 sps:$4 sm:$0xff]  }
  0x5d   : > { %6481 = vmatprep.subr.bf16.mxu1 %v6998_v31  ;;  %v6992_v34 = vld [vmem:[%s7919_s2 + $0x94] ss:$12 sps:$4 sm:$0xff]   ;;  %v7000_v35 = vld [vmem:[%s7919_s2 + $0x38] ss:$12 sps:$4 sm:$0xff]   ;;  %v6994_v36 = vld [vmem:[%s7919_s2 + $0x90] ss:$12 sps:$4 sm:$0xff]  }
  0x5e   : > { %1178 = vmatpush1.bf16.msra.mxu0 %v6979_v20  ;;  %v974_v24 = vld [vmem:[%s8000_s14] sm:$0xff]  ;;  %v975_v26 = vld [vmem:[%s8000_s14 + $0x8] sm:$0xff]  ;;  %6482 = vmatpush3.bf16.msra.mxu1 %v6998_v31  ;;  %v7001_v38 = vld [vmem:[%s7919_s2 + $0x50] ss:$12 sps:$4 sm:$0xff]   ;;  %v8083_v2 = vshrl.u32 %v1032_v1, 7  ;;  %s7719_s6 = smov 64  }
  0x5f   : > { %1179 = vmatprep.subr.bf16.mxu0 %v6980_v21  ;;  %v990_v28 = vpack.c.bf16 %v975_v26, %v974_v24  ;;  %6483 = vmatprep.subr.bf16.mxu1 %v6999_v32  ;;  %v6995_v37 = vld [vmem:[%s7919_s2 + $0xac] ss:$12 sps:$4 sm:$0xff]   ;;  %v6997_v39 = vld [vmem:[%s7919_s2 + $0xa8] ss:$12 sps:$4 sm:$0xff]   ;;  %v7005_v46 = vld [vmem:[%s7919_s2 + $0xb0] ss:$12 sps:$4 sm:$0xff]  }
  0x60   : > { %v7002_v40 = vld [vmem:[%s7919_s2 + $0x68] ss:$12 sps:$4 sm:$0xff]   ;;  %v7003_v41 = vld [vmem:[%s7919_s2 + $0x80] ss:$12 sps:$4 sm:$0xff]   ;;  %v977_v43 = vld [vmem:[%s8000_s14 + $0x18] sm:$0xff]  ;;  %v8086_v3 = vsub.s32 0, %v8083_v2 }
  0x61   : > { %6497 = vmatprep.mubr.bf16.mxu1 %v990_v28  ;;  %v976_v42 = vld [vmem:[%s8000_s14 + $0x10] sm:$0xff]  ;;  %v7004_v44 = vld [vmem:[%s7919_s2 + $0x98] ss:$12 sps:$4 sm:$0xff]   ;;  %v979_v48 = vld [vmem:[%s8000_s14 + $0x28] sm:$0xff]  ;;  %v8090_v5 = vsub.s32 1, %v8083_v2  ;;  %v10392_v24 = vsub.s32 2, %v8083_v2 }
  0x62   : > { %1180 = vmatpush1.bf16.msra.mxu0 %v6982_v22  ;;  %6484 = vmatpush3.bf16.msra.mxu1 %v6999_v32  ;;  %v991_v45 = vpack.c.bf16 %v977_v43, %v976_v42  ;;  %v978_v47 = vld [vmem:[%s8000_s14 + $0x20] sm:$0xff]  ;;  %v980_v50 = vld [vmem:[%s8000_s14 + $0x30] sm:$0xff]  ;;  %v981_v51 = vld [vmem:[%s8000_s14 + $0x38] sm:$0xff]  ;;  %10454 = vst [vmem:[#allocation21_spill] sm:$0xff] %v8086_v3  ;;  %s10463_s16 = sld [smem:[#allocation19_spill]]  ;;  %s10468_s23 = sld [smem:[#allocation31_spill]] }
  0x63   : > { %1181 = vmatprep.subr.bf16.mxu0 %v6983_v23  ;;  %6485 = vmatprep.subr.bf16.mxu1 %v7000_v35  ;;  %v992_v49 = vpack.c.bf16 %v979_v48, %v978_v47  ;;  %v982_v52 = vld [vmem:[%s8000_s14 + $0x40] sm:$0xff]  ;;  %v983_v53 = vld [vmem:[%s8000_s14 + $0x48] sm:$0xff]  ;;  %v993_v54 = vpack.c.bf16 %v981_v51, %v980_v50  ;;  %v984_v56 = vld [vmem:[%s8000_s14 + $0x50] sm:$0xff]  ;;  %10455 = vst [vmem:[#allocation22_spill] sm:$0xff] %v8090_v5  ;;  %s10490_s3 = sld [smem:[#allocation39_spill]] }
  0x64   : > { %v994_v55 = vpack.c.bf16 %v983_v53, %v982_v52  ;;  %v985_v57 = vld [vmem:[%s8000_s14 + $0x58] sm:$0xff]  ;;  %v986_v58 = vld [vmem:[%s8000_s14 + $0x60] sm:$0xff]  ;;  %v987_v59 = vld [vmem:[%s8000_s14 + $0x68] sm:$0xff] }
  0x65   : > { %v995_v60 = vpack.c.bf16 %v985_v57, %v984_v56  ;;  %v996_v61 = vpack.c.bf16 %v987_v59, %v986_v58  ;;  %v988_v62 = vld [vmem:[%s8000_s14 + $0x70] sm:$0xff]  ;;  %v989_v63 = vld [vmem:[%s8000_s14 + $0x78] sm:$0xff]  ;;  %v1030_v4 = vld [vmem:[%s7929_s27] sm:$0x7]  ;;  %s10471_s27 = sld [smem:[#allocation20_spill]] }
  0x66   : > { %1182 = vmatpush1.bf16.msra.mxu0 %v6985_v25  ;;  %6486 = vmatpush3.bf16.msra.mxu1 %v7000_v35  ;;  %v997_v0 = vpack.c.bf16 %v989_v63, %v988_v62  ;;  %v8093_v6 = vrot.slane %v1030_v4, %v8086_v3  ;;  %v8096_v8 = vrot.slane %v1030_v4, %v8090_v5 }
  0x67   : > { %1183 = vmatprep.subr.bf16.mxu0 %v6986_v27  ;;  %6487 = vmatprep.subr.bf16.mxu1 %v7001_v38  ;;  %v8118_v31 = vrot.slane %v1030_v4, %v10392_v24 }
  0x68   : > { %s10469_s8 = smov %s10468_s23 }
  0x69   : > { %s10491_s9 = scalar_lea.vmem %s10490_s3, %s7906_s1 }
  0x6a   : > { %1184 = vmatpush1.bf16.msra.mxu0 %v6988_v29  ;;  %6488 = vmatpush3.bf16.msra.mxu1 %v7001_v38 }
  0x6b   : > { %1185 = vmatprep.subr.bf16.mxu0 %v6989_v30  ;;  %6489 = vmatprep.subr.bf16.mxu1 %v7002_v40 }
  0x6e   : > { %1186 = vmatpush1.bf16.msra.mxu0 %v6991_v33  ;;  %6490 = vmatpush3.bf16.msra.mxu1 %v7002_v40 }
  0x6f   : > { %1187 = vmatprep.subr.bf16.mxu0 %v6992_v34  ;;  %6491 = vmatprep.subr.bf16.mxu1 %v7003_v41 }
  0x72   : > { %1188 = vmatpush1.bf16.msra.mxu0 %v6994_v36  ;;  %6492 = vmatpush3.bf16.msra.mxu1 %v7003_v41 }
  0x73   : > { %1189 = vmatprep.subr.bf16.mxu0 %v6995_v37  ;;  %6493 = vmatprep.subr.bf16.mxu1 %v7004_v44 }
  0x76   : > { %1190 = vmatpush1.bf16.msra.mxu0 %v6997_v39  ;;  %6494 = vmatpush3.bf16.msra.mxu1 %v7004_v44 }
  0x77   : > { %6495 = vmatprep.subr.bf16.mxu1 %v7005_v46 }
  0x79   : > { %1208 = vmatmul.mubr.bf16.vlgmr.msra.gmra.mrb[0].mxu0 %v990_v28 }
  0x7a   : > { %1217 = vmatprep.mubr.bf16.mxu0 %v10393_v18  ;;  %6496 = vmatpush3.bf16.msra.mxu1 %v7005_v46 }
  0x7d   : > { %6498 = vmatmul.mubr.bf16.vlgmr.msra.gmra.mrb[0].mxu1 %v991_v45 }
  0x7e   : > { %6501 = vmatprep.mubr.bf16.mxu1 %v992_v49 }
  0x81   : > { %1218 = vmatmul.mubr.bf16.gmra.mrb[4].mxu0 %v991_v45 }
  0x82   : > { %1227 = vmatprep.mubr.bf16.mxu0 %v10393_v18 }
  0x85   : > { %6502 = vmatmul.mubr.bf16.gmra.mrb[4].mxu1 %v993_v54 }
  0x86   : > { %6505 = vmatprep.mubr.bf16.mxu1 %v994_v55 }
  0x89   : > { %1228 = vmatmul.mubr.bf16.gmra.mrb[8].mxu0 %v992_v49 }
  0x8a   : > { %1237 = vmatprep.mubr.bf16.mxu0 %v10393_v18 }
  0x8d   : > { %6506 = vmatmul.mubr.bf16.gmra.mrb[8].mxu1 %v995_v60 }
  0x8e   : > { %6509 = vmatprep.mubr.bf16.mxu1 %v996_v61 }
  0x91   : > { %1238 = vmatmul.mubr.bf16.gmra.mrb[12].mxu0 %v993_v54 }
  0x92   : > { %1247 = vmatprep.mubr.bf16.mxu0 %v10393_v18 }
  0x95   : > { %6510 = vmatmul.mubr.bf16.gmra.mrb[12].mxu1 %v997_v0 }
  0x99   : > { %1248 = vmatmul.mubr.bf16.gmra.mrb[16].mxu0 %v994_v55 }
  0x9a   : > { %1257 = vmatprep.mubr.bf16.mxu0 %v10393_v18 }
  0xa1   : > { %1258 = vmatmul.mubr.bf16.gmra.mrb[20].mxu0 %v995_v60 }
  0xa2   : > { %1267 = vmatprep.mubr.bf16.mxu0 %v10393_v18 }
  0xa9   : > { %1268 = vmatmul.mubr.bf16.gmra.mrb[24].mxu0 %v996_v61 }
  0xaa   : > { %1277 = vmatprep.mubr.bf16.mxu0 %v10393_v18 }
  0xb1   : > { %1278 = vmatmul.mubr.bf16.gmra.mrb[28].mxu0 %v997_v0 }
 0x14c   : > { %v1209_v7 = vpop.f32.mrb[0].mxu0 }
 0x14d   : > { %v1211_v9 = vpop.f32.mrb[1].mxu0  ;;  %v1210_v11 = vadd.f32 %v1209_v7, %v8093_v6 }
 0x14e   : > { %v1213_v10 = vpop.f32.mrb[2].mxu0  ;;  %v1212_v14 = vadd.f32 %v1211_v9, %v8096_v8 }
 0x14f   : > { %v1214_v12 = vadd.f32 %v1213_v10, %v8093_v6  ;;  %v1215_v13 = vpop.f32.mrb[3].mxu0 }
 0x150   : > { %v1216_v15 = vadd.f32 %v1215_v13, %v8096_v8  ;;  %v6499_v34 = vpop.f32.mrb[0].mxu1 }
 0x151   : > { %v8102_v16 = vpack.c.bf16 %v1214_v12, %v1210_v11  ;;  %v1331_v37 = vadd.f32 %v6499_v34, %v8118_v31  ;;  %v1322_v38 = vpop.f32.mrb[1].mxu1 }
 0x152   : > { %v1386_v17 = vpack.c.bf16 %v1216_v15, %v1212_v14  ;;  %v1323_v40 = vadd.f32 %v1322_v38, %v8118_v31  ;;  %v6500_v41 = vpop.f32.mrb[2].mxu1 }
 0x153   : > { %6529 = vmatprep.mubr.msk.bf16.mxu0 %vm1409_vm0, %v8102_v16  ;;  %v1334_v44 = vadd.f32 %v6500_v41, %v8118_v31  ;;  %v1325_v45 = vpop.f32.mrb[3].mxu1 }
 0x154   : > { %v1219_v19 = vpop.f32.mrb[4].mxu0  ;;  %1844 = vrot.lane.b32.xlu0 %v1386_v17, %s7719_s6  ;;  %6865 = vmatprep.subr.msk.bf16.mxu0 %vm1409_vm0, %v1386_v17  ;;  %v1435_v20 = vsel %vm1409_vm0, %v1386_v17, 0  ;;  %v1326_v48 = vadd.f32 %v1325_v45, %v8118_v31 }
 0x155   : > { %v1220_v21 = vadd.f32 %v1219_v19, %v8093_v6  ;;  %v1221_v22 = vpop.f32.mrb[5].mxu0  ;;  %6514 = vmatpush3.bf16.xpose.msra.mxu0 %v1435_v20  ;;  %v8133_v50 = vpack.c.bf16 %v1334_v44, %v1331_v37 }
 0x156   : > { %v1223_v23 = vpop.f32.mrb[6].mxu0  ;;  %v1222_v27 = vadd.f32 %v1221_v22, %v8096_v8  ;;  %v8137_v52 = vpack.c.bf16 %v1326_v48, %v1323_v40 }
 0x157   : > { %v1224_v25 = vadd.f32 %v1223_v23, %v8093_v6  ;;  %v1225_v26 = vpop.f32.mrb[7].mxu0 }
 0x158   : > { %v1226_v28 = vadd.f32 %v1225_v26, %v8096_v8  ;;  %v6503_v55 = vpop.f32.mrb[4].mxu1  ;;  %6545 = vmatprep.subr.bf16.mxu1 %v8137_v52 }
 0x159   : > { %v8114_v29 = vpack.c.bf16 %v1224_v25, %v1220_v21  ;;  %v1347_v58 = vadd.f32 %v6503_v55, %v8118_v31  ;;  %v1338_v59 = vpop.f32.mrb[5].mxu1  ;;  %6546 = vmatpush3.bf16.msra.mxu1 %v8137_v52 }
 0x15a   : > { %v1389_v30 = vpack.c.bf16 %v1226_v28, %v1222_v27  ;;  %v1339_v61 = vadd.f32 %v1338_v59, %v8118_v31  ;;  %v6504_v62 = vpop.f32.mrb[6].mxu1  ;;  %6547 = vmatprep.subr.bf16.mxu1 %v8133_v50 }
 0x15b   : > { %v1350_v1 = vadd.f32 %v6504_v62, %v8118_v31  ;;  %v1341_v4 = vpop.f32.mrb[7].mxu1 }
 0x15c   : > { %v1229_v32 = vpop.f32.mrb[8].mxu0  ;;  %1846 = vrot.lane.b32.xlu1 %v1389_v30, %s7719_s6  ;;  %6866 = vmatprep.subr.msk.bf16.mxu0 %vm1409_vm0, %v1389_v30  ;;  %v1438_v33 = vsel %vm1409_vm0, %v1389_v30, 0  ;;  %v1342_v10 = vadd.f32 %v1341_v4, %v8118_v31 }
 0x15d   : > { %v1230_v35 = vadd.f32 %v1229_v32, %v8093_v6  ;;  %v1231_v36 = vpop.f32.mrb[9].mxu0  ;;  %6516 = vmatpush3.bf16.xpose.msra.mxu0 %v1438_v33  ;;  %v8156_v12 = vpack.c.bf16 %v1350_v1, %v1347_v58  ;;  %6548 = vmatpush3.bf16.msra.mxu1 %v8133_v50 }
 0x15e   : > { %v1233_v39 = vpop.f32.mrb[10].mxu0  ;;  %v1232_v46 = vadd.f32 %v1231_v36, %v8096_v8  ;;  %v8161_v14 = vpack.c.bf16 %v1342_v10, %v1339_v61 }
 0x15f   : > { %v1234_v42 = vadd.f32 %v1233_v39, %v8093_v6  ;;  %v1235_v43 = vpop.f32.mrb[11].mxu0 }
 0x160   : > { %v1236_v47 = vadd.f32 %v1235_v43, %v8096_v8  ;;  %v6507_v19 = vpop.f32.mrb[8].mxu1  ;;  %6549 = vmatprep.subr.bf16.mxu1 %v8161_v14 }
 0x161   : > { %v8131_v49 = vpack.c.bf16 %v1234_v42, %v1230_v35  ;;  %v1363_v22 = vadd.f32 %v6507_v19, %v8118_v31  ;;  %v1354_v23 = vpop.f32.mrb[9].mxu1  ;;  %6550 = vmatpush3.bf16.msra.mxu1 %v8161_v14 }
 0x162   : > { %v8135_v51 = vpack.c.bf16 %v1236_v47, %v1232_v46  ;;  %v1355_v26 = vadd.f32 %v1354_v23, %v8118_v31  ;;  %v6508_v27 = vpop.f32.mrb[10].mxu1  ;;  %6551 = vmatprep.subr.bf16.mxu1 %v8156_v12 }
 0x163   : > { %v1366_v32 = vadd.f32 %v6508_v27, %v8118_v31  ;;  %v1357_v33 = vpop.f32.mrb[11].mxu1 }
 0x164   : > { %v1239_v53 = vpop.f32.mrb[12].mxu0  ;;  %6867 = vmatprep.subr.msk.bf16.mxu0 %vm1409_vm0, %v8135_v51  ;;  %v1441_v54 = vsel %vm1409_vm0, %v8135_v51, 0  ;;  %v1358_v36 = vadd.f32 %v1357_v33, %v8118_v31 }
 0x165   : > { %v1240_v56 = vadd.f32 %v1239_v53, %v8093_v6  ;;  %v1241_v57 = vpop.f32.mrb[13].mxu0  ;;  %6518 = vmatpush3.bf16.xpose.msra.mxu0 %v1441_v54  ;;  %v8180_v38 = vpack.c.bf16 %v1366_v32, %v1363_v22  ;;  %6552 = vmatpush3.bf16.msra.mxu1 %v8156_v12 }
 0x166   : > { %v1243_v60 = vpop.f32.mrb[14].mxu0  ;;  %v1242_v7 = vadd.f32 %v1241_v57, %v8096_v8  ;;  %v8185_v40 = vpack.c.bf16 %v1358_v36, %v1355_v26 }
 0x167   : > { %v1244_v63 = vadd.f32 %v1243_v60, %v8093_v6  ;;  %v1245_v0 = vpop.f32.mrb[15].mxu0 }
 0x168   : > { %v1246_v9 = vadd.f32 %v1245_v0, %v8096_v8  ;;  %v6511_v43 = vpop.f32.mrb[12].mxu1  ;;  %6553 = vmatprep.subr.bf16.mxu1 %v8185_v40 }
 0x169   : > { %v8154_v11 = vpack.c.bf16 %v1244_v63, %v1240_v56  ;;  %v1379_v46 = vadd.f32 %v6511_v43, %v8118_v31  ;;  %v1370_v47 = vpop.f32.mrb[13].mxu1  ;;  %6554 = vmatpush3.bf16.msra.mxu1 %v8185_v40 }
 0x16a   : > { %v8159_v13 = vpack.c.bf16 %v1246_v9, %v1242_v7  ;;  %v1371_v53 = vadd.f32 %v1370_v47, %v8118_v31  ;;  %v6512_v54 = vpop.f32.mrb[14].mxu1  ;;  %6555 = vmatprep.subr.bf16.mxu1 %v8180_v38 }
 0x16b   : > { %v1382_v57 = vadd.f32 %v6512_v54, %v8118_v31  ;;  %v1373_v58 = vpop.f32.mrb[15].mxu1 }
 0x16c   : > { %v1249_v15 = vpop.f32.mrb[16].mxu0  ;;  %6868 = vmatprep.subr.msk.bf16.mxu0 %vm1409_vm0, %v8159_v13  ;;  %v1444_v17 = vsel %vm1409_vm0, %v8159_v13, 0  ;;  %v1374_v61 = vadd.f32 %v1373_v58, %v8118_v31 }
 0x16d   : > { %v1250_v20 = vadd.f32 %v1249_v15, %v8093_v6  ;;  %v1251_v21 = vpop.f32.mrb[17].mxu0  ;;  %6520 = vmatpush3.bf16.xpose.msra.mxu0 %v1444_v17  ;;  %v8204_v63 = vpack.c.bf16 %v1382_v57, %v1379_v46  ;;  %6556 = vmatpush3.bf16.msra.mxu1 %v8180_v38 }
 0x16e   : > { %v1253_v25 = vpop.f32.mrb[18].mxu0  ;;  %v1252_v34 = vadd.f32 %v1251_v21, %v8096_v8  ;;  %v8209_v1 = vpack.c.bf16 %v1374_v61, %v1371_v53 }
 0x16f   : > { %v1254_v28 = vadd.f32 %v1253_v25, %v8093_v6  ;;  %v1255_v30 = vpop.f32.mrb[19].mxu0 }
 0x170   : > { %v1256_v35 = vadd.f32 %v1255_v30, %v8096_v8  ;;  %6557 = vmatprep.subr.bf16.mxu1 %v8209_v1 }
 0x171   : > { %v8178_v37 = vpack.c.bf16 %v1254_v28, %v1250_v20  ;;  %6558 = vmatpush3.bf16.msra.mxu1 %v8209_v1 }
 0x172   : > { %v8183_v39 = vpack.c.bf16 %v1256_v35, %v1252_v34  ;;  %6559 = vmatprep.subr.bf16.mxu1 %v8204_v63 }
 0x174   : > { %v1259_v41 = vpop.f32.mrb[20].mxu0  ;;  %6869 = vmatprep.subr.msk.bf16.mxu0 %vm1409_vm0, %v8183_v39  ;;  %v1447_v42 = vsel %vm1409_vm0, %v8183_v39, 0 }
 0x175   : > { %v1260_v44 = vadd.f32 %v1259_v41, %v8093_v6  ;;  %v1261_v45 = vpop.f32.mrb[21].mxu0  ;;  %6522 = vmatpush3.bf16.xpose.msra.mxu0 %v1447_v42  ;;  %6560 = vmatpush3.bf16.msra.mxu1 %v8204_v63 }
 0x176   : > { %v1263_v48 = vpop.f32.mrb[22].mxu0  ;;  %v1262_v59 = vadd.f32 %v1261_v45, %v8096_v8 }
 0x177   : > { %v1264_v55 = vadd.f32 %v1263_v48, %v8093_v6  ;;  %v1265_v56 = vpop.f32.mrb[23].mxu0 }
 0x178   : > { %v1266_v60 = vadd.f32 %v1265_v56, %v8096_v8 }
 0x179   : > { %v8202_v62 = vpack.c.bf16 %v1264_v55, %v1260_v44 }
 0x17a   : > { %v8207_v0 = vpack.c.bf16 %v1266_v60, %v1262_v59 }
 0x17c   : > { %v1269_v4 = vpop.f32.mrb[24].mxu0  ;;  %6870 = vmatprep.subr.msk.bf16.mxu0 %vm1409_vm0, %v8207_v0  ;;  %v1450_v7 = vsel %vm1409_vm0, %v8207_v0, 0 }
 0x17d   : > { %v1270_v31 = vadd.f32 %v1269_v4, %v8093_v6  ;;  %v1271_v9 = vpop.f32.mrb[25].mxu0  ;;  %6524 = vmatpush3.bf16.xpose.msra.mxu0 %v1450_v7 }
 0x17e   : > { %v1273_v10 = vpop.f32.mrb[26].mxu0  ;;  %v1272_v19 = vadd.f32 %v1271_v9, %v8096_v8 }
 0x17f   : > { %v1274_v15 = vadd.f32 %v1273_v10, %v8093_v6  ;;  %v1275_v17 = vpop.f32.mrb[27].mxu0 }
 0x180   : > { %v1276_v20 = vadd.f32 %v1275_v17, %v8096_v8 }
 0x181   : > { %v8222_v21 = vpack.c.bf16 %v1274_v15, %v1270_v31 }
 0x182   : > { %v8225_v22 = vpack.c.bf16 %v1276_v20, %v1272_v19 }
 0x184   : > { %v1279_v23 = vpop.f32.mrb[28].mxu0  ;;  %6871 = vmatprep.subr.msk.bf16.mxu0 %vm1409_vm0, %v8225_v22  ;;  %v1453_v25 = vsel %vm1409_vm0, %v8225_v22, 0 }
 0x185   : > { %v1280_v26 = vadd.f32 %v1279_v23, %v8093_v6  ;;  %v1281_v27 = vpop.f32.mrb[29].mxu0  ;;  %6526 = vmatpush3.bf16.xpose.msra.mxu0 %v1453_v25 }
 0x186   : > { %v1283_v28 = vpop.f32.mrb[30].mxu0  ;;  %v1282_v33 = vadd.f32 %v1281_v27, %v8096_v8 }
 0x187   : > { %v1284_v30 = vadd.f32 %v1283_v28, %v8093_v6  ;;  %v1285_v32 = vpop.f32.mrb[31].mxu0 }
 0x188   : > { %v1286_v34 = vadd.f32 %v1285_v32, %v8096_v8 }
 0x189   : > { %v8235_v35 = vpack.c.bf16 %v1284_v30, %v1280_v26 }
 0x18a   : > { %v8237_v36 = vpack.c.bf16 %v1286_v34, %v1282_v33 }
 0x18c   : > { %6872 = vmatprep.subr.msk.bf16.mxu0 %vm1409_vm0, %v8237_v36  ;;  %v1456_v41 = vsel %vm1409_vm0, %v8237_v36, 0 }
 0x18d   : > { %6528 = vmatpush3.bf16.xpose.msra.mxu0 %v1456_v41 }
 0x194   : > { %6530 = vmatmul.mubr.msk.bf16.vlgmr.msra.gmra.mrb[32].mxu0 %vm1409_vm0, %v8114_v29 }
 0x195   : > { %6533 = vmatprep.mubr.msk.bf16.mxu0 %vm1409_vm0, %v8131_v49 }
 0x19c   : > { %6534 = vmatmul.mubr.msk.bf16.gmra.mrb[36].mxu0 %vm1409_vm0, %v8154_v11 }
 0x19d   : > { %6537 = vmatprep.mubr.msk.bf16.mxu0 %vm1409_vm0, %v8178_v37 }
 0x1a4   : > { %6538 = vmatmul.mubr.msk.bf16.gmra.mrb[40].mxu0 %vm1409_vm0, %v8202_v62 }
 0x1a5   : > { %6541 = vmatprep.mubr.msk.bf16.mxu0 %vm1409_vm0, %v8222_v21 }
 0x1ac   : > { %6542 = vmatmul.mubr.msk.bf16.gmra.mrb[44].mxu0 %vm1409_vm0, %v8235_v35 }
 0x1c6   : > { %v8257_v6 = vpop.permute.xlu0 %1844 }
 0x1c7   : > { %6873 = vmatprep.subr.msk.bf16.mxu1 %vm1409_vm0, %v8257_v6 }
 0x1ce   : > { %v8295_v61 = vpop.permute.xlu1 %1846 }
 0x267   : > { %v6531_v8 = vpop.f32.mrb[32].mxu0 }
 0x268   : > { %1559 = vmax.xlane.f32.xlu1 %v6531_v8  ;;  %v1492_v42 = vpop.f32.mrb[33].mxu0 }
 0x269   : > { %1555 = vmax.xlane.f32.xlu0 %v1492_v42  ;;  %v6532_v43 = vpop.f32.mrb[34].mxu0 }
 0x26a   : > { %v1495_v44 = vpop.f32.mrb[35].mxu0 }
 0x26c   : > { %1561 = vmax.xlane.f32.xlu1 %v6532_v43 }
 0x26d   : > { %1557 = vmax.xlane.f32.xlu0 %v1495_v44 }
 0x26f   : > { %v6535_v45 = vpop.f32.mrb[36].mxu0 }
 0x270   : > { %v8261_v46 = vpop.f32.mrb[37].mxu0 }
 0x271   : > { %1567 = vmax.xlane.f32.xlu0 %v6535_v45  ;;  %v8263_v47 = vpop.f32.mrb[38].mxu0 }
 0x272   : > { %1569 = vmax.xlane.f32.xlu1 %v8263_v47  ;;  %v8266_v48 = vpop.f32.mrb[39].mxu0 }
 0x275   : > { %1563 = vmax.xlane.f32.xlu0 %v8261_v46 }
 0x276   : > { %1565 = vmax.xlane.f32.xlu1 %v8266_v48 }
 0x277   : > { %v8270_v53 = vpop.f32.mrb[40].mxu0 }
 0x278   : > { %v8272_v54 = vpop.f32.mrb[41].mxu0 }
 0x279   : > { %1575 = vmax.xlane.f32.xlu0 %v8270_v53  ;;  %v8275_v55 = vpop.f32.mrb[42].mxu0 }
 0x27a   : > { %1577 = vmax.xlane.f32.xlu1 %v8275_v55  ;;  %v8278_v56 = vpop.f32.mrb[43].mxu0 }
 0x27d   : > { %1571 = vmax.xlane.f32.xlu0 %v8272_v54 }
 0x27e   : > { %1573 = vmax.xlane.f32.xlu1 %v8278_v56 }
 0x27f   : > { %v6543_v57 = vpop.f32.mrb[44].mxu0 }
 0x280   : > { %v8282_v58 = vpop.f32.mrb[45].mxu0 }
 0x281   : > { %1583 = vmax.xlane.f32.xlu0 %v6543_v57  ;;  %v8284_v59 = vpop.f32.mrb[46].mxu0 }
 0x282   : > { %v8286_v60 = vpop.f32.mrb[47].mxu0 }
 0x285   : > { %1579 = vmax.xlane.f32.xlu0 %v8282_v58 }
 0x28f   : > { %1850 = vrot.lane.b32.xlu1 %v8159_v13, %s7719_s6 }
 0x29b   : > { %1848 = vrot.lane.b32.xlu0 %v8135_v51, %s7719_s6 }
 0x2b3   : > { %1585 = vmax.xlane.f32.xlu1 %v8284_v59 }
 0x2b7   : > { %1581 = vmax.xlane.f32.xlu1 %v8286_v60 }
 0x2f5   : > { %v1560_v4 = vpop.xlane.xlu1 %1559 }
 0x2f6   : > { %v1589_v7 = vsub.f32 %v6531_v8, %v1560_v4  ;;  %v1556_v31 = vpop.xlane.xlu0 %1555 }
 0x2f7   : > { %v1587_v9 = vsub.f32 %v1492_v42, %v1556_v31 }
 0x2f8   : > { %v1607_v10 = vmul.f32 1.442695, %v1589_v7 }
 0x2f9   : > { %v1603_v15 = vmul.f32 1.442695, %v1587_v9  ;;  %v1562_v17 = vpop.xlane.xlu1 %1561 }
 0x2fa   : > { %7094 = vpow2.f32 %v1607_v10  ;;  %v1590_v19 = vsub.f32 %v6532_v43, %v1562_v17  ;;  %v1558_v20 = vpop.xlane.xlu0 %1557 }
 0x2fb   : > { %v1588_v13 = vsub.f32 %v1495_v44, %v1558_v20  ;;  %7096 = vpow2.f32 %v1603_v15 }
 0x2fc   : > { %v1609_v23 = vmul.f32 1.442695, %v1590_v19 }
 0x2fd   : > { %v1605_v51 = vmul.f32 1.442695, %v1588_v13 }
 0x2fe   : > { %7098 = vpow2.f32 %v1609_v23  ;;  %v1568_v30 = vpop.xlane.xlu0 %1567 }
 0x2ff   : > { %7100 = vpow2.f32 %v1605_v51  ;;  %v1570_v34 = vpop.xlane.xlu1 %1569  ;;  %v1593_v42 = vsub.f32 %v6535_v45, %v1568_v30 }
 0x300   : > { %v1594_v9 = vsub.f32 %v8263_v47, %v1570_v34 }
 0x301   : > { %v1615_v4 = vmul.f32 1.442695, %v1593_v42 }
 0x302   : > { %v1564_v32 = vpop.xlane.xlu0 %1563 }
 0x303   : > { %v1566_v8 = vpop.xlane.xlu1 %1565  ;;  %v1591_v43 = vsub.f32 %v8261_v46, %v1564_v32  ;;  %7102 = vpow2.f32 %v1615_v4 }
 0x304   : > { %v8297_v25 = vpop.eup %7094  ;;  %v1592_v7 = vsub.f32 %v8266_v48, %v1566_v8 }
 0x305   : > { %1639 = vadd.xlane.f32.xlu0 %v8297_v25  ;;  %v8300_v26 = vpop.eup %7096  ;;  %v1611_v10 = vmul.f32 1.442695, %v1591_v43 }
 0x306   : > { %v1576_v33 = vpop.xlane.xlu0 %1575 }
 0x307   : > { %v1578_v31 = vpop.xlane.xlu1 %1577  ;;  %7104 = vpow2.f32 %v1611_v10  ;;  %v1597_v19 = vsub.f32 %v8270_v53, %v1576_v33 }
 0x308   : > { %v8302_v27 = vpop.eup %7098  ;;  %v1598_v53 = vsub.f32 %v8275_v55, %v1578_v31 }
 0x309   : > { %1635 = vadd.xlane.f32.xlu0 %v8300_v26  ;;  %1641 = vadd.xlane.f32.xlu1 %v8302_v27  ;;  %v8306_v28 = vpop.eup %7100  ;;  %v1623_v13 = vmul.f32 1.442695, %v1597_v19 }
 0x30a   : > { %v1572_v41 = vpop.xlane.xlu0 %1571  ;;  %v1625_v33 = vmul.f32 1.442695, %v1598_v53 }
 0x30b   : > { %v1574_v20 = vpop.xlane.xlu1 %1573  ;;  %v1595_v48 = vsub.f32 %v8272_v54, %v1572_v41 }
 0x30c   : > { %v1596_v34 = vsub.f32 %v8278_v56, %v1574_v20 }
 0x30d   : > { %1637 = vadd.xlane.f32.xlu1 %v8306_v28  ;;  %v8321_v51 = vpop.eup %7102 }
 0x30e   : > { %v1584_v44 = vpop.xlane.xlu0 %1583 }
 0x30f   : > { %v1601_v15 = vsub.f32 %v6543_v57, %v1584_v44  ;;  %v8319_v23 = vpop.permute.xlu1 %1850  ;;  %v1619_v57 = vmul.f32 1.442695, %v1595_v48 }
 0x311   : > { %v1631_v45 = vmul.f32 1.442695, %v1601_v15  ;;  %v8325_v30 = vpop.eup %7104  ;;  %v1885_v15 = vsel %vm1409_vm0, %v8257_v6, 0 }
 0x312   : > { %v1580_v17 = vpop.xlane.xlu0 %1579 }
 0x313   : > { %v1599_v46 = vsub.f32 %v8282_v58, %v1580_v17 }
 0x315   : > { %v1627_v47 = vmul.f32 1.442695, %v1599_v46 }
 0x31e   : > { %1854 = vrot.lane.b32.xlu1 %v8207_v0, %s7719_s6  ;;  %v1613_v0 = vmul.f32 1.442695, %v1592_v7 }
 0x31f   : > { %1852 = vrot.lane.b32.xlu0 %v8183_v39, %s7719_s6  ;;  %v1617_v39 = vmul.f32 1.442695, %v1594_v9 }
 0x320   : > { %7106 = vpow2.f32 %v1613_v0 }
 0x321   : > { %7108 = vpow2.f32 %v1617_v39 }
 0x322   : > { %7110 = vpow2.f32 %v1631_v45 }
 0x323   : > { %7112 = vpow2.f32 %v1623_v13 }
 0x324   : > { %7114 = vpow2.f32 %v1627_v47 }
 0x325   : > { %7116 = vpow2.f32 %v1619_v57 }
 0x32a   : > { %v8327_v32 = vpop.eup %7106 }
 0x32b   : > { %v8333_v8 = vpop.eup %7108 }
 0x32c   : > { %v8335_v42 = vpop.eup %7110 }
 0x32d   : > { %v8340_v44 = vpop.eup %7112 }
 0x32e   : > { %v8342_v4 = vpop.eup %7114 }
 0x32f   : > { %v8346_v7 = vpop.eup %7116 }
 0x33e   : > { %1647 = vadd.xlane.f32.xlu0 %v8321_v51 }
 0x340   : > { %v1586_v58 = vpop.xlane.xlu1 %1585 }
 0x341   : > { %v1602_v54 = vsub.f32 %v8284_v59, %v1586_v58  ;;  %v1621_v59 = vmul.f32 1.442695, %v1596_v34 }
 0x342   : > { %1645 = vadd.xlane.f32.xlu0 %v8327_v32  ;;  %1643 = vadd.xlane.f32.xlu1 %v8325_v30 }
 0x343   : > { %v1633_v41 = vmul.f32 1.442695, %v1602_v54 }
 0x344   : > { %v1582_v55 = vpop.xlane.xlu1 %1581 }
 0x345   : > { %7118 = vpow2.f32 %v1633_v41  ;;  %v1600_v43 = vsub.f32 %v8286_v60, %v1582_v55 }
 0x346   : > { %1663 = vadd.xlane.f32.xlu0 %v8335_v42  ;;  %1649 = vadd.xlane.f32.xlu1 %v8333_v8  ;;  %7120 = vpow2.f32 %v1625_v33 }
 0x347   : > { %7122 = vpow2.f32 %v1621_v59  ;;  %v1629_v56 = vmul.f32 1.442695, %v1600_v43 }
 0x349   : > { %7124 = vpow2.f32 %v1629_v56 }
 0x34a   : > { %1659 = vadd.xlane.f32.xlu0 %v8342_v4  ;;  %1655 = vadd.xlane.f32.xlu1 %v8340_v44 }
 0x34e   : > { %1651 = vadd.xlane.f32.xlu1 %v8346_v7 }
 0x34f   : > { %v8349_v31 = vpop.eup %7118 }
 0x350   : > { %1665 = vadd.xlane.f32.xlu0 %v8349_v31  ;;  %v8352_v60 = vpop.eup %7120 }
 0x351   : > { %v8355_v9 = vpop.eup %7122 }
 0x352   : > { %1657 = vadd.xlane.f32.xlu1 %v8352_v60 }
 0x353   : > { %v8358_v10 = vpop.eup %7124 }
 0x356   : > { %1653 = vadd.xlane.f32.xlu1 %v8355_v9 }
 0x35a   : > { %1661 = vadd.xlane.f32.xlu1 %v8358_v10 }
 0x366   : > { %1856 = vrot.lane.b32.xlu0 %v8225_v22, %s7719_s6 }
 0x36a   : > { %1820 = vrot.lane.b32.xlu0 %v8102_v16, %s7719_s6  ;;  %v1849_v16 = vpop.permute.xlu0 %1848 }
 0x36b   : > { %1858 = vrot.lane.b32.xlu1 %v8237_v36, %s7719_s6 }
 0x36e   : > { %1824 = vrot.lane.b32.xlu0 %v8131_v49, %s7719_s6 }
 0x36f   : > { %1822 = vrot.lane.b32.xlu1 %v8114_v29, %s7719_s6 }
 0x372   : > { %1828 = vrot.lane.b32.xlu0 %v8178_v37, %s7719_s6 }
 0x373   : > { %1826 = vrot.lane.b32.xlu1 %v8154_v11, %s7719_s6 }
 0x376   : > { %1832 = vrot.lane.b32.xlu0 %v8222_v21, %s7719_s6 }
 0x377   : > { %1830 = vrot.lane.b32.xlu1 %v8202_v62, %s7719_s6 }
 0x37a   : > { %2165 = vrot.lane.b32.xlu0 %v8137_v52, %s7719_s6 }
 0x37b   : > { %1834 = vrot.lane.b32.xlu1 %v8235_v35, %s7719_s6 }
 0x37e   : > { %2169 = vrot.lane.b32.xlu0 %v8161_v14, %s7719_s6 }
 0x37f   : > { %2167 = vrot.lane.b32.xlu1 %v8133_v50, %s7719_s6 }
 0x382   : > { %2171 = vrot.lane.b32.xlu0 %v8156_v12, %s7719_s6 }
 0x392   : > { %v1640_v29 = vpop.xlane.xlu0 %1639 }
 0x396   : > { %v1636_v49 = vpop.xlane.xlu0 %1635  ;;  %v1642_v11 = vpop.xlane.xlu1 %1641 }
 0x397   : > { %7126 = vrcp.f32 %v1642_v11 }
 0x398   : > { %7128 = vrcp.f32 %v1636_v49 }
 0x399   : > { %7130 = vrcp.f32 %v1640_v29 }
 0x39a   : > { %v1638_v52 = vpop.xlane.xlu1 %1637  ;;  %v1853_v6 = vpop.permute.xlu0 %1852 }
 0x39b   : > { %7132 = vrcp.f32 %v1638_v52 }
 0x3a1   : > { %v7127_v37 = vpop.eup %7126 }
 0x3a2   : > { %v7129_v62 = vpop.eup %7128  ;;  %v1686_v14 = vmul.f32 %v7127_v37, %v8302_v27  ;;  %v1888_v27 = vsel %vm1409_vm0, %v8295_v61, 0 }
 0x3a3   : > { %v7131_v21 = vpop.eup %7130  ;;  %v1683_v50 = vmul.f32 %v7129_v62, %v8300_v26  ;;  %v1891_v26 = vsel %vm1409_vm0, %v1849_v16, 0 }
 0x3a4   : > { %v1685_v12 = vmul.f32 %v7131_v21, %v8297_v25  ;;  %v1894_v25 = vsel %vm1409_vm0, %v8319_v23, 0 }
 0x3a5   : > { %v7133_v22 = vpop.eup %7132 }
 0x3a6   : > { %v1684_v35 = vmul.f32 %v7133_v22, %v8306_v28  ;;  %v1700_v0 = vpack.c.bf16 %v1686_v14, %v1685_v12  ;;  %v1855_v28 = vpop.permute.xlu1 %1854 }
 0x3a7   : > { %v1900_v45 = vsel %vm1409_vm0, %v1855_v28, 0 }
 0x3a8   : > { %v1699_v36 = vpack.c.bf16 %v1684_v35, %v1683_v50 }
 0x3aa   : > { %6561 = vmatprep.mubr.bf16.mxu1 %v1699_v36 }
 0x3ab   : > { %6562 = vmatmul.mubr.bf16.vlgmr.msra.gmra.mrb[16].mxu1 %v1700_v0 }
 0x3ac   : > { %6578 = vmatpush3.bf16.xpose.msra.mxu1 %v1885_v15 }
 0x3ad   : > { %6874 = vmatprep.subr.msk.bf16.mxu1 %vm1409_vm0, %v8295_v61  ;;  %v1897_v61 = vsel %vm1409_vm0, %v1853_v6, 0 }
 0x3b4   : > { %6580 = vmatpush3.bf16.xpose.msra.mxu1 %v1888_v27 }
 0x3b5   : > { %6875 = vmatprep.subr.msk.bf16.mxu1 %vm1409_vm0, %v1849_v16 }
 0x3bc   : > { %6582 = vmatpush3.bf16.xpose.msra.mxu1 %v1891_v26 }
 0x3bd   : > { %6876 = vmatprep.subr.msk.bf16.mxu1 %vm1409_vm0, %v8319_v23 }
 0x3c4   : > { %6584 = vmatpush3.bf16.xpose.msra.mxu1 %v1894_v25 }
 0x3c5   : > { %6877 = vmatprep.subr.msk.bf16.mxu1 %vm1409_vm0, %v1853_v6 }
 0x3cb   : > { %v1648_v17 = vpop.xlane.xlu0 %1647 }
 0x3cc   : > { %6586 = vmatpush3.bf16.xpose.msra.mxu1 %v1897_v61 }
 0x3cd   : > { %6878 = vmatprep.subr.msk.bf16.mxu1 %vm1409_vm0, %v1855_v28 }
 0x3cf   : > { %v1646_v39 = vpop.xlane.xlu0 %1645  ;;  %v1644_v19 = vpop.xlane.xlu1 %1643 }
 0x3d0   : > { %7134 = vrcp.f32 %v1646_v39 }
 0x3d1   : > { %7136 = vrcp.f32 %v1644_v19 }
 0x3d2   : > { %7138 = vrcp.f32 %v1648_v17 }
 0x3d3   : > { %v1664_v20 = vpop.xlane.xlu0 %1663  ;;  %v1650_v46 = vpop.xlane.xlu1 %1649 }
 0x3d4   : > { %6588 = vmatpush3.bf16.xpose.msra.mxu1 %v1900_v45  ;;  %7140 = vrcp.f32 %v1650_v46 }
 0x3d7   : > { %v1656_v13 = vpop.xlane.xlu1 %1655  ;;  %v1660_v48 = vpop.xlane.xlu0 %1659 }
 0x3da   : > { %v7135_v47 = vpop.eup %7134 }
 0x3db   : > { %v7137_v23 = vpop.eup %7136  ;;  %v1652_v53 = vpop.xlane.xlu1 %1651  ;;  %v1688_v57 = vmul.f32 %v7135_v47, %v8327_v32 }
 0x3dc   : > { %v1687_v58 = vmul.f32 %v7137_v23, %v8325_v30  ;;  %v7139_v54 = vpop.eup %7138 }
 0x3dd   : > { %v1666_v33 = vpop.xlane.xlu0 %1665  ;;  %v1689_v59 = vmul.f32 %v7139_v54, %v8321_v51 }
 0x3de   : > { %v1701_v34 = vpack.c.bf16 %v1688_v57, %v1687_v58  ;;  %v7141_v41 = vpop.eup %7140 }
 0x3df   : > { %v1658_v55 = vpop.xlane.xlu1 %1657  ;;  %v1690_v43 = vmul.f32 %v7141_v41, %v8333_v8 }
 0x3e0   : > { %6565 = vmatprep.mubr.bf16.mxu1 %v1701_v34  ;;  %7142 = vrcp.f32 %v1658_v55 }
 0x3e1   : > { %v1857_v56 = vpop.permute.xlu0 %1856  ;;  %7144 = vrcp.f32 %v1652_v53  ;;  %v1702_v16 = vpack.c.bf16 %v1690_v43, %v1689_v59 }
 0x3e2   : > { %6879 = vmatprep.subr.msk.bf16.mxu1 %vm1409_vm0, %v1857_v56  ;;  %v1903_v32 = vsel %vm1409_vm0, %v1857_v56, 0  ;;  %7146 = vrcp.f32 %v1656_v13 }
 0x3e3   : > { %6590 = vmatpush3.bf16.xpose.msra.mxu1 %v1903_v32  ;;  %v1654_v30 = vpop.xlane.xlu1 %1653 }
 0x3e4   : > { %6566 = vmatmul.mubr.bf16.gmra.mrb[20].mxu1 %v1702_v16  ;;  %7148 = vrcp.f32 %v1654_v30 }
 0x3e5   : > { %v1821_v29 = vpop.permute.xlu0 %1820  ;;  %7150 = vrcp.f32 %v1660_v48 }
 0x3e7   : > { %v1662_v49 = vpop.xlane.xlu1 %1661 }
 0x3e8   : > { %7152 = vrcp.f32 %v1662_v49 }
 0x3e9   : > { %7154 = vrcp.f32 %v1666_v33  ;;  %v1825_v51 = vpop.permute.xlu0 %1824 }
 0x3ea   : > { %v7143_v8 = vpop.eup %7142  ;;  %7156 = vrcp.f32 %v1664_v20 }
 0x3eb   : > { %v1859_v11 = vpop.permute.xlu1 %1858  ;;  %v7145_v52 = vpop.eup %7144  ;;  %v1694_v14 = vmul.f32 %v7143_v8, %v8352_v60 }
 0x3ec   : > { %6880 = vmatprep.subr.msk.bf16.mxu1 %vm1409_vm0, %v1859_v11  ;;  %v1906_v37 = vsel %vm1409_vm0, %v1859_v11, 0  ;;  %v7147_v62 = vpop.eup %7146  ;;  %v1691_v35 = vmul.f32 %v7145_v52, %v8346_v7 }
 0x3ed   : > { %v1829_v21 = vpop.permute.xlu0 %1828  ;;  %6592 = vmatpush3.bf16.xpose.msra.mxu1 %v1906_v37  ;;  %v1693_v0 = vmul.f32 %v7147_v62, %v8340_v44 }
 0x3ee   : > { %v7149_v22 = vpop.eup %7148 }
 0x3ef   : > { %v1823_v50 = vpop.permute.xlu1 %1822  ;;  %v1692_v12 = vmul.f32 %v7149_v22, %v8355_v9  ;;  %v7151_v36 = vpop.eup %7150  ;;  %v1704_v25 = vpack.c.bf16 %v1694_v14, %v1693_v0 }
 0x3f0   : > { %v1695_v17 = vmul.f32 %v7151_v36, %v8342_v4 }
 0x3f1   : > { %v1833_v15 = vpop.permute.xlu0 %1832  ;;  %v1703_v27 = vpack.c.bf16 %v1692_v12, %v1691_v35 }
 0x3f2   : > { %v7153_v26 = vpop.eup %7152 }
 0x3f3   : > { %v7155_v6 = vpop.eup %7154  ;;  %6569 = vmatprep.mubr.bf16.mxu1 %v1703_v27  ;;  %v1827_v28 = vpop.permute.xlu1 %1826  ;;  %v1696_v61 = vmul.f32 %v7153_v26, %v8358_v10 }
 0x3f4   : > { %6570 = vmatmul.mubr.bf16.gmra.mrb[24].mxu1 %v1704_v25  ;;  %v7157_v60 = vpop.eup %7156  ;;  %v1698_v9 = vmul.f32 %v7155_v6, %v8349_v31 }
 0x3f5   : > { %v1705_v39 = vpack.c.bf16 %v1696_v61, %v1695_v17  ;;  %v2166_v7 = vpop.permute.xlu0 %2165  ;;  %v1697_v19 = vmul.f32 %v7157_v60, %v8335_v42 }
 0x3f6   : > { %6609 = vmatprep.subr.bf16.mxu0 %v2166_v7 }
 0x3f7   : > { %6573 = vmatprep.mubr.bf16.mxu1 %v1705_v39  ;;  %v1831_v44 = vpop.permute.xlu1 %1830  ;;  %6610 = vmatpush3.bf16.msra.mxu0 %v2166_v7  ;;  %v1706_v20 = vpack.c.bf16 %v1698_v9, %v1697_v19 }
 0x3f9   : > { %v2170_v4 = vpop.permute.xlu0 %2169 }
 0x3fb   : > { %v1835_v45 = vpop.permute.xlu1 %1834 }
 0x3fc   : > { %6574 = vmatmul.mubr.bf16.gmra.mrb[28].mxu1 %v1706_v20 }
 0x3fd   : > { %6593 = vmatprep.mubr.msk.bf16.mxu1 %vm1409_vm0, %v1821_v29  ;;  %v2172_v10 = vpop.permute.xlu0 %2171 }
 0x3ff   : > { %v2168_v46 = vpop.permute.xlu1 %2167 }
 0x400   : > { %6611 = vmatprep.subr.bf16.mxu0 %v2168_v46 }
 0x401   : > { %6612 = vmatpush3.bf16.msra.mxu0 %v2168_v46 }
 0x402   : > { %6613 = vmatprep.subr.bf16.mxu0 %v2170_v4 }
 0x404   : > { %6594 = vmatmul.mubr.msk.bf16.vlgmr.msra.gmra.mrb[32].mxu1 %vm1409_vm0, %v1823_v50 }
 0x405   : > { %6597 = vmatprep.mubr.msk.bf16.mxu1 %vm1409_vm0, %v1825_v51  ;;  %6614 = vmatpush3.bf16.msra.mxu0 %v2170_v4 }
 0x406   : > { %6615 = vmatprep.subr.bf16.mxu0 %v2172_v10 }
 0x409   : > { %6616 = vmatpush3.bf16.msra.mxu0 %v2172_v10 }
 0x40c   : > { %6598 = vmatmul.mubr.msk.bf16.gmra.mrb[36].mxu1 %vm1409_vm0, %v1827_v28 }
 0x40d   : > { %6601 = vmatprep.mubr.msk.bf16.mxu1 %vm1409_vm0, %v1829_v21 }
 0x414   : > { %6602 = vmatmul.mubr.msk.bf16.gmra.mrb[40].mxu1 %vm1409_vm0, %v1831_v44 }
 0x415   : > { %6605 = vmatprep.mubr.msk.bf16.mxu1 %vm1409_vm0, %v1833_v15 }
 0x41c   : > { %6606 = vmatmul.mubr.msk.bf16.gmra.mrb[44].mxu1 %vm1409_vm0, %v1835_v45 }
 0x41d   : > { %3118 = vmatprep.mubr.bf16.mxu1 %v10393_v18 }
 0x47e   : > { %v8434_v42 = vpop.f32.mrb[16].mxu1 }
 0x47f   : > { %v8436_v31 = vpop.f32.mrb[17].mxu1 }
 0x480   : > { %v8438_v13 = vpop.f32.mrb[18].mxu1 }
 0x481   : > { %v1805_v48 = vpack.c.bf16 %v8438_v13, %v8434_v42  ;;  %v8442_v47 = vpop.f32.mrb[19].mxu1 }
 0x482   : > { %v1804_v23 = vpack.c.bf16 %v8442_v47, %v8436_v31 }
 0x4b7   : > { %v8446_v53 = vpop.f32.mrb[20].mxu1 }
 0x4b8   : > { %v8448_v57 = vpop.f32.mrb[21].mxu1 }
 0x4b9   : > { %v8450_v58 = vpop.f32.mrb[22].mxu1 }
 0x4ba   : > { %v1807_v54 = vpack.c.bf16 %v8450_v58, %v8446_v53  ;;  %v8454_v33 = vpop.f32.mrb[23].mxu1 }
 0x4bb   : > { %v1806_v34 = vpack.c.bf16 %v8454_v33, %v8448_v57 }
 0x4c7   : > { %v8458_v41 = vpop.f32.mrb[24].mxu1 }
 0x4c8   : > { %v8460_v55 = vpop.f32.mrb[25].mxu1 }
 0x4c9   : > { %v8462_v59 = vpop.f32.mrb[26].mxu1 }
 0x4ca   : > { %v1809_v43 = vpack.c.bf16 %v8462_v59, %v8458_v41  ;;  %v8466_v56 = vpop.f32.mrb[27].mxu1 }
 0x4cb   : > { %v1808_v16 = vpack.c.bf16 %v8466_v56, %v8460_v55 }
 0x4cf   : > { %v8470_v32 = vpop.f32.mrb[28].mxu1 }
 0x4d0   : > { %v8472_v30 = vpop.f32.mrb[29].mxu1 }
 0x4d1   : > { %v8474_v29 = vpop.f32.mrb[30].mxu1 }
 0x4d2   : > { %v1811_v49 = vpack.c.bf16 %v8474_v29, %v8470_v32  ;;  %v8478_v51 = vpop.f32.mrb[31].mxu1 }
 0x4d3   : > { %v1810_v8 = vpack.c.bf16 %v8478_v51, %v8472_v30  ;;  %v7607_v30 = vld [vmem:[%s8000_s14 + $0x8] sm:$0xff]  ;;  %v7608_v51 = vld [vmem:[%s8000_s14 + $0x10] sm:$0xff] }
 0x4d7   : > { %v6595_v11 = vpop.f32.mrb[32].mxu1 }
 0x4d8   : > { %2009 = vmax.xlane.f32.xlu0 %v6595_v11  ;;  %v1942_v52 = vpop.f32.mrb[33].mxu1 }
 0x4d9   : > { %v6596_v37 = vpop.f32.mrb[34].mxu1 }
 0x4da   : > { %v1945_v62 = vpop.f32.mrb[35].mxu1 }
 0x4db   : > { %2007 = vmax.xlane.f32.xlu1 %v1945_v62 }
 0x4dc   : > { %2005 = vmax.xlane.f32.xlu0 %v1942_v52 }
 0x4df   : > { %v6599_v21 = vpop.f32.mrb[36].mxu1 }
 0x4e0   : > { %2011 = vmax.xlane.f32.xlu0 %v6596_v37  ;;  %v1958_v22 = vpop.f32.mrb[37].mxu1 }
 0x4e1   : > { %v6600_v14 = vpop.f32.mrb[38].mxu1 }
 0x4e2   : > { %2019 = vmax.xlane.f32.xlu1 %v6600_v14  ;;  %v1961_v50 = vpop.f32.mrb[39].mxu1 }
 0x4e4   : > { %2017 = vmax.xlane.f32.xlu0 %v6599_v21 }
 0x4e6   : > { %2015 = vmax.xlane.f32.xlu1 %v1961_v50 }
 0x4e7   : > { %v8482_v35 = vpop.f32.mrb[40].mxu1 }
 0x4e8   : > { %2013 = vmax.xlane.f32.xlu0 %v1958_v22  ;;  %v8484_v12 = vpop.f32.mrb[41].mxu1 }
 0x4e9   : > { %v8486_v36 = vpop.f32.mrb[42].mxu1 }
 0x4ea   : > { %2027 = vmax.xlane.f32.xlu1 %v8486_v36  ;;  %v8489_v0 = vpop.f32.mrb[43].mxu1 }
 0x4ec   : > { %2025 = vmax.xlane.f32.xlu0 %v8482_v35 }
 0x4ee   : > { %2023 = vmax.xlane.f32.xlu1 %v8489_v0 }
 0x4ef   : > { %v8493_v15 = vpop.f32.mrb[44].mxu1 }
 0x4f0   : > { %2021 = vmax.xlane.f32.xlu0 %v8484_v12  ;;  %v8496_v27 = vpop.f32.mrb[45].mxu1 }
 0x4f1   : > { %v8498_v26 = vpop.f32.mrb[46].mxu1 }
 0x4f2   : > { %v8500_v25 = vpop.f32.mrb[47].mxu1 }
 0x4f4   : > { %2033 = vmax.xlane.f32.xlu0 %v8493_v15 }
 0x4f8   : > { %2029 = vmax.xlane.f32.xlu0 %v8496_v27 }
 0x4ff   : > { %2175 = vrot.lane.b32.xlu1 %v8180_v38, %s7719_s6 }
 0x50e   : > { %2173 = vrot.lane.b32.xlu0 %v8185_v40, %s7719_s6 }
 0x523   : > { %2035 = vmax.xlane.f32.xlu1 %v8498_v26 }
 0x527   : > { %2031 = vmax.xlane.f32.xlu1 %v8500_v25 }
 0x565   : > { %v2010_v6 = vpop.xlane.xlu0 %2009 }
 0x566   : > { %v2039_v28 = vsub.f32 %v6595_v11, %v2010_v6 }
 0x568   : > { %v2057_v17 = vmul.f32 1.442695, %v2039_v28  ;;  %v2008_v60 = vpop.xlane.xlu1 %2007 }
 0x569   : > { %v2006_v61 = vpop.xlane.xlu0 %2005  ;;  %v2038_v9 = vsub.f32 %v1945_v62, %v2008_v60 }
 0x56a   : > { %7158 = vpow2.f32 %v2057_v17  ;;  %v2037_v39 = vsub.f32 %v1942_v52, %v2006_v61 }
 0x56b   : > { %v2055_v45 = vmul.f32 1.442695, %v2038_v9 }
 0x56c   : > { %v2053_v7 = vmul.f32 1.442695, %v2037_v39 }
 0x56d   : > { %v2012_v44 = vpop.xlane.xlu0 %2011 }
 0x56e   : > { %7160 = vpow2.f32 %v2053_v7  ;;  %v2040_v19 = vsub.f32 %v6596_v37, %v2012_v44 }
 0x56f   : > { %v2020_v38 = vpop.xlane.xlu1 %2019 }
 0x570   : > { %v2059_v20 = vmul.f32 1.442695, %v2040_v19  ;;  %v2044_v40 = vsub.f32 %v6600_v14, %v2020_v38 }
 0x571   : > { %v2018_v4 = vpop.xlane.xlu0 %2017 }
 0x572   : > { %7162 = vpow2.f32 %v2059_v20  ;;  %v2043_v46 = vsub.f32 %v6599_v21, %v2018_v4  ;;  %v2067_v6 = vmul.f32 1.442695, %v2044_v40 }
 0x573   : > { %v2016_v10 = vpop.xlane.xlu1 %2015  ;;  %7164 = vpow2.f32 %v2055_v45 }
 0x574   : > { %v8510_v24 = vpop.eup %7158  ;;  %v2065_v11 = vmul.f32 1.442695, %v2043_v46  ;;  %v2042_v52 = vsub.f32 %v1961_v50, %v2016_v10 }
 0x575   : > { %v2014_v28 = vpop.xlane.xlu0 %2013  ;;  %2089 = vadd.xlane.f32.xlu1 %v8510_v24 }
 0x576   : > { %7166 = vpow2.f32 %v2065_v11  ;;  %v2041_v62 = vsub.f32 %v1958_v22, %v2014_v28  ;;  %v2063_v21 = vmul.f32 1.442695, %v2042_v52 }
 0x577   : > { %7168 = vpow2.f32 %v2067_v6  ;;  %v2028_v7 = vpop.xlane.xlu1 %2027 }
 0x578   : > { %v8513_v37 = vpop.eup %7160  ;;  %v2061_v17 = vmul.f32 1.442695, %v2041_v62  ;;  %v2048_v46 = vsub.f32 %v8486_v36, %v2028_v7 }
 0x579   : > { %v2026_v14 = vpop.xlane.xlu0 %2025  ;;  %2085 = vadd.xlane.f32.xlu1 %v8513_v37 }
 0x57a   : > { %7170 = vpow2.f32 %v2061_v17  ;;  %v2075_v6 = vmul.f32 1.442695, %v2048_v46  ;;  %v2047_v28 = vsub.f32 %v8482_v35, %v2026_v14 }
 0x57b   : > { %7172 = vpow2.f32 %v2063_v21  ;;  %v2024_v19 = vpop.xlane.xlu1 %2023 }
 0x57c   : > { %v8516_v61 = vpop.eup %7162  ;;  %v2046_v10 = vsub.f32 %v8489_v0, %v2024_v19  ;;  %v2073_v17 = vmul.f32 1.442695, %v2047_v28 }
 0x57d   : > { %v2022_v60 = vpop.xlane.xlu0 %2021  ;;  %2091 = vadd.xlane.f32.xlu1 %v8516_v61  ;;  %v8519_v39 = vpop.eup %7164 }
 0x57e   : > { %v2045_v4 = vsub.f32 %v8484_v12, %v2022_v60  ;;  %v2071_v52 = vmul.f32 1.442695, %v2046_v10 }
 0x57f   : > { %v2176_v40 = vpop.permute.xlu1 %2175 }
 0x580   : > { %v8521_v50 = vpop.eup %7166  ;;  %v2069_v11 = vmul.f32 1.442695, %v2045_v4 }
 0x581   : > { %v2034_v22 = vpop.xlane.xlu0 %2033  ;;  %2097 = vadd.xlane.f32.xlu0 %v8521_v50  ;;  %2087 = vadd.xlane.f32.xlu1 %v8519_v39  ;;  %v8525_v9 = vpop.eup %7168 }
 0x582   : > { %7174 = vpow2.f32 %v2069_v11  ;;  %v2051_v36 = vsub.f32 %v8493_v15, %v2034_v22 }
 0x583   : > { %7176 = vpow2.f32 %v2075_v6 }
 0x584   : > { %v8527_v44 = vpop.eup %7170  ;;  %7178 = vpow2.f32 %v2071_v52  ;;  %v2081_v14 = vmul.f32 1.442695, %v2051_v36 }
 0x585   : > { %v2030_v38 = vpop.xlane.xlu0 %2029  ;;  %2093 = vadd.xlane.f32.xlu1 %v8527_v44  ;;  %2099 = vadd.xlane.f32.xlu0 %v8525_v9  ;;  %v8531_v20 = vpop.eup %7172  ;;  %7180 = vpow2.f32 %v2073_v17 }
 0x589   : > { %v2174_v45 = vpop.permute.xlu0 %2173  ;;  %2095 = vadd.xlane.f32.xlu0 %v8531_v20 }
 0x58a   : > { %6617 = vmatprep.subr.bf16.mxu0 %v2174_v45 }
 0x58b   : > { %6618 = vmatpush3.bf16.msra.mxu0 %v2174_v45 }
 0x58c   : > { %6619 = vmatprep.subr.bf16.mxu0 %v2176_v40  ;;  %v8546_v7 = vpop.eup %7174 }
 0x58d   : > { %v8549_v19 = vpop.eup %7176 }
 0x58f   : > { %6620 = vmatpush3.bf16.msra.mxu0 %v2176_v40 }
 0x596   : > { %2179 = vrot.lane.b32.xlu1 %v8204_v63, %s7719_s6  ;;  %v2049_v63 = vsub.f32 %v8496_v27, %v2030_v38  ;;  %v8551_v27 = vpop.eup %7178 }
 0x597   : > { %v8555_v15 = vpop.eup %7180 }
 0x598   : > { %v2077_v0 = vmul.f32 1.442695, %v2049_v63 }
 0x59f   : > { %2177 = vrot.lane.b32.xlu0 %v8209_v1, %s7719_s6 }
 0x5b0   : > { %v2036_v62 = vpop.xlane.xlu1 %2035 }
 0x5b1   : > { %v2052_v1 = vsub.f32 %v8498_v26, %v2036_v62 }
 0x5b3   : > { %v2083_v35 = vmul.f32 1.442695, %v2052_v1 }
 0x5b4   : > { %v2032_v21 = vpop.xlane.xlu1 %2031 }
 0x5b5   : > { %v2050_v12 = vsub.f32 %v8500_v25, %v2032_v21 }
 0x5b7   : > { %v2079_v60 = vmul.f32 1.442695, %v2050_v12 }
 0x5b9   : > { %7182 = vpow2.f32 %v2079_v60 }
 0x5ba   : > { %2101 = vadd.xlane.f32.xlu1 %v8546_v7  ;;  %7184 = vpow2.f32 %v2077_v0 }
 0x5bb   : > { %7186 = vpow2.f32 %v2083_v35 }
 0x5bc   : > { %7188 = vpow2.f32 %v2081_v14 }
 0x5be   : > { %2107 = vadd.xlane.f32.xlu1 %v8549_v19  ;;  %2103 = vadd.xlane.f32.xlu0 %v8551_v27 }
 0x5c2   : > { %2105 = vadd.xlane.f32.xlu0 %v8555_v15 }
 0x5c3   : > { %v8558_v26 = vpop.eup %7182 }
 0x5c4   : > { %2111 = vadd.xlane.f32.xlu1 %v8558_v26  ;;  %v8561_v25 = vpop.eup %7184 }
 0x5c5   : > { %v8564_v22 = vpop.eup %7186 }
 0x5c6   : > { %2109 = vadd.xlane.f32.xlu0 %v8561_v25  ;;  %v8567_v38 = vpop.eup %7188 }
 0x5c8   : > { %2115 = vadd.xlane.f32.xlu1 %v8564_v22 }
 0x5ca   : > { %2113 = vadd.xlane.f32.xlu0 %v8567_v38 }
 0x602   : > { %v2090_v45 = vpop.xlane.xlu1 %2089 }
 0x606   : > { %v2086_v40 = vpop.xlane.xlu1 %2085 }
 0x607   : > { %7190 = vrcp.f32 %v2086_v40 }
 0x60a   : > { %v2092_v4 = vpop.xlane.xlu1 %2091 }
 0x60b   : > { %7192 = vrcp.f32 %v2092_v4 }
 0x60e   : > { %v2098_v46 = vpop.xlane.xlu0 %2097  ;;  %v2088_v10 = vpop.xlane.xlu1 %2087 }
 0x60f   : > { %7194 = vrcp.f32 %v2088_v10 }
 0x610   : > { %7196 = vrcp.f32 %v2090_v45 }
 0x611   : > { %v7191_v52 = vpop.eup %7190 }
 0x612   : > { %v2100_v11 = vpop.xlane.xlu0 %2099  ;;  %v2094_v6 = vpop.xlane.xlu1 %2093  ;;  %v2133_v21 = vmul.f32 %v7191_v52, %v8513_v37 }
 0x613   : > { %7198 = vrcp.f32 %v2094_v6 }
 0x615   : > { %v7193_v62 = vpop.eup %7192 }
 0x616   : > { %v2096_v28 = vpop.xlane.xlu0 %2095  ;;  %v2180_v36 = vpop.permute.xlu1 %2179  ;;  %v2136_v0 = vmul.f32 %v7193_v62, %v8516_v61 }
 0x617   : > { %7200 = vrcp.f32 %v2096_v28 }
 0x618   : > { %7202 = vrcp.f32 %v2100_v11 }
 0x619   : > { %v7195_v17 = vpop.eup %7194  ;;  %7204 = vrcp.f32 %v2098_v46 }
 0x61a   : > { %v2178_v63 = vpop.permute.xlu0 %2177  ;;  %v2134_v1 = vmul.f32 %v7195_v17, %v8519_v39  ;;  %v7197_v12 = vpop.eup %7196 }
 0x61b   : > { %6621 = vmatprep.subr.bf16.mxu0 %v2178_v63  ;;  %v2135_v14 = vmul.f32 %v7197_v12, %v8510_v24 }
 0x61c   : > { %6622 = vmatpush3.bf16.msra.mxu0 %v2178_v63  ;;  %v2149_v60 = vpack.c.bf16 %v2134_v1, %v2133_v21 }
 0x61d   : > { %6623 = vmatprep.subr.bf16.mxu0 %v2180_v36  ;;  %v7199_v35 = vpop.eup %7198  ;;  %v2150_v40 = vpack.c.bf16 %v2136_v0, %v2135_v14 }
 0x61e   : > { %6625 = vmatprep.mubr.bf16.mxu0 %v2149_v60  ;;  %v2137_v46 = vmul.f32 %v7199_v35, %v8527_v44 }
 0x620   : > { %6624 = vmatpush3.bf16.msra.mxu0 %v2180_v36 }
 0x621   : > { %v7201_v45 = vpop.eup %7200 }
 0x622   : > { %v7203_v4 = vpop.eup %7202  ;;  %v2138_v37 = vmul.f32 %v7201_v45, %v8531_v20 }
 0x623   : > { %6626 = vmatmul.mubr.bf16.vlgmr.msra.gmra.mrb[48].mxu0 %v2150_v40  ;;  %v7205_v39 = vpop.eup %7204  ;;  %v2140_v11 = vmul.f32 %v7203_v4, %v8525_v9 }
 0x624   : > { %v2151_v10 = vpack.c.bf16 %v2138_v37, %v2137_v46  ;;  %v2139_v61 = vmul.f32 %v7205_v39, %v8521_v50 }
 0x626   : > { %6629 = vmatprep.mubr.bf16.mxu0 %v2151_v10  ;;  %v2152_v6 = vpack.c.bf16 %v2140_v11, %v2139_v61  ;;  %v7006_v10 = vld [vmem:[%s7924_s18] sm:$0xff]   ;;  %v7007_v11 = vld [vmem:[%s7924_s18 + $0x8] sm:$0xff]  }
 0x627   : > { %6641 = vmatprep.subr.bf16.mxu0 %v7006_v10  ;;  %v7010_v61 = vld [vmem:[%s7924_s18 + $0x20] sm:$0xff]  }
 0x628   : > { %6642 = vmatpush3.bf16.msra.mxu0 %v7006_v10 }
 0x629   : > { %6643 = vmatprep.subr.bf16.mxu0 %v7007_v11 }
 0x62b   : > { %6630 = vmatmul.mubr.bf16.gmra.mrb[52].mxu0 %v2152_v6  ;;  %v7013_v6 = vld [vmem:[%s7924_s18 + $0x38] sm:$0xff]  }
 0x62c   : > { %6644 = vmatpush3.bf16.msra.mxu0 %v7007_v11 }
 0x647   : > { %v2102_v24 = vpop.xlane.xlu1 %2101 }
 0x648   : > { %7206 = vrcp.f32 %v2102_v24 }
 0x64b   : > { %v2104_v28 = vpop.xlane.xlu0 %2103  ;;  %v2108_v52 = vpop.xlane.xlu1 %2107 }
 0x64c   : > { %7208 = vrcp.f32 %v2104_v28 }
 0x64d   : > { %7210 = vrcp.f32 %v2108_v52 }
 0x64f   : > { %v2106_v62 = vpop.xlane.xlu0 %2105 }
 0x650   : > { %7212 = vrcp.f32 %v2106_v62 }
 0x651   : > { %v2112_v44 = vpop.xlane.xlu1 %2111 }
 0x652   : > { %7214 = vrcp.f32 %v2112_v44  ;;  %v7207_v17 = vpop.eup %7206 }
 0x653   : > { %v2110_v20 = vpop.xlane.xlu0 %2109  ;;  %v2141_v50 = vmul.f32 %v7207_v17, %v8546_v7 }
 0x654   : > { %7216 = vrcp.f32 %v2110_v20 }
 0x655   : > { %v2116_v63 = vpop.xlane.xlu1 %2115 }
 0x656   : > { %v7209_v9 = vpop.eup %7208  ;;  %7218 = vrcp.f32 %v2116_v63 }
 0x657   : > { %v2114_v21 = vpop.xlane.xlu0 %2113  ;;  %v2142_v1 = vmul.f32 %v7209_v9, %v8551_v27  ;;  %v7211_v12 = vpop.eup %7210 }
 0x658   : > { %7220 = vrcp.f32 %v2114_v21  ;;  %v2144_v35 = vmul.f32 %v7211_v12, %v8549_v19 }
 0x659   : > { %v2153_v36 = vpack.c.bf16 %v2142_v1, %v2141_v50 }
 0x65a   : > { %v7213_v0 = vpop.eup %7212 }
 0x65b   : > { %6633 = vmatprep.mubr.bf16.mxu0 %v2153_v36  ;;  %v2143_v60 = vmul.f32 %v7213_v0, %v8555_v15 }
 0x65c   : > { %v7215_v14 = vpop.eup %7214 }
 0x65d   : > { %v2154_v45 = vpack.c.bf16 %v2144_v35, %v2143_v60  ;;  %v2146_v27 = vmul.f32 %v7215_v14, %v8558_v26  ;;  %v7008_v26 = vld [vmem:[%s7924_s18 + $0x10] sm:$0xff]  }
 0x65e   : > { %v7217_v40 = vpop.eup %7216  ;;  %6645 = vmatprep.subr.bf16.mxu0 %v7008_v26 }
 0x65f   : > { %6634 = vmatmul.mubr.bf16.gmra.mrb[56].mxu0 %v2154_v45  ;;  %v2145_v7 = vmul.f32 %v7217_v40, %v8561_v25  ;;  %v7009_v25 = vld [vmem:[%s7924_s18 + $0x18] sm:$0xff]  }
 0x660   : > { %v7219_v4 = vpop.eup %7218  ;;  %6646 = vmatpush3.bf16.msra.mxu0 %v7008_v26 }
 0x661   : > { %v2155_v46 = vpack.c.bf16 %v2146_v27, %v2145_v7  ;;  %v2148_v19 = vmul.f32 %v7219_v4, %v8564_v22  ;;  %6647 = vmatprep.subr.bf16.mxu0 %v7009_v25  ;;  %v7011_v22 = vld [vmem:[%s7924_s18 + $0x28] sm:$0xff]  }
 0x662   : > { %v7221_v37 = vpop.eup %7220 }
 0x663   : > { %6637 = vmatprep.mubr.bf16.mxu0 %v2155_v46  ;;  %v2147_v15 = vmul.f32 %v7221_v37, %v8567_v38  ;;  %v7012_v38 = vld [vmem:[%s7924_s18 + $0x30] sm:$0xff]   ;;  %s10492_s18 = sld [smem:[#allocation40_spill]] }
 0x664   : > { %6648 = vmatpush3.bf16.msra.mxu0 %v7009_v25 }
 0x665   : > { %v2156_v39 = vpack.c.bf16 %v2148_v19, %v2147_v15  ;;  %6649 = vmatprep.subr.bf16.mxu0 %v7010_v61 }
 0x667   : > { %6638 = vmatmul.mubr.bf16.gmra.mrb[60].mxu0 %v2156_v39 }
 0x668   : > { %6650 = vmatpush3.bf16.msra.mxu0 %v7010_v61  ;;  %v7609_v61 = vld [vmem:[%s8000_s14 + $0x18] sm:$0xff] }
 0x669   : > { %6651 = vmatprep.subr.bf16.mxu0 %v7011_v22  ;;  %s10493_s2 = scalar_lea.vmem %s10492_s18, %s7906_s1 }
 0x66c   : > { %6652 = vmatpush3.bf16.msra.mxu0 %v7011_v22 }
 0x66d   : > { %6653 = vmatprep.subr.bf16.mxu0 %v7012_v38 }
 0x670   : > { %6654 = vmatpush3.bf16.msra.mxu0 %v7012_v38 }
 0x671   : > { %6655 = vmatprep.subr.bf16.mxu0 %v7013_v6 }
 0x674   : > { %6656 = vmatpush3.bf16.msra.mxu0 %v7013_v6 }
 0x6f6   : > { %v6627_v24 = vpop.f32.mrb[48].mxu0 }
 0x6f7   : > { %v2223_v28 = vpop.f32.mrb[49].mxu0 }
 0x6f8   : > { %v6628_v52 = vpop.f32.mrb[50].mxu0 }
 0x6f9   : > { %v2287_v62 = vpack.c.bf16 %v6628_v52, %v6627_v24  ;;  %v2226_v44 = vpop.f32.mrb[51].mxu0  ;;  %v7610_v52 = vld [vmem:[%s8000_s14 + $0x20] sm:$0xff] }
 0x6fa   : > { %v2286_v20 = vpack.c.bf16 %v2226_v44, %v2223_v28 }
 0x6fb   : > { %2304 = vrot.lane.b32.xlu1 %v2287_v62, %s7719_s6 }
 0x6fc   : > { %2302 = vrot.lane.b32.xlu0 %v2286_v20, %s7719_s6 }
 0x6fe   : > { %v6631_v17 = vpop.f32.mrb[52].mxu0 }
 0x6ff   : > { %v2239_v63 = vpop.f32.mrb[53].mxu0 }
 0x700   : > { %v6632_v9 = vpop.f32.mrb[54].mxu0 }
 0x701   : > { %v2289_v21 = vpack.c.bf16 %v6632_v9, %v6631_v17  ;;  %v2242_v50 = vpop.f32.mrb[55].mxu0 }
 0x702   : > { %v2288_v1 = vpack.c.bf16 %v2242_v50, %v2239_v63  ;;  %v7611_v63 = vld [vmem:[%s8000_s14 + $0x28] sm:$0xff] }
 0x704   : > { %2306 = vrot.lane.b32.xlu1 %v2288_v1, %s7719_s6  ;;  %v7613_v1 = vld [vmem:[%s8000_s14 + $0x38] sm:$0xff] }
 0x708   : > { %2308 = vrot.lane.b32.xlu1 %v2289_v21, %s7719_s6  ;;  %v7612_v21 = vld [vmem:[%s8000_s14 + $0x30] sm:$0xff] }
 0x732   : > { %v6635_v12 = vpop.f32.mrb[56].mxu0 }
 0x733   : > { %v2255_v36 = vpop.f32.mrb[57].mxu0 }
 0x734   : > { %v6636_v0 = vpop.f32.mrb[58].mxu0 }
 0x735   : > { %v2291_v60 = vpack.c.bf16 %v6636_v0, %v6635_v12  ;;  %v2258_v35 = vpop.f32.mrb[59].mxu0 }
 0x736   : > { %v2290_v14 = vpack.c.bf16 %v2258_v35, %v2255_v36 }
 0x737   : > { %2312 = vrot.lane.b32.xlu1 %v2291_v60, %s7719_s6 }
 0x738   : > { %2310 = vrot.lane.b32.xlu0 %v2290_v14, %s7719_s6 }
 0x73a   : > { %v6639_v45 = vpop.f32.mrb[60].mxu0 }
 0x73b   : > { %v2271_v40 = vpop.f32.mrb[61].mxu0 }
 0x73c   : > { %v6640_v7 = vpop.f32.mrb[62].mxu0 }
 0x73d   : > { %v2293_v27 = vpack.c.bf16 %v6640_v7, %v6639_v45  ;;  %v2274_v4 = vpop.f32.mrb[63].mxu0 }
 0x73e   : > { %v2292_v46 = vpack.c.bf16 %v2274_v4, %v2271_v40  ;;  %v7614_v40 = vld [vmem:[%s8000_s14 + $0x40] sm:$0xff] }
 0x73f   : > { %2316 = vrot.lane.b32.xlu1 %v2293_v27, %s7719_s6 }
 0x740   : > { %2314 = vrot.lane.b32.xlu0 %v2292_v46, %s7719_s6  ;;  %v7615_v46 = vld [vmem:[%s8000_s14 + $0x48] sm:$0xff] }
 0x76d   : > { %v2305_v37 = vpop.permute.xlu1 %2304 }
 0x76e   : > { %v2303_v15 = vpop.permute.xlu0 %2302  ;;  %v2324_v39 = vsel %vm1409_vm0, %v1805_v48, %v2305_v37 }
 0x76f   : > { %v2320_v19 = vsel %vm1409_vm0, %v1804_v23, %v2303_v15  ;;  %v7616_v15 = vld [vmem:[%s8000_s14 + $0x50] sm:$0xff] }
 0x770   : > { %6657 = vmatprep.mubr.bf16.mxu0 %v2320_v19 }
 0x771   : > { %6658 = vmatmul.mubr.bf16.vlgmr.msra.gmra.mrb[64].mxu0 %v2324_v39 }
 0x776   : > { %v2307_v10 = vpop.permute.xlu1 %2306 }
 0x777   : > { %v2328_v11 = vsel %vm1409_vm0, %v1806_v34, %v2307_v10 }
 0x778   : > { %6661 = vmatprep.mubr.bf16.mxu0 %v2328_v11  ;;  %v7617_v11 = vld [vmem:[%s8000_s14 + $0x58] sm:$0xff] }
 0x77a   : > { %v2309_v26 = vpop.permute.xlu1 %2308 }
 0x77b   : > { %v2332_v31 = vsel %vm1409_vm0, %v1807_v54, %v2309_v26  ;;  %v8639_v54 = vld [vmem:[%s10456_s25] ss:$0 sm:$0xff]  ;;  %s10495_s25 = sld [smem:[#allocation6_spill]] }
 0x77c   : > { %6662 = vmatmul.mubr.bf16.gmra.mrb[68].mxu0 %v2332_v31 }
 0x7a9   : > { %v2313_v42 = vpop.permute.xlu1 %2312 }
 0x7aa   : > { %v2311_v13 = vpop.permute.xlu0 %2310  ;;  %v2340_v47 = vsel %vm1409_vm0, %v1809_v43, %v2313_v42 }
 0x7ab   : > { %v2336_v48 = vsel %vm1409_vm0, %v1808_v16, %v2311_v13  ;;  %v7606_v16 = vld [vmem:[%s8000_s14] sm:$0xff] }
 0x7ac   : > { %6665 = vmatprep.mubr.bf16.mxu0 %v2336_v48 }
 0x7ad   : > { %6666 = vmatmul.mubr.bf16.gmra.mrb[72].mxu0 %v2340_v47  ;;  %v7618_v47 = vld [vmem:[%s8000_s14 + $0x60] sm:$0xff] }
 0x7b1   : > { %v2317_v23 = vpop.permute.xlu1 %2316 }
 0x7b2   : > { %v2315_v53 = vpop.permute.xlu0 %2314  ;;  %v2348_v58 = vsel %vm1409_vm0, %v1811_v49, %v2317_v23 }
 0x7b3   : > { %v2344_v57 = vsel %vm1409_vm0, %v1810_v8, %v2315_v53 }
 0x7b4   : > { %6669 = vmatprep.mubr.bf16.mxu0 %v2344_v57 }
 0x7b5   : > { %6670 = vmatmul.mubr.bf16.gmra.mrb[76].mxu0 %v2348_v58  ;;  %v7619_v58 = vld [vmem:[%s8000_s14 + $0x68] sm:$0xff] }
 0x844   : > { %v6659_v33 = vpop.f32.mrb[64].mxu0 }
 0x845   : > { %v2455_v34 = vpop.f32.mrb[65].mxu0  ;;  %v2464_v43 = vadd.f32 %v6659_v33, %v8639_v54 }
 0x846   : > { %v2456_v41 = vadd.f32 %v8639_v54, %v2455_v34  ;;  %v6660_v55 = vpop.f32.mrb[66].mxu0  ;;  %v7620_v34 = vld [vmem:[%s8000_s14 + $0x70] sm:$0xff] }
 0x847   : > { %v2458_v59 = vpop.f32.mrb[67].mxu0  ;;  %v2467_v49 = vadd.f32 %v6660_v55, %v8639_v54  ;;  %v8654_v8 = vadd.f32 %v7608_v51, %v2464_v43  ;;  %v7621_v55 = vld [vmem:[%s8000_s14 + $0x78] sm:$0xff] }
 0x848   : > { %v2459_v56 = vadd.f32 %v8639_v54, %v2458_v59  ;;  %v8645_v32 = vadd.f32 %v7606_v16, %v2456_v41 }
 0x849   : > { %v8658_v22 = vadd.f32 %v7609_v61, %v2467_v49 }
 0x84a   : > { %v8648_v29 = vadd.f32 %v7607_v30, %v2459_v56  ;;  %2536 = vadd.xlane.f32.xlu0 %v8645_v32 }
 0x84c   : > { %2538 = vadd.xlane.f32.xlu1 %v8648_v29 }
 0x84e   : > { %2540 = vadd.xlane.f32.xlu0 %v8654_v8 }
 0x84f   : > { %v6663_v25 = vpop.f32.mrb[68].mxu0 }
 0x850   : > { %v2471_v38 = vpop.f32.mrb[69].mxu0  ;;  %v2480_v20 = vadd.f32 %v6663_v25, %v8639_v54 }
 0x851   : > { %v2472_v6 = vadd.f32 %v8639_v54, %v2471_v38  ;;  %v6664_v24 = vpop.f32.mrb[70].mxu0 }
 0x852   : > { %2542 = vadd.xlane.f32.xlu0 %v8658_v22  ;;  %v2474_v28 = vpop.f32.mrb[71].mxu0  ;;  %v2483_v17 = vadd.f32 %v6664_v24, %v8639_v54  ;;  %v8674_v50 = vadd.f32 %v7612_v21, %v2480_v20 }
 0x853   : > { %v8663_v62 = vadd.f32 %v7610_v52, %v2472_v6  ;;  %v2475_v44 = vadd.f32 %v8639_v54, %v2474_v28 }
 0x854   : > { %v8677_v12 = vadd.f32 %v7613_v1, %v2483_v17 }
 0x855   : > { %v8669_v9 = vadd.f32 %v7611_v63, %v2475_v44 }
 0x856   : > { %2544 = vadd.xlane.f32.xlu0 %v8663_v62 }
 0x857   : > { %2546 = vadd.xlane.f32.xlu1 %v8669_v9 }
 0x85a   : > { %2548 = vadd.xlane.f32.xlu0 %v8674_v50 }
 0x85b   : > { %2550 = vadd.xlane.f32.xlu1 %v8677_v12 }
 0x880   : > { %v6667_v36 = vpop.f32.mrb[72].mxu0 }
 0x881   : > { %v2487_v0 = vpop.f32.mrb[73].mxu0  ;;  %v2496_v45 = vadd.f32 %v6667_v36, %v8639_v54 }
 0x882   : > { %v2488_v60 = vadd.f32 %v8639_v54, %v2487_v0  ;;  %v6668_v35 = vpop.f32.mrb[74].mxu0 }
 0x883   : > { %v2490_v14 = vpop.f32.mrb[75].mxu0  ;;  %v2499_v4 = vadd.f32 %v6668_v35, %v8639_v54  ;;  %v8693_v19 = vadd.f32 %v7616_v15, %v2496_v45  ;;  %v7021_v15 = vld [vmem:[%s7938_s20 + $0x30] ss:$12 sps:$4 sm:$0xff]  }
 0x884   : > { %v8684_v7 = vadd.f32 %v7614_v40, %v2488_v60  ;;  %v2491_v27 = vadd.f32 %v8639_v54, %v2490_v14  ;;  %v7016_v40 = vld [vmem:[%s7938_s20 + $0x4] ss:$12 sps:$4 sm:$0xff]  }
 0x885   : > { %v8697_v26 = vadd.f32 %v7617_v11, %v2499_v4  ;;  %3086 = vmatprep.subr.bf16.mxu1 %v7016_v40  ;;  %v7020_v4 = vld [vmem:[%s7938_s20 + $0x8] ss:$12 sps:$4 sm:$0xff]  }
 0x886   : > { %v8689_v37 = vadd.f32 %v7615_v46, %v2491_v27  ;;  %2552 = vadd.xlane.f32.xlu0 %v8684_v7  ;;  %v7014_v27 = vld [vmem:[%s7938_s20] ss:$12 sps:$4 sm:$0xff]   ;;  %6673 = vmatprep.subr.bf16.mxu0 %v7020_v4  ;;  %v7025_v11 = vld [vmem:[%s7938_s20 + $0x48] ss:$12 sps:$4 sm:$0xff]  }
 0x887   : > { %3087 = vmatpush1.bf16.msra.mxu1 %v7014_v27  ;;  %v7023_v46 = vld [vmem:[%s7938_s20 + $0x34] ss:$12 sps:$4 sm:$0xff]   ;;  %6674 = vmatpush3.bf16.msra.mxu0 %v7020_v4 }
 0x888   : > { %2554 = vadd.xlane.f32.xlu1 %v8689_v37  ;;  %v6671_v39 = vpop.f32.mrb[76].mxu0 }
 0x889   : > { %v2503_v10 = vpop.f32.mrb[77].mxu0  ;;  %v2512_v48 = vadd.f32 %v6671_v39, %v8639_v54  ;;  %v7024_v39 = vld [vmem:[%s7938_s20 + $0x20] ss:$12 sps:$4 sm:$0xff]  }
 0x88a   : > { %v2504_v31 = vadd.f32 %v8639_v54, %v2503_v10  ;;  %2556 = vadd.xlane.f32.xlu0 %v8693_v19  ;;  %v6672_v42 = vpop.f32.mrb[78].mxu0  ;;  %6675 = vmatprep.subr.bf16.mxu0 %v7024_v39  ;;  %v7027_v10 = vld [vmem:[%s7938_s20 + $0x4c] ss:$12 sps:$4 sm:$0xff]  }
 0x88b   : > { %v2506_v13 = vpop.f32.mrb[79].mxu0  ;;  %v2515_v57 = vadd.f32 %v6672_v42, %v8639_v54  ;;  %v8713_v41 = vadd.f32 %v7620_v34, %v2512_v48  ;;  %6676 = vmatpush3.bf16.msra.mxu0 %v7024_v39  ;;  %v7031_v42 = vld [vmem:[%s7938_s20 + $0x64] ss:$12 sps:$4 sm:$0xff]  }
 0x88c   : > { %v8703_v23 = vadd.f32 %v7618_v47, %v2504_v31  ;;  %v2507_v53 = vadd.f32 %v8639_v54, %v2506_v13  ;;  %2558 = vadd.xlane.f32.xlu1 %v8697_v26  ;;  %v7028_v31 = vld [vmem:[%s7938_s20 + $0x38] ss:$12 sps:$4 sm:$0xff]   ;;  %v7029_v13 = vld [vmem:[%s7938_s20 + $0x60] ss:$12 sps:$4 sm:$0xff]   ;;  %v7032_v48 = vld [vmem:[%s7938_s20 + $0x50] ss:$12 sps:$4 sm:$0xff]  }
 0x88d   : > { %v8717_v59 = vadd.f32 %v7621_v55, %v2515_v57  ;;  %6677 = vmatprep.subr.bf16.mxu0 %v7028_v31  ;;  %v7035_v47 = vld [vmem:[%s7938_s20 + $0x7c] ss:$12 sps:$4 sm:$0xff]   ;;  %v7040_v55 = vld [vmem:[%s7938_s20 + $0x80] ss:$12 sps:$4 sm:$0xff]  }
 0x88e   : > { %v8709_v33 = vadd.f32 %v7619_v58, %v2507_v53  ;;  %2560 = vadd.xlane.f32.xlu0 %v8703_v23  ;;  %v7033_v53 = vld [vmem:[%s7938_s20 + $0x78] ss:$12 sps:$4 sm:$0xff]   ;;  %v7036_v57 = vld [vmem:[%s7938_s20 + $0x68] ss:$12 sps:$4 sm:$0xff]   ;;  %v7037_v34 = vld [vmem:[%s7938_s20 + $0x90] ss:$12 sps:$4 sm:$0xff]  }
 0x88f   : > { %6678 = vmatpush3.bf16.msra.mxu0 %v7028_v31  ;;  %v7039_v58 = vld [vmem:[%s7938_s20 + $0x94] ss:$12 sps:$4 sm:$0xff]  }
 0x890   : > { %2562 = vadd.xlane.f32.xlu1 %v8709_v33  ;;  %6679 = vmatprep.subr.bf16.mxu0 %v7032_v48 }
 0x892   : > { %2564 = vadd.xlane.f32.xlu0 %v8713_v41 }
 0x893   : > { %6680 = vmatpush3.bf16.msra.mxu0 %v7032_v48 }
 0x894   : > { %2566 = vadd.xlane.f32.xlu1 %v8717_v59  ;;  %6681 = vmatprep.subr.bf16.mxu0 %v7036_v57 }
 0x897   : > { %6682 = vmatpush3.bf16.msra.mxu0 %v7036_v57 }
 0x898   : > { %6683 = vmatprep.subr.bf16.mxu0 %v7040_v55 }
 0x89b   : > { %6684 = vmatpush3.bf16.msra.mxu0 %v7040_v55 }
 0x8d7   : > { %v2537_v43 = vpop.xlane.xlu0 %2536 }
 0x8d8   : > { %v2569_v56 = vmul.f32 0.0078125, %v2537_v43  ;;  %v7043_v43 = vld [vmem:[%s7938_s20 + $0xac] ss:$12 sps:$4 sm:$0xff]  }
 0x8d9   : > { %v2539_v54 = vpop.xlane.xlu1 %2538 }
 0x8da   : > { %v8722_v16 = vsub.f32 %v8645_v32, %v2569_v56  ;;  %v2570_v30 = vmul.f32 0.0078125, %v2539_v54  ;;  %v7044_v56 = vld [vmem:[%s7938_s20 + $0x98] ss:$12 sps:$4 sm:$0xff]   ;;  %v7041_v54 = vld [vmem:[%s7938_s20 + $0xa8] ss:$12 sps:$4 sm:$0xff]  }
 0x8db   : > { %v2541_v49 = vpop.xlane.xlu0 %2540  ;;  %6685 = vmatprep.subr.bf16.mxu0 %v7044_v56 }
 0x8dc   : > { %v8725_v51 = vsub.f32 %v8648_v29, %v2570_v30  ;;  %v2571_v25 = vmul.f32 0.0078125, %v2541_v49  ;;  %v2601_v61 = vmul.f32 %v8722_v16, %v8722_v16  ;;  %6686 = vmatpush3.bf16.msra.mxu0 %v7044_v56 }
 0x8de   : > { %v8730_v38 = vsub.f32 %v8654_v8, %v2571_v25  ;;  %2617 = vadd.xlane.f32.xlu0 %v2601_v61  ;;  %v2602_v6 = vmul.f32 %v8725_v51, %v8725_v51  ;;  %v7045_v61 = vld [vmem:[%s7938_s20 + $0xb0] ss:$12 sps:$4 sm:$0xff]  }
 0x8df   : > { %v2543_v24 = vpop.xlane.xlu0 %2542  ;;  %6687 = vmatprep.subr.bf16.mxu0 %v7045_v61 }
 0x8e0   : > { %v2572_v28 = vmul.f32 0.0078125, %v2543_v24  ;;  %2619 = vadd.xlane.f32.xlu1 %v2602_v6  ;;  %v2603_v32 = vmul.f32 %v8730_v38, %v8730_v38  ;;  %6688 = vmatpush3.bf16.msra.mxu0 %v7045_v61 }
 0x8e2   : > { %v8737_v29 = vsub.f32 %v8658_v22, %v2572_v28  ;;  %2621 = vadd.xlane.f32.xlu0 %v2603_v32 }
 0x8e3   : > { %v2545_v52 = vpop.xlane.xlu0 %2544 }
 0x8e4   : > { %v2573_v44 = vmul.f32 0.0078125, %v2545_v52  ;;  %v2547_v20 = vpop.xlane.xlu1 %2546  ;;  %v2604_v8 = vmul.f32 %v8737_v29, %v8737_v29 }
 0x8e5   : > { %v2574_v17 = vmul.f32 0.0078125, %v2547_v20 }
 0x8e6   : > { %v8742_v63 = vsub.f32 %v8663_v62, %v2573_v44  ;;  %2623 = vadd.xlane.f32.xlu1 %v2604_v8 }
 0x8e7   : > { %v8745_v21 = vsub.f32 %v8669_v9, %v2574_v17  ;;  %v2549_v1 = vpop.xlane.xlu0 %2548 }
 0x8e8   : > { %v2575_v22 = vmul.f32 0.0078125, %v2549_v1  ;;  %v2551_v36 = vpop.xlane.xlu1 %2550  ;;  %v2605_v0 = vmul.f32 %v8742_v63, %v8742_v63 }
 0x8e9   : > { %v2576_v60 = vmul.f32 0.0078125, %v2551_v36  ;;  %v2606_v35 = vmul.f32 %v8745_v21, %v8745_v21 }
 0x8ea   : > { %v8752_v62 = vsub.f32 %v8674_v50, %v2575_v22  ;;  %2625 = vadd.xlane.f32.xlu0 %v2605_v0  ;;  %v7019_v50 = vld [vmem:[%s7938_s20 + $0x1c] ss:$12 sps:$4 sm:$0xff]  }
 0x8eb   : > { %v8755_v9 = vsub.f32 %v8677_v12, %v2576_v60  ;;  %2627 = vadd.xlane.f32.xlu1 %v2606_v35  ;;  %v7017_v12 = vld [vmem:[%s7938_s20 + $0x18] ss:$12 sps:$4 sm:$0xff]   ;;  %3088 = vmatprep.subr.bf16.mxu1 %v7019_v50  ;;  %s5795_s20 = sshll.u32 %s8000_s14, 4  ;;  %s10295_s20 = int_to_ptr.vmem [resolvable:$true] %s5795_s20 }
 0x8ec   : > { %v2607_v14 = vmul.f32 %v8752_v62, %v8752_v62  ;;  %3089 = vmatpush1.bf16.msra.mxu1 %v7017_v12  ;;  %s7622_s28 = scalar_lea.vmem %s10295_s20, 2048 }
 0x8ed   : > { %v2608_v45 = vmul.f32 %v8755_v9, %v8755_v9  ;;  %3090 = vmatprep.subr.bf16.mxu1 %v7023_v46  ;;  %p7623_p1 = scmp.ne.s32.totalorder %s10295_s20, %s7622_s28 }
 0x8ee   : > { %2629 = vadd.xlane.f32.xlu0 %v2607_v14 }
 0x8ef   : > { %2631 = vadd.xlane.f32.xlu1 %v2608_v45  ;;  %p7624_p2 = pnand %p7623_p1, %p7877_p3 }
 0x8f0   : > { %3091 = vmatpush1.bf16.msra.mxu1 %v7021_v15 }
 0x8f1   : > { %3092 = vmatprep.subr.bf16.mxu1 %v7027_v10  ;;  %p7625_p4 = pneg %p7624_p2 }
 0x8f4   : > { %3093 = vmatpush1.bf16.msra.mxu1 %v7025_v11 }
 0x8f5   : > { %3094 = vmatprep.subr.bf16.mxu1 %v7031_v42 }
 0x8f8   : > { %3095 = vmatpush1.bf16.msra.mxu1 %v7029_v13 }
 0x8f9   : > { %3096 = vmatprep.subr.bf16.mxu1 %v7035_v47 }
 0x8fc   : > { %3097 = vmatpush1.bf16.msra.mxu1 %v7033_v53 }
 0x8fd   : > { %3098 = vmatprep.subr.bf16.mxu1 %v7039_v58 }
 0x900   : > { %3099 = vmatpush1.bf16.msra.mxu1 %v7037_v34 }
 0x901   : > { %3100 = vmatprep.subr.bf16.mxu1 %v7043_v43 }
 0x904   : > { %3101 = vmatpush1.bf16.msra.mxu1 %v7041_v54 }
 0x913   : > { %v2553_v30 = vpop.xlane.xlu0 %2552 }
 0x914   : > { %v2577_v49 = vmul.f32 0.0078125, %v2553_v30 }
 0x915   : > { %v2555_v25 = vpop.xlane.xlu1 %2554 }
 0x916   : > { %v8786_v6 = vsub.f32 %v8684_v7, %v2577_v49  ;;  %v2578_v24 = vmul.f32 0.0078125, %v2555_v25 }
 0x917   : > { %v2557_v28 = vpop.xlane.xlu0 %2556 }
 0x918   : > { %v8789_v32 = vsub.f32 %v8689_v37, %v2578_v24  ;;  %v2579_v52 = vmul.f32 0.0078125, %v2557_v28  ;;  %v2609_v44 = vmul.f32 %v8786_v6, %v8786_v6 }
 0x919   : > { %v2559_v20 = vpop.xlane.xlu1 %2558 }
 0x91a   : > { %v8794_v8 = vsub.f32 %v8693_v19, %v2579_v52  ;;  %v2580_v17 = vmul.f32 0.0078125, %v2559_v20  ;;  %2633 = vadd.xlane.f32.xlu0 %v2609_v44  ;;  %v2610_v7 = vmul.f32 %v8789_v32, %v8789_v32 }
 0x91b   : > { %v2561_v1 = vpop.xlane.xlu0 %2560 }
 0x91c   : > { %v8799_v22 = vsub.f32 %v8697_v26, %v2580_v17  ;;  %v2581_v37 = vmul.f32 0.0078125, %v2561_v1  ;;  %2635 = vadd.xlane.f32.xlu1 %v2610_v7  ;;  %v2611_v36 = vmul.f32 %v8794_v8, %v8794_v8 }
 0x91d   : > { %v2563_v0 = vpop.xlane.xlu1 %2562 }
 0x91e   : > { %v8804_v60 = vsub.f32 %v8703_v23, %v2581_v37  ;;  %v2582_v19 = vmul.f32 0.0078125, %v2563_v0  ;;  %2637 = vadd.xlane.f32.xlu0 %v2611_v36  ;;  %v2612_v35 = vmul.f32 %v8799_v22, %v8799_v22 }
 0x91f   : > { %v2565_v14 = vpop.xlane.xlu0 %2564 }
 0x920   : > { %v8809_v45 = vsub.f32 %v8709_v33, %v2582_v19  ;;  %v2583_v26 = vmul.f32 0.0078125, %v2565_v14  ;;  %2639 = vadd.xlane.f32.xlu1 %v2612_v35  ;;  %v2613_v40 = vmul.f32 %v8804_v60, %v8804_v60 }
 0x921   : > { %v2567_v27 = vpop.xlane.xlu1 %2566 }
 0x922   : > { %v8814_v50 = vsub.f32 %v8713_v41, %v2583_v26  ;;  %v2584_v23 = vmul.f32 0.0078125, %v2567_v27  ;;  %2641 = vadd.xlane.f32.xlu0 %v2613_v40  ;;  %v2614_v12 = vmul.f32 %v8809_v45, %v8809_v45 }
 0x924   : > { %v8819_v4 = vsub.f32 %v8717_v59, %v2584_v23  ;;  %2643 = vadd.xlane.f32.xlu1 %v2614_v12  ;;  %v2615_v33 = vmul.f32 %v8814_v50, %v8814_v50 }
 0x926   : > { %2645 = vadd.xlane.f32.xlu0 %v2615_v33  ;;  %v2616_v46 = vmul.f32 %v8819_v4, %v8819_v4 }
 0x928   : > { %2647 = vadd.xlane.f32.xlu1 %v2616_v46 }
 0x96b   : > { %v2618_v15 = vpop.xlane.xlu0 %2617 }
 0x96c   : > { %v2649_v41 = vmul.f32 0.007874016, %v2618_v15 }
 0x96d   : > { %v2620_v39 = vpop.xlane.xlu1 %2619 }
 0x96e   : > { %7222 = vrsqrt.f32 %v2649_v41  ;;  %v2650_v10 = vmul.f32 0.007874016, %v2620_v39  ;;  %vm2667_vm1 = vcmp.eq.f32.partialorder %v2649_v41, inf  ;;  %v2670_v34 = vand.u32 2147483648, %v2649_v41 }
 0x96f   : > { %v2622_v11 = vpop.xlane.xlu0 %2621  ;;  %vm2669_vm2 = vcmp.eq.f32.partialorder %v2649_v41, 0.0 }
 0x970   : > { %v2651_v31 = vmul.f32 0.007874016, %v2622_v11  ;;  %7224 = vrsqrt.f32 %v2650_v10  ;;  %vm2674_vm3 = vcmp.eq.f32.partialorder %v2650_v10, inf  ;;  %vm2676_vm4 = vcmp.eq.f32.partialorder %v2650_v10, 0.0 }
 0x971   : > { %v2677_v28 = vand.u32 2147483648, %v2650_v10 }
 0x972   : > { %7226 = vrsqrt.f32 %v2651_v31  ;;  %vm2681_vm5 = vcmp.eq.f32.partialorder %v2651_v31, inf  ;;  %v2684_v17 = vand.u32 2147483648, %v2651_v31  ;;  %vm2683_vm6 = vcmp.eq.f32.partialorder %v2651_v31, 0.0 }
 0x973   : > { %v2624_v59 = vpop.xlane.xlu1 %2623 }
 0x974   : > { %v2652_v42 = vmul.f32 0.007874016, %v2624_v59 }
 0x976   : > { %7228 = vrsqrt.f32 %v2652_v42  ;;  %vm2688_vm7 = vcmp.eq.f32.partialorder %v2652_v42, inf  ;;  %v2691_v14 = vand.u32 2147483648, %v2652_v42  ;;  %vm2690_vm8 = vcmp.eq.f32.partialorder %v2652_v42, 0.0 }
 0x977   : > { %v2626_v13 = vpop.xlane.xlu0 %2625 }
 0x978   : > { %v7223_v48 = vpop.eup %7222  ;;  %v2653_v47 = vmul.f32 0.007874016, %v2626_v13  ;;  %v2628_v53 = vpop.xlane.xlu1 %2627 }
 0x979   : > { %v2666_v57 = vmul.f32 %v7223_v48, %v2649_v41  ;;  %v2654_v58 = vmul.f32 0.007874016, %v2628_v53 }
 0x97a   : > { %7230 = vrsqrt.f32 %v2653_v47  ;;  %v7225_v55 = vpop.eup %7224  ;;  %vm2695_vm9 = vcmp.eq.f32.partialorder %v2653_v47, inf  ;;  %vm2697_vm10 = vcmp.eq.f32.partialorder %v2653_v47, 0.0  ;;  %v2698_v46 = vand.u32 2147483648, %v2653_v47 }
 0x97b   : > { %v2668_v43 = vsel %vm2667_vm1, %v2649_v41, %v2666_v57  ;;  %7232 = vrsqrt.f32 %v2654_v58  ;;  %v2630_v56 = vpop.xlane.xlu0 %2629  ;;  %v2673_v49 = vmul.f32 %v7225_v55, %v2650_v10  ;;  %vm2702_vm11 = vcmp.eq.f32.partialorder %v2654_v58, inf }
 0x97c   : > { %v7227_v54 = vpop.eup %7226  ;;  %v2671_v30 = vsel %vm2669_vm2, %v2670_v34, %v2668_v43  ;;  %v8825_v25 = vmul.f32 0.007874016, %v2630_v56  ;;  %v2632_v61 = vpop.xlane.xlu1 %2631  ;;  %v2705_v39 = vand.u32 2147483648, %v2654_v58  ;;  %vm2704_vm12 = vcmp.eq.f32.partialorder %v2654_v58, 0.0 }
 0x97d   : > { %v2777_v24 = vadd.f32 1e-05, %v2671_v30  ;;  %v2680_v52 = vmul.f32 %v7227_v54, %v2651_v31  ;;  %v8827_v44 = vmul.f32 0.007874016, %v2632_v61  ;;  %v2675_v20 = vsel %vm2674_vm3, %v2650_v10, %v2673_v49 }
 0x97e   : > { %7234 = vrsqrt.f32 %v8825_v25  ;;  %v2678_v7 = vsel %vm2676_vm4, %v2677_v28, %v2675_v20  ;;  %vm2709_vm13 = vcmp.eq.f32.partialorder %v8825_v25, inf  ;;  %vm2711_vm14 = vcmp.eq.f32.partialorder %v8825_v25, 0.0  ;;  %v8856_v28 = vld [vmem:[%s10458_s17] ss:$0 sm:$0xff]  ;;  %s10485_s17 = scalar_lea.vmem %s10365_s12, %s7906_s1 }
 0x97f   : > { %7236 = vrcp.f32 %v2777_v24  ;;  %v2682_v1 = vsel %vm2681_vm5, %v2651_v31, %v2680_v52  ;;  %v2778_v36 = vadd.f32 1e-05, %v2678_v7  ;;  %v2712_v57 = vand.u32 2147483648, %v8825_v25 }
 0x980   : > { %v7229_v37 = vpop.eup %7228  ;;  %v2685_v0 = vsel %vm2683_vm6, %v2684_v17, %v2682_v1  ;;  %7238 = vrsqrt.f32 %v8827_v44  ;;  %vm2716_vm15 = vcmp.eq.f32.partialorder %v8827_v44, inf  ;;  %vm2718_vm1 = vcmp.eq.f32.partialorder %v8827_v44, 0.0 }
 0x981   : > { %v2779_v19 = vadd.f32 1e-05, %v2685_v0  ;;  %v2687_v35 = vmul.f32 %v7229_v37, %v2652_v42  ;;  %7240 = vrcp.f32 %v2778_v36  ;;  %v2719_v54 = vand.u32 2147483648, %v8827_v44 }
 0x983   : > { %7242 = vrcp.f32 %v2779_v19  ;;  %v2689_v26 = vsel %vm2688_vm7, %v2652_v42, %v2687_v35 }
 0x984   : > { %v7231_v40 = vpop.eup %7230  ;;  %v2692_v27 = vsel %vm2690_vm8, %v2691_v14, %v2689_v26 }
 0x985   : > { %v7233_v23 = vpop.eup %7232  ;;  %v2780_v12 = vadd.f32 1e-05, %v2692_v27  ;;  %v2694_v33 = vmul.f32 %v7231_v40, %v2653_v47 }
 0x986   : > { %v2701_v15 = vmul.f32 %v7233_v23, %v2654_v58 }
 0x987   : > { %7244 = vrcp.f32 %v2780_v12  ;;  %v2696_v41 = vsel %vm2695_vm9, %v2653_v47, %v2694_v33  ;;  %v8840_v47 = vld [vmem:[%s10457_s29] ss:$0 sm:$0xff]  ;;  %s10476_s29 = sld [smem:[#allocation38_spill]] }
 0x988   : > { %v7235_v10 = vpop.eup %7234  ;;  %v2703_v11 = vsel %vm2702_vm11, %v2654_v58, %v2701_v15  ;;  %v2699_v31 = vsel %vm2697_vm10, %v2698_v46, %v2696_v41 }
 0x989   : > { %v7237_v59 = vpop.eup %7236  ;;  %v2708_v42 = vmul.f32 %v7235_v10, %v8825_v25  ;;  %v2706_v13 = vsel %vm2704_vm12, %v2705_v39, %v2703_v11  ;;  %v2781_v48 = vadd.f32 1e-05, %v2699_v31 }
 0x98a   : > { %v7239_v53 = vpop.eup %7238  ;;  %v2794_v58 = vmul.f32 %v7237_v59, %v8722_v16  ;;  %v2782_v34 = vadd.f32 1e-05, %v2706_v13 }
 0x98b   : > { %v2710_v55 = vsel %vm2709_vm13, %v8825_v25, %v2708_v42  ;;  %v2715_v43 = vmul.f32 %v7239_v53, %v8827_v44  ;;  %7246 = vrcp.f32 %v2781_v48  ;;  %v7241_v56 = vpop.eup %7240 }
 0x98c   : > { %7248 = vrcp.f32 %v2782_v34  ;;  %v2713_v30 = vsel %vm2711_vm14, %v2712_v57, %v2710_v55  ;;  %v2796_v16 = vmul.f32 %v7241_v56, %v8725_v51  ;;  %v2831_v24 = vmul.f32 %v8840_v47, %v2794_v58 }
 0x98d   : > { %v7243_v49 = vpop.eup %7242  ;;  %v2717_v61 = vsel %vm2716_vm15, %v8827_v44, %v2715_v43  ;;  %v2783_v25 = vadd.f32 1e-05, %v2713_v30  ;;  %s10477_s15 = scalar_lea.vmem %s10476_s29, %s7906_s1  ;;  %s10494_s1 = sld [smem:[#allocation9_spill]] }
 0x98e   : > { %v2798_v52 = vmul.f32 %v7243_v49, %v8730_v38  ;;  %v2720_v20 = vsel %vm2718_vm1, %v2719_v54, %v2717_v61  ;;  %v2832_v17 = vmul.f32 %v8840_v47, %v2796_v16  ;;  %v8861_v44 = vadd.f32 %v8856_v28, %v2831_v24 }
 0x98f   : > { %v2784_v7 = vadd.f32 1e-05, %v2720_v20  ;;  %7250 = vrcp.f32 %v2783_v25 }
 0x990   : > { %v8864_v51 = vadd.f32 %v8856_v28, %v2832_v17  ;;  %v2833_v36 = vmul.f32 %v8840_v47, %v2798_v52 }
 0x991   : > { %v7245_v1 = vpop.eup %7244  ;;  %7252 = vrcp.f32 %v2784_v7 }
 0x992   : > { %v2800_v37 = vmul.f32 %v7245_v1, %v8737_v29  ;;  %v2901_v38 = vpack.c.bf16 %v8864_v51, %v8861_v44  ;;  %v8872_v14 = vadd.f32 %v8856_v28, %v2833_v36 }
 0x994   : > { %v2834_v0 = vmul.f32 %v8840_v47, %v2800_v37  ;;  %3119 = vmatmul.mubr.bf16.vlgmr.msra.gmra.mrb[48].mxu1 %v2901_v38  ;;  %6689 = vmatprep.mubr.bf16.mxu0 %v2901_v38 }
 0x995   : > { %v7247_v19 = vpop.eup %7246  ;;  %3128 = vmatprep.mubr.bf16.mxu1 %v10393_v18 }
 0x996   : > { %v7249_v35 = vpop.eup %7248  ;;  %v8875_v26 = vadd.f32 %v8856_v28, %v2834_v0  ;;  %v2802_v29 = vmul.f32 %v7247_v19, %v8742_v63 }
 0x997   : > { %v2804_v40 = vmul.f32 %v7249_v35, %v8745_v21 }
 0x998   : > { %v2902_v27 = vpack.c.bf16 %v8875_v26, %v8872_v14  ;;  %v2835_v23 = vmul.f32 %v8840_v47, %v2802_v29 }
 0x999   : > { %v7251_v12 = vpop.eup %7250  ;;  %v2836_v33 = vmul.f32 %v8840_v47, %v2804_v40 }
 0x99a   : > { %6690 = vmatmul.mubr.bf16.vlgmr.msra.gmra.mrb[80].mxu0 %v2902_v27  ;;  %v8885_v46 = vadd.f32 %v8856_v28, %v2835_v23  ;;  %v2806_v15 = vmul.f32 %v7251_v12, %v8752_v62 }
 0x99b   : > { %v7253_v41 = vpop.eup %7252  ;;  %v8889_v39 = vadd.f32 %v8856_v28, %v2836_v33 }
 0x99c   : > { %v2808_v63 = vmul.f32 %v7253_v41, %v8755_v9  ;;  %v2837_v21 = vmul.f32 %v8840_v47, %v2806_v15  ;;  %3129 = vmatmul.mubr.bf16.gmra.mrb[52].mxu1 %v2902_v27 }
 0x99d   : > { %v2903_v10 = vpack.c.bf16 %v8889_v39, %v8885_v46  ;;  %3138 = vmatprep.mubr.bf16.mxu1 %v10393_v18 }
 0x99e   : > { %v2838_v11 = vmul.f32 %v8840_v47, %v2808_v63  ;;  %v8898_v31 = vadd.f32 %v8856_v28, %v2837_v21 }
 0x99f   : > { %6693 = vmatprep.mubr.bf16.mxu0 %v2903_v10 }
 0x9a0   : > { %v8901_v62 = vadd.f32 %v8856_v28, %v2838_v11 }
 0x9a2   : > { %v2904_v9 = vpack.c.bf16 %v8901_v62, %v8898_v31 }
 0x9a4   : > { %6694 = vmatmul.mubr.bf16.gmra.mrb[84].mxu0 %v2904_v9  ;;  %3139 = vmatmul.mubr.bf16.gmra.mrb[56].mxu1 %v2903_v10 }
 0x9a5   : > { %3148 = vmatprep.mubr.bf16.mxu1 %v10393_v18 }
 0x9a7   : > { %v2634_v59 = vpop.xlane.xlu0 %2633 }
 0x9a8   : > { %v2657_v42 = vmul.f32 0.007874016, %v2634_v59 }
 0x9a9   : > { %v2636_v13 = vpop.xlane.xlu1 %2635 }
 0x9aa   : > { %7254 = vrsqrt.f32 %v2657_v42  ;;  %v2658_v48 = vmul.f32 0.007874016, %v2636_v13  ;;  %vm2723_vm2 = vcmp.eq.f32.partialorder %v2657_v42, inf  ;;  %v2726_v25 = vand.u32 2147483648, %v2657_v42 }
 0x9ab   : > { %v2638_v53 = vpop.xlane.xlu0 %2637  ;;  %vm2725_vm3 = vcmp.eq.f32.partialorder %v2657_v42, 0.0 }
 0x9ac   : > { %v2659_v57 = vmul.f32 0.007874016, %v2638_v53  ;;  %7256 = vrsqrt.f32 %v2658_v48  ;;  %3149 = vmatmul.mubr.bf16.gmra.mrb[60].mxu1 %v2904_v9  ;;  %vm2730_vm4 = vcmp.eq.f32.partialorder %v2658_v48, inf  ;;  %vm2732_vm5 = vcmp.eq.f32.partialorder %v2658_v48, 0.0 }
 0x9ad   : > { %v2640_v58 = vpop.xlane.xlu1 %2639  ;;  %3158 = vmatprep.mubr.bf16.mxu1 %v10393_v18  ;;  %v2733_v36 = vand.u32 2147483648, %v2658_v48 }
 0x9ae   : > { %7258 = vrsqrt.f32 %v2659_v57  ;;  %v2660_v34 = vmul.f32 0.007874016, %v2640_v58  ;;  %vm2737_vm6 = vcmp.eq.f32.partialorder %v2659_v57, inf  ;;  %v2740_v19 = vand.u32 2147483648, %v2659_v57 }
 0x9af   : > { %v2642_v55 = vpop.xlane.xlu0 %2641  ;;  %vm2739_vm7 = vcmp.eq.f32.partialorder %v2659_v57, 0.0 }
 0x9b0   : > { %v2661_v43 = vmul.f32 0.007874016, %v2642_v55  ;;  %7260 = vrsqrt.f32 %v2660_v34  ;;  %vm2744_vm8 = vcmp.eq.f32.partialorder %v2660_v34, inf  ;;  %vm2746_vm9 = vcmp.eq.f32.partialorder %v2660_v34, 0.0 }
 0x9b1   : > { %v2644_v56 = vpop.xlane.xlu1 %2643  ;;  %v2747_v41 = vand.u32 2147483648, %v2660_v34 }
 0x9b2   : > { %7262 = vrsqrt.f32 %v2661_v43  ;;  %v8907_v54 = vmul.f32 0.007874016, %v2644_v56  ;;  %vm2751_vm10 = vcmp.eq.f32.partialorder %v2661_v43, inf  ;;  %v2754_v11 = vand.u32 2147483648, %v2661_v43 }
 0x9b3   : > { %v2646_v30 = vpop.xlane.xlu0 %2645  ;;  %vm2753_vm11 = vcmp.eq.f32.partialorder %v2661_v43, 0.0 }
 0x9b4   : > { %v7255_v49 = vpop.eup %7254  ;;  %v8909_v61 = vmul.f32 0.007874016, %v2646_v30  ;;  %7264 = vrsqrt.f32 %v8907_v54  ;;  %vm2758_vm12 = vcmp.eq.f32.partialorder %v8907_v54, inf  ;;  %vm2760_vm13 = vcmp.eq.f32.partialorder %v8907_v54, 0.0 }
 0x9b5   : > { %v2722_v16 = vmul.f32 %v7255_v49, %v2657_v42  ;;  %v2648_v24 = vpop.xlane.xlu1 %2647  ;;  %v2761_v58 = vand.u32 2147483648, %v8907_v54 }
 0x9b6   : > { %7266 = vrsqrt.f32 %v8909_v61  ;;  %v7257_v52 = vpop.eup %7256  ;;  %v8913_v17 = vmul.f32 0.007874016, %v2648_v24  ;;  %vm2765_vm14 = vcmp.eq.f32.partialorder %v8909_v61, inf  ;;  %vm2767_vm15 = vcmp.eq.f32.partialorder %v8909_v61, 0.0 }
 0x9b7   : > { %v2724_v20 = vsel %vm2723_vm2, %v2657_v42, %v2722_v16  ;;  %v2729_v1 = vmul.f32 %v7257_v52, %v2658_v48 }
 0x9b8   : > { %v7259_v7 = vpop.eup %7258  ;;  %v2727_v37 = vsel %vm2725_vm3, %v2726_v25, %v2724_v20  ;;  %7268 = vrsqrt.f32 %v8913_v17  ;;  %vm2772_vm1 = vcmp.eq.f32.partialorder %v8913_v17, inf  ;;  %vm2774_vm2 = vcmp.eq.f32.partialorder %v8913_v17, 0.0 }
 0x9b9   : > { %v2736_v38 = vmul.f32 %v7259_v7, %v2659_v57  ;;  %v2731_v0 = vsel %vm2730_vm4, %v2658_v48, %v2729_v1  ;;  %v2785_v35 = vadd.f32 1e-05, %v2727_v37 }
 0x9ba   : > { %v7261_v29 = vpop.eup %7260  ;;  %v2734_v27 = vsel %vm2732_vm5, %v2733_v36, %v2731_v0 }
 0x9bb   : > { %v2738_v40 = vsel %vm2737_vm6, %v2659_v57, %v2736_v38  ;;  %v2743_v12 = vmul.f32 %v7261_v29, %v2660_v34  ;;  %v2786_v33 = vadd.f32 1e-05, %v2734_v27  ;;  %7270 = vrcp.f32 %v2785_v35 }
 0x9bc   : > { %v7263_v23 = vpop.eup %7262  ;;  %v2741_v15 = vsel %vm2739_vm7, %v2740_v19, %v2738_v40 }
 0x9bd   : > { %v2750_v63 = vmul.f32 %v7263_v23, %v2661_v43  ;;  %v2787_v21 = vadd.f32 1e-05, %v2741_v15  ;;  %v2745_v10 = vsel %vm2744_vm8, %v2660_v34, %v2743_v12  ;;  %7272 = vrcp.f32 %v2786_v33 }
 0x9be   : > { %v7265_v9 = vpop.eup %7264  ;;  %v2748_v42 = vsel %vm2746_vm9, %v2747_v41, %v2745_v10 }
 0x9bf   : > { %v2752_v59 = vsel %vm2751_vm10, %v2661_v43, %v2750_v63  ;;  %7274 = vrcp.f32 %v2787_v21  ;;  %v2757_v48 = vmul.f32 %v7265_v9, %v8907_v54  ;;  %v2788_v53 = vadd.f32 1e-05, %v2748_v42 }
 0x9c0   : > { %v7267_v13 = vpop.eup %7266  ;;  %v2755_v57 = vsel %vm2753_vm11, %v2754_v11, %v2752_v59  ;;  %v2768_v43 = vand.u32 2147483648, %v8909_v61 }
 0x9c1   : > { %v2764_v34 = vmul.f32 %v7267_v13, %v8909_v61  ;;  %v2789_v55 = vadd.f32 1e-05, %v2755_v57  ;;  %v2759_v56 = vsel %vm2758_vm12, %v8907_v54, %v2757_v48  ;;  %7276 = vrcp.f32 %v2788_v53 }
 0x9c2   : > { %v7269_v30 = vpop.eup %7268  ;;  %v2762_v16 = vsel %vm2760_vm13, %v2761_v58, %v2759_v56  ;;  %v2775_v54 = vand.u32 2147483648, %v8913_v17 }
 0x9c3   : > { %v2766_v49 = vsel %vm2765_vm14, %v8909_v61, %v2764_v34  ;;  %7278 = vrcp.f32 %v2789_v55  ;;  %v2771_v24 = vmul.f32 %v7269_v30, %v8913_v17  ;;  %v2790_v25 = vadd.f32 1e-05, %v2762_v16  ;;  %v2941_v55 = vld [vmem:[%s10463_s16] sm:$0x7] }
 0x9c4   : > { %v2769_v52 = vsel %vm2767_vm15, %v2768_v43, %v2766_v49  ;;  %v8987_v43 = vrot.slane %v2941_v55, %v8090_v5 }
 0x9c5   : > { %v2791_v20 = vadd.f32 1e-05, %v2769_v52  ;;  %v7271_v7 = vpop.eup %7270  ;;  %v2773_v1 = vsel %vm2772_vm1, %v8913_v17, %v2771_v24  ;;  %7280 = vrcp.f32 %v2790_v25 }
 0x9c6   : > { %v2810_v37 = vmul.f32 %v7271_v7, %v8786_v6  ;;  %v2776_v61 = vsel %vm2774_vm2, %v2775_v54, %v2773_v1  ;;  %v10467_v54 = vsub.s32 2, %v8083_v2 }
 0x9c7   : > { %7282 = vrcp.f32 %v2791_v20  ;;  %v7273_v36 = vpop.eup %7272  ;;  %v2792_v38 = vadd.f32 1e-05, %v2776_v61 }
 0x9c8   : > { %v2812_v19 = vmul.f32 %v7273_v36, %v8789_v32  ;;  %v2839_v35 = vmul.f32 %v8840_v47, %v2810_v37  ;;  %v8995_v20 = vrot.slane %v2941_v55, %v10467_v54 }
 0x9c9   : > { %v7275_v0 = vpop.eup %7274  ;;  %7284 = vrcp.f32 %v2792_v38 }
 0x9ca   : > { %v2814_v29 = vmul.f32 %v7275_v0, %v8794_v8  ;;  %v2840_v40 = vmul.f32 %v8840_v47, %v2812_v19  ;;  %v8938_v6 = vadd.f32 %v8856_v28, %v2839_v35 }
 0x9cb   : > { %v7277_v27 = vpop.eup %7276 }
 0x9cc   : > { %v2841_v17 = vmul.f32 %v8840_v47, %v2814_v29  ;;  %v8941_v12 = vadd.f32 %v8856_v28, %v2840_v40  ;;  %v2816_v33 = vmul.f32 %v7277_v27, %v8799_v22 }
 0x9cd   : > { %v7279_v23 = vpop.eup %7278 }
 0x9ce   : > { %10459 = vst [vmem:[#allocation23_spill] sm:$0xff] %v8941_v12  ;;  %v2818_v32 = vmul.f32 %v7279_v23, %v8804_v60  ;;  %v2905_v8 = vpack.c.bf16 %v8941_v12, %v8938_v6  ;;  %v2842_v15 = vmul.f32 %v8840_v47, %v2816_v33  ;;  %v8949_v63 = vadd.f32 %v8856_v28, %v2841_v17 }
 0x9cf   : > { %v7281_v41 = vpop.eup %7280 }
 0x9d0   : > { %10460 = vst [vmem:[#allocation24_spill] sm:$0xff] %v8949_v63  ;;  %3159 = vmatmul.mubr.bf16.gmra.mrb[64].mxu1 %v2905_v8  ;;  %6697 = vmatprep.mubr.bf16.mxu0 %v2905_v8  ;;  %v8952_v10 = vadd.f32 %v8856_v28, %v2842_v15  ;;  %v2820_v11 = vmul.f32 %v7281_v41, %v8809_v45 }
 0x9d1   : > { %v7283_v21 = vpop.eup %7282  ;;  %v2843_v22 = vmul.f32 %v8840_v47, %v2818_v32  ;;  %3168 = vmatprep.mubr.bf16.mxu1 %v10393_v18 }
 0x9d2   : > { %10461 = vst [vmem:[#allocation25_spill] sm:$0xff] %v8952_v10  ;;  %v2822_v60 = vmul.f32 %v7283_v21, %v8814_v50  ;;  %v2906_v9 = vpack.c.bf16 %v8952_v10, %v8949_v63  ;;  %v2844_v59 = vmul.f32 %v8840_v47, %v2820_v11 }
 0x9d3   : > { %v7285_v42 = vpop.eup %7284  ;;  %v8962_v13 = vadd.f32 %v8856_v28, %v2843_v22 }
 0x9d4   : > { %6698 = vmatmul.mubr.bf16.gmra.mrb[88].mxu0 %v2906_v9  ;;  %v8965_v48 = vadd.f32 %v8856_v28, %v2844_v59  ;;  %v2824_v45 = vmul.f32 %v7285_v42, %v8819_v4  ;;  %v2845_v53 = vmul.f32 %v8840_v47, %v2822_v60 }
 0x9d5   : > { %10462 = vst [vmem:[#allocation26_spill] sm:$0xff] %v8962_v13 }
 0x9d6   : > { %10464 = vst [vmem:[#allocation27_spill] sm:$0xff] %v8965_v48  ;;  %v2907_v50 = vpack.c.bf16 %v8965_v48, %v8962_v13  ;;  %v2846_v57 = vmul.f32 %v8840_v47, %v2824_v45  ;;  %v8973_v58 = vadd.f32 %v8856_v28, %v2845_v53  ;;  %v8984_v47 = vrot.slane %v2941_v55, %v8086_v3 }
 0x9d8   : > { %3169 = vmatmul.mubr.bf16.gmra.mrb[68].mxu1 %v2906_v9  ;;  %6701 = vmatprep.mubr.bf16.mxu0 %v2907_v50  ;;  %10465 = vst [vmem:[#allocation28_spill] sm:$0xff] %v8973_v58  ;;  %v8976_v34 = vadd.f32 %v8856_v28, %v2846_v57 }
 0x9d9   : > { %3178 = vmatprep.mubr.bf16.mxu1 %v10393_v18 }
 0x9da   : > { %10466 = vst [vmem:[#allocation29_spill] sm:$0xff] %v8976_v34  ;;  %v2908_v4 = vpack.c.bf16 %v8976_v34, %v8973_v58 }
 0x9dc   : > { %6702 = vmatmul.mubr.bf16.gmra.mrb[92].mxu0 %v2908_v4 }
 0x9e0   : > { %3179 = vmatmul.mubr.bf16.gmra.mrb[72].mxu1 %v2907_v50 }
 0x9e1   : > { %3188 = vmatprep.mubr.bf16.mxu1 %v10393_v18 }
 0x9e8   : > { %3189 = vmatmul.mubr.bf16.gmra.mrb[76].mxu1 %v2908_v4 }
 0xa67   : > { %v3120_v56 = vpop.f32.mrb[48].mxu1 }
 0xa68   : > { %v3122_v28 = vpop.f32.mrb[49].mxu1  ;;  %v3121_v49 = vadd.f32 %v3120_v56, %v8984_v47 }
 0xa69   : > { %v3124_v30 = vpop.f32.mrb[50].mxu1  ;;  %v3123_v25 = vadd.f32 %v3122_v28, %v8987_v43 }
 0xa6a   : > { %v3125_v16 = vadd.f32 %v3124_v30, %v8984_v47  ;;  %v3126_v24 = vpop.f32.mrb[51].mxu1 }
 0xa6b   : > { %v3127_v52 = vadd.f32 %v3126_v24, %v8987_v43 }
 0xa6c   : > { %v8997_v7 = vpack.c.bf16 %v3125_v16, %v3121_v49 }
 0xa6d   : > { %v6691_v1 = vpop.f32.mrb[80].mxu0  ;;  %v3297_v37 = vpack.c.bf16 %v3127_v52, %v3123_v25 }
 0xa6e   : > { %v3233_v61 = vpop.f32.mrb[81].mxu0  ;;  %6721 = vmatprep.mubr.msk.bf16.mxu1 %vm1409_vm0, %v8997_v7  ;;  %v3242_v38 = vadd.f32 %v6691_v1, %v8995_v20 }
 0xa6f   : > { %v6692_v36 = vpop.f32.mrb[82].mxu0  ;;  %3754 = vrot.lane.b32.xlu0 %v3297_v37, %s7719_s6  ;;  %v3130_v0 = vpop.f32.mrb[52].mxu1  ;;  %6881 = vmatprep.subr.msk.bf16.mxu1 %vm1409_vm0, %v3297_v37  ;;  %v3345_v35 = vsel %vm1409_vm0, %v3297_v37, 0  ;;  %v3234_v29 = vadd.f32 %v3233_v61, %v8995_v20 }
 0xa70   : > { %v3245_v19 = vadd.f32 %v6692_v36, %v8995_v20  ;;  %v3236_v2 = vpop.f32.mrb[83].mxu0  ;;  %v3132_v40 = vpop.f32.mrb[53].mxu1  ;;  %6706 = vmatpush3.bf16.xpose.msra.mxu1 %v3345_v35  ;;  %v3131_v33 = vadd.f32 %v3130_v0, %v8984_v47 }
 0xa71   : > { %v3237_v27 = vadd.f32 %v3236_v2, %v8995_v20  ;;  %v3134_v23 = vpop.f32.mrb[54].mxu1  ;;  %v3133_v41 = vadd.f32 %v3132_v40, %v8987_v43 }
 0xa72   : > { %v9008_v17 = vpack.c.bf16 %v3245_v19, %v3242_v38  ;;  %v3135_v8 = vadd.f32 %v3134_v23, %v8984_v47  ;;  %v3136_v15 = vpop.f32.mrb[55].mxu1 }
 0xa73   : > { %v9011_v32 = vpack.c.bf16 %v3237_v27, %v3234_v29  ;;  %v3137_v21 = vadd.f32 %v3136_v15, %v8987_v43 }
 0xa74   : > { %v9016_v11 = vpack.c.bf16 %v3135_v8, %v3131_v33 }
 0xa75   : > { %6737 = vmatprep.subr.bf16.mxu0 %v9011_v32  ;;  %v3300_v22 = vpack.c.bf16 %v3137_v21, %v3133_v41 }
 0xa76   : > { %6738 = vmatpush3.bf16.msra.mxu0 %v9011_v32 }
 0xa77   : > { %v6695_v60 = vpop.f32.mrb[84].mxu0  ;;  %6739 = vmatprep.subr.bf16.mxu0 %v9008_v17  ;;  %3756 = vrot.lane.b32.xlu1 %v3300_v22, %s7719_s6  ;;  %v3140_v9 = vpop.f32.mrb[56].mxu1  ;;  %v3348_v42 = vsel %vm1409_vm0, %v3300_v22, 0 }
 0xa78   : > { %v3249_v59 = vpop.f32.mrb[85].mxu0  ;;  %6882 = vmatprep.subr.msk.bf16.mxu1 %vm1409_vm0, %v3300_v22  ;;  %v3142_v45 = vpop.f32.mrb[57].mxu1  ;;  %v3258_v50 = vadd.f32 %v6695_v60, %v8995_v20  ;;  %v3141_v56 = vadd.f32 %v3140_v9, %v8984_v47 }
 0xa79   : > { %v6696_v53 = vpop.f32.mrb[86].mxu0  ;;  %6708 = vmatpush3.bf16.xpose.msra.mxu1 %v3348_v42  ;;  %v3144_v4 = vpop.f32.mrb[58].mxu1  ;;  %v3250_v28 = vadd.f32 %v3249_v59, %v8995_v20  ;;  %v3143_v24 = vadd.f32 %v3142_v45, %v8987_v43 }
 0xa7a   : > { %v3261_v57 = vadd.f32 %v6696_v53, %v8995_v20  ;;  %v3252_v55 = vpop.f32.mrb[87].mxu0  ;;  %6740 = vmatpush3.bf16.msra.mxu0 %v9008_v17  ;;  %v3145_v30 = vadd.f32 %v3144_v4, %v8984_v47  ;;  %v3146_v16 = vpop.f32.mrb[59].mxu1 }
 0xa7b   : > { %v3253_v49 = vadd.f32 %v3252_v55, %v8995_v20  ;;  %v3147_v52 = vadd.f32 %v3146_v16, %v8987_v43 }
 0xa7c   : > { %v9032_v25 = vpack.c.bf16 %v3261_v57, %v3258_v50  ;;  %v9035_v54 = vpack.c.bf16 %v3145_v30, %v3141_v56 }
 0xa7d   : > { %v9037_v1 = vpack.c.bf16 %v3253_v49, %v3250_v28  ;;  %v9039_v37 = vpack.c.bf16 %v3147_v52, %v3143_v24 }
 0xa7f   : > { %6741 = vmatprep.subr.bf16.mxu0 %v9037_v1  ;;  %v3150_v61 = vpop.f32.mrb[60].mxu1  ;;  %6883 = vmatprep.subr.msk.bf16.mxu1 %vm1409_vm0, %v9039_v37  ;;  %v3351_v36 = vsel %vm1409_vm0, %v9039_v37, 0 }
 0xa80   : > { %6742 = vmatpush3.bf16.msra.mxu0 %v9037_v1  ;;  %v3152_v38 = vpop.f32.mrb[61].mxu1  ;;  %v3151_v19 = vadd.f32 %v3150_v61, %v8984_v47 }
 0xa81   : > { %6710 = vmatpush3.bf16.xpose.msra.mxu1 %v3351_v36  ;;  %6743 = vmatprep.subr.bf16.mxu0 %v9032_v25  ;;  %v3154_v0 = vpop.f32.mrb[62].mxu1  ;;  %v3153_v29 = vadd.f32 %v3152_v38, %v8987_v43 }
 0xa82   : > { %v3155_v2 = vadd.f32 %v3154_v0, %v8984_v47  ;;  %v3156_v35 = vpop.f32.mrb[63].mxu1 }
 0xa83   : > { %v3157_v40 = vadd.f32 %v3156_v35, %v8987_v43 }
 0xa84   : > { %6744 = vmatpush3.bf16.msra.mxu0 %v9032_v25  ;;  %v9053_v27 = vpack.c.bf16 %v3155_v2, %v3151_v19 }
 0xa85   : > { %v9055_v23 = vpack.c.bf16 %v3157_v40, %v3153_v29 }
 0xa87   : > { %6884 = vmatprep.subr.msk.bf16.mxu1 %vm1409_vm0, %v9055_v23  ;;  %v3354_v33 = vsel %vm1409_vm0, %v9055_v23, 0 }
 0xa89   : > { %6712 = vmatpush3.bf16.xpose.msra.mxu1 %v3354_v33 }
 0xaa3   : > { %v3160_v8 = vpop.f32.mrb[64].mxu1 }
 0xaa4   : > { %v3162_v15 = vpop.f32.mrb[65].mxu1  ;;  %v3161_v21 = vadd.f32 %v3160_v8, %v8984_v47 }
 0xaa5   : > { %v3164_v41 = vpop.f32.mrb[66].mxu1  ;;  %v3163_v9 = vadd.f32 %v3162_v15, %v8987_v43 }
 0xaa6   : > { %v3165_v22 = vadd.f32 %v3164_v41, %v8984_v47  ;;  %v3166_v60 = vpop.f32.mrb[67].mxu1 }
 0xaa7   : > { %v3167_v59 = vadd.f32 %v3166_v60, %v8987_v43  ;;  %v6699_v42 = vpop.f32.mrb[88].mxu0 }
 0xaa8   : > { %v9065_v45 = vpack.c.bf16 %v3165_v22, %v3161_v21  ;;  %v3265_v53 = vpop.f32.mrb[89].mxu0  ;;  %v3274_v4 = vadd.f32 %v6699_v42, %v8995_v20 }
 0xaa9   : > { %v9067_v50 = vpack.c.bf16 %v3167_v59, %v3163_v9  ;;  %v6700_v57 = vpop.f32.mrb[90].mxu0  ;;  %v3266_v28 = vadd.f32 %v3265_v53, %v8995_v20 }
 0xaaa   : > { %v3277_v55 = vadd.f32 %v6700_v57, %v8995_v20  ;;  %v3268_v56 = vpop.f32.mrb[91].mxu0 }
 0xaab   : > { %v3269_v30 = vadd.f32 %v3268_v56, %v8995_v20  ;;  %v3170_v49 = vpop.f32.mrb[68].mxu1  ;;  %6885 = vmatprep.subr.msk.bf16.mxu1 %vm1409_vm0, %v9067_v50  ;;  %v3357_v16 = vsel %vm1409_vm0, %v9067_v50, 0 }
 0xaac   : > { %v9077_v24 = vpack.c.bf16 %v3277_v55, %v3274_v4  ;;  %v3172_v52 = vpop.f32.mrb[69].mxu1  ;;  %6714 = vmatpush3.bf16.xpose.msra.mxu1 %v3357_v16  ;;  %v3171_v38 = vadd.f32 %v3170_v49, %v8984_v47 }
 0xaad   : > { %v9079_v61 = vpack.c.bf16 %v3269_v30, %v3266_v28  ;;  %v3174_v36 = vpop.f32.mrb[70].mxu1  ;;  %v3173_v2 = vadd.f32 %v3172_v52, %v8987_v43 }
 0xaae   : > { %v3175_v0 = vadd.f32 %v3174_v36, %v8984_v47  ;;  %v3176_v19 = vpop.f32.mrb[71].mxu1 }
 0xaaf   : > { %v3177_v35 = vadd.f32 %v3176_v19, %v8987_v43  ;;  %v6703_v29 = vpop.f32.mrb[92].mxu0  ;;  %6745 = vmatprep.subr.bf16.mxu0 %v9079_v61 }
 0xab0   : > { %v9086_v40 = vpack.c.bf16 %v3175_v0, %v3171_v38  ;;  %v3281_v33 = vpop.f32.mrb[93].mxu0  ;;  %6746 = vmatpush3.bf16.msra.mxu0 %v9079_v61  ;;  %v3290_v41 = vadd.f32 %v6703_v29, %v8995_v20 }
 0xab1   : > { %v9089_v8 = vpack.c.bf16 %v3177_v35, %v3173_v2  ;;  %v6704_v15 = vpop.f32.mrb[94].mxu0  ;;  %6747 = vmatprep.subr.bf16.mxu0 %v9077_v24  ;;  %v3282_v60 = vadd.f32 %v3281_v33, %v8995_v20 }
 0xab2   : > { %v3293_v21 = vadd.f32 %v6704_v15, %v8995_v20  ;;  %v3284_v22 = vpop.f32.mrb[95].mxu0 }
 0xab3   : > { %v3285_v9 = vadd.f32 %v3284_v22, %v8995_v20  ;;  %v3180_v59 = vpop.f32.mrb[72].mxu1  ;;  %6886 = vmatprep.subr.msk.bf16.mxu1 %vm1409_vm0, %v9089_v8  ;;  %v3360_v42 = vsel %vm1409_vm0, %v9089_v8, 0 }
 0xab4   : > { %v9100_v53 = vpack.c.bf16 %v3293_v21, %v3290_v41  ;;  %v3182_v57 = vpop.f32.mrb[73].mxu1  ;;  %6716 = vmatpush3.bf16.xpose.msra.mxu1 %v3360_v42  ;;  %6748 = vmatpush3.bf16.msra.mxu0 %v9077_v24  ;;  %v3181_v56 = vadd.f32 %v3180_v59, %v8984_v47 }
 0xab5   : > { %v9103_v4 = vpack.c.bf16 %v3285_v9, %v3282_v60  ;;  %v3184_v55 = vpop.f32.mrb[74].mxu1  ;;  %v3183_v30 = vadd.f32 %v3182_v57, %v8987_v43  ;;  %v2872_v9 = vld [vmem:[%s10469_s8 + $0x18] sm:$0xff]  ;;  %v2869_v57 = vld [vmem:[%s10469_s8] sm:$0xff] }
 0xab6   : > { %v3185_v20 = vadd.f32 %v3184_v55, %v8984_v47  ;;  %v3186_v28 = vpop.f32.mrb[75].mxu1 }
 0xab7   : > { %v3187_v49 = vadd.f32 %v3186_v28, %v8987_v43  ;;  %6749 = vmatprep.subr.bf16.mxu0 %v9103_v4  ;;  %v2870_v28 = vld [vmem:[%s10469_s8 + $0x8] sm:$0xff] }
 0xab8   : > { %v9110_v16 = vpack.c.bf16 %v3185_v20, %v3181_v56  ;;  %6750 = vmatpush3.bf16.msra.mxu0 %v9103_v4 }
 0xab9   : > { %v9113_v52 = vpack.c.bf16 %v3187_v49, %v3183_v30  ;;  %6751 = vmatprep.subr.bf16.mxu0 %v9100_v53  ;;  %v2875_v49 = vld [vmem:[%s10469_s8 + $0x30] sm:$0xff] }
 0xabb   : > { %v3190_v36 = vpop.f32.mrb[76].mxu1  ;;  %6887 = vmatprep.subr.msk.bf16.mxu1 %vm1409_vm0, %v9113_v52  ;;  %v3363_v38 = vsel %vm1409_vm0, %v9113_v52, 0 }
 0xabc   : > { %v3192_v0 = vpop.f32.mrb[77].mxu1  ;;  %6718 = vmatpush3.bf16.xpose.msra.mxu1 %v3363_v38  ;;  %6752 = vmatpush3.bf16.msra.mxu0 %v9100_v53  ;;  %v3191_v2 = vadd.f32 %v3190_v36, %v8984_v47 }
 0xabd   : > { %v3194_v19 = vpop.f32.mrb[78].mxu1  ;;  %v3193_v33 = vadd.f32 %v3192_v0, %v8987_v43  ;;  %v2876_v0 = vld [vmem:[%s10469_s8 + $0x38] sm:$0xff] }
 0xabe   : > { %v3195_v35 = vadd.f32 %v3194_v19, %v8984_v47  ;;  %v3196_v29 = vpop.f32.mrb[79].mxu1 }
 0xabf   : > { %v3197_v15 = vadd.f32 %v3196_v29, %v8987_v43  ;;  %v2871_v43 = vld [vmem:[%s10468_s23 + $0x10] sm:$0xff] }
 0xac0   : > { %v9125_v41 = vpack.c.bf16 %v3195_v35, %v3191_v2  ;;  %v2873_v35 = vld [vmem:[%s10469_s8 + $0x20] sm:$0xff] }
 0xac1   : > { %v9127_v21 = vpack.c.bf16 %v3197_v15, %v3193_v33 }
 0xac3   : > { %6888 = vmatprep.subr.msk.bf16.mxu1 %vm1409_vm0, %v9127_v21  ;;  %v3366_v22 = vsel %vm1409_vm0, %v9127_v21, 0 }
 0xac4   : > { %6720 = vmatpush3.bf16.xpose.msra.mxu1 %v3366_v22  ;;  %v2874_v22 = vld [vmem:[%s10469_s8 + $0x28] sm:$0xff] }
 0xacb   : > { %6722 = vmatmul.mubr.msk.bf16.vlgmr.msra.gmra.mrb[80].mxu1 %vm1409_vm0, %v9016_v11 }
 0xacc   : > { %6725 = vmatprep.mubr.msk.bf16.mxu1 %vm1409_vm0, %v9035_v54 }
 0xad3   : > { %6726 = vmatmul.mubr.msk.bf16.gmra.mrb[84].mxu1 %vm1409_vm0, %v9053_v27 }
 0xad4   : > { %6729 = vmatprep.mubr.msk.bf16.mxu1 %vm1409_vm0, %v9065_v45 }
 0xadb   : > { %6730 = vmatmul.mubr.msk.bf16.gmra.mrb[88].mxu1 %vm1409_vm0, %v9086_v40 }
 0xadc   : > { %6733 = vmatprep.mubr.msk.bf16.mxu1 %vm1409_vm0, %v9110_v16 }
 0xae1   : > { %v9145_v47 = vpop.permute.xlu0 %3754 }
 0xae2   : > { %6889 = vmatprep.subr.msk.bf16.mxu0 %vm1409_vm0, %v9145_v47 }
 0xae3   : > { %6734 = vmatmul.mubr.msk.bf16.gmra.mrb[92].mxu1 %vm1409_vm0, %v9125_v41 }
 0xb9e   : > { %v6723_v60 = vpop.f32.mrb[80].mxu1 }
 0xb9f   : > { %v9157_v59 = vadd.f32 %v6723_v60, %v2871_v43  ;;  %v3402_v42 = vpop.f32.mrb[81].mxu1  ;;  %v2879_v60 = vld [vmem:[%s10469_s8 + $0x50] sm:$0xff] }
 0xba0   : > { %v6724_v55 = vpop.f32.mrb[82].mxu1  ;;  %v9168_v30 = vadd.f32 %v3402_v42, %v2869_v57  ;;  %v2880_v57 = vld [vmem:[%s10469_s8 + $0x58] sm:$0xff] }
 0xba1   : > { %v9162_v56 = vadd.f32 %v6724_v55, %v2872_v9  ;;  %3469 = vmax.xlane.f32.xlu0 %v9157_v59  ;;  %v3405_v20 = vpop.f32.mrb[83].mxu1 }
 0xba2   : > { %v9174_v36 = vadd.f32 %v3405_v20, %v2870_v28  ;;  %v2877_v28 = vld [vmem:[%s10469_s8 + $0x40] sm:$0xff] }
 0xba3   : > { %3471 = vmax.xlane.f32.xlu1 %v9162_v56 }
 0xba5   : > { %3465 = vmax.xlane.f32.xlu0 %v9168_v30 }
 0xba6   : > { %v6727_v38 = vpop.f32.mrb[84].mxu1 }
 0xba7   : > { %v9180_v19 = vadd.f32 %v6727_v38, %v2875_v49  ;;  %v3418_v2 = vpop.f32.mrb[85].mxu1  ;;  %3467 = vmax.xlane.f32.xlu1 %v9174_v36 }
 0xba8   : > { %v6728_v29 = vpop.f32.mrb[86].mxu1  ;;  %v9192_v43 = vadd.f32 %v3418_v2, %v2873_v35  ;;  %v2878_v2 = vld [vmem:[%s10469_s8 + $0x48] sm:$0xff] }
 0xba9   : > { %v9186_v33 = vadd.f32 %v6728_v29, %v2876_v0  ;;  %v3421_v15 = vpop.f32.mrb[87].mxu1  ;;  %3477 = vmax.xlane.f32.xlu0 %v9180_v19  ;;  %v2883_v29 = vld [vmem:[%s10469_s8 + $0x70] sm:$0xff] }
 0xbaa   : > { %v9198_v9 = vadd.f32 %v3421_v15, %v2874_v22 }
 0xbab   : > { %3479 = vmax.xlane.f32.xlu1 %v9186_v33 }
 0xbad   : > { %3473 = vmax.xlane.f32.xlu0 %v9192_v43 }
 0xbae   : > { %v6731_v42 = vpop.f32.mrb[88].mxu1 }
 0xbaf   : > { %v9204_v55 = vadd.f32 %v6731_v42, %v2879_v60  ;;  %v3434_v20 = vpop.f32.mrb[89].mxu1  ;;  %3475 = vmax.xlane.f32.xlu1 %v9198_v9 }
 0xbb0   : > { %v6732_v49 = vpop.f32.mrb[90].mxu1  ;;  %v9216_v35 = vadd.f32 %v3434_v20, %v2877_v28 }
 0xbb1   : > { %v9210_v38 = vadd.f32 %v6732_v49, %v2880_v57  ;;  %v3437_v0 = vpop.f32.mrb[91].mxu1  ;;  %3485 = vmax.xlane.f32.xlu0 %v9204_v55  ;;  %v2881_v57 = vld [vmem:[%s10469_s8 + $0x60] sm:$0xff] }
 0xbb2   : > { %v9222_v15 = vadd.f32 %v3437_v0, %v2878_v2  ;;  %v2884_v0 = vld [vmem:[%s10469_s8 + $0x78] sm:$0xff] }
 0xbb3   : > { %3487 = vmax.xlane.f32.xlu1 %v9210_v38 }
 0xbb5   : > { %3481 = vmax.xlane.f32.xlu0 %v9216_v35 }
 0xbb6   : > { %v6735_v22 = vpop.f32.mrb[92].mxu1 }
 0xbb7   : > { %v9225_v60 = vadd.f32 %v6735_v22, %v2883_v29  ;;  %3483 = vmax.xlane.f32.xlu1 %v9222_v15  ;;  %v3450_v42 = vpop.f32.mrb[93].mxu1  ;;  %v2882_v29 = vld [vmem:[%s10469_s8 + $0x68] sm:$0xff] }
 0xbb8   : > { %v6736_v20 = vpop.f32.mrb[94].mxu1  ;;  %v9232_v49 = vadd.f32 %v3450_v42, %v2881_v57 }
 0xbb9   : > { %3493 = vmax.xlane.f32.xlu0 %v9225_v60  ;;  %v3453_v28 = vpop.f32.mrb[95].mxu1  ;;  %v9242_v2 = vadd.f32 %v6736_v20, %v2884_v0 }
 0xbba   : > { %v9248_v22 = vadd.f32 %v3453_v28, %v2882_v29 }
 0xbbd   : > { %3489 = vmax.xlane.f32.xlu0 %v9232_v49 }
 0xbc8   : > { %3760 = vrot.lane.b32.xlu1 %v9055_v23, %s7719_s6  ;;  %v9251_v23 = vpop.permute.xlu1 %3756 }
 0xbd3   : > { %3758 = vrot.lane.b32.xlu0 %v9039_v37, %s7719_s6 }
 0xbec   : > { %3495 = vmax.xlane.f32.xlu1 %v9242_v2 }
 0xbf0   : > { %3491 = vmax.xlane.f32.xlu1 %v9248_v22 }
 0xc2e   : > { %v3470_v42 = vpop.xlane.xlu0 %3469 }
 0xc2f   : > { %v3499_v37 = vsub.f32 %v9157_v59, %v3470_v42 }
 0xc30   : > { %v3472_v57 = vpop.xlane.xlu1 %3471 }
 0xc31   : > { %v3517_v18 = vmul.f32 1.442695, %v3499_v37  ;;  %v3500_v20 = vsub.f32 %v9162_v56, %v3472_v57 }
 0xc32   : > { %v3466_v0 = vpop.xlane.xlu0 %3465 }
 0xc33   : > { %7286 = vpow2.f32 %v3517_v18  ;;  %v3519_v5 = vmul.f32 1.442695, %v3500_v20  ;;  %v3497_v3 = vsub.f32 %v9168_v30, %v3466_v0 }
 0xc34   : > { %v3468_v34 = vpop.xlane.xlu1 %3467 }
 0xc35   : > { %7288 = vpow2.f32 %v3519_v5  ;;  %v3513_v28 = vmul.f32 1.442695, %v3497_v3  ;;  %v3498_v29 = vsub.f32 %v9174_v36, %v3468_v34 }
 0xc36   : > { %v3478_v3 = vpop.xlane.xlu0 %3477 }
 0xc37   : > { %7290 = vpow2.f32 %v3513_v28  ;;  %v3515_v58 = vmul.f32 1.442695, %v3498_v29  ;;  %v3503_v42 = vsub.f32 %v9180_v19, %v3478_v3 }
 0xc38   : > { %v3480_v34 = vpop.xlane.xlu1 %3479 }
 0xc39   : > { %7292 = vpow2.f32 %v3515_v58  ;;  %v3525_v20 = vmul.f32 1.442695, %v3503_v42  ;;  %v3504_v29 = vsub.f32 %v9186_v33, %v3480_v34 }
 0xc3a   : > { %v3474_v5 = vpop.xlane.xlu0 %3473 }
 0xc3b   : > { %v3501_v37 = vsub.f32 %v9192_v43, %v3474_v5  ;;  %7294 = vpow2.f32 %v3525_v20  ;;  %v3527_v63 = vmul.f32 1.442695, %v3504_v29 }
 0xc3c   : > { %v3476_v36 = vpop.xlane.xlu1 %3475 }
 0xc3d   : > { %v9257_v48 = vpop.eup %7286  ;;  %v3502_v0 = vsub.f32 %v9198_v9, %v3476_v36  ;;  %v3521_v13 = vmul.f32 1.442695, %v3501_v37 }
 0xc3e   : > { %3549 = vadd.xlane.f32.xlu0 %v9257_v48  ;;  %v3486_v58 = vpop.xlane.xlu0 %3485 }
 0xc3f   : > { %v9260_v59 = vpop.eup %7288  ;;  %7296 = vpow2.f32 %v3521_v13  ;;  %v3507_v12 = vsub.f32 %v9204_v55, %v3486_v58 }
 0xc40   : > { %3551 = vadd.xlane.f32.xlu1 %v9260_v59  ;;  %v3488_v28 = vpop.xlane.xlu1 %3487 }
 0xc41   : > { %v9263_v18 = vpop.eup %7290  ;;  %v3533_v9 = vmul.f32 1.442695, %v3507_v12  ;;  %v3508_v34 = vsub.f32 %v9210_v38, %v3488_v28 }
 0xc42   : > { %3545 = vadd.xlane.f32.xlu0 %v9263_v18  ;;  %v3482_v30 = vpop.xlane.xlu0 %3481 }
 0xc43   : > { %v9266_v56 = vpop.eup %7292  ;;  %v3505_v5 = vsub.f32 %v9216_v35, %v3482_v30 }
 0xc44   : > { %3547 = vadd.xlane.f32.xlu1 %v9266_v56  ;;  %v3484_v19 = vpop.xlane.xlu1 %3483 }
 0xc45   : > { %v3529_v13 = vmul.f32 1.442695, %v3505_v5  ;;  %v3506_v38 = vsub.f32 %v9222_v15, %v3484_v19  ;;  %v3795_v19 = vsel %vm1409_vm0, %v9145_v47, 0 }
 0xc46   : > { %v3494_v57 = vpop.xlane.xlu0 %3493 }
 0xc47   : > { %v3531_v37 = vmul.f32 1.442695, %v3506_v38 }
 0xc48   : > { %v9282_v36 = vpop.permute.xlu1 %3760 }
 0xc4a   : > { %v3490_v10 = vpop.xlane.xlu0 %3489 }
 0xc4b   : > { %v3509_v3 = vsub.f32 %v9232_v49, %v3490_v10  ;;  %v3535_v10 = vmul.f32 1.442695, %v3508_v34 }
 0xc4d   : > { %v3537_v33 = vmul.f32 1.442695, %v3509_v3 }
 0xc55   : > { %3764 = vrot.lane.b32.xlu1 %v9089_v8, %s7719_s6  ;;  %v3523_v8 = vmul.f32 1.442695, %v3502_v0 }
 0xc57   : > { %7298 = vpow2.f32 %v3523_v8 }
 0xc58   : > { %3762 = vrot.lane.b32.xlu0 %v9067_v50, %s7719_s6  ;;  %v3511_v50 = vsub.f32 %v9225_v60, %v3494_v57  ;;  %7300 = vpow2.f32 %v3527_v63  ;;  %v9284_v60 = vpop.eup %7294 }
 0xc59   : > { %v9287_v55 = vpop.eup %7296 }
 0xc5a   : > { %v3541_v43 = vmul.f32 1.442695, %v3511_v50 }
 0xc5c   : > { %7302 = vpow2.f32 %v3541_v43 }
 0xc5d   : > { %7304 = vpow2.f32 %v3533_v9 }
 0xc5e   : > { %7306 = vpow2.f32 %v3537_v33 }
 0xc5f   : > { %7308 = vpow2.f32 %v3529_v13 }
 0xc60   : > { %7310 = vpow2.f32 %v3535_v10 }
 0xc61   : > { %v9290_v63 = vpop.eup %7298 }
 0xc62   : > { %v9295_v49 = vpop.eup %7300 }
 0xc66   : > { %v9298_v42 = vpop.eup %7302 }
 0xc67   : > { %v9302_v15 = vpop.eup %7304 }
 0xc77   : > { %3557 = vadd.xlane.f32.xlu0 %v9284_v60 }
 0xc79   : > { %3553 = vadd.xlane.f32.xlu1 %v9287_v55  ;;  %v3496_v12 = vpop.xlane.xlu1 %3495 }
 0xc7a   : > { %v3512_v35 = vsub.f32 %v9242_v2, %v3496_v12  ;;  %v9305_v2 = vpop.eup %7306 }
 0xc7b   : > { %3555 = vadd.xlane.f32.xlu0 %v9290_v63  ;;  %v9308_v0 = vpop.eup %7308 }
 0xc7c   : > { %v3543_v58 = vmul.f32 1.442695, %v3512_v35  ;;  %v9311_v28 = vpop.eup %7310 }
 0xc7d   : > { %3559 = vadd.xlane.f32.xlu1 %v9295_v49  ;;  %v3492_v30 = vpop.xlane.xlu1 %3491 }
 0xc7e   : > { %7312 = vpow2.f32 %v3543_v58  ;;  %v3510_v57 = vsub.f32 %v9248_v22, %v3492_v30 }
 0xc7f   : > { %3573 = vadd.xlane.f32.xlu0 %v9298_v42  ;;  %7314 = vpow2.f32 %v3531_v37 }
 0xc80   : > { %v3539_v20 = vmul.f32 1.442695, %v3510_v57 }
 0xc81   : > { %3565 = vadd.xlane.f32.xlu1 %v9302_v15 }
 0xc82   : > { %7316 = vpow2.f32 %v3539_v20 }
 0xc83   : > { %3569 = vadd.xlane.f32.xlu0 %v9305_v2 }
 0xc85   : > { %3561 = vadd.xlane.f32.xlu1 %v9308_v0 }
 0xc88   : > { %v9313_v22 = vpop.eup %7312 }
 0xc89   : > { %3567 = vadd.xlane.f32.xlu1 %v9311_v28  ;;  %3575 = vadd.xlane.f32.xlu0 %v9313_v22  ;;  %v9317_v29 = vpop.eup %7314 }
 0xc8c   : > { %v9320_v8 = vpop.eup %7316 }
 0xc8d   : > { %3563 = vadd.xlane.f32.xlu1 %v9317_v29 }
 0xc91   : > { %3571 = vadd.xlane.f32.xlu1 %v9320_v8 }
 0xc9f   : > { %3766 = vrot.lane.b32.xlu0 %v9113_v52, %s7719_s6 }
 0xca2   : > { %3768 = vrot.lane.b32.xlu1 %v9127_v21, %s7719_s6 }
 0xca3   : > { %3730 = vrot.lane.b32.xlu0 %v8997_v7, %s7719_s6  ;;  %v3759_v7 = vpop.permute.xlu0 %3758 }
 0xca6   : > { %3732 = vrot.lane.b32.xlu1 %v9016_v11, %s7719_s6 }
 0xca7   : > { %3734 = vrot.lane.b32.xlu0 %v9035_v54, %s7719_s6 }
 0xcaa   : > { %3736 = vrot.lane.b32.xlu1 %v9053_v27, %s7719_s6 }
 0xcab   : > { %3738 = vrot.lane.b32.xlu0 %v9065_v45, %s7719_s6 }
 0xcae   : > { %3740 = vrot.lane.b32.xlu1 %v9086_v40, %s7719_s6 }
 0xcaf   : > { %3742 = vrot.lane.b32.xlu0 %v9110_v16, %s7719_s6 }
 0xcb2   : > { %3744 = vrot.lane.b32.xlu1 %v9125_v41, %s7719_s6 }
 0xcb3   : > { %4075 = vrot.lane.b32.xlu0 %v9011_v32, %s7719_s6 }
 0xcb6   : > { %4077 = vrot.lane.b32.xlu1 %v9008_v17, %s7719_s6 }
 0xcb7   : > { %4079 = vrot.lane.b32.xlu0 %v9037_v1, %s7719_s6 }
 0xcbb   : > { %4081 = vrot.lane.b32.xlu0 %v9032_v25, %s7719_s6 }
 0xccb   : > { %v3550_v11 = vpop.xlane.xlu0 %3549 }
 0xccd   : > { %v3552_v54 = vpop.xlane.xlu1 %3551 }
 0xcce   : > { %7318 = vrcp.f32 %v3552_v54 }
 0xccf   : > { %v3546_v27 = vpop.xlane.xlu0 %3545 }
 0xcd0   : > { %7320 = vrcp.f32 %v3546_v27 }
 0xcd1   : > { %7322 = vrcp.f32 %v3550_v11  ;;  %v3548_v45 = vpop.xlane.xlu1 %3547 }
 0xcd2   : > { %7324 = vrcp.f32 %v3548_v45 }
 0xcd3   : > { %v3763_v47 = vpop.permute.xlu0 %3762 }
 0xcd4   : > { %v3807_v43 = vsel %vm1409_vm0, %v3763_v47, 0 }
 0xcd8   : > { %v7319_v40 = vpop.eup %7318 }
 0xcd9   : > { %v3596_v17 = vmul.f32 %v7319_v40, %v9260_v59  ;;  %v3798_v59 = vsel %vm1409_vm0, %v9251_v23, 0 }
 0xcda   : > { %v7321_v32 = vpop.eup %7320 }
 0xcdb   : > { %v7323_v16 = vpop.eup %7322  ;;  %v3593_v1 = vmul.f32 %v7321_v32, %v9263_v18  ;;  %v3801_v18 = vsel %vm1409_vm0, %v3759_v7, 0 }
 0xcdc   : > { %v7325_v52 = vpop.eup %7324  ;;  %v3595_v25 = vmul.f32 %v7323_v16, %v9257_v48  ;;  %v3804_v48 = vsel %vm1409_vm0, %v9282_v36, 0 }
 0xcdd   : > { %v3594_v41 = vmul.f32 %v7325_v52, %v9266_v56  ;;  %v3765_v56 = vpop.permute.xlu1 %3764 }
 0xcde   : > { %v3610_v50 = vpack.c.bf16 %v3596_v17, %v3595_v25  ;;  %v3810_v5 = vsel %vm1409_vm0, %v3765_v56, 0 }
 0xcdf   : > { %v3609_v21 = vpack.c.bf16 %v3594_v41, %v3593_v1 }
 0xce1   : > { %6753 = vmatprep.mubr.bf16.mxu0 %v3609_v21 }
 0xce2   : > { %6754 = vmatmul.mubr.bf16.vlgmr.msra.gmra.mrb[96].mxu0 %v3610_v50 }
 0xce3   : > { %6770 = vmatpush3.bf16.xpose.msra.mxu0 %v3795_v19 }
 0xce4   : > { %6890 = vmatprep.subr.msk.bf16.mxu0 %vm1409_vm0, %v9251_v23 }
 0xceb   : > { %6772 = vmatpush3.bf16.xpose.msra.mxu0 %v3798_v59 }
 0xcec   : > { %6891 = vmatprep.subr.msk.bf16.mxu0 %vm1409_vm0, %v3759_v7 }
 0xcf3   : > { %6774 = vmatpush3.bf16.xpose.msra.mxu0 %v3801_v18 }
 0xcf4   : > { %6892 = vmatprep.subr.msk.bf16.mxu0 %vm1409_vm0, %v9282_v36 }
 0xcfb   : > { %6776 = vmatpush3.bf16.xpose.msra.mxu0 %v3804_v48 }
 0xcfc   : > { %6893 = vmatprep.subr.msk.bf16.mxu0 %vm1409_vm0, %v3763_v47 }
 0xd03   : > { %6778 = vmatpush3.bf16.xpose.msra.mxu0 %v3807_v43 }
 0xd04   : > { %6894 = vmatprep.subr.msk.bf16.mxu0 %vm1409_vm0, %v3765_v56  ;;  %v3558_v23 = vpop.xlane.xlu0 %3557 }
 0xd06   : > { %v3554_v3 = vpop.xlane.xlu1 %3553 }
 0xd07   : > { %7326 = vrcp.f32 %v3554_v3 }
 0xd08   : > { %7328 = vrcp.f32 %v3558_v23  ;;  %v3556_v9 = vpop.xlane.xlu0 %3555 }
 0xd09   : > { %7330 = vrcp.f32 %v3556_v9 }
 0xd0a   : > { %v3560_v33 = vpop.xlane.xlu1 %3559 }
 0xd0b   : > { %6780 = vmatpush3.bf16.xpose.msra.mxu0 %v3810_v5  ;;  %7332 = vrcp.f32 %v3560_v33 }
 0xd0c   : > { %v3574_v34 = vpop.xlane.xlu0 %3573 }
 0xd0e   : > { %v3566_v36 = vpop.xlane.xlu1 %3565 }
 0xd10   : > { %v3570_v12 = vpop.xlane.xlu0 %3569 }
 0xd11   : > { %v7327_v13 = vpop.eup %7326 }
 0xd12   : > { %v7329_v10 = vpop.eup %7328  ;;  %v3562_v38 = vpop.xlane.xlu1 %3561  ;;  %v3597_v58 = vmul.f32 %v7327_v13, %v9287_v55 }
 0xd13   : > { %v7331_v35 = vpop.eup %7330  ;;  %v3599_v11 = vmul.f32 %v7329_v10, %v9284_v60 }
 0xd14   : > { %v3598_v30 = vmul.f32 %v7331_v35, %v9290_v63 }
 0xd15   : > { %v7333_v37 = vpop.eup %7332 }
 0xd16   : > { %v3576_v57 = vpop.xlane.xlu0 %3575  ;;  %v3568_v20 = vpop.xlane.xlu1 %3567  ;;  %v3611_v7 = vpack.c.bf16 %v3598_v30, %v3597_v58  ;;  %v3600_v54 = vmul.f32 %v7333_v37, %v9295_v49 }
 0xd17   : > { %7334 = vrcp.f32 %v3568_v20 }
 0xd18   : > { %6757 = vmatprep.mubr.bf16.mxu0 %v3611_v7  ;;  %v3612_v27 = vpack.c.bf16 %v3600_v54, %v3599_v11  ;;  %7336 = vrcp.f32 %v3562_v38 }
 0xd19   : > { %7338 = vrcp.f32 %v3566_v36 }
 0xd1a   : > { %v3767_v45 = vpop.permute.xlu0 %3766  ;;  %6758 = vmatmul.mubr.bf16.gmra.mrb[100].mxu0 %v3612_v27  ;;  %v3564_v40 = vpop.xlane.xlu1 %3563 }
 0xd1b   : > { %7340 = vrcp.f32 %v3564_v40  ;;  %6895 = vmatprep.subr.msk.bf16.mxu0 %vm1409_vm0, %v3767_v45  ;;  %v3813_v55 = vsel %vm1409_vm0, %v3767_v45, 0 }
 0xd1c   : > { %6782 = vmatpush3.bf16.xpose.msra.mxu0 %v3813_v55  ;;  %7342 = vrcp.f32 %v3570_v12 }
 0xd1e   : > { %v3731_v63 = vpop.permute.xlu0 %3730  ;;  %v3572_v32 = vpop.xlane.xlu1 %3571 }
 0xd1f   : > { %7344 = vrcp.f32 %v3572_v32 }
 0xd20   : > { %7346 = vrcp.f32 %v3576_v57 }
 0xd21   : > { %v7335_v60 = vpop.eup %7334  ;;  %7348 = vrcp.f32 %v3574_v34 }
 0xd22   : > { %v3735_v49 = vpop.permute.xlu0 %3734  ;;  %v3769_v16 = vpop.permute.xlu1 %3768  ;;  %v3604_v25 = vmul.f32 %v7335_v60, %v9311_v28 }
 0xd23   : > { %v7337_v52 = vpop.eup %7336  ;;  %6896 = vmatprep.subr.msk.bf16.mxu0 %vm1409_vm0, %v3769_v16  ;;  %v3816_v17 = vsel %vm1409_vm0, %v3769_v16, 0 }
 0xd24   : > { %v7339_v1 = vpop.eup %7338  ;;  %6784 = vmatpush3.bf16.xpose.msra.mxu0 %v3816_v17  ;;  %v3601_v19 = vmul.f32 %v7337_v52, %v9308_v0 }
 0xd25   : > { %v7341_v41 = vpop.eup %7340  ;;  %v3603_v48 = vmul.f32 %v7339_v1, %v9302_v15 }
 0xd26   : > { %v3739_v21 = vpop.permute.xlu0 %3738  ;;  %v3733_v50 = vpop.permute.xlu1 %3732  ;;  %v3602_v59 = vmul.f32 %v7341_v41, %v9317_v29 }
 0xd27   : > { %v7343_v18 = vpop.eup %7342  ;;  %v3614_v43 = vpack.c.bf16 %v3604_v25, %v3603_v48  ;;  %v2887_v25 = vld [vmem:[%s10469_s8 + $0x90] sm:$0xff] }
 0xd28   : > { %v3613_v47 = vpack.c.bf16 %v3602_v59, %v3601_v19  ;;  %v3605_v5 = vmul.f32 %v7343_v18, %v9305_v2  ;;  %v2886_v59 = vld [vmem:[%s10469_s8 + $0x88] sm:$0xff]  ;;  %v2885_v18 = vld [vmem:[%s10469_s8 + $0x80] sm:$0xff] }
 0xd29   : > { %v7345_v56 = vpop.eup %7344 }
 0xd2a   : > { %v7347_v23 = vpop.eup %7346  ;;  %v3743_v3 = vpop.permute.xlu0 %3742  ;;  %6761 = vmatprep.mubr.bf16.mxu0 %v3613_v47  ;;  %v3606_v28 = vmul.f32 %v7345_v56, %v9320_v8 }
 0xd2b   : > { %v3737_v9 = vpop.permute.xlu1 %3736  ;;  %6762 = vmatmul.mubr.bf16.gmra.mrb[104].mxu0 %v3614_v43  ;;  %v7349_v33 = vpop.eup %7348  ;;  %v3608_v0 = vmul.f32 %v7347_v23, %v9313_v22  ;;  %v2888_v23 = vld [vmem:[%s10469_s8 + $0x98] sm:$0xff] }
 0xd2c   : > { %v3615_v34 = vpack.c.bf16 %v3606_v28, %v3605_v5  ;;  %v3607_v15 = vmul.f32 %v7349_v33, %v9298_v42  ;;  %v10470_v42 = vmov 0   ;;  %v2891_v33 = vld [vmem:[%s10469_s8 + $0xb0] sm:$0xff] }
 0xd2e   : > { %v4076_v29 = vpop.permute.xlu0 %4075  ;;  %6765 = vmatprep.mubr.bf16.mxu0 %v3615_v34  ;;  %v3616_v13 = vpack.c.bf16 %v3608_v0, %v3607_v15 }
 0xd2f   : > { %v3741_v36 = vpop.permute.xlu1 %3740  ;;  %6801 = vmatprep.subr.bf16.mxu1 %v4076_v29 }
 0xd30   : > { %6802 = vmatpush3.bf16.msra.mxu1 %v4076_v29 }
 0xd32   : > { %v4080_v2 = vpop.permute.xlu0 %4079 }
 0xd33   : > { %v3745_v10 = vpop.permute.xlu1 %3744  ;;  %6766 = vmatmul.mubr.bf16.gmra.mrb[108].mxu0 %v3616_v13  ;;  %v2889_v13 = vld [vmem:[%s10469_s8 + $0xa0] sm:$0xff] }
 0xd34   : > { %6785 = vmatprep.mubr.msk.bf16.mxu0 %vm1409_vm0, %v3731_v63 }
 0xd36   : > { %v4082_v22 = vpop.permute.xlu0 %4081 }
 0xd37   : > { %v4078_v12 = vpop.permute.xlu1 %4077 }
 0xd38   : > { %6803 = vmatprep.subr.bf16.mxu1 %v4078_v12 }
 0xd39   : > { %6804 = vmatpush3.bf16.msra.mxu1 %v4078_v12  ;;  %v2896_v12 = vld [vmem:[%s10469_s8 + $0xd8] sm:$0xff] }
 0xd3a   : > { %6805 = vmatprep.subr.bf16.mxu1 %v4080_v2 }
 0xd3b   : > { %6786 = vmatmul.mubr.msk.bf16.vlgmr.msra.gmra.mrb[112].mxu0 %vm1409_vm0, %v3733_v50 }
 0xd3c   : > { %6789 = vmatprep.mubr.msk.bf16.mxu0 %vm1409_vm0, %v3735_v49 }
 0xd3d   : > { %6806 = vmatpush3.bf16.msra.mxu1 %v4080_v2 }
 0xd3e   : > { %6807 = vmatprep.subr.bf16.mxu1 %v4082_v22 }
 0xd41   : > { %6808 = vmatpush3.bf16.msra.mxu1 %v4082_v22 }
 0xd43   : > { %6790 = vmatmul.mubr.msk.bf16.gmra.mrb[116].mxu0 %vm1409_vm0, %v3737_v9  ;;  %v2892_v9 = vld [vmem:[%s10469_s8 + $0xb8] sm:$0xff] }
 0xd44   : > { %6793 = vmatprep.mubr.msk.bf16.mxu0 %vm1409_vm0, %v3739_v21 }
 0xd4b   : > { %6794 = vmatmul.mubr.msk.bf16.gmra.mrb[120].mxu0 %vm1409_vm0, %v3741_v36  ;;  %v2890_v36 = vld [vmem:[%s10469_s8 + $0xa8] sm:$0xff] }
 0xd4c   : > { %6797 = vmatprep.mubr.msk.bf16.mxu0 %vm1409_vm0, %v3743_v3 }
 0xd53   : > { %6798 = vmatmul.mubr.msk.bf16.gmra.mrb[124].mxu0 %vm1409_vm0, %v3745_v10 }
 0xd54   : > { %4959 = vmatprep.mubr.bf16.mxu0 %v10470_v42 }
 0xdb5   : > { %v9396_v8 = vpop.f32.mrb[96].mxu0 }
 0xdb6   : > { %v9398_v38 = vpop.f32.mrb[97].mxu0 }
 0xdb7   : > { %v9400_v35 = vpop.f32.mrb[98].mxu0 }
 0xdb8   : > { %v3715_v58 = vpack.c.bf16 %v9400_v35, %v9396_v8  ;;  %v9404_v30 = vpop.f32.mrb[99].mxu0 }
 0xdb9   : > { %v3714_v37 = vpack.c.bf16 %v9404_v30, %v9398_v38 }
 0xded   : > { %v9408_v57 = vpop.f32.mrb[100].mxu0 }
 0xdee   : > { %v9410_v20 = vpop.f32.mrb[101].mxu0 }
 0xdef   : > { %v9412_v7 = vpop.f32.mrb[102].mxu0 }
 0xdf0   : > { %v3717_v11 = vpack.c.bf16 %v9412_v7, %v9408_v57  ;;  %v9416_v54 = vpop.f32.mrb[103].mxu0 }
 0xdf1   : > { %v3716_v27 = vpack.c.bf16 %v9416_v54, %v9410_v20 }
 0xdfe   : > { %v9420_v45 = vpop.f32.mrb[104].mxu0 }
 0xdff   : > { %v9422_v40 = vpop.f32.mrb[105].mxu0 }
 0xe00   : > { %v9424_v55 = vpop.f32.mrb[106].mxu0 }
 0xe01   : > { %v9428_v32 = vpop.f32.mrb[107].mxu0 }
 0xe06   : > { %v9432_v49 = vpop.f32.mrb[108].mxu0 }
 0xe07   : > { %v9434_v16 = vpop.f32.mrb[109].mxu0 }
 0xe08   : > { %v9436_v52 = vpop.f32.mrb[110].mxu0 }
 0xe09   : > { %v9440_v1 = vpop.f32.mrb[111].mxu0 }
 0xe0a   : > { %v10474_v57 = vpack.c.bf16 %v9440_v1, %v9434_v16 }
 0xe0e   : > { %v6787_v21 = vpop.f32.mrb[112].mxu0 }
 0xe0f   : > { %v9447_v50 = vadd.f32 %v6787_v21, %v2887_v25  ;;  %v3852_v19 = vpop.f32.mrb[113].mxu0  ;;  %v2895_v21 = vld [vmem:[%s10469_s8 + $0xd0] sm:$0xff] }
 0xe10   : > { %v6788_v48 = vpop.f32.mrb[114].mxu0  ;;  %v9458_v43 = vadd.f32 %v3852_v19, %v2885_v18 }
 0xe11   : > { %3919 = vmax.xlane.f32.xlu0 %v9447_v50  ;;  %v3855_v47 = vpop.f32.mrb[115].mxu0  ;;  %v9468_v5 = vadd.f32 %v6788_v48, %v2888_v23  ;;  %v2894_v48 = vld [vmem:[%s10469_s8 + $0xc8] sm:$0xff]  ;;  %v2893_v23 = vld [vmem:[%s10469_s8 + $0xc0] sm:$0xff] }
 0xe12   : > { %v9456_v56 = vadd.f32 %v3855_v47, %v2886_v59 }
 0xe14   : > { %3917 = vmax.xlane.f32.xlu1 %v9456_v56 }
 0xe15   : > { %3915 = vmax.xlane.f32.xlu0 %v9458_v43 }
 0xe16   : > { %v6791_v3 = vpop.f32.mrb[116].mxu0 }
 0xe17   : > { %v3868_v28 = vpop.f32.mrb[117].mxu0  ;;  %v9479_v15 = vadd.f32 %v6791_v3, %v2891_v33 }
 0xe18   : > { %v6792_v34 = vpop.f32.mrb[118].mxu0  ;;  %v9491_v22 = vadd.f32 %v3868_v28, %v2889_v13 }
 0xe19   : > { %v9473_v0 = vadd.f32 %v6792_v34, %v2892_v9  ;;  %3921 = vmax.xlane.f32.xlu0 %v9468_v5  ;;  %v3871_v29 = vpop.f32.mrb[119].mxu0  ;;  %v2899_v34 = vld [vmem:[%s10469_s8 + $0xf0] sm:$0xff] }
 0xe1a   : > { %v9485_v10 = vadd.f32 %v3871_v29, %v2890_v36 }
 0xe1b   : > { %3929 = vmax.xlane.f32.xlu1 %v9473_v0 }
 0xe1d   : > { %3927 = vmax.xlane.f32.xlu0 %v9479_v15 }
 0xe1e   : > { %v6795_v2 = vpop.f32.mrb[120].mxu0 }
 0xe1f   : > { %3925 = vmax.xlane.f32.xlu1 %v9485_v10  ;;  %v3884_v25 = vpop.f32.mrb[121].mxu0  ;;  %v9503_v47 = vadd.f32 %v6795_v2, %v2895_v21  ;;  %v2897_v2 = vld [vmem:[%s10469_s8 + $0xe0] sm:$0xff] }
 0xe20   : > { %v6796_v19 = vpop.f32.mrb[122].mxu0  ;;  %v9512_v28 = vadd.f32 %v3884_v25, %v2893_v23  ;;  %v2900_v25 = vld [vmem:[%s10469_s8 + $0xf8] sm:$0xff] }
 0xe21   : > { %v9497_v59 = vadd.f32 %v6796_v19, %v2896_v12  ;;  %3923 = vmax.xlane.f32.xlu0 %v9491_v22  ;;  %v3887_v18 = vpop.f32.mrb[123].mxu0  ;;  %v2898_v19 = vld [vmem:[%s10469_s8 + $0xe8] sm:$0xff] }
 0xe22   : > { %v9509_v3 = vadd.f32 %v3887_v18, %v2894_v48 }
 0xe23   : > { %3937 = vmax.xlane.f32.xlu1 %v9497_v59 }
 0xe25   : > { %3935 = vmax.xlane.f32.xlu0 %v9503_v47 }
 0xe26   : > { %v6799_v9 = vpop.f32.mrb[124].mxu0 }
 0xe27   : > { %3933 = vmax.xlane.f32.xlu1 %v9509_v3  ;;  %v3900_v33 = vpop.f32.mrb[125].mxu0  ;;  %v9519_v13 = vadd.f32 %v6799_v9, %v2899_v34 }
 0xe28   : > { %v6800_v29 = vpop.f32.mrb[126].mxu0  ;;  %v9525_v12 = vadd.f32 %v3900_v33, %v2897_v2 }
 0xe29   : > { %3931 = vmax.xlane.f32.xlu0 %v9512_v28  ;;  %v3903_v36 = vpop.f32.mrb[127].mxu0  ;;  %v9535_v21 = vadd.f32 %v6800_v29, %v2900_v25 }
 0xe2a   : > { %v9541_v18 = vadd.f32 %v3903_v36, %v2898_v19 }
 0xe2d   : > { %3943 = vmax.xlane.f32.xlu0 %v9519_v13 }
 0xe31   : > { %3939 = vmax.xlane.f32.xlu0 %v9525_v12 }
 0xe38   : > { %4085 = vrot.lane.b32.xlu1 %v9077_v24, %s7719_s6 }
 0xe47   : > { %4083 = vrot.lane.b32.xlu0 %v9079_v61, %s7719_s6 }
 0xe5c   : > { %3945 = vmax.xlane.f32.xlu1 %v9535_v21 }
 0xe60   : > { %3941 = vmax.xlane.f32.xlu1 %v9541_v18 }
 0xe9e   : > { %v3920_v24 = vpop.xlane.xlu0 %3919 }
 0xe9f   : > { %v3949_v48 = vsub.f32 %v9447_v50, %v3920_v24 }
 0xea1   : > { %v3967_v61 = vmul.f32 1.442695, %v3949_v48  ;;  %v3918_v9 = vpop.xlane.xlu1 %3917 }
 0xea2   : > { %v3916_v23 = vpop.xlane.xlu0 %3915  ;;  %v3948_v29 = vsub.f32 %v9456_v56, %v3918_v9 }
 0xea3   : > { %7350 = vpow2.f32 %v3967_v61  ;;  %v3947_v33 = vsub.f32 %v9458_v43, %v3916_v23 }
 0xea4   : > { %v3965_v17 = vmul.f32 1.442695, %v3948_v29 }
 0xea5   : > { %v3963_v34 = vmul.f32 1.442695, %v3947_v33 }
 0xea6   : > { %v3922_v2 = vpop.xlane.xlu0 %3921 }
 0xea7   : > { %7352 = vpow2.f32 %v3963_v34  ;;  %v3950_v25 = vsub.f32 %v9468_v5, %v3922_v2 }
 0xea8   : > { %v3930_v36 = vpop.xlane.xlu1 %3929 }
 0xea9   : > { %v3969_v19 = vmul.f32 1.442695, %v3950_v25  ;;  %v3954_v41 = vsub.f32 %v9473_v0, %v3930_v36 }
 0xeaa   : > { %v3928_v63 = vpop.xlane.xlu0 %3927 }
 0xeab   : > { %7354 = vpow2.f32 %v3969_v19  ;;  %v3953_v50 = vsub.f32 %v9479_v15, %v3928_v63  ;;  %v3977_v61 = vmul.f32 1.442695, %v3954_v41 }
 0xeac   : > { %v3926_v24 = vpop.xlane.xlu1 %3925  ;;  %7356 = vpow2.f32 %v3965_v17 }
 0xead   : > { %v9550_v48 = vpop.eup %7350  ;;  %v3975_v43 = vmul.f32 1.442695, %v3953_v50  ;;  %v3952_v5 = vsub.f32 %v9485_v10, %v3926_v24 }
 0xeae   : > { %v3924_v56 = vpop.xlane.xlu0 %3923  ;;  %3999 = vadd.xlane.f32.xlu1 %v9550_v48 }
 0xeaf   : > { %7358 = vpow2.f32 %v3975_v43  ;;  %v3951_v23 = vsub.f32 %v9491_v22, %v3924_v56  ;;  %v3973_v63 = vmul.f32 1.442695, %v3952_v5 }
 0xeb0   : > { %7360 = vpow2.f32 %v3977_v61  ;;  %v3938_v10 = vpop.xlane.xlu1 %3937 }
 0xeb1   : > { %v9555_v9 = vpop.eup %7352  ;;  %v3971_v0 = vmul.f32 1.442695, %v3951_v23  ;;  %v3958_v61 = vsub.f32 %v9497_v59, %v3938_v10 }
 0xeb2   : > { %v3936_v33 = vpop.xlane.xlu0 %3935  ;;  %3995 = vadd.xlane.f32.xlu1 %v9555_v9 }
 0xeb3   : > { %7362 = vpow2.f32 %v3971_v0  ;;  %v3985_v23 = vmul.f32 1.442695, %v3958_v61  ;;  %v3957_v0 = vsub.f32 %v9503_v47, %v3936_v33 }
 0xeb4   : > { %7364 = vpow2.f32 %v3973_v63  ;;  %v3934_v25 = vpop.xlane.xlu1 %3933 }
 0xeb5   : > { %v9558_v15 = vpop.eup %7354  ;;  %v3956_v56 = vsub.f32 %v9509_v3, %v3934_v25 }
 0xeb6   : > { %v3932_v17 = vpop.xlane.xlu0 %3931  ;;  %4001 = vadd.xlane.f32.xlu1 %v9558_v15  ;;  %v9561_v41 = vpop.eup %7356 }
 0xeb7   : > { %v3955_v43 = vsub.f32 %v9512_v28, %v3932_v17  ;;  %v3981_v63 = vmul.f32 1.442695, %v3956_v56 }
 0xeb8   : > { %v4086_v24 = vpop.permute.xlu1 %4085 }
 0xeb9   : > { %v9563_v34 = vpop.eup %7358  ;;  %v3979_v5 = vmul.f32 1.442695, %v3955_v43 }
 0xeba   : > { %v3944_v22 = vpop.xlane.xlu0 %3943  ;;  %4007 = vadd.xlane.f32.xlu0 %v9563_v34  ;;  %3997 = vadd.xlane.f32.xlu1 %v9561_v41  ;;  %v9567_v29 = vpop.eup %7360 }
 0xebb   : > { %7366 = vpow2.f32 %v3979_v5  ;;  %v3961_v59 = vsub.f32 %v9519_v13, %v3944_v22 }
 0xebc   : > { %7368 = vpow2.f32 %v3985_v23 }
 0xebd   : > { %v9569_v2 = vpop.eup %7362  ;;  %7370 = vpow2.f32 %v3981_v63  ;;  %v3991_v33 = vmul.f32 1.442695, %v3961_v59 }
 0xebe   : > { %v3940_v36 = vpop.xlane.xlu0 %3939  ;;  %4003 = vadd.xlane.f32.xlu1 %v9569_v2  ;;  %4009 = vadd.xlane.f32.xlu0 %v9567_v29  ;;  %v9573_v19 = vpop.eup %7364 }
 0xec2   : > { %v4084_v50 = vpop.permute.xlu0 %4083  ;;  %4005 = vadd.xlane.f32.xlu0 %v9573_v19 }
 0xec3   : > { %6809 = vmatprep.subr.bf16.mxu1 %v4084_v50 }
 0xec4   : > { %6810 = vmatpush3.bf16.msra.mxu1 %v4084_v50 }
 0xec5   : > { %6811 = vmatprep.subr.bf16.mxu1 %v4086_v24  ;;  %v9588_v10 = vpop.eup %7366 }
 0xec6   : > { %v9591_v25 = vpop.eup %7368 }
 0xec8   : > { %6812 = vmatpush3.bf16.msra.mxu1 %v4086_v24  ;;  %v3983_v24 = vmul.f32 1.442695, %v3957_v0 }
 0xeca   : > { %7372 = vpow2.f32 %v3983_v24 }
 0xecf   : > { %4089 = vrot.lane.b32.xlu1 %v9100_v53, %s7719_s6  ;;  %v3959_v53 = vsub.f32 %v9525_v12, %v3940_v36  ;;  %v9593_v12 = vpop.eup %7370 }
 0xed1   : > { %v3987_v3 = vmul.f32 1.442695, %v3959_v53 }
 0xed8   : > { %4087 = vrot.lane.b32.xlu0 %v9103_v4, %s7719_s6 }
 0xee9   : > { %v3946_v50 = vpop.xlane.xlu1 %3945 }
 0xeea   : > { %v3962_v4 = vsub.f32 %v9535_v21, %v3946_v50 }
 0xeec   : > { %v3993_v47 = vmul.f32 1.442695, %v3962_v4 }
 0xeed   : > { %v3942_v60 = vpop.xlane.xlu1 %3941 }
 0xeee   : > { %v3960_v28 = vsub.f32 %v9541_v18, %v3942_v60  ;;  %v9597_v60 = vpop.eup %7372 }
 0xef0   : > { %v3989_v17 = vmul.f32 1.442695, %v3960_v28 }
 0xef2   : > { %7374 = vpow2.f32 %v3989_v17 }
 0xef3   : > { %4011 = vadd.xlane.f32.xlu1 %v9588_v10  ;;  %7376 = vpow2.f32 %v3987_v3 }
 0xef4   : > { %7378 = vpow2.f32 %v3993_v47 }
 0xef5   : > { %7380 = vpow2.f32 %v3991_v33 }
 0xef7   : > { %4017 = vadd.xlane.f32.xlu1 %v9591_v25  ;;  %4013 = vadd.xlane.f32.xlu0 %v9593_v12 }
 0xefb   : > { %4015 = vadd.xlane.f32.xlu0 %v9597_v60 }
 0xefc   : > { %v9600_v13 = vpop.eup %7374 }
 0xefd   : > { %4021 = vadd.xlane.f32.xlu1 %v9600_v13  ;;  %v9603_v21 = vpop.eup %7376 }
 0xefe   : > { %v9606_v18 = vpop.eup %7378 }
 0xeff   : > { %4019 = vadd.xlane.f32.xlu0 %v9603_v21  ;;  %v9609_v22 = vpop.eup %7380 }
 0xf01   : > { %4025 = vadd.xlane.f32.xlu1 %v9606_v18 }
 0xf03   : > { %4023 = vadd.xlane.f32.xlu0 %v9609_v22 }
 0xf3b   : > { %v4000_v36 = vpop.xlane.xlu1 %3999 }
 0xf3f   : > { %v3996_v43 = vpop.xlane.xlu1 %3995 }
 0xf40   : > { %7382 = vrcp.f32 %v3996_v43 }
 0xf43   : > { %v4002_v61 = vpop.xlane.xlu1 %4001 }
 0xf44   : > { %7384 = vrcp.f32 %v4002_v61 }
 0xf47   : > { %v4008_v56 = vpop.xlane.xlu0 %4007  ;;  %v3998_v5 = vpop.xlane.xlu1 %3997 }
 0xf48   : > { %7386 = vrcp.f32 %v3998_v5 }
 0xf49   : > { %7388 = vrcp.f32 %v4000_v36 }
 0xf4a   : > { %v7383_v50 = vpop.eup %7382 }
 0xf4b   : > { %v4010_v23 = vpop.xlane.xlu0 %4009  ;;  %v4004_v0 = vpop.xlane.xlu1 %4003  ;;  %v4043_v28 = vmul.f32 %v7383_v50, %v9555_v9 }
 0xf4c   : > { %7390 = vrcp.f32 %v4004_v0 }
 0xf4e   : > { %v7385_v24 = vpop.eup %7384 }
 0xf4f   : > { %v4006_v63 = vpop.xlane.xlu0 %4005  ;;  %v4090_v17 = vpop.permute.xlu1 %4089  ;;  %v4046_v47 = vmul.f32 %v7385_v24, %v9558_v15 }
 0xf50   : > { %7392 = vrcp.f32 %v4006_v63 }
 0xf51   : > { %7394 = vrcp.f32 %v4010_v23 }
 0xf52   : > { %v7387_v53 = vpop.eup %7386  ;;  %7396 = vrcp.f32 %v4008_v56 }
 0xf53   : > { %v4088_v4 = vpop.permute.xlu0 %4087  ;;  %v4044_v59 = vmul.f32 %v7387_v53, %v9561_v41  ;;  %v7389_v3 = vpop.eup %7388 }
 0xf54   : > { %6813 = vmatprep.subr.bf16.mxu1 %v4088_v4  ;;  %v4045_v43 = vmul.f32 %v7389_v3, %v9550_v48 }
 0xf55   : > { %6814 = vmatpush3.bf16.msra.mxu1 %v4088_v4  ;;  %v4059_v33 = vpack.c.bf16 %v4044_v59, %v4043_v28 }
 0xf56   : > { %6815 = vmatprep.subr.bf16.mxu1 %v4090_v17  ;;  %v7391_v36 = vpop.eup %7390  ;;  %v4060_v56 = vpack.c.bf16 %v4046_v47, %v4045_v43 }
 0xf57   : > { %6817 = vmatprep.mubr.bf16.mxu1 %v4059_v33  ;;  %v4047_v23 = vmul.f32 %v7391_v36, %v9569_v2 }
 0xf59   : > { %6816 = vmatpush3.bf16.msra.mxu1 %v4090_v17 }
 0xf5a   : > { %v7393_v61 = vpop.eup %7392 }
 0xf5b   : > { %v7395_v5 = vpop.eup %7394  ;;  %v4048_v9 = vmul.f32 %v7393_v61, %v9573_v19 }
 0xf5c   : > { %6818 = vmatmul.mubr.bf16.vlgmr.msra.gmra.mrb[96].mxu1 %v4060_v56  ;;  %v7397_v41 = vpop.eup %7396  ;;  %v4050_v63 = vmul.f32 %v7395_v5, %v9567_v29 }
 0xf5d   : > { %v4061_v0 = vpack.c.bf16 %v4048_v9, %v4047_v23  ;;  %v4049_v15 = vmul.f32 %v7397_v41, %v9563_v34 }
 0xf5f   : > { %6821 = vmatprep.mubr.bf16.mxu1 %v4061_v0  ;;  %v4062_v50 = vpack.c.bf16 %v4050_v63, %v4049_v15  ;;  %v7046_v15 = vld [vmem:[%s10471_s27] sm:$0xff]  }
 0xf60   : > { %6833 = vmatprep.subr.bf16.mxu1 %v7046_v15 }
 0xf61   : > { %6834 = vmatpush3.bf16.msra.mxu1 %v7046_v15 }
 0xf64   : > { %6822 = vmatmul.mubr.bf16.gmra.mrb[100].mxu1 %v4062_v50  ;;  %v7047_v50 = vld [vmem:[%s10471_s27 + $0x8] sm:$0xff]  }
 0xf65   : > { %6835 = vmatprep.subr.bf16.mxu1 %v7047_v50 }
 0xf66   : > { %6836 = vmatpush3.bf16.msra.mxu1 %v7047_v50 }
 0xf80   : > { %v4012_v48 = vpop.xlane.xlu1 %4011 }
 0xf81   : > { %7398 = vrcp.f32 %v4012_v48  ;;  %v7050_v48 = vld [vmem:[%s10471_s27 + $0x20] sm:$0xff]  }
 0xf84   : > { %v4014_v24 = vpop.xlane.xlu0 %4013  ;;  %v4018_v53 = vpop.xlane.xlu1 %4017 }
 0xf85   : > { %7400 = vrcp.f32 %v4014_v24  ;;  %v7053_v24 = vld [vmem:[%s10471_s27 + $0x38] sm:$0xff]  }
 0xf86   : > { %7402 = vrcp.f32 %v4018_v53 }
 0xf88   : > { %v4016_v4 = vpop.xlane.xlu0 %4015 }
 0xf89   : > { %7404 = vrcp.f32 %v4016_v4 }
 0xf8a   : > { %v4022_v2 = vpop.xlane.xlu1 %4021 }
 0xf8b   : > { %7406 = vrcp.f32 %v4022_v2  ;;  %v7399_v28 = vpop.eup %7398 }
 0xf8c   : > { %v4020_v19 = vpop.xlane.xlu0 %4019  ;;  %v4051_v34 = vmul.f32 %v7399_v28, %v9588_v10 }
 0xf8d   : > { %7408 = vrcp.f32 %v4020_v19 }
 0xf8e   : > { %v4026_v59 = vpop.xlane.xlu1 %4025 }
 0xf8f   : > { %v7401_v29 = vpop.eup %7400  ;;  %7410 = vrcp.f32 %v4026_v59 }
 0xf90   : > { %v4024_v3 = vpop.xlane.xlu0 %4023  ;;  %v4052_v17 = vmul.f32 %v7401_v29, %v9593_v12  ;;  %v7403_v47 = vpop.eup %7402 }
 0xf91   : > { %7412 = vrcp.f32 %v4024_v3  ;;  %v4054_v61 = vmul.f32 %v7403_v47, %v9591_v25 }
 0xf92   : > { %v4063_v33 = vpack.c.bf16 %v4052_v17, %v4051_v34 }
 0xf93   : > { %v7405_v36 = vpop.eup %7404 }
 0xf94   : > { %6825 = vmatprep.mubr.bf16.mxu1 %v4063_v33  ;;  %v4053_v43 = vmul.f32 %v7405_v36, %v9597_v60 }
 0xf95   : > { %v7407_v56 = vpop.eup %7406 }
 0xf96   : > { %v4064_v5 = vpack.c.bf16 %v4054_v61, %v4053_v43  ;;  %v4056_v12 = vmul.f32 %v7407_v56, %v9600_v13  ;;  %v7048_v13 = vld [vmem:[%s10471_s27 + $0x10] sm:$0xff]  }
 0xf97   : > { %v7409_v23 = vpop.eup %7408  ;;  %6837 = vmatprep.subr.bf16.mxu1 %v7048_v13 }
 0xf98   : > { %6826 = vmatmul.mubr.bf16.gmra.mrb[104].mxu1 %v4064_v5  ;;  %v4055_v10 = vmul.f32 %v7409_v23, %v9603_v21  ;;  %v7049_v21 = vld [vmem:[%s10471_s27 + $0x18] sm:$0xff]  }
 0xf99   : > { %v7411_v9 = vpop.eup %7410  ;;  %6838 = vmatpush3.bf16.msra.mxu1 %v7048_v13 }
 0xf9a   : > { %v4065_v41 = vpack.c.bf16 %v4056_v12, %v4055_v10  ;;  %v4058_v25 = vmul.f32 %v7411_v9, %v9606_v18  ;;  %6839 = vmatprep.subr.bf16.mxu1 %v7049_v21  ;;  %v7051_v18 = vld [vmem:[%s10471_s27 + $0x28] sm:$0xff]  }
 0xf9b   : > { %v7413_v0 = vpop.eup %7412 }
 0xf9c   : > { %6829 = vmatprep.mubr.bf16.mxu1 %v4065_v41  ;;  %v4057_v60 = vmul.f32 %v7413_v0, %v9609_v22  ;;  %v7052_v22 = vld [vmem:[%s10471_s27 + $0x30] sm:$0xff]  }
 0xf9d   : > { %6840 = vmatpush3.bf16.msra.mxu1 %v7049_v21 }
 0xf9e   : > { %v4066_v63 = vpack.c.bf16 %v4058_v25, %v4057_v60  ;;  %6841 = vmatprep.subr.bf16.mxu1 %v7050_v48 }
 0xfa0   : > { %6830 = vmatmul.mubr.bf16.gmra.mrb[108].mxu1 %v4066_v63 }
 0xfa1   : > { %6842 = vmatpush3.bf16.msra.mxu1 %v7050_v48 }
 0xfa2   : > { %6843 = vmatprep.subr.bf16.mxu1 %v7051_v18 }
 0xfa5   : > { %6844 = vmatpush3.bf16.msra.mxu1 %v7051_v18 }
 0xfa6   : > { %6845 = vmatprep.subr.bf16.mxu1 %v7052_v22 }
 0xfa9   : > { %6846 = vmatpush3.bf16.msra.mxu1 %v7052_v22 }
 0xfaa   : > { %6847 = vmatprep.subr.bf16.mxu1 %v7053_v24 }
 0xfad   : > { %6848 = vmatpush3.bf16.msra.mxu1 %v7053_v24 }
0x102f   : > { %v6819_v53 = vpop.f32.mrb[96].mxu1 }
0x1030   : > { %v4133_v4 = vpop.f32.mrb[97].mxu1 }
0x1031   : > { %v6820_v2 = vpop.f32.mrb[98].mxu1 }
0x1032   : > { %v4197_v19 = vpack.c.bf16 %v6820_v2, %v6819_v53  ;;  %v4136_v28 = vpop.f32.mrb[99].mxu1 }
0x1033   : > { %v4196_v59 = vpack.c.bf16 %v4136_v28, %v4133_v4 }
0x1034   : > { %4214 = vrot.lane.b32.xlu1 %v4197_v19, %s7719_s6 }
0x1035   : > { %4212 = vrot.lane.b32.xlu0 %v4196_v59, %s7719_s6 }
0x1037   : > { %v6823_v29 = vpop.f32.mrb[100].mxu1 }
0x1038   : > { %v4149_v3 = vpop.f32.mrb[101].mxu1 }
0x1039   : > { %v6824_v34 = vpop.f32.mrb[102].mxu1 }
0x103a   : > { %v4199_v17 = vpack.c.bf16 %v6824_v34, %v6823_v29  ;;  %v4152_v47 = vpop.f32.mrb[103].mxu1 }
0x103b   : > { %v4198_v33 = vpack.c.bf16 %v4152_v47, %v4149_v3 }
0x103d   : > { %4216 = vrot.lane.b32.xlu1 %v4198_v33, %s7719_s6 }
0x1041   : > { %4218 = vrot.lane.b32.xlu1 %v4199_v17, %s7719_s6 }
0x106b   : > { %v6827_v36 = vpop.f32.mrb[104].mxu1 }
0x106c   : > { %v4165_v43 = vpop.f32.mrb[105].mxu1 }
0x106d   : > { %v6828_v61 = vpop.f32.mrb[106].mxu1 }
0x106e   : > { %v4201_v56 = vpack.c.bf16 %v6828_v61, %v6827_v36  ;;  %v4168_v5 = vpop.f32.mrb[107].mxu1 }
0x106f   : > { %v4200_v23 = vpack.c.bf16 %v4168_v5, %v4165_v43 }
0x1070   : > { %4222 = vrot.lane.b32.xlu1 %v4201_v56, %s7719_s6 }
0x1071   : > { %4220 = vrot.lane.b32.xlu0 %v4200_v23, %s7719_s6 }
0x1073   : > { %v6831_v10 = vpop.f32.mrb[108].mxu1 }
0x1074   : > { %v4181_v12 = vpop.f32.mrb[109].mxu1 }
0x1075   : > { %v6832_v9 = vpop.f32.mrb[110].mxu1 }
0x1076   : > { %v4203_v41 = vpack.c.bf16 %v6832_v9, %v6831_v10  ;;  %v4184_v0 = vpop.f32.mrb[111].mxu1 }
0x1077   : > { %v4202_v60 = vpack.c.bf16 %v4184_v0, %v4181_v12  ;;  %v10480_v0 = vld [vmem:[#allocation25_spill] sm:$0xff] }
0x1078   : > { %4226 = vrot.lane.b32.xlu1 %v4203_v41, %s7719_s6 }
0x1079   : > { %4224 = vrot.lane.b32.xlu0 %v4202_v60, %s7719_s6  ;;  %s6224_s6 = sshll.u32 %s10494_s1, 11 }
0x10a6   : > { %v4215_v25 = vpop.permute.xlu1 %4214 }
0x10a7   : > { %v4213_v63 = vpop.permute.xlu0 %4212  ;;  %v4234_v50 = vsel %vm1409_vm0, %v3715_v58, %v4215_v25  ;;  %v10472_v58 = vpack.c.bf16 %v9428_v32, %v9422_v40 }
0x10a8   : > { %v4230_v15 = vsel %vm1409_vm0, %v3714_v37, %v4213_v63  ;;  %v10473_v37 = vpack.c.bf16 %v9424_v55, %v9420_v45  ;;  %v6168_v45 = vld [vmem:[%s10477_s15] ss:$0 sm:$0xff] }
0x10a9   : > { %6849 = vmatprep.mubr.bf16.mxu1 %v4230_v15 }
0x10aa   : > { %6850 = vmatmul.mubr.bf16.vlgmr.msra.gmra.mrb[112].mxu1 %v4234_v50  ;;  %v10481_v50 = vld [vmem:[#allocation26_spill] sm:$0xff] }
0x10af   : > { %v4217_v13 = vpop.permute.xlu1 %4216 }
0x10b0   : > { %v4238_v21 = vsel %vm1409_vm0, %v3716_v27, %v4217_v13 }
0x10b1   : > { %6853 = vmatprep.mubr.bf16.mxu1 %v4238_v21 }
0x10b3   : > { %v4219_v48 = vpop.permute.xlu1 %4218 }
0x10b4   : > { %v4242_v38 = vsel %vm1409_vm0, %v3717_v11, %v4219_v48  ;;  %v10475_v11 = vpack.c.bf16 %v9436_v52, %v9432_v49 }
0x10b5   : > { %6854 = vmatmul.mubr.bf16.gmra.mrb[116].mxu1 %v4242_v38  ;;  %v10482_v38 = vld [vmem:[#allocation27_spill] sm:$0xff] }
0x10e2   : > { %v4223_v8 = vpop.permute.xlu1 %4222 }
0x10e3   : > { %v4221_v35 = vpop.permute.xlu0 %4220  ;;  %v4250_v20 = vsel %vm1409_vm0, %v10473_v37, %v4223_v8 }
0x10e4   : > { %v4246_v30 = vsel %vm1409_vm0, %v10472_v58, %v4221_v35  ;;  %v10483_v35 = vld [vmem:[#allocation28_spill] sm:$0xff] }
0x10e5   : > { %6857 = vmatprep.mubr.bf16.mxu1 %v4246_v30  ;;  %v10484_v30 = vld [vmem:[#allocation29_spill] sm:$0xff] }
0x10e6   : > { %6858 = vmatmul.mubr.bf16.gmra.mrb[120].mxu1 %v4250_v20 }
0x10ea   : > { %v4227_v54 = vpop.permute.xlu1 %4226 }
0x10eb   : > { %v4225_v27 = vpop.permute.xlu0 %4224  ;;  %v4258_v40 = vsel %vm1409_vm0, %v10475_v11, %v4227_v54 }
0x10ec   : > { %v4254_v7 = vsel %vm1409_vm0, %v10474_v57, %v4225_v27 }
0x10ed   : > { %6861 = vmatprep.mubr.bf16.mxu1 %v4254_v7 }
0x10ee   : > { %6862 = vmatmul.mubr.bf16.gmra.mrb[124].mxu1 %v4258_v40 }
0x117d   : > { %v6851_v55 = vpop.f32.mrb[112].mxu1 }
0x117e   : > { %v4365_v32 = vpop.f32.mrb[113].mxu1  ;;  %v4374_v16 = vadd.f32 %v6851_v55, %v6168_v45 }
0x117f   : > { %v4366_v18 = vadd.f32 %v6168_v45, %v4365_v32  ;;  %v6852_v22 = vpop.f32.mrb[114].mxu1 }
0x1180   : > { %v4368_v24 = vpop.f32.mrb[115].mxu1  ;;  %v9684_v49 = vadd.f32 %v4374_v16, %v8872_v14  ;;  %v4377_v52 = vadd.f32 %v6852_v22, %v6168_v45 }
0x1181   : > { %v4428_v1 = vadd.f32 %v4366_v18, %v8861_v44  ;;  %v4369_v53 = vadd.f32 %v6168_v45, %v4368_v24 }
0x1182   : > { %v9688_v19 = vadd.f32 %v4377_v52, %v8875_v26 }
0x1183   : > { %v4429_v4 = vadd.f32 %v4369_v53, %v8864_v51  ;;  %4446 = vadd.xlane.f32.xlu0 %v4428_v1 }
0x1185   : > { %4448 = vadd.xlane.f32.xlu1 %v4429_v4 }
0x1187   : > { %4450 = vadd.xlane.f32.xlu0 %v9684_v49 }
0x1188   : > { %v6855_v2 = vpop.f32.mrb[116].mxu1 }
0x1189   : > { %v4381_v28 = vpop.f32.mrb[117].mxu1  ;;  %v4390_v14 = vadd.f32 %v6855_v2, %v6168_v45 }
0x118a   : > { %v4382_v59 = vadd.f32 %v6168_v45, %v4381_v28  ;;  %v6856_v29 = vpop.f32.mrb[118].mxu1 }
0x118b   : > { %4452 = vadd.xlane.f32.xlu0 %v9688_v19  ;;  %v4384_v44 = vpop.f32.mrb[119].mxu1  ;;  %v4393_v34 = vadd.f32 %v6856_v29, %v6168_v45  ;;  %v9700_v26 = vadd.f32 %v4390_v14, %v8898_v31  ;;  %v10478_v31 = vld [vmem:[#allocation23_spill] sm:$0xff] }
0x118c   : > { %v9692_v51 = vadd.f32 %v4382_v59, %v8885_v46  ;;  %v4385_v3 = vadd.f32 %v6168_v45, %v4384_v44 }
0x118d   : > { %v9703_v47 = vadd.f32 %v4393_v34, %v8901_v62  ;;  %v10479_v62 = vld [vmem:[#allocation24_spill] sm:$0xff] }
0x118e   : > { %v9695_v17 = vadd.f32 %v4385_v3, %v8889_v39 }
0x118f   : > { %4454 = vadd.xlane.f32.xlu0 %v9692_v51 }
0x1190   : > { %4456 = vadd.xlane.f32.xlu1 %v9695_v17 }
0x1193   : > { %4458 = vadd.xlane.f32.xlu0 %v9700_v26 }
0x1194   : > { %4460 = vadd.xlane.f32.xlu1 %v9703_v47 }
0x11b9   : > { %v6859_v46 = vpop.f32.mrb[120].mxu1 }
0x11ba   : > { %v4397_v33 = vpop.f32.mrb[121].mxu1  ;;  %v4406_v61 = vadd.f32 %v6859_v46, %v6168_v45 }
0x11bb   : > { %v4398_v36 = vadd.f32 %v6168_v45, %v4397_v33  ;;  %v6860_v43 = vpop.f32.mrb[122].mxu1 }
0x11bc   : > { %v4400_v39 = vpop.f32.mrb[123].mxu1  ;;  %v4409_v23 = vadd.f32 %v6860_v43, %v6168_v45  ;;  %v9715_v12 = vadd.f32 %v4406_v61, %v10479_v62  ;;  %v7059_v43 = vld [vmem:[%s7983_s19 + $0x14] ss:$8 sps:$4 sm:$0xff]   ;;  %v7060_v61 = vld [vmem:[%s7983_s19 + $0x20] ss:$8 sps:$4 sm:$0xff]  }
0x11bd   : > { %v9708_v56 = vadd.f32 %v4398_v36, %v8938_v6  ;;  %v4401_v5 = vadd.f32 %v6168_v45, %v4400_v39  ;;  %v7056_v36 = vld [vmem:[%s7983_s19 + $0x4] ss:$8 sps:$4 sm:$0xff]   ;;  %v7066_v62 = vld [vmem:[%s7983_s19 + $0x40] ss:$8 sps:$4 sm:$0xff]  }
0x11be   : > { %v9719_v60 = vadd.f32 %v4409_v23, %v10480_v0  ;;  %4927 = vmatprep.subr.bf16.mxu0 %v7056_v36  ;;  %v7062_v39 = vld [vmem:[%s7983_s19 + $0x24] ss:$8 sps:$4 sm:$0xff]   ;;  %v7063_v23 = vld [vmem:[%s7983_s19 + $0x30] ss:$8 sps:$4 sm:$0xff]  }
0x11bf   : > { %v9711_v10 = vadd.f32 %v4401_v5, %v10478_v31  ;;  %4462 = vadd.xlane.f32.xlu0 %v9708_v56  ;;  %v7065_v5 = vld [vmem:[%s7983_s19 + $0x34] ss:$8 sps:$4 sm:$0xff]   ;;  %v7068_v31 = vld [vmem:[%s7983_s19 + $0x44] ss:$8 sps:$4 sm:$0xff]  }
0x11c0   : > { %v7074_v0 = vld [vmem:[%s7983_s19 + $0x64] ss:$8 sps:$4 sm:$0xff]  }
0x11c1   : > { %4464 = vadd.xlane.f32.xlu1 %v9711_v10  ;;  %v6863_v9 = vpop.f32.mrb[124].mxu1 }
0x11c2   : > { %v4413_v41 = vpop.f32.mrb[125].mxu1  ;;  %v4422_v15 = vadd.f32 %v6863_v9, %v6168_v45  ;;  %v7071_v9 = vld [vmem:[%s7983_s19 + $0x54] ss:$8 sps:$4 sm:$0xff]  }
0x11c3   : > { %v4414_v25 = vadd.f32 %v6168_v45, %v4413_v41  ;;  %4466 = vadd.xlane.f32.xlu0 %v9715_v12  ;;  %v6864_v6 = vpop.f32.mrb[126].mxu1  ;;  %v7069_v41 = vld [vmem:[%s7983_s19 + $0x50] ss:$8 sps:$4 sm:$0xff]  }
0x11c4   : > { %v4416_v63 = vpop.f32.mrb[127].mxu1  ;;  %v4425_v48 = vadd.f32 %v6864_v6, %v6168_v45  ;;  %v9731_v58 = vadd.f32 %v4422_v15, %v10483_v35  ;;  %v7075_v6 = vld [vmem:[%s7983_s19 + $0x70] ss:$8 sps:$4 sm:$0xff]  }
0x11c5   : > { %v9723_v13 = vadd.f32 %v4414_v25, %v10481_v50  ;;  %v4417_v21 = vadd.f32 %v6168_v45, %v4416_v63  ;;  %4468 = vadd.xlane.f32.xlu1 %v9719_v60  ;;  %v7072_v25 = vld [vmem:[%s7983_s19 + $0x60] ss:$8 sps:$4 sm:$0xff]   ;;  %v7077_v63 = vld [vmem:[%s7983_s19 + $0x74] ss:$8 sps:$4 sm:$0xff]  }
0x11c6   : > { %v9735_v37 = vadd.f32 %v4425_v48, %v10484_v30 }
0x11c7   : > { %v9727_v8 = vadd.f32 %v4417_v21, %v10482_v38  ;;  %4470 = vadd.xlane.f32.xlu0 %v9723_v13 }
0x11c9   : > { %4472 = vadd.xlane.f32.xlu1 %v9727_v8 }
0x11cb   : > { %4474 = vadd.xlane.f32.xlu0 %v9731_v58 }
0x11cd   : > { %4476 = vadd.xlane.f32.xlu1 %v9735_v37 }
0x1210   : > { %v4447_v20 = vpop.xlane.xlu0 %4446 }
0x1211   : > { %v4478_v54 = vmul.f32 0.0078125, %v4447_v20 }
0x1212   : > { %v4449_v27 = vpop.xlane.xlu1 %4448 }
0x1213   : > { %v9739_v57 = vsub.f32 %v4428_v1, %v4478_v54  ;;  %v4479_v7 = vmul.f32 0.0078125, %v4449_v27 }
0x1214   : > { %v4451_v11 = vpop.xlane.xlu0 %4450 }
0x1215   : > { %v9741_v40 = vsub.f32 %v4429_v4, %v4479_v7  ;;  %v4480_v45 = vmul.f32 0.0078125, %v4451_v11  ;;  %v4510_v55 = vmul.f32 %v9739_v57, %v9739_v57 }
0x1217   : > { %v9746_v32 = vsub.f32 %v9684_v49, %v4480_v45  ;;  %4526 = vadd.xlane.f32.xlu0 %v4510_v55  ;;  %v4511_v18 = vmul.f32 %v9741_v40, %v9741_v40 }
0x1218   : > { %v4453_v22 = vpop.xlane.xlu0 %4452 }
0x1219   : > { %v4481_v24 = vmul.f32 0.0078125, %v4453_v22  ;;  %4528 = vadd.xlane.f32.xlu1 %v4511_v18  ;;  %v4512_v16 = vmul.f32 %v9746_v32, %v9746_v32 }
0x121b   : > { %v9753_v1 = vsub.f32 %v9688_v19, %v4481_v24  ;;  %4530 = vadd.xlane.f32.xlu0 %v4512_v16 }
0x121c   : > { %v4455_v53 = vpop.xlane.xlu0 %4454 }
0x121d   : > { %v4482_v4 = vmul.f32 0.0078125, %v4455_v53  ;;  %v4457_v52 = vpop.xlane.xlu1 %4456  ;;  %v4513_v49 = vmul.f32 %v9753_v1, %v9753_v1 }
0x121e   : > { %v4483_v2 = vmul.f32 0.0078125, %v4457_v52 }
0x121f   : > { %v9758_v28 = vsub.f32 %v9692_v51, %v4482_v4  ;;  %4532 = vadd.xlane.f32.xlu1 %v4513_v49 }
0x1220   : > { %v9761_v59 = vsub.f32 %v9695_v17, %v4483_v2  ;;  %v4459_v29 = vpop.xlane.xlu0 %4458 }
0x1221   : > { %v4484_v19 = vmul.f32 0.0078125, %v4459_v29  ;;  %v4461_v44 = vpop.xlane.xlu1 %4460  ;;  %v4514_v3 = vmul.f32 %v9758_v28, %v9758_v28 }
0x1222   : > { %v4485_v14 = vmul.f32 0.0078125, %v4461_v44  ;;  %v4515_v34 = vmul.f32 %v9761_v59, %v9761_v59 }
0x1223   : > { %v9768_v51 = vsub.f32 %v9700_v26, %v4484_v19  ;;  %4534 = vadd.xlane.f32.xlu0 %v4514_v3  ;;  %v7054_v26 = vld [vmem:[%s7983_s19] ss:$8 sps:$4 sm:$0xff]  }
0x1224   : > { %v9771_v17 = vsub.f32 %v9703_v47, %v4485_v14  ;;  %4536 = vadd.xlane.f32.xlu1 %v4515_v34  ;;  %4928 = vmatpush1.bf16.msra.mxu0 %v7054_v26  ;;  %v7057_v47 = vld [vmem:[%s7983_s19 + $0x10] ss:$8 sps:$4 sm:$0xff]   ;;  %v7079_v3 = vld [vmem:[%s7993_s0] sm:$0xff]   ;;  %v7080_v14 = vld [vmem:[%s7993_s0 + $0x48] sm:$0xff]   ;;  %s10497_s19 = sld [smem:[#allocation45_spill]] }
0x1225   : > { %v4516_v46 = vmul.f32 %v9768_v51, %v9768_v51  ;;  %4929 = vmatprep.subr.bf16.mxu0 %v7059_v43 }
0x1226   : > { %v4517_v33 = vmul.f32 %v9771_v17, %v9771_v17 }
0x1227   : > { %4538 = vadd.xlane.f32.xlu0 %v4516_v46 }
0x1228   : > { %4540 = vadd.xlane.f32.xlu1 %v4517_v33  ;;  %4930 = vmatpush1.bf16.msra.mxu0 %v7057_v47  ;;  %v7081_v33 = vld [vmem:[%s7993_s0 + $0x8] sm:$0xff]  }
0x1229   : > { %4931 = vmatprep.subr.bf16.mxu0 %v7062_v39 }
0x122a   : > { %s10293_s26 = scalar_lea.hbm %s10497_s19, %s6224_s6 }
0x122c   : > { %4932 = vmatpush1.bf16.msra.mxu0 %v7060_v61 }
0x122d   : > { %4933 = vmatprep.subr.bf16.mxu0 %v7065_v5 }
0x1230   : > { %4934 = vmatpush1.bf16.msra.mxu0 %v7063_v23 }
0x1231   : > { %4935 = vmatprep.subr.bf16.mxu0 %v7068_v31 }
0x1234   : > { %4936 = vmatpush1.bf16.msra.mxu0 %v7066_v62 }
0x1235   : > { %4937 = vmatprep.subr.bf16.mxu0 %v7071_v9 }
0x1238   : > { %4938 = vmatpush1.bf16.msra.mxu0 %v7069_v41 }
0x1239   : > { %4939 = vmatprep.subr.bf16.mxu0 %v7074_v0 }
0x123c   : > { %4940 = vmatpush1.bf16.msra.mxu0 %v7072_v25 }
0x123d   : > { %4941 = vmatprep.subr.bf16.mxu0 %v7077_v63 }
0x1240   : > { %4942 = vmatpush1.bf16.msra.mxu0 %v7075_v6 }
0x124c   : > { %v4463_v15 = vpop.xlane.xlu0 %4462 }
0x124d   : > { %v4486_v50 = vmul.f32 0.0078125, %v4463_v15 }
0x124e   : > { %v4465_v21 = vpop.xlane.xlu1 %4464 }
0x124f   : > { %v9794_v48 = vsub.f32 %v9708_v56, %v4486_v50  ;;  %v4487_v38 = vmul.f32 0.0078125, %v4465_v21 }
0x1250   : > { %v4467_v35 = vpop.xlane.xlu0 %4466 }
0x1251   : > { %v9797_v30 = vsub.f32 %v9711_v10, %v4487_v38  ;;  %v4488_v20 = vmul.f32 0.0078125, %v4467_v35  ;;  %v4518_v54 = vmul.f32 %v9794_v48, %v9794_v48 }
0x1252   : > { %v4469_v27 = vpop.xlane.xlu1 %4468 }
0x1253   : > { %v9802_v7 = vsub.f32 %v9715_v12, %v4488_v20  ;;  %v4489_v11 = vmul.f32 0.0078125, %v4469_v27  ;;  %4542 = vadd.xlane.f32.xlu0 %v4518_v54  ;;  %v4519_v45 = vmul.f32 %v9797_v30, %v9797_v30 }
0x1254   : > { %v4471_v56 = vpop.xlane.xlu0 %4470 }
0x1255   : > { %v9807_v55 = vsub.f32 %v9719_v60, %v4489_v11  ;;  %v4490_v18 = vmul.f32 0.0078125, %v4471_v56  ;;  %4544 = vadd.xlane.f32.xlu1 %v4519_v45  ;;  %v4520_v10 = vmul.f32 %v9802_v7, %v9802_v7 }
0x1256   : > { %v4473_v22 = vpop.xlane.xlu1 %4472 }
0x1257   : > { %v9812_v24 = vsub.f32 %v9723_v13, %v4490_v18  ;;  %v4491_v12 = vmul.f32 0.0078125, %v4473_v22  ;;  %4546 = vadd.xlane.f32.xlu0 %v4520_v10  ;;  %v4521_v16 = vmul.f32 %v9807_v55, %v9807_v55 }
0x1258   : > { %v4475_v53 = vpop.xlane.xlu0 %4474 }
0x1259   : > { %v9817_v4 = vsub.f32 %v9727_v8, %v4491_v12  ;;  %v4492_v60 = vmul.f32 0.0078125, %v4475_v53  ;;  %4548 = vadd.xlane.f32.xlu1 %v4521_v16  ;;  %v4522_v52 = vmul.f32 %v9812_v24, %v9812_v24 }
0x125a   : > { %v4477_v49 = vpop.xlane.xlu1 %4476 }
0x125b   : > { %v9822_v13 = vsub.f32 %v9731_v58, %v4492_v60  ;;  %v4493_v2 = vmul.f32 0.0078125, %v4477_v49  ;;  %4550 = vadd.xlane.f32.xlu0 %v4522_v52  ;;  %v4523_v29 = vmul.f32 %v9817_v4, %v9817_v4  ;;  %v7078_v58 = vld [vmem:[%s7993_s0 + $0x40] sm:$0xff]  }
0x125c   : > { %6417 = vmatprep.subr.bf16.mxu1 %v7078_v58 }
0x125d   : > { %v9827_v8 = vsub.f32 %v9735_v37, %v4493_v2  ;;  %4552 = vadd.xlane.f32.xlu1 %v4523_v29  ;;  %v4524_v19 = vmul.f32 %v9822_v13, %v9822_v13  ;;  %6418 = vmatpush3.bf16.msra.mxu1 %v7079_v3 }
0x125e   : > { %6419 = vmatprep.subr.bf16.mxu1 %v7080_v14 }
0x125f   : > { %4554 = vadd.xlane.f32.xlu0 %v4524_v19  ;;  %v4525_v44 = vmul.f32 %v9827_v8, %v9827_v8 }
0x1261   : > { %4556 = vadd.xlane.f32.xlu1 %v4525_v44  ;;  %6420 = vmatpush3.bf16.msra.mxu1 %v7081_v33 }
0x12a4   : > { %v4527_v34 = vpop.xlane.xlu0 %4526 }
0x12a5   : > { %v4558_v46 = vmul.f32 0.007874016, %v4527_v34 }
0x12a6   : > { %v4529_v36 = vpop.xlane.xlu1 %4528 }
0x12a7   : > { %7414 = vrsqrt.f32 %v4558_v46  ;;  %v4559_v37 = vmul.f32 0.007874016, %v4529_v36  ;;  %vm4576_vm0 = vcmp.eq.f32.partialorder %v4558_v46, inf  ;;  %v4579_v41 = vand.u32 2147483648, %v4558_v46 }
0x12a8   : > { %v4531_v26 = vpop.xlane.xlu0 %4530  ;;  %vm4578_vm3 = vcmp.eq.f32.partialorder %v4558_v46, 0.0 }
0x12a9   : > { %v4560_v43 = vmul.f32 0.007874016, %v4531_v26  ;;  %7416 = vrsqrt.f32 %v4559_v37  ;;  %vm4583_vm4 = vcmp.eq.f32.partialorder %v4559_v37, inf  ;;  %vm4585_vm5 = vcmp.eq.f32.partialorder %v4559_v37, 0.0 }
0x12aa   : > { %v4586_v20 = vand.u32 2147483648, %v4559_v37 }
0x12ab   : > { %7418 = vrsqrt.f32 %v4560_v43  ;;  %vm4590_vm6 = vcmp.eq.f32.partialorder %v4560_v43, inf  ;;  %v4593_v45 = vand.u32 2147483648, %v4560_v43  ;;  %vm4592_vm7 = vcmp.eq.f32.partialorder %v4560_v43, 0.0 }
0x12ac   : > { %v4533_v47 = vpop.xlane.xlu1 %4532 }
0x12ad   : > { %v4561_v39 = vmul.f32 0.007874016, %v4533_v47 }
0x12af   : > { %7420 = vrsqrt.f32 %v4561_v39  ;;  %vm4597_vm8 = vcmp.eq.f32.partialorder %v4561_v39, inf  ;;  %v4600_v60 = vand.u32 2147483648, %v4561_v39  ;;  %vm4599_vm9 = vcmp.eq.f32.partialorder %v4561_v39, 0.0 }
0x12b0   : > { %v4535_v61 = vpop.xlane.xlu0 %4534 }
0x12b1   : > { %v7415_v5 = vpop.eup %7414  ;;  %v4562_v23 = vmul.f32 0.007874016, %v4535_v61  ;;  %v4537_v31 = vpop.xlane.xlu1 %4536 }
0x12b2   : > { %v4575_v62 = vmul.f32 %v7415_v5, %v4558_v46  ;;  %v4563_v9 = vmul.f32 0.007874016, %v4537_v31 }
0x12b3   : > { %7422 = vrsqrt.f32 %v4562_v23  ;;  %v7417_v0 = vpop.eup %7416  ;;  %vm4604_vm10 = vcmp.eq.f32.partialorder %v4562_v23, inf  ;;  %vm4606_vm11 = vcmp.eq.f32.partialorder %v4562_v23, 0.0  ;;  %v4607_v58 = vand.u32 2147483648, %v4562_v23 }
0x12b4   : > { %v4577_v25 = vsel %vm4576_vm0, %v4558_v46, %v4575_v62  ;;  %7424 = vrsqrt.f32 %v4563_v9  ;;  %v4539_v6 = vpop.xlane.xlu0 %4538  ;;  %v4582_v50 = vmul.f32 %v7417_v0, %v4559_v37  ;;  %vm4611_vm12 = vcmp.eq.f32.partialorder %v4563_v9, inf }
0x12b5   : > { %v7419_v63 = vpop.eup %7418  ;;  %v4580_v15 = vsel %vm4578_vm3, %v4579_v41, %v4577_v25  ;;  %v4564_v21 = vmul.f32 0.007874016, %v4539_v6  ;;  %v4541_v38 = vpop.xlane.xlu1 %4540  ;;  %v4614_v34 = vand.u32 2147483648, %v4563_v9  ;;  %vm4613_vm13 = vcmp.eq.f32.partialorder %v4563_v9, 0.0 }
0x12b6   : > { %v4686_v35 = vadd.f32 1e-05, %v4580_v15  ;;  %v4589_v54 = vmul.f32 %v7419_v63, %v4560_v43  ;;  %v9837_v27 = vmul.f32 0.007874016, %v4541_v38  ;;  %v4584_v11 = vsel %vm4583_vm4, %v4559_v37, %v4582_v50  ;;  %v9860_v38 = vld [vmem:[%s10486_s30] ss:$0 sm:$0xff] }
0x12b7   : > { %7426 = vrsqrt.f32 %v4564_v21  ;;  %v4587_v56 = vsel %vm4585_vm5, %v4586_v20, %v4584_v11  ;;  %vm4618_vm14 = vcmp.eq.f32.partialorder %v4564_v21, inf  ;;  %vm4620_vm15 = vcmp.eq.f32.partialorder %v4564_v21, 0.0  ;;  %s7720_s30 = smov [#allocation2]  }
0x12b8   : > { %7428 = vrcp.f32 %v4686_v35  ;;  %v4591_v18 = vsel %vm4590_vm6, %v4560_v43, %v4589_v54  ;;  %v4687_v22 = vadd.f32 1e-05, %v4587_v56  ;;  %v4621_v5 = vand.u32 2147483648, %v4564_v21 }
0x12b9   : > { %v7421_v10 = vpop.eup %7420  ;;  %v4594_v12 = vsel %vm4592_vm7, %v4593_v45, %v4591_v18  ;;  %7430 = vrsqrt.f32 %v9837_v27  ;;  %vm4625_vm1 = vcmp.eq.f32.partialorder %v9837_v27, inf  ;;  %vm4627_vm2 = vcmp.eq.f32.partialorder %v9837_v27, 0.0 }
0x12ba   : > { %v4688_v16 = vadd.f32 1e-05, %v4594_v12  ;;  %v4596_v53 = vmul.f32 %v7421_v10, %v4561_v39  ;;  %7432 = vrcp.f32 %v4687_v22  ;;  %v4628_v25 = vand.u32 2147483648, %v9837_v27 }
0x12bc   : > { %v4598_v52 = vsel %vm4597_vm8, %v4561_v39, %v4596_v53  ;;  %7434 = vrcp.f32 %v4688_v16 }
0x12bd   : > { %v7423_v49 = vpop.eup %7422  ;;  %v4601_v2 = vsel %vm4599_vm9, %v4600_v60, %v4598_v52 }
0x12be   : > { %v7425_v29 = vpop.eup %7424  ;;  %v4689_v19 = vadd.f32 1e-05, %v4601_v2  ;;  %v4603_v44 = vmul.f32 %v7423_v49, %v4562_v23 }
0x12bf   : > { %v4610_v3 = vmul.f32 %v7425_v29, %v4563_v9 }
0x12c0   : > { %v4605_v14 = vsel %vm4604_vm10, %v4562_v23, %v4603_v44  ;;  %7436 = vrcp.f32 %v4689_v19  ;;  %v9845_v23 = vld [vmem:[%s10485_s17] ss:$0 sm:$0xff]  ;;  %s10498_s17 = sand.u32 1, %s10495_s25  }
0x12c1   : > { %v7427_v46 = vpop.eup %7426  ;;  %v4608_v33 = vsel %vm4606_vm11, %v4607_v58, %v4605_v14  ;;  %v4612_v36 = vsel %vm4611_vm12, %v4563_v9, %v4610_v3  ;;  %s10301_s16 = scalar_lea.sflag [#allocation3], %s10498_s17 }
0x12c2   : > { %v7429_v37 = vpop.eup %7428  ;;  %v4690_v26 = vadd.f32 1e-05, %v4608_v33  ;;  %v4615_v43 = vsel %vm4613_vm13, %v4614_v34, %v4612_v36  ;;  %v4617_v47 = vmul.f32 %v7427_v46, %v4564_v21 }
0x12c3   : > { %v7431_v39 = vpop.eup %7430  ;;  %v4691_v61 = vadd.f32 1e-05, %v4615_v43  ;;  %v4703_v31 = vmul.f32 %v7429_v37, %v9739_v57 }
0x12c4   : > { %v4619_v62 = vsel %vm4618_vm14, %v4564_v21, %v4617_v47  ;;  %v4624_v9 = vmul.f32 %v7431_v39, %v9837_v27  ;;  %7438 = vrcp.f32 %v4690_v26  ;;  %v7433_v41 = vpop.eup %7432 }
0x12c5   : > { %v4622_v0 = vsel %vm4620_vm15, %v4621_v5, %v4619_v62  ;;  %7440 = vrcp.f32 %v4691_v61  ;;  %v4705_v15 = vmul.f32 %v7433_v41, %v9741_v40  ;;  %v4740_v57 = vmul.f32 %v9845_v23, %v4703_v31 }
0x12c6   : > { %v4692_v6 = vadd.f32 1e-05, %v4622_v0  ;;  %v4626_v63 = vsel %vm4625_vm1, %v9837_v27, %v4624_v9  ;;  %v7435_v50 = vpop.eup %7434 }
0x12c7   : > { %v4629_v21 = vsel %vm4627_vm2, %v4628_v25, %v4626_v63  ;;  %v4741_v20 = vmul.f32 %v9845_v23, %v4705_v15  ;;  %v9864_v11 = vadd.f32 %v9860_v38, %v4740_v57  ;;  %v4707_v40 = vmul.f32 %v7435_v50, %v9746_v32 }
0x12c8   : > { %v4693_v35 = vadd.f32 1e-05, %v4629_v21  ;;  %7442 = vrcp.f32 %v4692_v6 }
0x12c9   : > { %v9867_v27 = vadd.f32 %v9860_v38, %v4741_v20  ;;  %v4742_v22 = vmul.f32 %v9845_v23, %v4707_v40 }
0x12ca   : > { %v7437_v54 = vpop.eup %7436  ;;  %7444 = vrcp.f32 %v4693_v35 }
0x12cb   : > { %v4709_v45 = vmul.f32 %v7437_v54, %v9753_v1  ;;  %v4828_v56 = vpack.c.bf16 %v9867_v27, %v9864_v11  ;;  %v9882_v53 = vadd.f32 %v9860_v38, %v4742_v22 }
0x12cd   : > { %v4743_v18 = vmul.f32 %v9845_v23, %v4709_v45  ;;  %4960 = vmatmul.mubr.bf16.vlgmr.msra.gmra.mrb[128].mxu0 %v4828_v56 }
0x12ce   : > { %v7439_v10 = vpop.eup %7438  ;;  %4969 = vmatprep.mubr.bf16.mxu0 %v10470_v42 }
0x12cf   : > { %v7441_v12 = vpop.eup %7440  ;;  %v9877_v16 = vadd.f32 %v9860_v38, %v4743_v18  ;;  %v4711_v32 = vmul.f32 %v7439_v10, %v9758_v28 }
0x12d0   : > { %v4713_v1 = vmul.f32 %v7441_v12, %v9761_v59 }
0x12d1   : > { %v4829_v52 = vpack.c.bf16 %v9877_v16, %v9882_v53  ;;  %v4744_v49 = vmul.f32 %v9845_v23, %v4711_v32 }
0x12d2   : > { %v7443_v60 = vpop.eup %7442  ;;  %v4745_v2 = vmul.f32 %v9845_v23, %v4713_v1 }
0x12d3   : > { %v9890_v19 = vadd.f32 %v9860_v38, %v4744_v49  ;;  %v4715_v59 = vmul.f32 %v7443_v60, %v9768_v51 }
0x12d4   : > { %v7445_v29 = vpop.eup %7444  ;;  %v9893_v28 = vadd.f32 %v9860_v38, %v4745_v2 }
0x12d5   : > { %4970 = vmatmul.mubr.bf16.gmra.mrb[132].mxu0 %v4829_v52  ;;  %v4717_v44 = vmul.f32 %v7445_v29, %v9771_v17  ;;  %v4746_v3 = vmul.f32 %v9845_v23, %v4715_v59 }
0x12d6   : > { %4979 = vmatprep.mubr.bf16.mxu0 %v10470_v42  ;;  %v4830_v58 = vpack.c.bf16 %v9893_v28, %v9890_v19 }
0x12d7   : > { %v4747_v14 = vmul.f32 %v9845_v23, %v4717_v44  ;;  %v9903_v46 = vadd.f32 %v9860_v38, %v4746_v3 }
0x12d9   : > { %v9906_v33 = vadd.f32 %v9860_v38, %v4747_v14 }
0x12db   : > { %v4831_v26 = vpack.c.bf16 %v9906_v33, %v9903_v46 }
0x12dd   : > { %4980 = vmatmul.mubr.bf16.gmra.mrb[136].mxu0 %v4830_v58 }
0x12de   : > { %4989 = vmatprep.mubr.bf16.mxu0 %v10470_v42 }
0x12e0   : > { %v4543_v34 = vpop.xlane.xlu0 %4542 }
0x12e1   : > { %v4566_v51 = vmul.f32 0.007874016, %v4543_v34 }
0x12e2   : > { %v4545_v36 = vpop.xlane.xlu1 %4544 }
0x12e3   : > { %7446 = vrsqrt.f32 %v4566_v51  ;;  %v4567_v17 = vmul.f32 0.007874016, %v4545_v36  ;;  %vm4632_vm0 = vcmp.eq.f32.partialorder %v4566_v51, inf  ;;  %v4635_v63 = vand.u32 2147483648, %v4566_v51 }
0x12e4   : > { %v4547_v37 = vpop.xlane.xlu0 %4546  ;;  %vm4634_vm3 = vcmp.eq.f32.partialorder %v4566_v51, 0.0 }
0x12e5   : > { %v4568_v43 = vmul.f32 0.007874016, %v4547_v37  ;;  %7448 = vrsqrt.f32 %v4567_v17  ;;  %4990 = vmatmul.mubr.bf16.gmra.mrb[140].mxu0 %v4831_v26  ;;  %vm4639_vm4 = vcmp.eq.f32.partialorder %v4567_v17, inf  ;;  %v4642_v40 = vand.u32 2147483648, %v4567_v17 }
0x12e6   : > { %v4549_v47 = vpop.xlane.xlu1 %4548  ;;  %4999 = vmatprep.mubr.bf16.mxu0 %v10470_v42  ;;  %vm4641_vm5 = vcmp.eq.f32.partialorder %v4567_v17, 0.0 }
0x12e7   : > { %7450 = vrsqrt.f32 %v4568_v43  ;;  %v4569_v39 = vmul.f32 0.007874016, %v4549_v47  ;;  %vm4646_vm6 = vcmp.eq.f32.partialorder %v4568_v43, inf  ;;  %v4649_v18 = vand.u32 2147483648, %v4568_v43 }
0x12e8   : > { %v4551_v61 = vpop.xlane.xlu0 %4550  ;;  %vm4648_vm7 = vcmp.eq.f32.partialorder %v4568_v43, 0.0 }
0x12e9   : > { %v4570_v5 = vmul.f32 0.007874016, %v4551_v61  ;;  %7452 = vrsqrt.f32 %v4569_v39  ;;  %vm4653_vm8 = vcmp.eq.f32.partialorder %v4569_v39, inf  ;;  %v4656_v2 = vand.u32 2147483648, %v4569_v39 }
0x12ea   : > { %v4553_v31 = vpop.xlane.xlu1 %4552  ;;  %vm4655_vm9 = vcmp.eq.f32.partialorder %v4569_v39, 0.0 }
0x12eb   : > { %7454 = vrsqrt.f32 %v4570_v5  ;;  %v4571_v62 = vmul.f32 0.007874016, %v4553_v31  ;;  %vm4660_vm10 = vcmp.eq.f32.partialorder %v4570_v5, inf  ;;  %v4663_v14 = vand.u32 2147483648, %v4570_v5 }
0x12ec   : > { %v4555_v9 = vpop.xlane.xlu0 %4554  ;;  %vm4662_vm11 = vcmp.eq.f32.partialorder %v4570_v5, 0.0 }
0x12ed   : > { %v7447_v41 = vpop.eup %7446  ;;  %v9911_v0 = vmul.f32 0.007874016, %v4555_v9  ;;  %7456 = vrsqrt.f32 %v4571_v62  ;;  %vm4667_vm12 = vcmp.eq.f32.partialorder %v4571_v62, inf  ;;  %v4670_v37 = vand.u32 2147483648, %v4571_v62 }
0x12ee   : > { %v4631_v25 = vmul.f32 %v7447_v41, %v4566_v51  ;;  %v4557_v6 = vpop.xlane.xlu1 %4556  ;;  %vm4669_vm13 = vcmp.eq.f32.partialorder %v4571_v62, 0.0 }
0x12ef   : > { %7458 = vrsqrt.f32 %v9911_v0  ;;  %v7449_v15 = vpop.eup %7448  ;;  %v9914_v50 = vmul.f32 0.007874016, %v4557_v6  ;;  %vm4674_vm14 = vcmp.eq.f32.partialorder %v9911_v0, inf  ;;  %vm4676_vm2 = vcmp.eq.f32.partialorder %v9911_v0, 0.0 }
0x12f0   : > { %v4633_v57 = vsel %vm4632_vm0, %v4566_v51, %v4631_v25  ;;  %v4638_v20 = vmul.f32 %v7449_v15, %v4567_v17 }
0x12f1   : > { %v7451_v21 = vpop.eup %7450  ;;  %v4636_v35 = vsel %vm4634_vm3, %v4635_v63, %v4633_v57  ;;  %7460 = vrsqrt.f32 %v9914_v50  ;;  %vm4681_vm15 = vcmp.eq.f32.partialorder %v9914_v50, inf  ;;  %vm4683_vm1 = vcmp.eq.f32.partialorder %v9914_v50, 0.0 }
0x12f2   : > { %v4694_v54 = vadd.f32 1e-05, %v4636_v35  ;;  %v4645_v45 = vmul.f32 %v7451_v21, %v4568_v43  ;;  %v4640_v56 = vsel %vm4639_vm4, %v4567_v17, %v4638_v20  ;;  %v4677_v63 = vand.u32 2147483648, %v9911_v0 }
0x12f3   : > { %v7453_v10 = vpop.eup %7452  ;;  %v4643_v22 = vsel %vm4641_vm5, %v4642_v40, %v4640_v56 }
0x12f4   : > { %v4647_v12 = vsel %vm4646_vm6, %v4568_v43, %v4645_v45  ;;  %7462 = vrcp.f32 %v4694_v54  ;;  %v4695_v1 = vadd.f32 1e-05, %v4643_v22  ;;  %v4652_v52 = vmul.f32 %v7453_v10, %v4569_v39 }
0x12f5   : > { %v7455_v32 = vpop.eup %7454  ;;  %v4650_v60 = vsel %vm4648_vm7, %v4649_v18, %v4647_v12 }
0x12f6   : > { %v4696_v49 = vadd.f32 1e-05, %v4650_v60  ;;  %v4659_v29 = vmul.f32 %v7455_v32, %v4570_v5  ;;  %v4654_v59 = vsel %vm4653_vm8, %v4569_v39, %v4652_v52  ;;  %7464 = vrcp.f32 %v4695_v1 }
0x12f7   : > { %v7457_v44 = vpop.eup %7456  ;;  %v4657_v58 = vsel %vm4655_vm9, %v4656_v2, %v4654_v59 }
0x12f8   : > { %v4661_v3 = vsel %vm4660_vm10, %v4570_v5, %v4659_v29  ;;  %v4697_v51 = vadd.f32 1e-05, %v4657_v58  ;;  %v4666_v36 = vmul.f32 %v7457_v44, %v4571_v62  ;;  %7466 = vrcp.f32 %v4696_v49 }
0x12f9   : > { %v7459_v34 = vpop.eup %7458  ;;  %v4664_v17 = vsel %vm4662_vm11, %v4663_v14, %v4661_v3  ;;  %v4684_v5 = vand.u32 2147483648, %v9914_v50 }
0x12fa   : > { %v4668_v26 = vsel %vm4667_vm12, %v4571_v62, %v4666_v36  ;;  %v4673_v43 = vmul.f32 %v7459_v34, %v9911_v0  ;;  %7468 = vrcp.f32 %v4697_v51  ;;  %v4698_v61 = vadd.f32 1e-05, %v4664_v17  ;;  %v7082_v17 = vld [vmem:[%s7993_s0 + $0x50] sm:$0xff]  }
0x12fb   : > { %v7461_v47 = vpop.eup %7460  ;;  %v4671_v39 = vsel %vm4669_vm13, %v4670_v37, %v4668_v26  ;;  %v7083_v37 = vld [vmem:[%s7993_s0 + $0x10] sm:$0xff]   ;;  %6421 = vmatprep.subr.bf16.mxu1 %v7082_v17  ;;  %v7086_v26 = vld [vmem:[%s7993_s0 + $0x60] sm:$0xff]  }
0x12fc   : > { %v4699_v31 = vadd.f32 1e-05, %v4671_v39  ;;  %v4680_v9 = vmul.f32 %v7461_v47, %v9914_v50  ;;  %v4675_v62 = vsel %vm4674_vm14, %v9911_v0, %v4673_v43  ;;  %6422 = vmatpush3.bf16.msra.mxu1 %v7083_v37  ;;  %v7088_v43 = vld [vmem:[%s7993_s0 + $0x68] sm:$0xff]   ;;  %v7090_v39 = vld [vmem:[%s7993_s0 + $0x70] sm:$0xff]  }
0x12fd   : > { %v4678_v21 = vsel %vm4676_vm2, %v4677_v63, %v4675_v62  ;;  %v7089_v47 = vld [vmem:[%s7993_s0 + $0x28] sm:$0xff]  }
0x12fe   : > { %v7463_v41 = vpop.eup %7462  ;;  %v4682_v25 = vsel %vm4681_vm15, %v9914_v50, %v4680_v9  ;;  %7470 = vrcp.f32 %v4699_v31  ;;  %v4700_v56 = vadd.f32 1e-05, %v4678_v21  ;;  %v7092_v31 = vld [vmem:[%s7993_s0 + $0x78] sm:$0xff]  }
0x12ff   : > { %v4719_v6 = vmul.f32 %v7463_v41, %v9794_v48  ;;  %v4685_v15 = vsel %vm4683_vm1, %v4684_v5, %v4682_v25  ;;  %7472 = vrcp.f32 %v4698_v61  ;;  %v7091_v61 = vld [vmem:[%s7993_s0 + $0x30] sm:$0xff]   ;;  %v7093_v9 = vld [vmem:[%s7993_s0 + $0x38] sm:$0xff]   ;;  %v4794_v41 = vld [vmem:[%s7988_s7] sm:$0x3]  ;;  %s7626_s7 = sshll.u32 %s7720_s30, 4  ;;  %s7627_s7 = int_to_ptr.vmem [resolvable:$false] %s7626_s7 }
0x1300   : > { %v7465_v57 = vpop.eup %7464  ;;  %v4701_v40 = vadd.f32 1e-05, %v4685_v15  ;;  %v10487_v5 = vld [vmem:[#allocation21_spill] sm:$0xff]  ;;  %v10488_v25 = vld [vmem:[#allocation22_spill] sm:$0xff]  ;;  %p7629_p5 = scmp.lt.s32.totalorder %s10295_s20, %s7627_s7 }
0x1301   : > { %v4721_v35 = vmul.f32 %v7465_v57, %v9797_v30  ;;  %v4748_v20 = vmul.f32 %v9845_v23, %v4719_v6  ;;  %v9992_v62 = vrot.slane %v4794_v41, %v10487_v5  ;;  %v9995_v6 = vrot.slane %v4794_v41, %v10488_v25 }
0x1302   : > { %v7467_v54 = vpop.eup %7466  ;;  %7474 = vrcp.f32 %v4701_v40 }
0x1303   : > { %v4749_v45 = vmul.f32 %v9845_v23, %v4721_v35  ;;  %v9932_v48 = vadd.f32 %v9860_v38, %v4748_v20  ;;  %v4723_v0 = vmul.f32 %v7467_v54, %v9802_v7  ;;  %7476 = vrcp.f32 %v4700_v56 }
0x1304   : > { %v7469_v50 = vpop.eup %7468 }
0x1305   : > { %v9935_v18 = vadd.f32 %v9860_v38, %v4749_v45  ;;  %v4725_v10 = vmul.f32 %v7469_v50, %v9807_v55  ;;  %v4750_v32 = vmul.f32 %v9845_v23, %v4723_v0 }
0x1307   : > { %v4832_v30 = vpack.c.bf16 %v9935_v18, %v9932_v48  ;;  %v4751_v22 = vmul.f32 %v9845_v23, %v4725_v10  ;;  %v9949_v55 = vadd.f32 %v9860_v38, %v4750_v32 }
0x1308   : > { %v7471_v12 = vpop.eup %7470 }
0x1309   : > { %5000 = vmatmul.mubr.bf16.gmra.mrb[144].mxu0 %v4832_v30  ;;  %v7473_v1 = vpop.eup %7472  ;;  %v9945_v60 = vadd.f32 %v9860_v38, %v4751_v22  ;;  %v4729_v7 = vmul.f32 %v7471_v12, %v9817_v4 }
0x130a   : > { %5009 = vmatprep.mubr.bf16.mxu0 %v10470_v42  ;;  %v4727_v52 = vmul.f32 %v7473_v1, %v9812_v24 }
0x130b   : > { %v4833_v49 = vpack.c.bf16 %v9945_v60, %v9949_v55  ;;  %v4753_v2 = vmul.f32 %v9845_v23, %v4729_v7 }
0x130c   : > { %v7475_v29 = vpop.eup %7474  ;;  %v4752_v59 = vmul.f32 %v9845_v23, %v4727_v52 }
0x130d   : > { %v7477_v44 = vpop.eup %7476  ;;  %v9958_v4 = vadd.f32 %v9860_v38, %v4753_v2  ;;  %v4733_v58 = vmul.f32 %v7475_v29, %v9827_v8 }
0x130e   : > { %v9962_v24 = vadd.f32 %v9860_v38, %v4752_v59  ;;  %v4731_v3 = vmul.f32 %v7477_v44, %v9822_v13 }
0x130f   : > { %v4755_v34 = vmul.f32 %v9845_v23, %v4733_v58 }
0x1310   : > { %v4834_v14 = vpack.c.bf16 %v9958_v4, %v9962_v24  ;;  %v4754_v51 = vmul.f32 %v9845_v23, %v4731_v3  ;;  %v7084_v23 = vld [vmem:[%s7993_s0 + $0x58] sm:$0xff]  }
0x1311   : > { %5010 = vmatmul.mubr.bf16.gmra.mrb[148].mxu0 %v4833_v49  ;;  %v9971_v8 = vadd.f32 %v9860_v38, %v4755_v34  ;;  %6423 = vmatprep.subr.bf16.mxu1 %v7084_v23 }
0x1312   : > { %5019 = vmatprep.mubr.bf16.mxu0 %v10470_v42  ;;  %v9974_v36 = vadd.f32 %v9860_v38, %v4754_v51  ;;  %v7087_v38 = vld [vmem:[%s7993_s0 + $0x20] sm:$0xff]  }
0x1314   : > { %v4835_v13 = vpack.c.bf16 %v9971_v8, %v9974_v36 }
0x1319   : > { %5020 = vmatmul.mubr.bf16.gmra.mrb[152].mxu0 %v4834_v14 }
0x131a   : > { %5029 = vmatprep.mubr.bf16.mxu0 %v10470_v42  ;;  %v7085_v42 = vld [vmem:[%s7993_s0 + $0x18] sm:$0xff]   ;;  %s7628_s0 = scalar_lea.vmem %s7627_s7, 4096 }
0x131b   : > { %6424 = vmatpush3.bf16.msra.mxu1 %v7085_v42  ;;  %p7630_p6 = scmp.lt.s32.totalorder %s7628_s0, %s7622_s28 }
0x131c   : > { %6425 = vmatprep.subr.bf16.mxu1 %v7086_v26 }
0x131d   : > { %p7631_p7 = por %p7630_p6, %p7629_p5 }
0x131f   : > { %6426 = vmatpush3.bf16.msra.mxu1 %v7087_v38  ;;  %p7632_p8 = pnand %p7631_p7, %p7625_p4 }
0x1320   : > { %6427 = vmatprep.subr.bf16.mxu1 %v7088_v43 }
0x1321   : > { %5030 = vmatmul.mubr.bf16.gmra.mrb[156].mxu0 %v4835_v13 }
0x1323   : > { %6428 = vmatpush3.bf16.msra.mxu1 %v7089_v47 }
0x1324   : > { %6429 = vmatprep.subr.bf16.mxu1 %v7090_v39 }
0x1327   : > { %6430 = vmatpush3.bf16.msra.mxu1 %v7091_v61 }
0x1328   : > { %6431 = vmatprep.subr.bf16.mxu1 %v7092_v31 }
0x132b   : > { %6432 = vmatpush3.bf16.msra.mxu1 %v7093_v9 }
0x13a0   : > { %v4961_v63 = vpop.f32.mrb[128].mxu0 }
0x13a1   : > { %v4962_v15 = vadd.f32 %v4961_v63, %v9992_v62  ;;  %v4963_v57 = vpop.f32.mrb[129].mxu0 }
0x13a2   : > { %v4964_v21 = vadd.f32 %v4963_v57, %v9995_v6  ;;  %v4965_v35 = vpop.f32.mrb[130].mxu0 }
0x13a3   : > { %v5072_v20 = vmul.f32 0.70710677, %v4962_v15  ;;  %v4966_v54 = vadd.f32 %v4965_v35, %v9992_v62  ;;  %v4967_v40 = vpop.f32.mrb[131].mxu0  ;;  %v5040_v23 = vmul.f32 0.5, %v4962_v15 }
0x13a4   : > { %v5073_v45 = vmul.f32 0.70710677, %v4964_v21  ;;  %v4968_v50 = vadd.f32 %v4967_v40, %v9995_v6  ;;  %v5041_v47 = vmul.f32 0.5, %v4964_v21 }
0x13a5   : > { %7478 = verf.f32 %v5072_v20  ;;  %v5074_v56 = vmul.f32 0.70710677, %v4966_v54  ;;  %v5042_v42 = vmul.f32 0.5, %v4966_v54 }
0x13a6   : > { %7480 = verf.f32 %v5073_v45  ;;  %v5075_v0 = vmul.f32 0.70710677, %v4968_v50  ;;  %v5043_v39 = vmul.f32 0.5, %v4968_v50 }
0x13a7   : > { %7482 = verf.f32 %v5074_v56 }
0x13a8   : > { %7484 = verf.f32 %v5075_v0  ;;  %v4971_v10 = vpop.f32.mrb[132].mxu0 }
0x13a9   : > { %v4972_v30 = vadd.f32 %v4971_v10, %v9992_v62  ;;  %v4973_v22 = vpop.f32.mrb[133].mxu0 }
0x13aa   : > { %v4974_v12 = vadd.f32 %v4973_v22, %v9995_v6  ;;  %v4975_v32 = vpop.f32.mrb[134].mxu0 }
0x13ab   : > { %v5076_v1 = vmul.f32 0.70710677, %v4972_v30  ;;  %v4976_v7 = vadd.f32 %v4975_v32, %v9992_v62  ;;  %v4977_v52 = vpop.f32.mrb[135].mxu0 }
0x13ac   : > { %v5077_v49 = vmul.f32 0.70710677, %v4974_v12  ;;  %v4978_v2 = vadd.f32 %v4977_v52, %v9995_v6 }
0x13ad   : > { %7486 = verf.f32 %v5076_v1  ;;  %v5078_v29 = vmul.f32 0.70710677, %v4976_v7 }
0x13ae   : > { %7488 = verf.f32 %v5077_v49  ;;  %v5079_v59 = vmul.f32 0.70710677, %v4978_v2  ;;  %v5044_v49 = vmul.f32 0.5, %v4972_v30 }
0x13af   : > { %v7479_v44 = vpop.eup %7478  ;;  %7490 = verf.f32 %v5078_v29  ;;  %v5046_v29 = vmul.f32 0.5, %v4976_v7 }
0x13b0   : > { %v7481_v58 = vpop.eup %7480  ;;  %v5136_v3 = vadd.f32 1.0, %v7479_v44  ;;  %7492 = verf.f32 %v5079_v59  ;;  %v4981_v14 = vpop.f32.mrb[136].mxu0 }
0x13b1   : > { %v7483_v34 = vpop.eup %7482  ;;  %v5137_v51 = vadd.f32 1.0, %v7481_v58  ;;  %v10006_v13 = vadd.f32 %v4981_v14, %v9992_v62  ;;  %v4983_v17 = vpop.f32.mrb[137].mxu0  ;;  %v5047_v14 = vmul.f32 0.5, %v4978_v2 }
0x13b2   : > { %v7485_v37 = vpop.eup %7484  ;;  %v5138_v26 = vadd.f32 1.0, %v7483_v34  ;;  %v10009_v38 = vadd.f32 %v4983_v17, %v9995_v6  ;;  %v4985_v43 = vpop.f32.mrb[138].mxu0  ;;  %v5168_v41 = vmul.f32 %v5136_v3, %v5040_v23  ;;  %v5045_v3 = vmul.f32 0.5, %v4974_v12 }
0x13b3   : > { %v5139_v61 = vadd.f32 1.0, %v7485_v37  ;;  %v5080_v31 = vmul.f32 0.70710677, %v10006_v13  ;;  %v4987_v9 = vpop.f32.mrb[139].mxu0  ;;  %v4986_v63 = vadd.f32 %v4985_v43, %v9992_v62  ;;  %v5169_v57 = vmul.f32 %v5137_v51, %v5041_v47 }
0x13b4   : > { %v5170_v5 = vmul.f32 %v5138_v26, %v5042_v42  ;;  %v5081_v25 = vmul.f32 0.70710677, %v10009_v38  ;;  %v4988_v35 = vadd.f32 %v4987_v9, %v9995_v6 }
0x13b5   : > { %v5171_v15 = vmul.f32 %v5139_v61, %v5043_v39  ;;  %7494 = verf.f32 %v5080_v31  ;;  %v5082_v54 = vmul.f32 0.70710677, %v4986_v63 }
0x13b6   : > { %v5200_v20 = vpack.c.bf16 %v5170_v5, %v5168_v41  ;;  %7496 = verf.f32 %v5081_v25  ;;  %v5083_v40 = vmul.f32 0.70710677, %v4988_v35 }
0x13b7   : > { %v7487_v21 = vpop.eup %7486  ;;  %v5201_v45 = vpack.c.bf16 %v5171_v15, %v5169_v57  ;;  %7498 = verf.f32 %v5082_v54  ;;  %v5048_v57 = vmul.f32 0.5, %v10006_v13  ;;  %v5050_v15 = vmul.f32 0.5, %v4986_v63 }
0x13b8   : > { %v7489_v50 = vpop.eup %7488  ;;  %v5140_v56 = vadd.f32 1.0, %v7487_v21  ;;  %v4991_v0 = vpop.f32.mrb[140].mxu0  ;;  %7500 = verf.f32 %v5083_v40  ;;  %v5049_v54 = vmul.f32 0.5, %v10009_v38  ;;  %v5051_v21 = vmul.f32 0.5, %v4988_v35 }
0x13b9   : > { %v7491_v10 = vpop.eup %7490  ;;  %v5141_v22 = vadd.f32 1.0, %v7489_v50  ;;  %v4992_v32 = vadd.f32 %v4991_v0, %v9992_v62  ;;  %v4993_v1 = vpop.f32.mrb[141].mxu0  ;;  %5350 = vmatprep.mubr.bf16.mxu1 %v5201_v45 }
0x13ba   : > { %v7493_v52 = vpop.eup %7492  ;;  %v5142_v59 = vadd.f32 1.0, %v7491_v10  ;;  %v4994_v44 = vadd.f32 %v4993_v1, %v9995_v6  ;;  %v4995_v58 = vpop.f32.mrb[142].mxu0  ;;  %5351 = vmatmul.mubr.bf16.vlgmr.msra.gmra.mrb[128].mxu1 %v5200_v20  ;;  %v5172_v37 = vmul.f32 %v5140_v56, %v5044_v49 }
0x13bb   : > { %v5143_v34 = vadd.f32 1.0, %v7493_v52  ;;  %v5084_v51 = vmul.f32 0.70710677, %v4992_v32  ;;  %v4997_v17 = vpop.f32.mrb[143].mxu0  ;;  %v4996_v26 = vadd.f32 %v4995_v58, %v9992_v62  ;;  %v5173_v43 = vmul.f32 %v5141_v22, %v5045_v3 }
0x13bc   : > { %v5174_v23 = vmul.f32 %v5142_v59, %v5046_v29  ;;  %v5085_v42 = vmul.f32 0.70710677, %v4994_v44  ;;  %v4998_v30 = vadd.f32 %v4997_v17, %v9995_v6  ;;  %v5052_v13 = vmul.f32 0.5, %v4992_v32 }
0x13bd   : > { %v5175_v47 = vmul.f32 %v5143_v34, %v5047_v14  ;;  %7502 = verf.f32 %v5084_v51  ;;  %v5086_v7 = vmul.f32 0.70710677, %v4996_v26  ;;  %v5054_v63 = vmul.f32 0.5, %v4996_v26 }
0x13be   : > { %7504 = verf.f32 %v5085_v42  ;;  %v5202_v39 = vpack.c.bf16 %v5174_v23, %v5172_v37  ;;  %v5087_v31 = vmul.f32 0.70710677, %v4998_v30  ;;  %v5053_v38 = vmul.f32 0.5, %v4994_v44 }
0x13bf   : > { %v7495_v61 = vpop.eup %7494  ;;  %v5203_v12 = vpack.c.bf16 %v5175_v47, %v5173_v43  ;;  %7506 = verf.f32 %v5086_v7  ;;  %v5055_v35 = vmul.f32 0.5, %v4998_v30 }
0x13c0   : > { %v7497_v2 = vpop.eup %7496  ;;  %v5144_v9 = vadd.f32 1.0, %v7495_v61  ;;  %7508 = verf.f32 %v5087_v31 }
0x13c1   : > { %5358 = vmatprep.mubr.bf16.mxu1 %v5203_v12  ;;  %v7499_v41 = vpop.eup %7498  ;;  %v5145_v5 = vadd.f32 1.0, %v7497_v2 }
0x13c2   : > { %5359 = vmatmul.mubr.bf16.gmra.mrb[132].mxu1 %v5202_v39  ;;  %v7501_v25 = vpop.eup %7500  ;;  %v5146_v20 = vadd.f32 1.0, %v7499_v41  ;;  %v5176_v45 = vmul.f32 %v5144_v9, %v5048_v57 }
0x13c3   : > { %v5147_v40 = vadd.f32 1.0, %v7501_v25  ;;  %v5177_v56 = vmul.f32 %v5145_v5, %v5049_v54 }
0x13c4   : > { %v5178_v50 = vmul.f32 %v5146_v20, %v5050_v15 }
0x13c5   : > { %v5179_v0 = vmul.f32 %v5147_v40, %v5051_v21 }
0x13c6   : > { %v5204_v22 = vpack.c.bf16 %v5178_v50, %v5176_v45 }
0x13c7   : > { %v7503_v10 = vpop.eup %7502  ;;  %v5205_v52 = vpack.c.bf16 %v5179_v0, %v5177_v56 }
0x13c8   : > { %v7505_v1 = vpop.eup %7504  ;;  %v5148_v49 = vadd.f32 1.0, %v7503_v10 }
0x13c9   : > { %v7507_v29 = vpop.eup %7506  ;;  %v5149_v59 = vadd.f32 1.0, %v7505_v1  ;;  %5366 = vmatprep.mubr.bf16.mxu1 %v5205_v52 }
0x13ca   : > { %v7509_v58 = vpop.eup %7508  ;;  %v5150_v3 = vadd.f32 1.0, %v7507_v29  ;;  %5367 = vmatmul.mubr.bf16.gmra.mrb[136].mxu1 %v5204_v22  ;;  %v5180_v34 = vmul.f32 %v5148_v49, %v5052_v13 }
0x13cb   : > { %v5151_v14 = vadd.f32 1.0, %v7509_v58  ;;  %v5181_v17 = vmul.f32 %v5149_v59, %v5053_v38 }
0x13cc   : > { %v5182_v51 = vmul.f32 %v5150_v3, %v5054_v63 }
0x13cd   : > { %v5183_v37 = vmul.f32 %v5151_v14, %v5055_v35 }
0x13ce   : > { %v5206_v23 = vpack.c.bf16 %v5182_v51, %v5180_v34 }
0x13cf   : > { %v5207_v42 = vpack.c.bf16 %v5183_v37, %v5181_v17 }
0x13d1   : > { %5374 = vmatprep.mubr.bf16.mxu1 %v5207_v42 }
0x13d2   : > { %5375 = vmatmul.mubr.bf16.gmra.mrb[140].mxu1 %v5206_v23 }
0x13dc   : > { %v5001_v43 = vpop.f32.mrb[144].mxu0 }
0x13dd   : > { %v5002_v47 = vadd.f32 %v5001_v43, %v9992_v62  ;;  %v5003_v7 = vpop.f32.mrb[145].mxu0 }
0x13de   : > { %v5004_v32 = vadd.f32 %v5003_v7, %v9995_v6  ;;  %v5005_v26 = vpop.f32.mrb[146].mxu0 }
0x13df   : > { %v5088_v39 = vmul.f32 0.70710677, %v5002_v47  ;;  %v5006_v44 = vadd.f32 %v5005_v26, %v9992_v62  ;;  %v5007_v30 = vpop.f32.mrb[147].mxu0  ;;  %v5056_v58 = vmul.f32 0.5, %v5002_v47 }
0x13e0   : > { %v5089_v61 = vmul.f32 0.70710677, %v5004_v32  ;;  %v5008_v31 = vadd.f32 %v5007_v30, %v9995_v6  ;;  %v5057_v35 = vmul.f32 0.5, %v5004_v32 }
0x13e1   : > { %7510 = verf.f32 %v5088_v39  ;;  %v5090_v12 = vmul.f32 0.70710677, %v5006_v44  ;;  %v5058_v13 = vmul.f32 0.5, %v5006_v44 }
0x13e2   : > { %7512 = verf.f32 %v5089_v61  ;;  %v5091_v2 = vmul.f32 0.70710677, %v5008_v31  ;;  %v5059_v14 = vmul.f32 0.5, %v5008_v31 }
0x13e3   : > { %7514 = verf.f32 %v5090_v12 }
0x13e4   : > { %7516 = verf.f32 %v5091_v2  ;;  %v5011_v9 = vpop.f32.mrb[148].mxu0 }
0x13e5   : > { %v5012_v41 = vadd.f32 %v5011_v9, %v9992_v62  ;;  %v5013_v5 = vpop.f32.mrb[149].mxu0 }
0x13e6   : > { %v5014_v25 = vadd.f32 %v5013_v5, %v9995_v6  ;;  %v5015_v57 = vpop.f32.mrb[150].mxu0 }
0x13e7   : > { %v5092_v15 = vmul.f32 0.70710677, %v5012_v41  ;;  %v5016_v20 = vadd.f32 %v5015_v57, %v9992_v62  ;;  %v5017_v54 = vpop.f32.mrb[151].mxu0 }
0x13e8   : > { %v5093_v21 = vmul.f32 0.70710677, %v5014_v25  ;;  %v5018_v40 = vadd.f32 %v5017_v54, %v9995_v6 }
0x13e9   : > { %7518 = verf.f32 %v5092_v15  ;;  %v5094_v45 = vmul.f32 0.70710677, %v5016_v20 }
0x13ea   : > { %7520 = verf.f32 %v5093_v21  ;;  %v5095_v50 = vmul.f32 0.70710677, %v5018_v40  ;;  %v5060_v21 = vmul.f32 0.5, %v5012_v41 }
0x13eb   : > { %v7511_v56 = vpop.eup %7510  ;;  %7522 = verf.f32 %v5094_v45  ;;  %v5062_v45 = vmul.f32 0.5, %v5016_v20 }
0x13ec   : > { %v7513_v0 = vpop.eup %7512  ;;  %v5152_v10 = vadd.f32 1.0, %v7511_v56  ;;  %7524 = verf.f32 %v5095_v50  ;;  %v5021_v22 = vpop.f32.mrb[152].mxu0 }
0x13ed   : > { %v7515_v1 = vpop.eup %7514  ;;  %v5153_v52 = vadd.f32 1.0, %v7513_v0  ;;  %v10030_v49 = vadd.f32 %v5021_v22, %v9992_v62  ;;  %v5023_v29 = vpop.f32.mrb[153].mxu0  ;;  %v5063_v22 = vmul.f32 0.5, %v5018_v40 }
0x13ee   : > { %v7517_v59 = vpop.eup %7516  ;;  %v5154_v63 = vadd.f32 1.0, %v7515_v1  ;;  %v10033_v3 = vadd.f32 %v5023_v29, %v9995_v6  ;;  %v5025_v38 = vpop.f32.mrb[154].mxu0  ;;  %v5184_v37 = vmul.f32 %v5152_v10, %v5056_v58  ;;  %v5061_v10 = vmul.f32 0.5, %v5014_v25 }
0x13ef   : > { %v5155_v34 = vadd.f32 1.0, %v7517_v59  ;;  %v5096_v51 = vmul.f32 0.70710677, %v10030_v49  ;;  %v5027_v17 = vpop.f32.mrb[155].mxu0  ;;  %v5026_v43 = vadd.f32 %v5025_v38, %v9992_v62  ;;  %v5185_v7 = vmul.f32 %v5153_v52, %v5057_v35 }
0x13f0   : > { %v5186_v23 = vmul.f32 %v5154_v63, %v5058_v13  ;;  %v5097_v42 = vmul.f32 0.70710677, %v10033_v3  ;;  %v5028_v26 = vadd.f32 %v5027_v17, %v9995_v6 }
0x13f1   : > { %v5187_v47 = vmul.f32 %v5155_v34, %v5059_v14  ;;  %7526 = verf.f32 %v5096_v51  ;;  %v5098_v39 = vmul.f32 0.70710677, %v5026_v43 }
0x13f2   : > { %7528 = verf.f32 %v5097_v42  ;;  %v5208_v44 = vpack.c.bf16 %v5186_v23, %v5184_v37  ;;  %v5099_v30 = vmul.f32 0.70710677, %v5028_v26  ;;  %v5064_v42 = vmul.f32 0.5, %v10030_v49 }
0x13f3   : > { %v7519_v32 = vpop.eup %7518  ;;  %v5209_v61 = vpack.c.bf16 %v5187_v47, %v5185_v7  ;;  %7530 = verf.f32 %v5098_v39  ;;  %v5066_v7 = vmul.f32 0.5, %v5026_v43  ;;  %v5067_v39 = vmul.f32 0.5, %v5028_v26 }
0x13f4   : > { %v7521_v31 = vpop.eup %7520  ;;  %v5156_v12 = vadd.f32 1.0, %v7519_v32  ;;  %v5031_v2 = vpop.f32.mrb[156].mxu0  ;;  %7532 = verf.f32 %v5099_v30 }
0x13f5   : > { %v7523_v9 = vpop.eup %7522  ;;  %v5157_v5 = vadd.f32 1.0, %v7521_v31  ;;  %v5032_v57 = vadd.f32 %v5031_v2, %v9992_v62  ;;  %v5033_v15 = vpop.f32.mrb[157].mxu0  ;;  %5382 = vmatprep.mubr.bf16.mxu1 %v5209_v61 }
0x13f6   : > { %v7525_v54 = vpop.eup %7524  ;;  %v5158_v50 = vadd.f32 1.0, %v7523_v9  ;;  %v5034_v56 = vadd.f32 %v5033_v15, %v9995_v6  ;;  %v5035_v0 = vpop.f32.mrb[158].mxu0  ;;  %5383 = vmatmul.mubr.bf16.gmra.mrb[144].mxu1 %v5208_v44  ;;  %v5188_v59 = vmul.f32 %v5156_v12, %v5060_v21 }
0x13f7   : > { %v5159_v1 = vadd.f32 1.0, %v7525_v54  ;;  %v5100_v52 = vmul.f32 0.70710677, %v5032_v57  ;;  %v5037_v29 = vpop.f32.mrb[159].mxu0  ;;  %v5036_v63 = vadd.f32 %v5035_v0, %v9992_v62  ;;  %v5189_v38 = vmul.f32 %v5157_v5, %v5061_v10 }
0x13f8   : > { %v5190_v58 = vmul.f32 %v5158_v50, %v5062_v45  ;;  %v5101_v13 = vmul.f32 0.70710677, %v5034_v56  ;;  %v5038_v41 = vadd.f32 %v5037_v29, %v9995_v6  ;;  %v5065_v6 = vmul.f32 0.5, %v10033_v3 }
0x13f9   : > { %v5191_v35 = vmul.f32 %v5159_v1, %v5063_v22  ;;  %7534 = verf.f32 %v5100_v52  ;;  %v5102_v20 = vmul.f32 0.70710677, %v5036_v63  ;;  %v5068_v49 = vmul.f32 0.5, %v5032_v57  ;;  %v10050_v57 = vld [vmem:[%s936_s21] ss:$0 sm:$0xff] }
0x13fa   : > { %7536 = verf.f32 %v5101_v13  ;;  %v5210_v14 = vpack.c.bf16 %v5190_v58, %v5188_v59  ;;  %v5103_v51 = vmul.f32 0.70710677, %v5038_v41  ;;  %v5070_v43 = vmul.f32 0.5, %v5036_v63 }
0x13fb   : > { %v7527_v34 = vpop.eup %7526  ;;  %v5211_v25 = vpack.c.bf16 %v5191_v35, %v5189_v38  ;;  %7538 = verf.f32 %v5102_v20  ;;  %v5069_v3 = vmul.f32 0.5, %v5034_v56  ;;  %v5071_v26 = vmul.f32 0.5, %v5038_v41 }
0x13fc   : > { %v7529_v40 = vpop.eup %7528  ;;  %v5160_v17 = vadd.f32 1.0, %v7527_v34  ;;  %7540 = verf.f32 %v5103_v51 }
0x13fd   : > { %5390 = vmatprep.mubr.bf16.mxu1 %v5211_v25  ;;  %v7531_v37 = vpop.eup %7530  ;;  %v5161_v23 = vadd.f32 1.0, %v7529_v40 }
0x13fe   : > { %5391 = vmatmul.mubr.bf16.gmra.mrb[148].mxu1 %v5210_v14  ;;  %v7533_v62 = vpop.eup %7532  ;;  %v5162_v47 = vadd.f32 1.0, %v7531_v37  ;;  %v5192_v32 = vmul.f32 %v5160_v17, %v5064_v42 }
0x13ff   : > { %v5163_v44 = vadd.f32 1.0, %v7533_v62  ;;  %v5193_v61 = vmul.f32 %v5161_v23, %v5065_v6 }
0x1400   : > { %v5194_v30 = vmul.f32 %v5162_v47, %v5066_v7 }
0x1401   : > { %v5195_v31 = vmul.f32 %v5163_v44, %v5067_v39 }
0x1402   : > { %v5212_v2 = vpack.c.bf16 %v5194_v30, %v5192_v32 }
0x1403   : > { %v7535_v12 = vpop.eup %7534  ;;  %v5213_v5 = vpack.c.bf16 %v5195_v31, %v5193_v61 }
0x1404   : > { %v7537_v9 = vpop.eup %7536  ;;  %v5164_v15 = vadd.f32 1.0, %v7535_v12 }
0x1405   : > { %v7539_v54 = vpop.eup %7538  ;;  %v5165_v21 = vadd.f32 1.0, %v7537_v9  ;;  %5398 = vmatprep.mubr.bf16.mxu1 %v5213_v5 }
0x1406   : > { %v7541_v45 = vpop.eup %7540  ;;  %v5166_v50 = vadd.f32 1.0, %v7539_v54  ;;  %5399 = vmatmul.mubr.bf16.gmra.mrb[152].mxu1 %v5212_v2  ;;  %v5196_v10 = vmul.f32 %v5164_v15, %v5068_v49 }
0x1407   : > { %v5167_v0 = vadd.f32 1.0, %v7541_v45  ;;  %v5197_v1 = vmul.f32 %v5165_v21, %v5069_v3 }
0x1408   : > { %v5198_v22 = vmul.f32 %v5166_v50, %v5070_v43 }
0x1409   : > { %v5199_v52 = vmul.f32 %v5167_v0, %v5071_v26 }
0x140a   : > { %v5214_v29 = vpack.c.bf16 %v5198_v22, %v5196_v10 }
0x140b   : > { %v5215_v59 = vpack.c.bf16 %v5199_v52, %v5197_v1 }
0x140d   : > { %5406 = vmatprep.mubr.bf16.mxu1 %v5215_v59 }
0x140e   : > { %5407 = vmatmul.mubr.bf16.gmra.mrb[156].mxu1 %v5214_v29 }
0x148d   : > { %v6433_v58 = vpop.f32.mrb[128].mxu1 }
0x148e   : > { %v6434_v13 = vpop.f32.mrb[129].mxu1 }
0x148f   : > { %v6435_v63 = vadd.f32 %v6434_v13, %v6433_v58  ;;  %v6436_v56 = vpop.f32.mrb[130].mxu1 }
0x1490   : > { %v6437_v38 = vpop.f32.mrb[131].mxu1 }
0x1491   : > { %v5353_v35 = vadd.f32 %v6435_v63, %v10050_v57  ;;  %v6438_v41 = vadd.f32 %v6437_v38, %v6436_v56 }
0x1493   : > { %v5356_v20 = vadd.f32 %v6438_v41, %v10050_v57  ;;  %v10055_v14 = vadd.f32 %v5353_v35, %v9864_v11 }
0x1495   : > { %5433 = vadd.xlane.f32.xlu0 %v10055_v14  ;;  %v6439_v34 = vpop.f32.mrb[132].mxu1  ;;  %v10059_v51 = vadd.f32 %v5356_v20, %v9867_v27 }
0x1496   : > { %v6440_v25 = vpop.f32.mrb[133].mxu1 }
0x1497   : > { %v6441_v40 = vadd.f32 %v6440_v25, %v6439_v34  ;;  %5435 = vadd.xlane.f32.xlu1 %v10059_v51  ;;  %v6442_v17 = vpop.f32.mrb[134].mxu1 }
0x1498   : > { %v6443_v37 = vpop.f32.mrb[135].mxu1 }
0x1499   : > { %v5361_v23 = vadd.f32 %v6441_v40, %v10050_v57  ;;  %v6444_v62 = vadd.f32 %v6443_v37, %v6442_v17 }
0x149b   : > { %v5364_v42 = vadd.f32 %v6444_v62, %v10050_v57  ;;  %v10065_v11 = vadd.f32 %v5361_v23, %v9882_v53 }
0x149d   : > { %5437 = vadd.xlane.f32.xlu0 %v10065_v11  ;;  %v10069_v7 = vadd.f32 %v5364_v42, %v9877_v16  ;;  %v6445_v27 = vpop.f32.mrb[136].mxu1 }
0x149e   : > { %v6446_v47 = vpop.f32.mrb[137].mxu1 }
0x149f   : > { %5439 = vadd.xlane.f32.xlu1 %v10069_v7  ;;  %v6447_v6 = vadd.f32 %v6446_v47, %v6445_v27  ;;  %v6448_v39 = vpop.f32.mrb[138].mxu1 }
0x14a0   : > { %v6449_v44 = vpop.f32.mrb[139].mxu1 }
0x14a1   : > { %v5369_v32 = vadd.f32 %v6447_v6, %v10050_v57  ;;  %v6450_v30 = vadd.f32 %v6449_v44, %v6448_v39 }
0x14a3   : > { %v5372_v61 = vadd.f32 %v6450_v30, %v10050_v57  ;;  %v10075_v53 = vadd.f32 %v5369_v32, %v9890_v19 }
0x14a5   : > { %5441 = vadd.xlane.f32.xlu0 %v10075_v53  ;;  %v6451_v31 = vpop.f32.mrb[140].mxu1  ;;  %v10079_v16 = vadd.f32 %v5372_v61, %v9893_v28 }
0x14a6   : > { %v6452_v12 = vpop.f32.mrb[141].mxu1 }
0x14a7   : > { %v6453_v2 = vadd.f32 %v6452_v12, %v6451_v31  ;;  %5443 = vadd.xlane.f32.xlu1 %v10079_v16  ;;  %v6454_v9 = vpop.f32.mrb[142].mxu1 }
0x14a8   : > { %v6455_v5 = vpop.f32.mrb[143].mxu1 }
0x14a9   : > { %v5377_v15 = vadd.f32 %v6453_v2, %v10050_v57  ;;  %v6456_v54 = vadd.f32 %v6455_v5, %v6454_v9 }
0x14ab   : > { %v5380_v21 = vadd.f32 %v6456_v54, %v10050_v57  ;;  %v10085_v19 = vadd.f32 %v5377_v15, %v9903_v46 }
0x14ad   : > { %5445 = vadd.xlane.f32.xlu0 %v10085_v19  ;;  %v10089_v45 = vadd.f32 %v5380_v21, %v9906_v33 }
0x14af   : > { %5447 = vadd.xlane.f32.xlu1 %v10089_v45 }
0x14c9   : > { %v6457_v28 = vpop.f32.mrb[144].mxu1 }
0x14ca   : > { %v6458_v49 = vpop.f32.mrb[145].mxu1 }
0x14cb   : > { %v6459_v43 = vadd.f32 %v6458_v49, %v6457_v28  ;;  %v6460_v50 = vpop.f32.mrb[146].mxu1 }
0x14cc   : > { %v6461_v3 = vpop.f32.mrb[147].mxu1 }
0x14cd   : > { %v5385_v26 = vadd.f32 %v6459_v43, %v10050_v57  ;;  %v6462_v0 = vadd.f32 %v6461_v3, %v6460_v50 }
0x14cf   : > { %v5388_v10 = vadd.f32 %v6462_v0, %v10050_v57  ;;  %v10095_v46 = vadd.f32 %v5385_v26, %v9932_v48 }
0x14d1   : > { %5449 = vadd.xlane.f32.xlu0 %v10095_v46  ;;  %v6463_v22 = vpop.f32.mrb[148].mxu1  ;;  %v10099_v33 = vadd.f32 %v5388_v10, %v9935_v18 }
0x14d2   : > { %v6464_v1 = vpop.f32.mrb[149].mxu1 }
0x14d3   : > { %v6465_v52 = vadd.f32 %v6464_v1, %v6463_v22  ;;  %5451 = vadd.xlane.f32.xlu1 %v10099_v33  ;;  %v6466_v29 = vpop.f32.mrb[150].mxu1 }
0x14d4   : > { %v6467_v59 = vpop.f32.mrb[151].mxu1 }
0x14d5   : > { %v5393_v58 = vadd.f32 %v6465_v52, %v10050_v57  ;;  %v6468_v13 = vadd.f32 %v6467_v59, %v6466_v29 }
0x14d7   : > { %v5396_v63 = vadd.f32 %v6468_v13, %v10050_v57  ;;  %v10105_v48 = vadd.f32 %v5393_v58, %v9949_v55 }
0x14d9   : > { %5453 = vadd.xlane.f32.xlu0 %v10105_v48  ;;  %v10109_v56 = vadd.f32 %v5396_v63, %v9945_v60  ;;  %v6469_v18 = vpop.f32.mrb[152].mxu1 }
0x14da   : > { %v6470_v38 = vpop.f32.mrb[153].mxu1 }
0x14db   : > { %5455 = vadd.xlane.f32.xlu1 %v10109_v56  ;;  %v6471_v35 = vadd.f32 %v6470_v38, %v6469_v18  ;;  %v6472_v41 = vpop.f32.mrb[154].mxu1 }
0x14dc   : > { %v6473_v20 = vpop.f32.mrb[155].mxu1 }
0x14dd   : > { %v5401_v34 = vadd.f32 %v6471_v35, %v10050_v57  ;;  %v6474_v25 = vadd.f32 %v6473_v20, %v6472_v41 }
0x14df   : > { %v5404_v40 = vadd.f32 %v6474_v25, %v10050_v57  ;;  %v10115_v55 = vadd.f32 %v5401_v34, %v9962_v24 }
0x14e1   : > { %5457 = vadd.xlane.f32.xlu0 %v10115_v55  ;;  %v6475_v17 = vpop.f32.mrb[156].mxu1  ;;  %v10119_v60 = vadd.f32 %v5404_v40, %v9958_v4 }
0x14e2   : > { %v6476_v37 = vpop.f32.mrb[157].mxu1 }
0x14e3   : > { %v6477_v23 = vadd.f32 %v6476_v37, %v6475_v17  ;;  %5459 = vadd.xlane.f32.xlu1 %v10119_v60  ;;  %v6478_v62 = vpop.f32.mrb[158].mxu1 }
0x14e4   : > { %v6479_v42 = vpop.f32.mrb[159].mxu1 }
0x14e5   : > { %v5409_v27 = vadd.f32 %v6477_v23, %v10050_v57  ;;  %v6480_v47 = vadd.f32 %v6479_v42, %v6478_v62 }
0x14e7   : > { %v5412_v6 = vadd.f32 %v6480_v47, %v10050_v57  ;;  %v10125_v24 = vadd.f32 %v5409_v27, %v9974_v36 }
0x14e9   : > { %5461 = vadd.xlane.f32.xlu0 %v10125_v24  ;;  %v10129_v39 = vadd.f32 %v5412_v6, %v9971_v8 }
0x14eb   : > { %5463 = vadd.xlane.f32.xlu1 %v10129_v39 }
0x1522   : > { %v5434_v4 = vpop.xlane.xlu0 %5433 }
0x1523   : > { %v5465_v44 = vmul.f32 0.0078125, %v5434_v4 }
0x1524   : > { %v5436_v32 = vpop.xlane.xlu1 %5435 }
0x1525   : > { %v10133_v30 = vsub.f32 %v10055_v14, %v5465_v44  ;;  %v5466_v61 = vmul.f32 0.0078125, %v5436_v32 }
0x1527   : > { %v10136_v31 = vsub.f32 %v10059_v51, %v5466_v61  ;;  %v5497_v36 = vmul.f32 %v10133_v30, %v10133_v30 }
0x1529   : > { %5513 = vadd.xlane.f32.xlu0 %v5497_v36  ;;  %v5498_v8 = vmul.f32 %v10136_v31, %v10136_v31 }
0x152a   : > { %v5438_v57 = vpop.xlane.xlu0 %5437 }
0x152b   : > { %v5467_v12 = vmul.f32 0.0078125, %v5438_v57  ;;  %5515 = vadd.xlane.f32.xlu1 %v5498_v8 }
0x152c   : > { %v5440_v2 = vpop.xlane.xlu1 %5439 }
0x152d   : > { %v10143_v9 = vsub.f32 %v10065_v11, %v5467_v12  ;;  %v5468_v14 = vmul.f32 0.0078125, %v5440_v2 }
0x152f   : > { %v10146_v5 = vsub.f32 %v10069_v7, %v5468_v14  ;;  %v5499_v51 = vmul.f32 %v10143_v9, %v10143_v9 }
0x1531   : > { %5517 = vadd.xlane.f32.xlu0 %v5499_v51  ;;  %v5500_v15 = vmul.f32 %v10146_v5, %v10146_v5 }
0x1532   : > { %v5442_v54 = vpop.xlane.xlu0 %5441 }
0x1533   : > { %5519 = vadd.xlane.f32.xlu1 %v5500_v15  ;;  %v5469_v21 = vmul.f32 0.0078125, %v5442_v54 }
0x1534   : > { %v5444_v28 = vpop.xlane.xlu1 %5443 }
0x1535   : > { %v10153_v49 = vsub.f32 %v10075_v53, %v5469_v21  ;;  %v5470_v11 = vmul.f32 0.0078125, %v5444_v28 }
0x1537   : > { %v10156_v43 = vsub.f32 %v10079_v16, %v5470_v11  ;;  %v5501_v7 = vmul.f32 %v10153_v49, %v10153_v49 }
0x1539   : > { %5521 = vadd.xlane.f32.xlu0 %v5501_v7  ;;  %v5502_v50 = vmul.f32 %v10156_v43, %v10156_v43 }
0x153a   : > { %v5446_v3 = vpop.xlane.xlu0 %5445 }
0x153b   : > { %v5471_v26 = vmul.f32 0.0078125, %v5446_v3  ;;  %5523 = vadd.xlane.f32.xlu1 %v5502_v50 }
0x153c   : > { %v5448_v0 = vpop.xlane.xlu1 %5447 }
0x153d   : > { %v10163_v10 = vsub.f32 %v10085_v19, %v5471_v26  ;;  %v5472_v53 = vmul.f32 0.0078125, %v5448_v0 }
0x153f   : > { %v10166_v22 = vsub.f32 %v10089_v45, %v5472_v53  ;;  %v5503_v16 = vmul.f32 %v10163_v10, %v10163_v10 }
0x1541   : > { %5525 = vadd.xlane.f32.xlu0 %v5503_v16  ;;  %v5504_v1 = vmul.f32 %v10166_v22, %v10166_v22 }
0x1543   : > { %5527 = vadd.xlane.f32.xlu1 %v5504_v1 }
0x155e   : > { %v5450_v52 = vpop.xlane.xlu0 %5449 }
0x155f   : > { %v5473_v29 = vmul.f32 0.0078125, %v5450_v52 }
0x1560   : > { %v5452_v59 = vpop.xlane.xlu1 %5451 }
0x1561   : > { %v10173_v58 = vsub.f32 %v10095_v46, %v5473_v29  ;;  %v5474_v19 = vmul.f32 0.0078125, %v5452_v59 }
0x1563   : > { %v10176_v13 = vsub.f32 %v10099_v33, %v5474_v19  ;;  %v5505_v45 = vmul.f32 %v10173_v58, %v10173_v58 }
0x1565   : > { %5529 = vadd.xlane.f32.xlu0 %v5505_v45  ;;  %v5506_v63 = vmul.f32 %v10176_v13, %v10176_v13 }
0x1566   : > { %v5454_v18 = vpop.xlane.xlu0 %5453 }
0x1567   : > { %v5475_v38 = vmul.f32 0.0078125, %v5454_v18  ;;  %5531 = vadd.xlane.f32.xlu1 %v5506_v63 }
0x1568   : > { %v5456_v35 = vpop.xlane.xlu1 %5455 }
0x1569   : > { %v10183_v41 = vsub.f32 %v10105_v48, %v5475_v38  ;;  %v5476_v46 = vmul.f32 0.0078125, %v5456_v35 }
0x156b   : > { %v10186_v20 = vsub.f32 %v10109_v56, %v5476_v46  ;;  %v5507_v33 = vmul.f32 %v10183_v41, %v10183_v41 }
0x156d   : > { %5533 = vadd.xlane.f32.xlu0 %v5507_v33  ;;  %v5508_v34 = vmul.f32 %v10186_v20, %v10186_v20 }
0x156e   : > { %v5458_v25 = vpop.xlane.xlu0 %5457 }
0x156f   : > { %5535 = vadd.xlane.f32.xlu1 %v5508_v34  ;;  %v5477_v40 = vmul.f32 0.0078125, %v5458_v25 }
0x1570   : > { %v5460_v17 = vpop.xlane.xlu1 %5459 }
0x1571   : > { %v10193_v37 = vsub.f32 %v10115_v55, %v5477_v40  ;;  %v5478_v48 = vmul.f32 0.0078125, %v5460_v17 }
0x1573   : > { %v10196_v23 = vsub.f32 %v10119_v60, %v5478_v48  ;;  %v5509_v56 = vmul.f32 %v10193_v37, %v10193_v37 }
0x1575   : > { %5537 = vadd.xlane.f32.xlu0 %v5509_v56  ;;  %v5510_v62 = vmul.f32 %v10196_v23, %v10196_v23 }
0x1576   : > { %v5462_v42 = vpop.xlane.xlu0 %5461 }
0x1577   : > { %v5479_v27 = vmul.f32 0.0078125, %v5462_v42  ;;  %5539 = vadd.xlane.f32.xlu1 %v5510_v62  ;;  %v10217_v62 = vld [vmem:[%s10491_s9] ss:$0 sm:$0xff] }
0x1578   : > { %v5464_v47 = vpop.xlane.xlu1 %5463 }
0x1579   : > { %v10203_v6 = vsub.f32 %v10125_v24, %v5479_v27  ;;  %v5480_v55 = vmul.f32 0.0078125, %v5464_v47  ;;  %v10225_v47 = vld [vmem:[%s10493_s2] ss:$0 sm:$0xff] }
0x157b   : > { %v10206_v4 = vsub.f32 %v10129_v39, %v5480_v55  ;;  %v5511_v60 = vmul.f32 %v10203_v6, %v10203_v6 }
0x157d   : > { %5541 = vadd.xlane.f32.xlu0 %v5511_v60  ;;  %v5512_v44 = vmul.f32 %v10206_v4, %v10206_v4 }
0x157f   : > { %5543 = vadd.xlane.f32.xlu1 %v5512_v44 }
0x15b6   : > { %v5514_v32 = vpop.xlane.xlu0 %5513 }
0x15b7   : > { %v5545_v61 = vmul.f32 0.007874016, %v5514_v32 }
0x15b8   : > { %v5516_v36 = vpop.xlane.xlu1 %5515 }
0x15b9   : > { %7542 = vrsqrt.f32 %v5545_v61  ;;  %v5546_v8 = vmul.f32 0.007874016, %v5516_v36  ;;  %vm5563_vm0 = vcmp.eq.f32.partialorder %v5545_v61, inf  ;;  %v5566_v51 = vand.u32 2147483648, %v5545_v61 }
0x15ba   : > { %vm5565_vm3 = vcmp.eq.f32.partialorder %v5545_v61, 0.0 }
0x15bb   : > { %7544 = vrsqrt.f32 %v5546_v8  ;;  %vm5570_vm4 = vcmp.eq.f32.partialorder %v5546_v8, inf  ;;  %v5573_v50 = vand.u32 2147483648, %v5546_v8  ;;  %vm5572_vm5 = vcmp.eq.f32.partialorder %v5546_v8, 0.0 }
0x15be   : > { %v5518_v24 = vpop.xlane.xlu0 %5517 }
0x15bf   : > { %v5547_v57 = vmul.f32 0.007874016, %v5518_v24 }
0x15c0   : > { %v5520_v12 = vpop.xlane.xlu1 %5519 }
0x15c1   : > { %7546 = vrsqrt.f32 %v5547_v57  ;;  %v5548_v39 = vmul.f32 0.007874016, %v5520_v12  ;;  %vm5577_vm6 = vcmp.eq.f32.partialorder %v5547_v57, inf  ;;  %v5580_v59 = vand.u32 2147483648, %v5547_v57 }
0x15c2   : > { %vm5579_vm7 = vcmp.eq.f32.partialorder %v5547_v57, 0.0 }
0x15c3   : > { %v7543_v2 = vpop.eup %7542  ;;  %7548 = vrsqrt.f32 %v5548_v39  ;;  %vm5584_vm8 = vcmp.eq.f32.partialorder %v5548_v39, inf  ;;  %v5587_v46 = vand.u32 2147483648, %v5548_v39  ;;  %vm5586_vm9 = vcmp.eq.f32.partialorder %v5548_v39, 0.0 }
0x15c4   : > { %v5562_v14 = vmul.f32 %v7543_v2, %v5545_v61 }
0x15c5   : > { %v7545_v15 = vpop.eup %7544 }
0x15c6   : > { %v5564_v54 = vsel %vm5563_vm0, %v5545_v61, %v5562_v14  ;;  %v5569_v28 = vmul.f32 %v7545_v15, %v5546_v8  ;;  %v5522_v11 = vpop.xlane.xlu0 %5521 }
0x15c7   : > { %v5567_v21 = vsel %vm5565_vm3, %v5566_v51, %v5564_v54  ;;  %v5549_v3 = vmul.f32 0.007874016, %v5522_v11 }
0x15c8   : > { %v5673_v7 = vadd.f32 1e-05, %v5567_v21  ;;  %v5571_v26 = vsel %vm5570_vm4, %v5546_v8, %v5569_v28  ;;  %v5524_v0 = vpop.xlane.xlu1 %5523 }
0x15c9   : > { %v5574_v53 = vsel %vm5572_vm5, %v5573_v50, %v5571_v26  ;;  %v5550_v52 = vmul.f32 0.007874016, %v5524_v0  ;;  %vm5591_vm10 = vcmp.eq.f32.partialorder %v5549_v3, inf  ;;  %v5594_v32 = vand.u32 2147483648, %v5549_v3 }
0x15ca   : > { %7550 = vrcp.f32 %v5673_v7  ;;  %v5674_v1 = vadd.f32 1e-05, %v5574_v53  ;;  %vm5593_vm11 = vcmp.eq.f32.partialorder %v5549_v3, 0.0 }
0x15cb   : > { %v7547_v16 = vpop.eup %7546  ;;  %7552 = vrsqrt.f32 %v5549_v3  ;;  %vm5598_vm12 = vcmp.eq.f32.partialorder %v5550_v52, inf  ;;  %v5601_v2 = vand.u32 2147483648, %v5550_v52  ;;  %vm5600_vm13 = vcmp.eq.f32.partialorder %v5550_v52, 0.0 }
0x15cc   : > { %v5576_v29 = vmul.f32 %v7547_v16, %v5547_v57  ;;  %7554 = vrcp.f32 %v5674_v1 }
0x15cd   : > { %v7549_v19 = vpop.eup %7548  ;;  %7556 = vrsqrt.f32 %v5550_v52 }
0x15ce   : > { %v5578_v45 = vsel %vm5577_vm6, %v5547_v57, %v5576_v29  ;;  %v5583_v18 = vmul.f32 %v7549_v19, %v5548_v39  ;;  %v5526_v38 = vpop.xlane.xlu0 %5525 }
0x15cf   : > { %v5581_v63 = vsel %vm5579_vm7, %v5580_v59, %v5578_v45  ;;  %v5551_v33 = vmul.f32 0.007874016, %v5526_v38 }
0x15d0   : > { %v5675_v35 = vadd.f32 1e-05, %v5581_v63  ;;  %v5585_v34 = vsel %vm5584_vm8, %v5548_v39, %v5583_v18  ;;  %v5528_v25 = vpop.xlane.xlu1 %5527 }
0x15d1   : > { %v5588_v40 = vsel %vm5586_vm9, %v5587_v46, %v5585_v34  ;;  %v5552_v48 = vmul.f32 0.007874016, %v5528_v25  ;;  %vm5605_vm14 = vcmp.eq.f32.partialorder %v5551_v33, inf  ;;  %vm5607_vm15 = vcmp.eq.f32.partialorder %v5551_v33, 0.0 }
0x15d2   : > { %7558 = vrcp.f32 %v5675_v35  ;;  %v5676_v17 = vadd.f32 1e-05, %v5588_v40 }
0x15d3   : > { %7560 = vrsqrt.f32 %v5551_v33  ;;  %vm5612_vm1 = vcmp.eq.f32.partialorder %v5552_v48, inf  ;;  %v5615_v59 = vand.u32 2147483648, %v5552_v48  ;;  %vm5614_vm2 = vcmp.eq.f32.partialorder %v5552_v48, 0.0 }
0x15d4   : > { %v7551_v56 = vpop.eup %7550  ;;  %7562 = vrcp.f32 %v5676_v17 }
0x15d5   : > { %v7553_v42 = vpop.eup %7552  ;;  %v5690_v27 = vmul.f32 %v7551_v56, %v10133_v30  ;;  %7564 = vrsqrt.f32 %v5552_v48 }
0x15d6   : > { %v5590_v55 = vmul.f32 %v7553_v42, %v5549_v3  ;;  %v7555_v60 = vpop.eup %7554 }
0x15d7   : > { %v5727_v44 = vmul.f32 %v10217_v62, %v5690_v27  ;;  %v7557_v61 = vpop.eup %7556  ;;  %v5692_v36 = vmul.f32 %v7555_v60, %v10136_v31 }
0x15d8   : > { %v5592_v8 = vsel %vm5591_vm10, %v5549_v3, %v5590_v55  ;;  %v5597_v57 = vmul.f32 %v7557_v61, %v5550_v52  ;;  %v5608_v3 = vand.u32 2147483648, %v5551_v33 }
0x15d9   : > { %v5749_v30 = vadd.f32 %v10225_v47, %v5727_v44  ;;  %v5595_v24 = vsel %vm5593_vm11, %v5594_v32, %v5592_v8  ;;  %v5728_v12 = vmul.f32 %v10217_v62, %v5692_v36 }
0x15da   : > { %v5677_v39 = vadd.f32 1e-05, %v5595_v24  ;;  %v5599_v14 = vsel %vm5598_vm12, %v5550_v52, %v5597_v57 }
0x15db   : > { %5765 = vst [vmem:[%s8000_s14] sm:$0xff] %v5749_v30  ;;  %v5750_v15 = vadd.f32 %v10225_v47, %v5728_v12  ;;  %v5602_v31 = vsel %vm5600_vm13, %v5601_v2, %v5599_v14 }
0x15dc   : > { %v7559_v51 = vpop.eup %7558  ;;  %7566 = vrcp.f32 %v5677_v39  ;;  %v5678_v28 = vadd.f32 1e-05, %v5602_v31 }
0x15dd   : > { %v7561_v54 = vpop.eup %7560  ;;  %v5694_v21 = vmul.f32 %v7559_v51, %v10143_v9  ;;  %5766 = vst [vmem:[%s8000_s14 + $0x8] sm:$0xff] %v5750_v15 }
0x15de   : > { %v5604_v11 = vmul.f32 %v7561_v54, %v5551_v33  ;;  %v7563_v7 = vpop.eup %7562  ;;  %7568 = vrcp.f32 %v5678_v28 }
0x15df   : > { %v5729_v50 = vmul.f32 %v10217_v62, %v5694_v21  ;;  %v7565_v26 = vpop.eup %7564  ;;  %v5696_v0 = vmul.f32 %v7563_v7, %v10146_v5 }
0x15e0   : > { %v5606_v53 = vsel %vm5605_vm14, %v5551_v33, %v5604_v11  ;;  %v5611_v9 = vmul.f32 %v7565_v26, %v5552_v48 }
0x15e1   : > { %v5751_v16 = vadd.f32 %v10225_v47, %v5729_v50  ;;  %v5609_v1 = vsel %vm5607_vm15, %v5608_v3, %v5606_v53  ;;  %v5730_v52 = vmul.f32 %v10217_v62, %v5696_v0 }
0x15e2   : > { %v5679_v29 = vadd.f32 1e-05, %v5609_v1  ;;  %v5613_v19 = vsel %vm5612_vm1, %v5552_v48, %v5611_v9 }
0x15e3   : > { %5767 = vst [vmem:[%s8000_s14 + $0x10] sm:$0xff] %v5751_v16  ;;  %v5752_v45 = vadd.f32 %v10225_v47, %v5730_v52  ;;  %v5616_v5 = vsel %vm5614_vm2, %v5615_v59, %v5613_v19 }
0x15e4   : > { %7570 = vrcp.f32 %v5679_v29  ;;  %v5680_v63 = vadd.f32 1e-05, %v5616_v5 }
0x15e5   : > { %5768 = vst [vmem:[%s8000_s14 + $0x18] sm:$0xff] %v5752_v45 }
0x15e6   : > { %v7567_v18 = vpop.eup %7566  ;;  %7572 = vrcp.f32 %v5680_v63 }
0x15e7   : > { %v5698_v38 = vmul.f32 %v7567_v18, %v10153_v49 }
0x15e8   : > { %v7569_v35 = vpop.eup %7568 }
0x15e9   : > { %v5731_v46 = vmul.f32 %v10217_v62, %v5698_v38  ;;  %v5700_v33 = vmul.f32 %v7569_v35, %v10156_v43 }
0x15eb   : > { %v5753_v34 = vadd.f32 %v10225_v47, %v5731_v46  ;;  %v5732_v25 = vmul.f32 %v10217_v62, %v5700_v33 }
0x15ed   : > { %5769 = vst [vmem:[%s8000_s14 + $0x20] sm:$0xff] %v5753_v34  ;;  %v5754_v17 = vadd.f32 %v10225_v47, %v5732_v25 }
0x15ee   : > { %v7571_v40 = vpop.eup %7570 }
0x15ef   : > { %v5702_v48 = vmul.f32 %v7571_v40, %v10163_v10  ;;  %5770 = vst [vmem:[%s8000_s14 + $0x28] sm:$0xff] %v5754_v17 }
0x15f0   : > { %v7573_v49 = vpop.eup %7572 }
0x15f1   : > { %v5733_v56 = vmul.f32 %v10217_v62, %v5702_v48  ;;  %v5704_v42 = vmul.f32 %v7573_v49, %v10166_v22 }
0x15f2   : > { %v5530_v27 = vpop.xlane.xlu0 %5529 }
0x15f3   : > { %v5755_v43 = vadd.f32 %v10225_v47, %v5733_v56  ;;  %v5553_v55 = vmul.f32 0.007874016, %v5530_v27  ;;  %v5734_v60 = vmul.f32 %v10217_v62, %v5704_v42 }
0x15f4   : > { %v5532_v44 = vpop.xlane.xlu1 %5531 }
0x15f5   : > { %5771 = vst [vmem:[%s8000_s14 + $0x30] sm:$0xff] %v5755_v43  ;;  %7574 = vrsqrt.f32 %v5553_v55  ;;  %v5756_v32 = vadd.f32 %v10225_v47, %v5734_v60  ;;  %v5554_v61 = vmul.f32 0.007874016, %v5532_v44  ;;  %vm5619_vm0 = vcmp.eq.f32.partialorder %v5553_v55, inf }
0x15f6   : > { %v5622_v57 = vand.u32 2147483648, %v5553_v55  ;;  %vm5621_vm3 = vcmp.eq.f32.partialorder %v5553_v55, 0.0 }
0x15f7   : > { %5772 = vst [vmem:[%s8000_s14 + $0x38] sm:$0xff] %v5756_v32  ;;  %7576 = vrsqrt.f32 %v5554_v61  ;;  %vm5626_vm4 = vcmp.eq.f32.partialorder %v5554_v61, inf  ;;  %v5629_v31 = vand.u32 2147483648, %v5554_v61  ;;  %vm5628_vm5 = vcmp.eq.f32.partialorder %v5554_v61, 0.0 }
0x15fa   : > { %v5534_v10 = vpop.xlane.xlu0 %5533 }
0x15fb   : > { %v5555_v36 = vmul.f32 0.007874016, %v5534_v10 }
0x15fc   : > { %v5536_v8 = vpop.xlane.xlu1 %5535 }
0x15fd   : > { %7578 = vrsqrt.f32 %v5555_v36  ;;  %v5556_v30 = vmul.f32 0.007874016, %v5536_v8  ;;  %vm5633_vm6 = vcmp.eq.f32.partialorder %v5555_v36, inf  ;;  %v5636_v0 = vand.u32 2147483648, %v5555_v36 }
0x15fe   : > { %vm5635_vm7 = vcmp.eq.f32.partialorder %v5555_v36, 0.0 }
0x15ff   : > { %v7575_v22 = vpop.eup %7574  ;;  %7580 = vrsqrt.f32 %v5556_v30  ;;  %vm5640_vm8 = vcmp.eq.f32.partialorder %v5556_v30, inf  ;;  %v5643_v59 = vand.u32 2147483648, %v5556_v30  ;;  %vm5642_vm9 = vcmp.eq.f32.partialorder %v5556_v30, 0.0 }
0x1600   : > { %v5618_v24 = vmul.f32 %v7575_v22, %v5553_v55 }
0x1601   : > { %v7577_v12 = vpop.eup %7576 }
0x1602   : > { %v5620_v39 = vsel %vm5619_vm0, %v5553_v55, %v5618_v24  ;;  %v5625_v14 = vmul.f32 %v7577_v12, %v5554_v61  ;;  %v5538_v51 = vpop.xlane.xlu0 %5537 }
0x1603   : > { %v5623_v2 = vsel %vm5621_vm3, %v5622_v57, %v5620_v39  ;;  %v5557_v54 = vmul.f32 0.007874016, %v5538_v51 }
0x1604   : > { %v5681_v15 = vadd.f32 1e-05, %v5623_v2  ;;  %v5627_v21 = vsel %vm5626_vm4, %v5554_v61, %v5625_v14  ;;  %v5540_v28 = vpop.xlane.xlu1 %5539 }
0x1605   : > { %v5630_v11 = vsel %vm5628_vm5, %v5629_v31, %v5627_v21  ;;  %v5558_v3 = vmul.f32 0.007874016, %v5540_v28  ;;  %vm5647_vm10 = vcmp.eq.f32.partialorder %v5557_v54, inf  ;;  %v5650_v17 = vand.u32 2147483648, %v5557_v54 }
0x1606   : > { %7582 = vrcp.f32 %v5681_v15  ;;  %v5682_v50 = vadd.f32 1e-05, %v5630_v11  ;;  %vm5649_vm11 = vcmp.eq.f32.partialorder %v5557_v54, 0.0 }
0x1607   : > { %v7579_v7 = vpop.eup %7578  ;;  %7584 = vrsqrt.f32 %v5557_v54  ;;  %vm5654_vm12 = vcmp.eq.f32.partialorder %v5558_v3, inf  ;;  %v5657_v60 = vand.u32 2147483648, %v5558_v3  ;;  %vm5656_vm13 = vcmp.eq.f32.partialorder %v5558_v3, 0.0 }
0x1608   : > { %v5632_v26 = vmul.f32 %v7579_v7, %v5555_v36  ;;  %7586 = vrcp.f32 %v5682_v50 }
0x1609   : > { %v7581_v53 = vpop.eup %7580  ;;  %7588 = vrsqrt.f32 %v5558_v3 }
0x160a   : > { %v5634_v16 = vsel %vm5633_vm6, %v5555_v36, %v5632_v26  ;;  %v5639_v9 = vmul.f32 %v7581_v53, %v5556_v30  ;;  %v5542_v52 = vpop.xlane.xlu0 %5541 }
0x160b   : > { %v5637_v1 = vsel %vm5635_vm7, %v5636_v0, %v5634_v16  ;;  %v5559_v19 = vmul.f32 0.007874016, %v5542_v52 }
0x160c   : > { %v5683_v29 = vadd.f32 1e-05, %v5637_v1  ;;  %v5641_v45 = vsel %vm5640_vm8, %v5556_v30, %v5639_v9  ;;  %v5544_v5 = vpop.xlane.xlu1 %5543 }
0x160d   : > { %v5644_v63 = vsel %vm5642_vm9, %v5643_v59, %v5641_v45  ;;  %v5560_v38 = vmul.f32 0.007874016, %v5544_v5  ;;  %vm5661_vm14 = vcmp.eq.f32.partialorder %v5559_v19, inf  ;;  %v5664_v57 = vand.u32 2147483648, %v5559_v19 }
0x160e   : > { %7590 = vrcp.f32 %v5683_v29  ;;  %v5684_v18 = vadd.f32 1e-05, %v5644_v63  ;;  %vm5663_vm15 = vcmp.eq.f32.partialorder %v5559_v19, 0.0 }
0x160f   : > { %7592 = vrsqrt.f32 %v5559_v19  ;;  %vm5668_vm1 = vcmp.eq.f32.partialorder %v5560_v38, inf  ;;  %vm5670_vm2 = vcmp.eq.f32.partialorder %v5560_v38, 0.0 }
0x1610   : > { %v7583_v35 = vpop.eup %7582  ;;  %7594 = vrcp.f32 %v5684_v18 }
0x1611   : > { %v7585_v46 = vpop.eup %7584  ;;  %v5706_v33 = vmul.f32 %v7583_v35, %v10173_v58  ;;  %7596 = vrsqrt.f32 %v5560_v38 }
0x1612   : > { %v5646_v34 = vmul.f32 %v7585_v46, %v5557_v54  ;;  %v7587_v25 = vpop.eup %7586 }
0x1613   : > { %v5735_v40 = vmul.f32 %v10217_v62, %v5706_v33  ;;  %v7589_v48 = vpop.eup %7588  ;;  %v5708_v49 = vmul.f32 %v7587_v25, %v10176_v13 }
0x1614   : > { %v5648_v56 = vsel %vm5647_vm10, %v5557_v54, %v5646_v34  ;;  %v5653_v43 = vmul.f32 %v7589_v48, %v5558_v3  ;;  %v5671_v54 = vand.u32 2147483648, %v5560_v38 }
0x1615   : > { %v5757_v42 = vadd.f32 %v10225_v47, %v5735_v40  ;;  %v5651_v27 = vsel %vm5649_vm11, %v5650_v17, %v5648_v56  ;;  %v5736_v58 = vmul.f32 %v10217_v62, %v5708_v49 }
0x1616   : > { %v5685_v55 = vadd.f32 1e-05, %v5651_v27  ;;  %v5655_v44 = vsel %vm5654_vm12, %v5558_v3, %v5653_v43 }
0x1617   : > { %5773 = vst [vmem:[%s8000_s14 + $0x40] sm:$0xff] %v5757_v42  ;;  %v5758_v61 = vadd.f32 %v10225_v47, %v5736_v58  ;;  %v5658_v13 = vsel %vm5656_vm13, %v5657_v60, %v5655_v44 }
0x1618   : > { %v7591_v32 = vpop.eup %7590  ;;  %7598 = vrcp.f32 %v5685_v55  ;;  %v5686_v8 = vadd.f32 1e-05, %v5658_v13 }
0x1619   : > { %v7593_v10 = vpop.eup %7592  ;;  %v5710_v36 = vmul.f32 %v7591_v32, %v10183_v41  ;;  %5774 = vst [vmem:[%s8000_s14 + $0x48] sm:$0xff] %v5758_v61 }
0x161a   : > { %v5660_v30 = vmul.f32 %v7593_v10, %v5559_v19  ;;  %v7595_v22 = vpop.eup %7594  ;;  %7600 = vrcp.f32 %v5686_v8 }
0x161b   : > { %v5737_v24 = vmul.f32 %v10217_v62, %v5710_v36  ;;  %v7597_v12 = vpop.eup %7596  ;;  %v5712_v39 = vmul.f32 %v7595_v22, %v10186_v20 }
0x161c   : > { %v5662_v2 = vsel %vm5661_vm14, %v5559_v19, %v5660_v30  ;;  %v5667_v41 = vmul.f32 %v7597_v12, %v5560_v38 }
0x161d   : > { %v5759_v14 = vadd.f32 %v10225_v47, %v5737_v24  ;;  %v5665_v51 = vsel %vm5663_vm15, %v5664_v57, %v5662_v2  ;;  %v5738_v15 = vmul.f32 %v10217_v62, %v5712_v39 }
0x161e   : > { %v5687_v31 = vadd.f32 1e-05, %v5665_v51  ;;  %v5669_v21 = vsel %vm5668_vm1, %v5560_v38, %v5667_v41 }
0x161f   : > { %5775 = vst [vmem:[%s8000_s14 + $0x50] sm:$0xff] %v5759_v14  ;;  %v5760_v28 = vadd.f32 %v10225_v47, %v5738_v15  ;;  %v5672_v20 = vsel %vm5670_vm2, %v5671_v54, %v5669_v21 }
0x1620   : > { %7602 = vrcp.f32 %v5687_v31  ;;  %v5688_v11 = vadd.f32 1e-05, %v5672_v20 }
0x1621   : > { %5776 = vst [vmem:[%s8000_s14 + $0x58] sm:$0xff] %v5760_v28 }
0x1622   : > { %v7599_v7 = vpop.eup %7598  ;;  %7604 = vrcp.f32 %v5688_v11 }
0x1623   : > { %v5714_v50 = vmul.f32 %v7599_v7, %v10193_v37 }
0x1624   : > { %v7601_v3 = vpop.eup %7600 }
0x1625   : > { %v5739_v26 = vmul.f32 %v10217_v62, %v5714_v50  ;;  %v5716_v0 = vmul.f32 %v7601_v3, %v10196_v23 }
0x1627   : > { %v5761_v53 = vadd.f32 %v10225_v47, %v5739_v26  ;;  %v5740_v16 = vmul.f32 %v10217_v62, %v5716_v0 }
0x1629   : > { %5777 = vst [vmem:[%s8000_s14 + $0x60] sm:$0xff] %v5761_v53  ;;  %v5762_v9 = vadd.f32 %v10225_v47, %v5740_v16 }
0x162a   : > { %v7603_v1 = vpop.eup %7602 }
0x162b   : > { %v5718_v37 = vmul.f32 %v7603_v1, %v10203_v6  ;;  %5778 = vst [vmem:[%s8000_s14 + $0x68] sm:$0xff] %v5762_v9 }
0x162c   : > { %v7605_v52 = vpop.eup %7604 }
0x162d   : > { %v5741_v29 = vmul.f32 %v10217_v62, %v5718_v37  ;;  %v5720_v59 = vmul.f32 %v7605_v52, %v10206_v4 }
0x162f   : > { %v5763_v23 = vadd.f32 %v10225_v47, %v5741_v29  ;;  %v5742_v19 = vmul.f32 %v10217_v62, %v5720_v59 }
0x1631   : > { %5779 = vst [vmem:[%s8000_s14 + $0x70] sm:$0xff] %v5763_v23  ;;  %v5764_v6 = vadd.f32 %v10225_v47, %v5742_v19 }
0x1633   : > { %5780 = vst [vmem:[%s8000_s14 + $0x78] sm:$0xff] %v5764_v6 }
0x1634   : > { %7635 = shalt.err (!%p7632_p8)
}
0x1635   : > { %s7636_s14 = scalar_lea.hbm %s10293_s26, 2048  ;;  %s7640_s24 = scalar_lea.hbm %s10497_s19, 4096 }
0x1636   : > { %p7637_p10 = scmp.ne.s32.totalorder %s10293_s26, %s7636_s14  ;;  %p7641_p13 = scmp.lt.u32.totalorder %s10293_s26, %s10497_s19 }
0x1637   : > { %p7642_p0 = scmp.lt.u32.totalorder %s7640_s24, %s7636_s14  ;;  %p7644_p2 = scmp.lt.u32.totalorder %s7636_s14, %s10293_s26 }
0x1638   : > { %p7638_p11 = pnand %p7637_p10, %p7877_p3 }
0x1639   : > { %p7643_p1 = por %p7642_p0, %p7641_p13 }
0x163a   : > { %p7639_p12 = pneg %p7638_p11 }
0x163b   : > { %p7645_p4 = por %p7644_p2, %p7643_p1 }
0x163d   : > { %p7646_p5 = pnand %p7645_p4, %p7639_p12 }
0x163f   : > { %7649 = shalt.err (!%p7646_p5)
}
0x1640   : > { %s7721_s4 = smov 128   ;;  %s7722_s22 = smov 8  }
0x1641   : > { %6899 = dma.vmem_to_hbm [thread:$0]  (%p7877_p3), %s10295_s20, 2048, %s10293_s26, %s10301_s16, %s7721_s4, %s7721_s4, %s7722_s22  }
0x1642 PF: > { %s10499_s18 = sld [smem:[#allocation12_spill]]  ;;  %s10500_s2 = sld [smem:[#allocation5_spill]] }
0x1648   : > { %p6905_p6 = scmp.ge.s32.totalorder %s10499_s18, 2  ;;  %s5810_s25 = sand.u32 1, %s10500_s2  }
0x1649   : > { %s5811_s6 = scalar_lea.sflag [#allocation3], %s5810_s25 }
0x164a   : > { %p6902_p7 = pnand %p6905_p6, %p7887_p9 }
0x164c   : > { %7683 = dma.done.wait (!%p6902_p7), %s5811_s6, 2048  }
0x164d   : > { %7685 = vsyncadd (!%p6902_p7), %s5811_s6, 4294965248  ;;  %s33_s26 = sadd.s32 1, %s10499_s18   ;;  %s10502_s1 = sld [smem:[#allocation6_spill]] }
0x164e   : > { %p30_p8 = scmp.ge.s32.totalorder %s33_s26, 6   ;;  %s10503_s22 = sld [smem:[#allocation7_spill]] }
0x164f   : > { %s10504_s23 = sld [smem:[#allocation17_spill]]  ;;  %s10505_s24 = sld [smem:[#allocation10_spill]] }
0x1650   : > { %s10506_s2 = sld [smem:[#allocation11_spill]]  ;;  %s10507_s25 = sld [smem:[#allocation13_spill]] }
0x1651   : > { %s10508_s3 = sld [smem:[#allocation15_spill]]  ;;  %32 = sbr.rel (!%p30_p8) target bundleno = 22 (0x16), region = 193 }
0x1658   :  { %5816 = vsyncpa [#allocation3], 1 }
0x1659   :  { %5818 = vsyncpa [#allocation3 + $0x1], 1 }

</bundles_post_ra>
